<compile_context>
chip_gen: v7x
topology: tpu7x:2x2x1
jax: 0.10.0
libtpu: 0.0.40
codegen_flags: <defaults>
</compile_context>

<pallas_src>
import functools
import math

import jax
import jax.numpy as jnp
from jax.experimental import pallas as pl
from jax.experimental.pallas import tpu as pltpu


# ----------------------------------------------------------------------------
# Fused transformer decoder layer kernel
# ----------------------------------------------------------------------------
def _decoder_layer_kernel(x_ref, mem_ref,
                          wqkv_ref, bqkv_ref, wos_ref, bos_ref, ln1g_ref, ln1b_ref,
                          wqc_ref, bqc_ref, wkvc_ref, bkvc_ref, woc_ref, boc_ref,
                          ln2g_ref, ln2b_ref,
                          wff1_ref, bff1_ref, wff2_ref, bff2_ref, ln3g_ref, ln3b_ref,
                          o_ref, *, n_heads):
    x = x_ref[0].astype(jnp.float32)        # (S, D)
    mem = mem_ref[0].astype(jnp.float32)    # (S, D)
    S, D = x.shape
    d_head = D // n_heads
    scale = 1.0 / math.sqrt(d_head)

    def layer_norm(v, g, b):
        mu = jnp.mean(v, axis=-1, keepdims=True)
        c = v - mu
        var = jnp.mean(c * c, axis=-1, keepdims=True)
        return c * jax.lax.rsqrt(var + 1e-5) * g + b

    def mha(q, k, v, wo, bo):
        # q, k, v: (S, D) with heads concatenated along the lane dim.
        out = jnp.zeros((S, D), jnp.float32) + bo
        for h in range(n_heads):               # static unroll, heads stay in vregs
            sl = slice(h * d_head, (h + 1) * d_head)
            qh, kh, vh = q[:, sl], k[:, sl], v[:, sl]
            s = jax.lax.dot_general(qh, kh, (((1,), (1,)), ((), ())),
                                    preferred_element_type=jnp.float32) * scale
            s = s - jnp.max(s, axis=-1, keepdims=True)
            p = jnp.exp(s)
            p = p * pl.reciprocal(jnp.sum(p, axis=-1, keepdims=True), approx=True)
            oh = jnp.dot(p, vh, preferred_element_type=jnp.float32)      # (S, d_head)
            out = out + jnp.dot(oh, wo[sl, :], preferred_element_type=jnp.float32)
        return out

    # --- self attention (merged QKV projection) ---
    qkv = jnp.dot(x, wqkv_ref[...], preferred_element_type=jnp.float32) + bqkv_ref[...]
    sa = mha(qkv[:, :D], qkv[:, D:2 * D], qkv[:, 2 * D:], wos_ref[...], bos_ref[...])
    x = layer_norm(x + sa, ln1g_ref[...], ln1b_ref[...])

    # --- cross attention (merged KV projection on the memory) ---
    qc = jnp.dot(x, wqc_ref[...], preferred_element_type=jnp.float32) + bqc_ref[...]
    kv = jnp.dot(mem, wkvc_ref[...], preferred_element_type=jnp.float32) + bkvc_ref[...]
    ca = mha(qc, kv[:, :D], kv[:, D:], woc_ref[...], boc_ref[...])
    x = layer_norm(x + ca, ln2g_ref[...], ln2b_ref[...])

    # --- feed forward ---
    h = jnp.maximum(jnp.dot(x, wff1_ref[...], preferred_element_type=jnp.float32)
                    + bff1_ref[...], 0.0)
    ff = jnp.dot(h, wff2_ref[...], preferred_element_type=jnp.float32) + bff2_ref[...]
    x = layer_norm(x + ff, ln3g_ref[...], ln3b_ref[...])

    o_ref[0] = x.astype(o_ref.dtype)


def decoder_layer_pallas(x, mem, p, n_heads):
    B, S, D = x.shape
    act = pl.BlockSpec((1, S, D), lambda b: (b, 0, 0))

    def rep(a):  # whole-array block, same for every grid step (VMEM-resident)
        return pl.BlockSpec(a.shape, lambda b: (0,) * a.ndim)

    weights = (p["wqkv"], p["bqkv"], p["wo_s"], p["bo_s"], p["ln1_g"], p["ln1_b"],
               p["wq_c"], p["bq_c"], p["wkv_c"], p["bkv_c"], p["wo_c"], p["bo_c"],
               p["ln2_g"], p["ln2_b"],
               p["ff1_w"], p["ff1_b"], p["ff2_w"], p["ff2_b"], p["ln3_g"], p["ln3_b"])
    return pl.pallas_call(
        functools.partial(_decoder_layer_kernel, n_heads=n_heads),
        grid=(B,),
        in_specs=[act, act] + [rep(w) for w in weights],
        out_specs=act,
        out_shape=jax.ShapeDtypeStruct((B, S, D), jnp.float32),
        compiler_params=pltpu.CompilerParams(dimension_semantics=("parallel",)),
    )(x, mem, *weights)


# ----------------------------------------------------------------------------
# Fused conv3x3 + relu + maxpool2 kernel (im2col rows pre-grouped by pool offset)
# ----------------------------------------------------------------------------
def _conv_relu_pool_kernel(p_ref, w_ref, b_ref, o_ref):
    n_pool = o_ref.shape[1]                       # (H//2)*(W//2)
    h = jnp.dot(p_ref[0], w_ref[...], preferred_element_type=jnp.float32) + b_ref[...]
    h = jnp.maximum(h, 0.0)                       # (4*n_pool, OC)
    o_ref[0] = jnp.maximum(jnp.maximum(h[:n_pool], h[n_pool:2 * n_pool]),
                           jnp.maximum(h[2 * n_pool:3 * n_pool], h[3 * n_pool:]))


def _im2col_pool_ordered(x_nhwc):
    """3x3 'same' im2col; rows grouped by 2x2-maxpool offset.

    Returns (B, 4*(H//2)*(W//2), 9*C).  Row o*P + py*(W//2) + px holds the patch
    of output pixel (2*py + o//2, 2*px + o%2), so maxpool = max over the 4 row
    blocks of size P (all slices aligned, no reshapes needed in-kernel)."""
    B, H, W, C = x_nhwc.shape
    xp = jnp.pad(x_nhwc, ((0, 0), (1, 1), (1, 1), (0, 0)))
    pats = jnp.concatenate([xp[:, dy:dy + H, dx:dx + W, :]
                            for dy in range(3) for dx in range(3)], axis=-1)
    pats = pats.reshape(B, H // 2, 2, W // 2, 2, 9 * C)
    pats = pats.transpose(0, 2, 4, 1, 3, 5)       # (B, ybit, xbit, H//2, W//2, 9C)
    return pats.reshape(B, 4 * (H // 2) * (W // 2), 9 * C)


def conv_relu_pool_pallas(x_nhwc, w, b):
    B, H, W, C = x_nhwc.shape
    OC = w.shape[1]
    P = (H // 2) * (W // 2)
    patches = _im2col_pool_ordered(x_nhwc)        # (B, 4P, 9C)  (tiny; JAX glue)
    y = pl.pallas_call(
        _conv_relu_pool_kernel,
        grid=(B,),
        in_specs=[pl.BlockSpec((1, 4 * P, 9 * C), lambda i: (i, 0, 0)),
                  pl.BlockSpec((9 * C, OC), lambda i: (0, 0)),
                  pl.BlockSpec((1, OC), lambda i: (0, 0))],
        out_specs=pl.BlockSpec((1, P, OC), lambda i: (i, 0, 0)),
        out_shape=jax.ShapeDtypeStruct((B, P, OC), jnp.float32),
        compiler_params=pltpu.CompilerParams(dimension_semantics=("parallel",)),
    )(patches, w, b)
    return y.reshape(B, H // 2, W // 2, OC)       # NHWC feature map


def cnn_branch(x_nchw, cnn_p):
    x = jnp.transpose(x_nchw, (0, 2, 3, 1))                       # NCHW -> NHWC
    x = conv_relu_pool_pallas(x, cnn_p["conv1_w"], cnn_p["conv1_b"])
    x = conv_relu_pool_pallas(x, cnn_p["conv2_w"], cnn_p["conv2_b"])
    B = x.shape[0]
    return jnp.transpose(x, (0, 3, 1, 2)).reshape(B, -1)          # flatten (NCHW order)


# ----------------------------------------------------------------------------
# Fused head kernel: cnn-fc + fc1(+relu) + fc2  (concat avoided by split fc1)
# ----------------------------------------------------------------------------
def _head_kernel(flat_ref, aud_ref, wc_ref, bc_ref, w1i_ref, w1a_ref, b1_ref,
                 w2_ref, b2_ref, out_ref, img_ref):
    img = jnp.dot(flat_ref[...], wc_ref[...],
                  preferred_element_type=jnp.float32) + bc_ref[...]
    h = (jnp.dot(img, w1i_ref[...], preferred_element_type=jnp.float32)
         + jnp.dot(aud_ref[...], w1a_ref[...], preferred_element_type=jnp.float32)
         + b1_ref[...])
    h = jnp.maximum(h, 0.0)
    out = jnp.dot(h, w2_ref[...], preferred_element_type=jnp.float32) + b2_ref[...]
    out_ref[...] = out.astype(out_ref.dtype)
    img_ref[...] = img.astype(img_ref.dtype)


def head_pallas(cnn_flat, audio, params):
    B, FLAT = cnn_flat.shape
    D = audio.shape[1]
    cnn_p = params["cnn"]
    CO = cnn_p["fc_w"].shape[1]
    H1 = params["fc1_w"].shape[1]
    NC = params["fc2_w"].shape[1]
    w1_img = params["fc1_w"][:CO, :]      # (CO, H1)
    w1_aud = params["fc1_w"][CO:, :]      # (D, H1)

    def rep(shape):
        return pl.BlockSpec(shape, lambda i: (0,) * len(shape))

    out, img = pl.pallas_call(
        _head_kernel,
        grid=(1,),
        in_specs=[rep((B, FLAT)), rep((B, D)),
                  rep((FLAT, CO)), rep((1, CO)),
                  rep((CO, H1)), rep((D, H1)), rep((1, H1)),
                  rep((H1, NC)), rep((1, NC))],
        out_specs=(rep((B, NC)), rep((B, CO))),
        out_shape=(jax.ShapeDtypeStruct((B, NC), jnp.float32),
                   jax.ShapeDtypeStruct((B, CO), jnp.float32)),
    )(cnn_flat, audio, cnn_p["fc_w"], cnn_p["fc_b"],
      w1_img, w1_aud, params["fc1_b"], params["fc2_w"], params["fc2_b"])
    return out, img


# ----------------------------------------------------------------------------
# Plain-JAX glue
# ----------------------------------------------------------------------------
def positional_encoding(x):
    # TODO(synk): assumes batch-first sinusoidal PE (dropout omitted in eval).
    B, S, D = x.shape
    pos = jnp.arange(S, dtype=jnp.float32)[:, None]
    div = jnp.exp(jnp.arange(0, D, 2, dtype=jnp.float32) * (-math.log(10000.0) / D))
    pe = jnp.zeros((S, D), jnp.float32)
    pe = pe.at[:, 0::2].set(jnp.sin(pos * div))
    pe = pe.at[:, 1::2].set(jnp.cos(pos * div))
    return x + pe[None, :, :]


def cnn_transformer_linear_forward(params, x_wr, x_sp, *, n_heads):
    # PositionalEncoding + TransformerDecoder(x_sp, x_sp)
    x_sp = positional_encoding(x_sp)
    mem = x_sp
    x = x_sp
    for layer in params["trans_layers"]:
        x = decoder_layer_pallas(x, mem, layer, n_heads)
    # CNN branch + fused head
    cnn_flat = cnn_branch(x_wr, params["cnn"])
    audio_embedding = x[:, -1, :]
    out, img_embedding = head_pallas(cnn_flat, audio_embedding, params)
    return out, img_embedding, audio_embedding


# ----------------------------------------------------------------------------
# Deterministic parameter construction (synthetic, no checkpoint load)
# ----------------------------------------------------------------------------
def _dense(key, shape):
    scale = 1.0 / math.sqrt(shape[0])
    return scale * jax.random.normal(key, shape, jnp.float32)


def init_params(key, *, d_model, num_layers, dim_feedforward,
                cnn_in_ch, img_hw, cnn_output_size, num_classes):
    D, F = d_model, dim_feedforward
    keys = jax.random.split(key, 5 + num_layers)
    # CNN: conv(3x3, in->8) + pool + conv(3x3, 8->16) + pool + fc -> cnn_output_size
    flat = 16 * (img_hw // 4) * (img_hw // 4)
    cnn = {
        "conv1_w": _dense(keys[0], (3 * 3 * cnn_in_ch, 8)),
        "conv1_b": jnp.zeros((1, 8), jnp.float32),
        "conv2_w": _dense(keys[1], (3 * 3 * 8, 16)),
        "conv2_b": jnp.zeros((1, 16), jnp.float32),
        "fc_w": _dense(keys[2], (flat, cnn_output_size)),
        "fc_b": jnp.zeros((1, cnn_output_size), jnp.float32),
    }
    layers = []
    for li in range(num_layers):
        lk = jax.random.split(keys[3 + li], 7)
        layers.append({
            "wqkv": _dense(lk[0], (D, 3 * D)),  "bqkv": jnp.zeros((1, 3 * D), jnp.float32),
            "wo_s": _dense(lk[1], (D, D)),      "bo_s": jnp.zeros((1, D), jnp.float32),
            "wq_c": _dense(lk[2], (D, D)),      "bq_c": jnp.zeros((1, D), jnp.float32),
            "wkv_c": _dense(lk[3], (D, 2 * D)), "bkv_c": jnp.zeros((1, 2 * D), jnp.float32),
            "wo_c": _dense(lk[4], (D, D)),      "bo_c": jnp.zeros((1, D), jnp.float32),
            "ln1_g": jnp.ones((1, D), jnp.float32), "ln1_b": jnp.zeros((1, D), jnp.float32),
            "ln2_g": jnp.ones((1, D), jnp.float32), "ln2_b": jnp.zeros((1, D), jnp.float32),
            "ln3_g": jnp.ones((1, D), jnp.float32), "ln3_b": jnp.zeros((1, D), jnp.float32),
            "ff1_w": _dense(lk[5], (D, F)), "ff1_b": jnp.zeros((1, F), jnp.float32),
            "ff2_w": _dense(lk[6], (F, D)), "ff2_b": jnp.zeros((1, D), jnp.float32),
        })
    params = {
        "cnn": cnn,
        "trans_layers": layers,
        "fc1_w": _dense(keys[3 + num_layers], (cnn_output_size + d_model, 1024)),
        "fc1_b": jnp.zeros((1, 1024), jnp.float32),
        "fc2_w": _dense(keys[4 + num_layers], (1024, num_classes)),
        "fc2_b": jnp.zeros((1, num_classes), jnp.float32),
    }
    return params


# ----------------------------------------------------------------------------
if __name__ == "__main__":
    # Small shapes consistent with the module's forward signature.
    B, CIN, HW = 2, 3, 16          # x_wr: (B, C, H, W)  (PyTorch NCHW)
    S, D_MODEL = 8, 128            # x_sp: (B, S, d_model), d_model % n_heads == 0
    N_HEADS, N_LAYERS, DFF = 4, 2, 256
    CNN_OUT, NUM_CLASSES = 10, 10

    key = jax.random.PRNGKey(0)
    kp, kx, ks = jax.random.split(key, 3)
    params = init_params(kp, d_model=D_MODEL, num_layers=N_LAYERS,
                         dim_feedforward=DFF, cnn_in_ch=CIN, img_hw=HW,
                         cnn_output_size=CNN_OUT, num_classes=NUM_CLASSES)

    x_wr = jax.random.normal(kx, (B, CIN, HW, HW), jnp.float32)
    x_sp = jax.random.normal(ks, (B, S, D_MODEL), jnp.float32)

    # n_heads must be static (it drives Python-level head slicing).
    fwd = jax.jit(functools.partial(cnn_transformer_linear_forward, n_heads=N_HEADS))
    out, img_emb, audio_emb = fwd(params, x_wr, x_sp)
    jax.block_until_ready((out, img_emb, audio_emb))

    assert out.shape == (B, NUM_CLASSES)
    assert img_emb.shape == (B, CNN_OUT)
    assert audio_emb.shape == (B, D_MODEL)
    print("KERNEL_OK")
</pallas_src>

<mosaic_0001>
module attributes {stable_mosaic.version = 11 : i64} {
  func.func @_conv_relu_pool_kernel(%arg0: i32, %arg1: memref<1x256x27xf32, #tpu.memory_space<vmem>>, %arg2: memref<27x8xf32, #tpu.memory_space<vmem>>, %arg3: memref<1x8xf32, #tpu.memory_space<vmem>>, %arg4: memref<1x64x8xf32, #tpu.memory_space<vmem>>) attributes {dimension_semantics = [#tpu.dimension_semantics<parallel>], iteration_bounds = array<i64: 2>, scalar_prefetch = 0 : i64, scratch_operands = 0 : i64, tpu.core_type = #tpu.core_type<tc>, window_params = [{transform_indices = @transform_0, window_bounds = array<i64: 1, 256, 27>}, {pipeline_mode = #tpu.pipeline_mode<synchronous>, transform_indices = @transform_1, window_bounds = array<i64: 27, 8>}, {pipeline_mode = #tpu.pipeline_mode<synchronous>, transform_indices = @transform_2, window_bounds = array<i64: 1, 8>}, {transform_indices = @transform_3, window_bounds = array<i64: 1, 64, 8>}]} {
    %c0 = arith.constant 0 : index
    %c0_0 = arith.constant 0 : index
    %c0_1 = arith.constant 0 : index
    %0 = vector.load %arg1[%c0, %c0_0, %c0_1] : memref<1x256x27xf32, #tpu.memory_space<vmem>>, vector<1x256x27xf32>
    %1 = vector.shape_cast %0 : vector<1x256x27xf32> to vector<256x27xf32>
    %c0_2 = arith.constant 0 : index
    %c0_3 = arith.constant 0 : index
    %2 = vector.load %arg2[%c0_2, %c0_3] : memref<27x8xf32, #tpu.memory_space<vmem>>, vector<27x8xf32>
    %cst = arith.constant dense<0.000000e+00> : vector<256x8xf32>
    %3 = tpu.matmul %1, %2, %cst {dimension_numbers = #tpu.dot_dimension_numbers<[1], [0], [0], [1], [0, 0, 1, 1], [], []>} : vector<256x27xf32>, vector<27x8xf32>, vector<256x8xf32> -> vector<256x8xf32>
    %c0_4 = arith.constant 0 : index
    %c0_5 = arith.constant 0 : index
    %4 = vector.load %arg3[%c0_4, %c0_5] : memref<1x8xf32, #tpu.memory_space<vmem>>, vector<1x8xf32>
    %5 = vector.broadcast %4 : vector<1x8xf32> to vector<256x8xf32>
    %6 = arith.addf %3, %5 : vector<256x8xf32>
    %cst_6 = arith.constant 0.000000e+00 : f32
    %7 = vector.broadcast %cst_6 : f32 to vector<256x8xf32>
    %8 = arith.maximumf %6, %7 : vector<256x8xf32>
    %9 = vector.extract_strided_slice %8 {offsets = [0, 0], sizes = [64, 8], strides = [1, 1]} : vector<256x8xf32> to vector<64x8xf32>
    %10 = vector.extract_strided_slice %8 {offsets = [64, 0], sizes = [64, 8], strides = [1, 1]} : vector<256x8xf32> to vector<64x8xf32>
    %11 = arith.maximumf %9, %10 : vector<64x8xf32>
    %12 = vector.extract_strided_slice %8 {offsets = [128, 0], sizes = [64, 8], strides = [1, 1]} : vector<256x8xf32> to vector<64x8xf32>
    %13 = vector.extract_strided_slice %8 {offsets = [192, 0], sizes = [64, 8], strides = [1, 1]} : vector<256x8xf32> to vector<64x8xf32>
    %14 = arith.maximumf %12, %13 : vector<64x8xf32>
    %15 = arith.maximumf %11, %14 : vector<64x8xf32>
    %c0_7 = arith.constant 0 : index
    %c0_8 = arith.constant 0 : index
    %c0_9 = arith.constant 0 : index
    %16 = vector.load %arg4[%c0_7, %c0_8, %c0_9] : memref<1x64x8xf32, #tpu.memory_space<vmem>>, vector<1x64x8xf32>
    %17 = vector.shape_cast %16 : vector<1x64x8xf32> to vector<64x8xf32>
    %18 = vector.shape_cast %15 : vector<64x8xf32> to vector<1x64x8xf32>
    tpu.vector_store %arg4[%c0_7, %c0_8, %c0_9], %18 {strides = array<i32>} : memref<1x64x8xf32, #tpu.memory_space<vmem>>, vector<1x64x8xf32>,
    return
  }
  func.func @transform_0(%arg0: i32) -> (i32, i32, i32) {
    %c0_i32 = arith.constant 0 : i32
    %c0_i32_0 = arith.constant 0 : i32
    %c0_i32_1 = arith.constant 0 : i32
    return %arg0, %c0_i32, %c0_i32_0 : i32, i32, i32
  }
  func.func @transform_1(%arg0: i32) -> (i32, i32) {
    %c0_i32 = arith.constant 0 : i32
    %c0_i32_0 = arith.constant 0 : i32
    %c0_i32_1 = arith.constant 0 : i32
    return %c0_i32, %c0_i32_0 : i32, i32
  }
  func.func @transform_2(%arg0: i32) -> (i32, i32) {
    %c0_i32 = arith.constant 0 : i32
    %c0_i32_0 = arith.constant 0 : i32
    %c0_i32_1 = arith.constant 0 : i32
    return %c0_i32, %c0_i32_0 : i32, i32
  }
  func.func @transform_3(%arg0: i32) -> (i32, i32, i32) {
    %c0_i32 = arith.constant 0 : i32
    %c0_i32_0 = arith.constant 0 : i32
    %c0_i32_1 = arith.constant 0 : i32
    return %arg0, %c0_i32, %c0_i32_0 : i32, i32, i32
  }
}

module attributes {stable_mosaic.version = 11 : i64} {
  func.func @_conv_relu_pool_kernel(%arg0: i32, %arg1: memref<1x64x72xf32, #tpu.memory_space<vmem>>, %arg2: memref<72x16xf32, #tpu.memory_space<vmem>>, %arg3: memref<1x16xf32, #tpu.memory_space<vmem>>, %arg4: memref<1x16x16xf32, #tpu.memory_space<vmem>>) attributes {dimension_semantics = [#tpu.dimension_semantics<parallel>], iteration_bounds = array<i64: 2>, scalar_prefetch = 0 : i64, scratch_operands = 0 : i64, tpu.core_type = #tpu.core_type<tc>, window_params = [{transform_indices = @transform_0, window_bounds = array<i64: 1, 64, 72>}, {pipeline_mode = #tpu.pipeline_mode<synchronous>, transform_indices = @transform_1, window_bounds = array<i64: 72, 16>}, {pipeline_mode = #tpu.pipeline_mode<synchronous>, transform_indices = @transform_2, window_bounds = array<i64: 1, 16>}, {transform_indices = @transform_3, window_bounds = array<i64: 1, 16, 16>}]} {
    %c0 = arith.constant 0 : index
    %c0_0 = arith.constant 0 : index
    %c0_1 = arith.constant 0 : index
    %0 = vector.load %arg1[%c0, %c0_0, %c0_1] : memref<1x64x72xf32, #tpu.memory_space<vmem>>, vector<1x64x72xf32>
    %1 = vector.shape_cast %0 : vector<1x64x72xf32> to vector<64x72xf32>
    %c0_2 = arith.constant 0 : index
    %c0_3 = arith.constant 0 : index
    %2 = vector.load %arg2[%c0_2, %c0_3] : memref<72x16xf32, #tpu.memory_space<vmem>>, vector<72x16xf32>
    %cst = arith.constant dense<0.000000e+00> : vector<64x16xf32>
    %3 = tpu.matmul %1, %2, %cst {dimension_numbers = #tpu.dot_dimension_numbers<[1], [0], [0], [1], [0, 0, 1, 1], [], []>} : vector<64x72xf32>, vector<72x16xf32>, vector<64x16xf32> -> vector<64x16xf32>
    %c0_4 = arith.constant 0 : index
    %c0_5 = arith.constant 0 : index
    %4 = vector.load %arg3[%c0_4, %c0_5] : memref<1x16xf32, #tpu.memory_space<vmem>>, vector<1x16xf32>
    %5 = vector.broadcast %4 : vector<1x16xf32> to vector<64x16xf32>
    %6 = arith.addf %3, %5 : vector<64x16xf32>
    %cst_6 = arith.constant 0.000000e+00 : f32
    %7 = vector.broadcast %cst_6 : f32 to vector<64x16xf32>
    %8 = arith.maximumf %6, %7 : vector<64x16xf32>
    %9 = vector.extract_strided_slice %8 {offsets = [0, 0], sizes = [16, 16], strides = [1, 1]} : vector<64x16xf32> to vector<16x16xf32>
    %10 = vector.extract_strided_slice %8 {offsets = [16, 0], sizes = [16, 16], strides = [1, 1]} : vector<64x16xf32> to vector<16x16xf32>
    %11 = arith.maximumf %9, %10 : vector<16x16xf32>
    %12 = vector.extract_strided_slice %8 {offsets = [32, 0], sizes = [16, 16], strides = [1, 1]} : vector<64x16xf32> to vector<16x16xf32>
    %13 = vector.extract_strided_slice %8 {offsets = [48, 0], sizes = [16, 16], strides = [1, 1]} : vector<64x16xf32> to vector<16x16xf32>
    %14 = arith.maximumf %12, %13 : vector<16x16xf32>
    %15 = arith.maximumf %11, %14 : vector<16x16xf32>
    %c0_7 = arith.constant 0 : index
    %c0_8 = arith.constant 0 : index
    %c0_9 = arith.constant 0 : index
    %16 = vector.load %arg4[%c0_7, %c0_8, %c0_9] : memref<1x16x16xf32, #tpu.memory_space<vmem>>, vector<1x16x16xf32>
    %17 = vector.shape_cast %16 : vector<1x16x16xf32> to vector<16x16xf32>
    %18 = vector.shape_cast %15 : vector<16x16xf32> to vector<1x16x16xf32>
    tpu.vector_store %arg4[%c0_7, %c0_8, %c0_9], %18 {strides = array<i32>} : memref<1x16x16xf32, #tpu.memory_space<vmem>>, vector<1x16x16xf32>,
    return
  }
  func.func @transform_0(%arg0: i32) -> (i32, i32, i32) {
    %c0_i32 = arith.constant 0 : i32
    %c0_i32_0 = arith.constant 0 : i32
    %c0_i32_1 = arith.constant 0 : i32
    return %arg0, %c0_i32, %c0_i32_0 : i32, i32, i32
  }
  func.func @transform_1(%arg0: i32) -> (i32, i32) {
    %c0_i32 = arith.constant 0 : i32
    %c0_i32_0 = arith.constant 0 : i32
    %c0_i32_1 = arith.constant 0 : i32
    return %c0_i32, %c0_i32_0 : i32, i32
  }
  func.func @transform_2(%arg0: i32) -> (i32, i32) {
    %c0_i32 = arith.constant 0 : i32
    %c0_i32_0 = arith.constant 0 : i32
    %c0_i32_1 = arith.constant 0 : i32
    return %c0_i32, %c0_i32_0 : i32, i32
  }
  func.func @transform_3(%arg0: i32) -> (i32, i32, i32) {
    %c0_i32 = arith.constant 0 : i32
    %c0_i32_0 = arith.constant 0 : i32
    %c0_i32_1 = arith.constant 0 : i32
    return %arg0, %c0_i32, %c0_i32_0 : i32, i32, i32
  }
}

module attributes {stable_mosaic.version = 11 : i64} {
  func.func @_decoder_layer_kernel(%arg0: i32, %arg1: memref<1x8x128xf32, #tpu.memory_space<vmem>>, %arg2: memref<1x8x128xf32, #tpu.memory_space<vmem>>, %arg3: memref<128x384xf32, #tpu.memory_space<vmem>>, %arg4: memref<1x384xf32, #tpu.memory_space<vmem>>, %arg5: memref<128x128xf32, #tpu.memory_space<vmem>>, %arg6: memref<1x128xf32, #tpu.memory_space<vmem>>, %arg7: memref<1x128xf32, #tpu.memory_space<vmem>>, %arg8: memref<1x128xf32, #tpu.memory_space<vmem>>, %arg9: memref<128x128xf32, #tpu.memory_space<vmem>>, %arg10: memref<1x128xf32, #tpu.memory_space<vmem>>, %arg11: memref<128x256xf32, #tpu.memory_space<vmem>>, %arg12: memref<1x256xf32, #tpu.memory_space<vmem>>, %arg13: memref<128x128xf32, #tpu.memory_space<vmem>>, %arg14: memref<1x128xf32, #tpu.memory_space<vmem>>, %arg15: memref<1x128xf32, #tpu.memory_space<vmem>>, %arg16: memref<1x128xf32, #tpu.memory_space<vmem>>, %arg17: memref<128x256xf32, #tpu.memory_space<vmem>>, %arg18: memref<1x256xf32, #tpu.memory_space<vmem>>, %arg19: memref<256x128xf32, #tpu.memory_space<vmem>>, %arg20: memref<1x128xf32, #tpu.memory_space<vmem>>, %arg21: memref<1x128xf32, #tpu.memory_space<vmem>>, %arg22: memref<1x128xf32, #tpu.memory_space<vmem>>, %arg23: memref<1x8x128xf32, #tpu.memory_space<vmem>>) attributes {dimension_semantics = [#tpu.dimension_semantics<parallel>], iteration_bounds = array<i64: 2>, scalar_prefetch = 0 : i64, scratch_operands = 0 : i64, tpu.core_type = #tpu.core_type<tc>, window_params = [{transform_indices = @transform_0, window_bounds = array<i64: 1, 8, 128>}, {transform_indices = @transform_1, window_bounds = array<i64: 1, 8, 128>}, {pipeline_mode = #tpu.pipeline_mode<synchronous>, transform_indices = @transform_2, window_bounds = array<i64: 128, 384>}, {pipeline_mode = #tpu.pipeline_mode<synchronous>, transform_indices = @transform_3, window_bounds = array<i64: 1, 384>}, {pipeline_mode = #tpu.pipeline_mode<synchronous>, transform_indices = @transform_4, window_bounds = array<i64: 128, 128>}, {pipeline_mode = #tpu.pipeline_mode<synchronous>, transform_indices = @transform_5, window_bounds = array<i64: 1, 128>}, {pipeline_mode = #tpu.pipeline_mode<synchronous>, transform_indices = @transform_6, window_bounds = array<i64: 1, 128>}, {pipeline_mode = #tpu.pipeline_mode<synchronous>, transform_indices = @transform_7, window_bounds = array<i64: 1, 128>}, {pipeline_mode = #tpu.pipeline_mode<synchronous>, transform_indices = @transform_8, window_bounds = array<i64: 128, 128>}, {pipeline_mode = #tpu.pipeline_mode<synchronous>, transform_indices = @transform_9, window_bounds = array<i64: 1, 128>}, {pipeline_mode = #tpu.pipeline_mode<synchronous>, transform_indices = @transform_10, window_bounds = array<i64: 128, 256>}, {pipeline_mode = #tpu.pipeline_mode<synchronous>, transform_indices = @transform_11, window_bounds = array<i64: 1, 256>}, {pipeline_mode = #tpu.pipeline_mode<synchronous>, transform_indices = @transform_12, window_bounds = array<i64: 128, 128>}, {pipeline_mode = #tpu.pipeline_mode<synchronous>, transform_indices = @transform_13, window_bounds = array<i64: 1, 128>}, {pipeline_mode = #tpu.pipeline_mode<synchronous>, transform_indices = @transform_14, window_bounds = array<i64: 1, 128>}, {pipeline_mode = #tpu.pipeline_mode<synchronous>, transform_indices = @transform_15, window_bounds = array<i64: 1, 128>}, {pipeline_mode = #tpu.pipeline_mode<synchronous>, transform_indices = @transform_16, window_bounds = array<i64: 128, 256>}, {pipeline_mode = #tpu.pipeline_mode<synchronous>, transform_indices = @transform_17, window_bounds = array<i64: 1, 256>}, {pipeline_mode = #tpu.pipeline_mode<synchronous>, transform_indices = @transform_18, window_bounds = array<i64: 256, 128>}, {pipeline_mode = #tpu.pipeline_mode<synchronous>, transform_indices = @transform_19, window_bounds = array<i64: 1, 128>}, {pipeline_mode = #tpu.pipeline_mode<synchronous>, transform_indices = @transform_20, window_bounds = array<i64: 1, 128>}, {pipeline_mode = #tpu.pipeline_mode<synchronous>, transform_indices = @transform_21, window_bounds = array<i64: 1, 128>}, {transform_indices = @transform_22, window_bounds = array<i64: 1, 8, 128>}]} {
    %c0 = arith.constant 0 : index
    %c0_0 = arith.constant 0 : index
    %c0_1 = arith.constant 0 : index
    %0 = vector.load %arg1[%c0, %c0_0, %c0_1] : memref<1x8x128xf32, #tpu.memory_space<vmem>>, vector<1x8x128xf32>
    %1 = vector.shape_cast %0 : vector<1x8x128xf32> to vector<8x128xf32>
    %c0_2 = arith.constant 0 : index
    %c0_3 = arith.constant 0 : index
    %c0_4 = arith.constant 0 : index
    %2 = vector.load %arg2[%c0_2, %c0_3, %c0_4] : memref<1x8x128xf32, #tpu.memory_space<vmem>>, vector<1x8x128xf32>
    %3 = vector.shape_cast %2 : vector<1x8x128xf32> to vector<8x128xf32>
    %c0_5 = arith.constant 0 : index
    %c0_6 = arith.constant 0 : index
    %4 = vector.load %arg3[%c0_5, %c0_6] : memref<128x384xf32, #tpu.memory_space<vmem>>, vector<128x384xf32>
    %cst = arith.constant dense<0.000000e+00> : vector<8x384xf32>
    %5 = tpu.matmul %1, %4, %cst {dimension_numbers = #tpu.dot_dimension_numbers<[1], [0], [0], [1], [0, 0, 1, 1], [], []>} : vector<8x128xf32>, vector<128x384xf32>, vector<8x384xf32> -> vector<8x384xf32>
    %c0_7 = arith.constant 0 : index
    %c0_8 = arith.constant 0 : index
    %6 = vector.load %arg4[%c0_7, %c0_8] : memref<1x384xf32, #tpu.memory_space<vmem>>, vector<1x384xf32>
    %7 = vector.broadcast %6 : vector<1x384xf32> to vector<8x384xf32>
    %8 = arith.addf %5, %7 : vector<8x384xf32>
    %9 = vector.extract_strided_slice %8 {offsets = [0, 0], sizes = [8, 128], strides = [1, 1]} : vector<8x384xf32> to vector<8x128xf32>
    %10 = vector.extract_strided_slice %8 {offsets = [0, 128], sizes = [8, 128], strides = [1, 1]} : vector<8x384xf32> to vector<8x128xf32>
    %11 = vector.extract_strided_slice %8 {offsets = [0, 256], sizes = [8, 128], strides = [1, 1]} : vector<8x384xf32> to vector<8x128xf32>
    %c0_9 = arith.constant 0 : index
    %c0_10 = arith.constant 0 : index
    %12 = vector.load %arg5[%c0_9, %c0_10] : memref<128x128xf32, #tpu.memory_space<vmem>>, vector<128x128xf32>
    %c0_11 = arith.constant 0 : index
    %c0_12 = arith.constant 0 : index
    %13 = vector.load %arg6[%c0_11, %c0_12] : memref<1x128xf32, #tpu.memory_space<vmem>>, vector<1x128xf32>
    %cst_13 = arith.constant 0.000000e+00 : f32
    %14 = vector.broadcast %cst_13 : f32 to vector<8x128xf32>
    %15 = vector.broadcast %13 : vector<1x128xf32> to vector<8x128xf32>
    %16 = arith.addf %14, %15 : vector<8x128xf32>
    %17 = vector.extract_strided_slice %9 {offsets = [0, 0], sizes = [8, 32], strides = [1, 1]} : vector<8x128xf32> to vector<8x32xf32>
    %18 = vector.extract_strided_slice %10 {offsets = [0, 0], sizes = [8, 32], strides = [1, 1]} : vector<8x128xf32> to vector<8x32xf32>
    %19 = vector.extract_strided_slice %11 {offsets = [0, 0], sizes = [8, 32], strides = [1, 1]} : vector<8x128xf32> to vector<8x32xf32>
    %cst_14 = arith.constant dense<0.000000e+00> : vector<8x8xf32>
    %20 = tpu.matmul %17, %18, %cst_14 {dimension_numbers = #tpu.dot_dimension_numbers<[1], [1], [0], [0], [0, 0, 1, 0], [], []>} : vector<8x32xf32>, vector<8x32xf32>, vector<8x8xf32> -> vector<8x8xf32>
    %cst_15 = arith.constant 0.176776692 : f32
    %21 = vector.broadcast %cst_15 : f32 to vector<8x8xf32>
    %22 = arith.mulf %20, %21 : vector<8x8xf32>
    %cst_16 = arith.constant dense<0xFF800000> : vector<8xf32>
    %23 = vector.multi_reduction <maximumf>, %22, %cst_16 [1] : vector<8x8xf32> to vector<8xf32>
    %24 = vector.shape_cast %23 : vector<8xf32> to vector<8x1xf32>
    %25 = vector.broadcast %24 : vector<8x1xf32> to vector<8x8xf32>
    %26 = arith.subf %22, %25 : vector<8x8xf32>
    %27 = math.exp %26 : vector<8x8xf32>
    %cst_17 = arith.constant dense<0.000000e+00> : vector<8xf32>
    %28 = vector.multi_reduction <add>, %27, %cst_17 [1] : vector<8x8xf32> to vector<8xf32>
    %29 = vector.shape_cast %28 : vector<8xf32> to vector<8x1xf32>
    %30 = tpu.reciprocal %29 {approx = true} : vector<8x1xf32> -> vector<8x1xf32>
    %31 = vector.broadcast %30 : vector<8x1xf32> to vector<8x8xf32>
    %32 = arith.mulf %27, %31 : vector<8x8xf32>
    %cst_18 = arith.constant dense<0.000000e+00> : vector<8x32xf32>
    %33 = tpu.matmul %32, %19, %cst_18 {dimension_numbers = #tpu.dot_dimension_numbers<[1], [0], [0], [1], [0, 0, 1, 1], [], []>} : vector<8x8xf32>, vector<8x32xf32>, vector<8x32xf32> -> vector<8x32xf32>
    %34 = vector.extract_strided_slice %12 {offsets = [0, 0], sizes = [32, 128], strides = [1, 1]} : vector<128x128xf32> to vector<32x128xf32>
    %cst_19 = arith.constant dense<0.000000e+00> : vector<8x128xf32>
    %35 = tpu.matmul %33, %34, %cst_19 {dimension_numbers = #tpu.dot_dimension_numbers<[1], [0], [0], [1], [0, 0, 1, 1], [], []>} : vector<8x32xf32>, vector<32x128xf32>, vector<8x128xf32> -> vector<8x128xf32>
    %36 = arith.addf %16, %35 : vector<8x128xf32>
    %37 = vector.extract_strided_slice %9 {offsets = [0, 32], sizes = [8, 32], strides = [1, 1]} : vector<8x128xf32> to vector<8x32xf32>
    %38 = vector.extract_strided_slice %10 {offsets = [0, 32], sizes = [8, 32], strides = [1, 1]} : vector<8x128xf32> to vector<8x32xf32>
    %39 = vector.extract_strided_slice %11 {offsets = [0, 32], sizes = [8, 32], strides = [1, 1]} : vector<8x128xf32> to vector<8x32xf32>
    %cst_20 = arith.constant dense<0.000000e+00> : vector<8x8xf32>
    %40 = tpu.matmul %37, %38, %cst_20 {dimension_numbers = #tpu.dot_dimension_numbers<[1], [1], [0], [0], [0, 0, 1, 0], [], []>} : vector<8x32xf32>, vector<8x32xf32>, vector<8x8xf32> -> vector<8x8xf32>
    %cst_21 = arith.constant 0.176776692 : f32
    %41 = vector.broadcast %cst_21 : f32 to vector<8x8xf32>
    %42 = arith.mulf %40, %41 : vector<8x8xf32>
    %cst_22 = arith.constant dense<0xFF800000> : vector<8xf32>
    %43 = vector.multi_reduction <maximumf>, %42, %cst_22 [1] : vector<8x8xf32> to vector<8xf32>
    %44 = vector.shape_cast %43 : vector<8xf32> to vector<8x1xf32>
    %45 = vector.broadcast %44 : vector<8x1xf32> to vector<8x8xf32>
    %46 = arith.subf %42, %45 : vector<8x8xf32>
    %47 = math.exp %46 : vector<8x8xf32>
    %cst_23 = arith.constant dense<0.000000e+00> : vector<8xf32>
    %48 = vector.multi_reduction <add>, %47, %cst_23 [1] : vector<8x8xf32> to vector<8xf32>
    %49 = vector.shape_cast %48 : vector<8xf32> to vector<8x1xf32>
    %50 = tpu.reciprocal %49 {approx = true} : vector<8x1xf32> -> vector<8x1xf32>
    %51 = vector.broadcast %50 : vector<8x1xf32> to vector<8x8xf32>
    %52 = arith.mulf %47, %51 : vector<8x8xf32>
    %cst_24 = arith.constant dense<0.000000e+00> : vector<8x32xf32>
    %53 = tpu.matmul %52, %39, %cst_24 {dimension_numbers = #tpu.dot_dimension_numbers<[1], [0], [0], [1], [0, 0, 1, 1], [], []>} : vector<8x8xf32>, vector<8x32xf32>, vector<8x32xf32> -> vector<8x32xf32>
    %54 = vector.extract_strided_slice %12 {offsets = [32, 0], sizes = [32, 128], strides = [1, 1]} : vector<128x128xf32> to vector<32x128xf32>
    %cst_25 = arith.constant dense<0.000000e+00> : vector<8x128xf32>
    %55 = tpu.matmul %53, %54, %cst_25 {dimension_numbers = #tpu.dot_dimension_numbers<[1], [0], [0], [1], [0, 0, 1, 1], [], []>} : vector<8x32xf32>, vector<32x128xf32>, vector<8x128xf32> -> vector<8x128xf32>
    %56 = arith.addf %36, %55 : vector<8x128xf32>
    %57 = vector.extract_strided_slice %9 {offsets = [0, 64], sizes = [8, 32], strides = [1, 1]} : vector<8x128xf32> to vector<8x32xf32>
    %58 = vector.extract_strided_slice %10 {offsets = [0, 64], sizes = [8, 32], strides = [1, 1]} : vector<8x128xf32> to vector<8x32xf32>
    %59 = vector.extract_strided_slice %11 {offsets = [0, 64], sizes = [8, 32], strides = [1, 1]} : vector<8x128xf32> to vector<8x32xf32>
    %cst_26 = arith.constant dense<0.000000e+00> : vector<8x8xf32>
    %60 = tpu.matmul %57, %58, %cst_26 {dimension_numbers = #tpu.dot_dimension_numbers<[1], [1], [0], [0], [0, 0, 1, 0], [], []>} : vector<8x32xf32>, vector<8x32xf32>, vector<8x8xf32> -> vector<8x8xf32>
    %cst_27 = arith.constant 0.176776692 : f32
    %61 = vector.broadcast %cst_27 : f32 to vector<8x8xf32>
    %62 = arith.mulf %60, %61 : vector<8x8xf32>
    %cst_28 = arith.constant dense<0xFF800000> : vector<8xf32>
    %63 = vector.multi_reduction <maximumf>, %62, %cst_28 [1] : vector<8x8xf32> to vector<8xf32>
    %64 = vector.shape_cast %63 : vector<8xf32> to vector<8x1xf32>
    %65 = vector.broadcast %64 : vector<8x1xf32> to vector<8x8xf32>
    %66 = arith.subf %62, %65 : vector<8x8xf32>
    %67 = math.exp %66 : vector<8x8xf32>
    %cst_29 = arith.constant dense<0.000000e+00> : vector<8xf32>
    %68 = vector.multi_reduction <add>, %67, %cst_29 [1] : vector<8x8xf32> to vector<8xf32>
    %69 = vector.shape_cast %68 : vector<8xf32> to vector<8x1xf32>
    %70 = tpu.reciprocal %69 {approx = true} : vector<8x1xf32> -> vector<8x1xf32>
    %71 = vector.broadcast %70 : vector<8x1xf32> to vector<8x8xf32>
    %72 = arith.mulf %67, %71 : vector<8x8xf32>
    %cst_30 = arith.constant dense<0.000000e+00> : vector<8x32xf32>
    %73 = tpu.matmul %72, %59, %cst_30 {dimension_numbers = #tpu.dot_dimension_numbers<[1], [0], [0], [1], [0, 0, 1, 1], [], []>} : vector<8x8xf32>, vector<8x32xf32>, vector<8x32xf32> -> vector<8x32xf32>
    %74 = vector.extract_strided_slice %12 {offsets = [64, 0], sizes = [32, 128], strides = [1, 1]} : vector<128x128xf32> to vector<32x128xf32>
    %cst_31 = arith.constant dense<0.000000e+00> : vector<8x128xf32>
    %75 = tpu.matmul %73, %74, %cst_31 {dimension_numbers = #tpu.dot_dimension_numbers<[1], [0], [0], [1], [0, 0, 1, 1], [], []>} : vector<8x32xf32>, vector<32x128xf32>, vector<8x128xf32> -> vector<8x128xf32>
    %76 = arith.addf %56, %75 : vector<8x128xf32>
    %77 = vector.extract_strided_slice %9 {offsets = [0, 96], sizes = [8, 32], strides = [1, 1]} : vector<8x128xf32> to vector<8x32xf32>
    %78 = vector.extract_strided_slice %10 {offsets = [0, 96], sizes = [8, 32], strides = [1, 1]} : vector<8x128xf32> to vector<8x32xf32>
    %79 = vector.extract_strided_slice %11 {offsets = [0, 96], sizes = [8, 32], strides = [1, 1]} : vector<8x128xf32> to vector<8x32xf32>
    %cst_32 = arith.constant dense<0.000000e+00> : vector<8x8xf32>
    %80 = tpu.matmul %77, %78, %cst_32 {dimension_numbers = #tpu.dot_dimension_numbers<[1], [1], [0], [0], [0, 0, 1, 0], [], []>} : vector<8x32xf32>, vector<8x32xf32>, vector<8x8xf32> -> vector<8x8xf32>
    %cst_33 = arith.constant 0.176776692 : f32
    %81 = vector.broadcast %cst_33 : f32 to vector<8x8xf32>
    %82 = arith.mulf %80, %81 : vector<8x8xf32>
    %cst_34 = arith.constant dense<0xFF800000> : vector<8xf32>
    %83 = vector.multi_reduction <maximumf>, %82, %cst_34 [1] : vector<8x8xf32> to vector<8xf32>
    %84 = vector.shape_cast %83 : vector<8xf32> to vector<8x1xf32>
    %85 = vector.broadcast %84 : vector<8x1xf32> to vector<8x8xf32>
    %86 = arith.subf %82, %85 : vector<8x8xf32>
    %87 = math.exp %86 : vector<8x8xf32>
    %cst_35 = arith.constant dense<0.000000e+00> : vector<8xf32>
    %88 = vector.multi_reduction <add>, %87, %cst_35 [1] : vector<8x8xf32> to vector<8xf32>
    %89 = vector.shape_cast %88 : vector<8xf32> to vector<8x1xf32>
    %90 = tpu.reciprocal %89 {approx = true} : vector<8x1xf32> -> vector<8x1xf32>
    %91 = vector.broadcast %90 : vector<8x1xf32> to vector<8x8xf32>
    %92 = arith.mulf %87, %91 : vector<8x8xf32>
    %cst_36 = arith.constant dense<0.000000e+00> : vector<8x32xf32>
    %93 = tpu.matmul %92, %79, %cst_36 {dimension_numbers = #tpu.dot_dimension_numbers<[1], [0], [0], [1], [0, 0, 1, 1], [], []>} : vector<8x8xf32>, vector<8x32xf32>, vector<8x32xf32> -> vector<8x32xf32>
    %94 = vector.extract_strided_slice %12 {offsets = [96, 0], sizes = [32, 128], strides = [1, 1]} : vector<128x128xf32> to vector<32x128xf32>
    %cst_37 = arith.constant dense<0.000000e+00> : vector<8x128xf32>
    %95 = tpu.matmul %93, %94, %cst_37 {dimension_numbers = #tpu.dot_dimension_numbers<[1], [0], [0], [1], [0, 0, 1, 1], [], []>} : vector<8x32xf32>, vector<32x128xf32>, vector<8x128xf32> -> vector<8x128xf32>
    %96 = arith.addf %76, %95 : vector<8x128xf32>
    %97 = arith.addf %1, %96 : vector<8x128xf32>
    %c0_38 = arith.constant 0 : index
    %c0_39 = arith.constant 0 : index
    %98 = vector.load %arg7[%c0_38, %c0_39] : memref<1x128xf32, #tpu.memory_space<vmem>>, vector<1x128xf32>
    %c0_40 = arith.constant 0 : index
    %c0_41 = arith.constant 0 : index
    %99 = vector.load %arg8[%c0_40, %c0_41] : memref<1x128xf32, #tpu.memory_space<vmem>>, vector<1x128xf32>
    %cst_42 = arith.constant dense<0.000000e+00> : vector<8xf32>
    %100 = vector.multi_reduction <add>, %97, %cst_42 [1] : vector<8x128xf32> to vector<8xf32>
    %101 = vector.shape_cast %100 : vector<8xf32> to vector<8x1xf32>
    %cst_43 = arith.constant 1.280000e+02 : f32
    %102 = vector.broadcast %cst_43 : f32 to vector<8x1xf32>
    %103 = arith.divf %101, %102 : vector<8x1xf32>
    %104 = vector.broadcast %103 : vector<8x1xf32> to vector<8x128xf32>
    %105 = arith.subf %97, %104 : vector<8x128xf32>
    %106 = arith.mulf %105, %105 : vector<8x128xf32>
    %cst_44 = arith.constant dense<0.000000e+00> : vector<8xf32>
    %107 = vector.multi_reduction <add>, %106, %cst_44 [1] : vector<8x128xf32> to vector<8xf32>
    %108 = vector.shape_cast %107 : vector<8xf32> to vector<8x1xf32>
    %cst_45 = arith.constant 1.280000e+02 : f32
    %109 = vector.broadcast %cst_45 : f32 to vector<8x1xf32>
    %110 = arith.divf %108, %109 : vector<8x1xf32>
    %cst_46 = arith.constant 9.99999974E-6 : f32
    %111 = vector.broadcast %cst_46 : f32 to vector<8x1xf32>
    %112 = arith.addf %110, %111 : vector<8x1xf32>
    %113 = math.rsqrt %112 : vector<8x1xf32>
    %114 = vector.broadcast %113 : vector<8x1xf32> to vector<8x128xf32>
    %115 = arith.mulf %105, %114 : vector<8x128xf32>
    %116 = vector.broadcast %98 : vector<1x128xf32> to vector<8x128xf32>
    %117 = arith.mulf %115, %116 : vector<8x128xf32>
    %118 = vector.broadcast %99 : vector<1x128xf32> to vector<8x128xf32>
    %119 = arith.addf %117, %118 : vector<8x128xf32>
    %c0_47 = arith.constant 0 : index
    %c0_48 = arith.constant 0 : index
    %120 = vector.load %arg9[%c0_47, %c0_48] : memref<128x128xf32, #tpu.memory_space<vmem>>, vector<128x128xf32>
    %cst_49 = arith.constant dense<0.000000e+00> : vector<8x128xf32>
    %121 = tpu.matmul %119, %120, %cst_49 {dimension_numbers = #tpu.dot_dimension_numbers<[1], [0], [0], [1], [0, 0, 1, 1], [], []>} : vector<8x128xf32>, vector<128x128xf32>, vector<8x128xf32> -> vector<8x128xf32>
    %c0_50 = arith.constant 0 : index
    %c0_51 = arith.constant 0 : index
    %122 = vector.load %arg10[%c0_50, %c0_51] : memref<1x128xf32, #tpu.memory_space<vmem>>, vector<1x128xf32>
    %123 = vector.broadcast %122 : vector<1x128xf32> to vector<8x128xf32>
    %124 = arith.addf %121, %123 : vector<8x128xf32>
    %c0_52 = arith.constant 0 : index
    %c0_53 = arith.constant 0 : index
    %125 = vector.load %arg11[%c0_52, %c0_53] : memref<128x256xf32, #tpu.memory_space<vmem>>, vector<128x256xf32>
    %cst_54 = arith.constant dense<0.000000e+00> : vector<8x256xf32>
    %126 = tpu.matmul %3, %125, %cst_54 {dimension_numbers = #tpu.dot_dimension_numbers<[1], [0], [0], [1], [0, 0, 1, 1], [], []>} : vector<8x128xf32>, vector<128x256xf32>, vector<8x256xf32> -> vector<8x256xf32>
    %c0_55 = arith.constant 0 : index
    %c0_56 = arith.constant 0 : index
    %127 = vector.load %arg12[%c0_55, %c0_56] : memref<1x256xf32, #tpu.memory_space<vmem>>, vector<1x256xf32>
    %128 = vector.broadcast %127 : vector<1x256xf32> to vector<8x256xf32>
    %129 = arith.addf %126, %128 : vector<8x256xf32>
    %130 = vector.extract_strided_slice %129 {offsets = [0, 0], sizes = [8, 128], strides = [1, 1]} : vector<8x256xf32> to vector<8x128xf32>
    %131 = vector.extract_strided_slice %129 {offsets = [0, 128], sizes = [8, 128], strides = [1, 1]} : vector<8x256xf32> to vector<8x128xf32>
    %c0_57 = arith.constant 0 : index
    %c0_58 = arith.constant 0 : index
    %132 = vector.load %arg13[%c0_57, %c0_58] : memref<128x128xf32, #tpu.memory_space<vmem>>, vector<128x128xf32>
    %c0_59 = arith.constant 0 : index
    %c0_60 = arith.constant 0 : index
    %133 = vector.load %arg14[%c0_59, %c0_60] : memref<1x128xf32, #tpu.memory_space<vmem>>, vector<1x128xf32>
    %cst_61 = arith.constant 0.000000e+00 : f32
    %134 = vector.broadcast %cst_61 : f32 to vector<8x128xf32>
    %135 = vector.broadcast %133 : vector<1x128xf32> to vector<8x128xf32>
    %136 = arith.addf %134, %135 : vector<8x128xf32>
    %137 = vector.extract_strided_slice %124 {offsets = [0, 0], sizes = [8, 32], strides = [1, 1]} : vector<8x128xf32> to vector<8x32xf32>
    %138 = vector.extract_strided_slice %130 {offsets = [0, 0], sizes = [8, 32], strides = [1, 1]} : vector<8x128xf32> to vector<8x32xf32>
    %139 = vector.extract_strided_slice %131 {offsets = [0, 0], sizes = [8, 32], strides = [1, 1]} : vector<8x128xf32> to vector<8x32xf32>
    %cst_62 = arith.constant dense<0.000000e+00> : vector<8x8xf32>
    %140 = tpu.matmul %137, %138, %cst_62 {dimension_numbers = #tpu.dot_dimension_numbers<[1], [1], [0], [0], [0, 0, 1, 0], [], []>} : vector<8x32xf32>, vector<8x32xf32>, vector<8x8xf32> -> vector<8x8xf32>
    %cst_63 = arith.constant 0.176776692 : f32
    %141 = vector.broadcast %cst_63 : f32 to vector<8x8xf32>
    %142 = arith.mulf %140, %141 : vector<8x8xf32>
    %cst_64 = arith.constant dense<0xFF800000> : vector<8xf32>
    %143 = vector.multi_reduction <maximumf>, %142, %cst_64 [1] : vector<8x8xf32> to vector<8xf32>
    %144 = vector.shape_cast %143 : vector<8xf32> to vector<8x1xf32>
    %145 = vector.broadcast %144 : vector<8x1xf32> to vector<8x8xf32>
    %146 = arith.subf %142, %145 : vector<8x8xf32>
    %147 = math.exp %146 : vector<8x8xf32>
    %cst_65 = arith.constant dense<0.000000e+00> : vector<8xf32>
    %148 = vector.multi_reduction <add>, %147, %cst_65 [1] : vector<8x8xf32> to vector<8xf32>
    %149 = vector.shape_cast %148 : vector<8xf32> to vector<8x1xf32>
    %150 = tpu.reciprocal %149 {approx = true} : vector<8x1xf32> -> vector<8x1xf32>
    %151 = vector.broadcast %150 : vector<8x1xf32> to vector<8x8xf32>
    %152 = arith.mulf %147, %151 : vector<8x8xf32>
    %cst_66 = arith.constant dense<0.000000e+00> : vector<8x32xf32>
    %153 = tpu.matmul %152, %139, %cst_66 {dimension_numbers = #tpu.dot_dimension_numbers<[1], [0], [0], [1], [0, 0, 1, 1], [], []>} : vector<8x8xf32>, vector<8x32xf32>, vector<8x32xf32> -> vector<8x32xf32>
    %154 = vector.extract_strided_slice %132 {offsets = [0, 0], sizes = [32, 128], strides = [1, 1]} : vector<128x128xf32> to vector<32x128xf32>
    %cst_67 = arith.constant dense<0.000000e+00> : vector<8x128xf32>
    %155 = tpu.matmul %153, %154, %cst_67 {dimension_numbers = #tpu.dot_dimension_numbers<[1], [0], [0], [1], [0, 0, 1, 1], [], []>} : vector<8x32xf32>, vector<32x128xf32>, vector<8x128xf32> -> vector<8x128xf32>
    %156 = arith.addf %136, %155 : vector<8x128xf32>
    %157 = vector.extract_strided_slice %124 {offsets = [0, 32], sizes = [8, 32], strides = [1, 1]} : vector<8x128xf32> to vector<8x32xf32>
    %158 = vector.extract_strided_slice %130 {offsets = [0, 32], sizes = [8, 32], strides = [1, 1]} : vector<8x128xf32> to vector<8x32xf32>
    %159 = vector.extract_strided_slice %131 {offsets = [0, 32], sizes = [8, 32], strides = [1, 1]} : vector<8x128xf32> to vector<8x32xf32>
    %cst_68 = arith.constant dense<0.000000e+00> : vector<8x8xf32>
    %160 = tpu.matmul %157, %158, %cst_68 {dimension_numbers = #tpu.dot_dimension_numbers<[1], [1], [0], [0], [0, 0, 1, 0], [], []>} : vector<8x32xf32>, vector<8x32xf32>, vector<8x8xf32> -> vector<8x8xf32>
    %cst_69 = arith.constant 0.176776692 : f32
    %161 = vector.broadcast %cst_69 : f32 to vector<8x8xf32>
    %162 = arith.mulf %160, %161 : vector<8x8xf32>
    %cst_70 = arith.constant dense<0xFF800000> : vector<8xf32>
    %163 = vector.multi_reduction <maximumf>, %162, %cst_70 [1] : vector<8x8xf32> to vector<8xf32>
    %164 = vector.shape_cast %163 : vector<8xf32> to vector<8x1xf32>
    %165 = vector.broadcast %164 : vector<8x1xf32> to vector<8x8xf32>
    %166 = arith.subf %162, %165 : vector<8x8xf32>
    %167 = math.exp %166 : vector<8x8xf32>
    %cst_71 = arith.constant dense<0.000000e+00> : vector<8xf32>
    %168 = vector.multi_reduction <add>, %167, %cst_71 [1] : vector<8x8xf32> to vector<8xf32>
    %169 = vector.shape_cast %168 : vector<8xf32> to vector<8x1xf32>
    %170 = tpu.reciprocal %169 {approx = true} : vector<8x1xf32> -> vector<8x1xf32>
    %171 = vector.broadcast %170 : vector<8x1xf32> to vector<8x8xf32>
    %172 = arith.mulf %167, %171 : vector<8x8xf32>
    %cst_72 = arith.constant dense<0.000000e+00> : vector<8x32xf32>
    %173 = tpu.matmul %172, %159, %cst_72 {dimension_numbers = #tpu.dot_dimension_numbers<[1], [0], [0], [1], [0, 0, 1, 1], [], []>} : vector<8x8xf32>, vector<8x32xf32>, vector<8x32xf32> -> vector<8x32xf32>
    %174 = vector.extract_strided_slice %132 {offsets = [32, 0], sizes = [32, 128], strides = [1, 1]} : vector<128x128xf32> to vector<32x128xf32>
    %cst_73 = arith.constant dense<0.000000e+00> : vector<8x128xf32>
    %175 = tpu.matmul %173, %174, %cst_73 {dimension_numbers = #tpu.dot_dimension_numbers<[1], [0], [0], [1], [0, 0, 1, 1], [], []>} : vector<8x32xf32>, vector<32x128xf32>, vector<8x128xf32> -> vector<8x128xf32>
    %176 = arith.addf %156, %175 : vector<8x128xf32>
    %177 = vector.extract_strided_slice %124 {offsets = [0, 64], sizes = [8, 32], strides = [1, 1]} : vector<8x128xf32> to vector<8x32xf32>
    %178 = vector.extract_strided_slice %130 {offsets = [0, 64], sizes = [8, 32], strides = [1, 1]} : vector<8x128xf32> to vector<8x32xf32>
    %179 = vector.extract_strided_slice %131 {offsets = [0, 64], sizes = [8, 32], strides = [1, 1]} : vector<8x128xf32> to vector<8x32xf32>
    %cst_74 = arith.constant dense<0.000000e+00> : vector<8x8xf32>
    %180 = tpu.matmul %177, %178, %cst_74 {dimension_numbers = #tpu.dot_dimension_numbers<[1], [1], [0], [0], [0, 0, 1, 0], [], []>} : vector<8x32xf32>, vector<8x32xf32>, vector<8x8xf32> -> vector<8x8xf32>
    %cst_75 = arith.constant 0.176776692 : f32
    %181 = vector.broadcast %cst_75 : f32 to vector<8x8xf32>
    %182 = arith.mulf %180, %181 : vector<8x8xf32>
    %cst_76 = arith.constant dense<0xFF800000> : vector<8xf32>
    %183 = vector.multi_reduction <maximumf>, %182, %cst_76 [1] : vector<8x8xf32> to vector<8xf32>
    %184 = vector.shape_cast %183 : vector<8xf32> to vector<8x1xf32>
    %185 = vector.broadcast %184 : vector<8x1xf32> to vector<8x8xf32>
    %186 = arith.subf %182, %185 : vector<8x8xf32>
    %187 = math.exp %186 : vector<8x8xf32>
    %cst_77 = arith.constant dense<0.000000e+00> : vector<8xf32>
    %188 = vector.multi_reduction <add>, %187, %cst_77 [1] : vector<8x8xf32> to vector<8xf32>
    %189 = vector.shape_cast %188 : vector<8xf32> to vector<8x1xf32>
    %190 = tpu.reciprocal %189 {approx = true} : vector<8x1xf32> -> vector<8x1xf32>
    %191 = vector.broadcast %190 : vector<8x1xf32> to vector<8x8xf32>
    %192 = arith.mulf %187, %191 : vector<8x8xf32>
    %cst_78 = arith.constant dense<0.000000e+00> : vector<8x32xf32>
    %193 = tpu.matmul %192, %179, %cst_78 {dimension_numbers = #tpu.dot_dimension_numbers<[1], [0], [0], [1], [0, 0, 1, 1], [], []>} : vector<8x8xf32>, vector<8x32xf32>, vector<8x32xf32> -> vector<8x32xf32>
    %194 = vector.extract_strided_slice %132 {offsets = [64, 0], sizes = [32, 128], strides = [1, 1]} : vector<128x128xf32> to vector<32x128xf32>
    %cst_79 = arith.constant dense<0.000000e+00> : vector<8x128xf32>
    %195 = tpu.matmul %193, %194, %cst_79 {dimension_numbers = #tpu.dot_dimension_numbers<[1], [0], [0], [1], [0, 0, 1, 1], [], []>} : vector<8x32xf32>, vector<32x128xf32>, vector<8x128xf32> -> vector<8x128xf32>
    %196 = arith.addf %176, %195 : vector<8x128xf32>
    %197 = vector.extract_strided_slice %124 {offsets = [0, 96], sizes = [8, 32], strides = [1, 1]} : vector<8x128xf32> to vector<8x32xf32>
    %198 = vector.extract_strided_slice %130 {offsets = [0, 96], sizes = [8, 32], strides = [1, 1]} : vector<8x128xf32> to vector<8x32xf32>
    %199 = vector.extract_strided_slice %131 {offsets = [0, 96], sizes = [8, 32], strides = [1, 1]} : vector<8x128xf32> to vector<8x32xf32>
    %cst_80 = arith.constant dense<0.000000e+00> : vector<8x8xf32>
    %200 = tpu.matmul %197, %198, %cst_80 {dimension_numbers = #tpu.dot_dimension_numbers<[1], [1], [0], [0], [0, 0, 1, 0], [], []>} : vector<8x32xf32>, vector<8x32xf32>, vector<8x8xf32> -> vector<8x8xf32>
    %cst_81 = arith.constant 0.176776692 : f32
    %201 = vector.broadcast %cst_81 : f32 to vector<8x8xf32>
    %202 = arith.mulf %200, %201 : vector<8x8xf32>
    %cst_82 = arith.constant dense<0xFF800000> : vector<8xf32>
    %203 = vector.multi_reduction <maximumf>, %202, %cst_82 [1] : vector<8x8xf32> to vector<8xf32>
    %204 = vector.shape_cast %203 : vector<8xf32> to vector<8x1xf32>
    %205 = vector.broadcast %204 : vector<8x1xf32> to vector<8x8xf32>
    %206 = arith.subf %202, %205 : vector<8x8xf32>
    %207 = math.exp %206 : vector<8x8xf32>
    %cst_83 = arith.constant dense<0.000000e+00> : vector<8xf32>
    %208 = vector.multi_reduction <add>, %207, %cst_83 [1] : vector<8x8xf32> to vector<8xf32>
    %209 = vector.shape_cast %208 : vector<8xf32> to vector<8x1xf32>
    %210 = tpu.reciprocal %209 {approx = true} : vector<8x1xf32> -> vector<8x1xf32>
    %211 = vector.broadcast %210 : vector<8x1xf32> to vector<8x8xf32>
    %212 = arith.mulf %207, %211 : vector<8x8xf32>
    %cst_84 = arith.constant dense<0.000000e+00> : vector<8x32xf32>
    %213 = tpu.matmul %212, %199, %cst_84 {dimension_numbers = #tpu.dot_dimension_numbers<[1], [0], [0], [1], [0, 0, 1, 1], [], []>} : vector<8x8xf32>, vector<8x32xf32>, vector<8x32xf32> -> vector<8x32xf32>
    %214 = vector.extract_strided_slice %132 {offsets = [96, 0], sizes = [32, 128], strides = [1, 1]} : vector<128x128xf32> to vector<32x128xf32>
    %cst_85 = arith.constant dense<0.000000e+00> : vector<8x128xf32>
    %215 = tpu.matmul %213, %214, %cst_85 {dimension_numbers = #tpu.dot_dimension_numbers<[1], [0], [0], [1], [0, 0, 1, 1], [], []>} : vector<8x32xf32>, vector<32x128xf32>, vector<8x128xf32> -> vector<8x128xf32>
    %216 = arith.addf %196, %215 : vector<8x128xf32>
    %217 = arith.addf %119, %216 : vector<8x128xf32>
    %c0_86 = arith.constant 0 : index
    %c0_87 = arith.constant 0 : index
    %218 = vector.load %arg15[%c0_86, %c0_87] : memref<1x128xf32, #tpu.memory_space<vmem>>, vector<1x128xf32>
    %c0_88 = arith.constant 0 : index
    %c0_89 = arith.constant 0 : index
    %219 = vector.load %arg16[%c0_88, %c0_89] : memref<1x128xf32, #tpu.memory_space<vmem>>, vector<1x128xf32>
    %cst_90 = arith.constant dense<0.000000e+00> : vector<8xf32>
    %220 = vector.multi_reduction <add>, %217, %cst_90 [1] : vector<8x128xf32> to vector<8xf32>
    %221 = vector.shape_cast %220 : vector<8xf32> to vector<8x1xf32>
    %cst_91 = arith.constant 1.280000e+02 : f32
    %222 = vector.broadcast %cst_91 : f32 to vector<8x1xf32>
    %223 = arith.divf %221, %222 : vector<8x1xf32>
    %224 = vector.broadcast %223 : vector<8x1xf32> to vector<8x128xf32>
    %225 = arith.subf %217, %224 : vector<8x128xf32>
    %226 = arith.mulf %225, %225 : vector<8x128xf32>
    %cst_92 = arith.constant dense<0.000000e+00> : vector<8xf32>
    %227 = vector.multi_reduction <add>, %226, %cst_92 [1] : vector<8x128xf32> to vector<8xf32>
    %228 = vector.shape_cast %227 : vector<8xf32> to vector<8x1xf32>
    %cst_93 = arith.constant 1.280000e+02 : f32
    %229 = vector.broadcast %cst_93 : f32 to vector<8x1xf32>
    %230 = arith.divf %228, %229 : vector<8x1xf32>
    %cst_94 = arith.constant 9.99999974E-6 : f32
    %231 = vector.broadcast %cst_94 : f32 to vector<8x1xf32>
    %232 = arith.addf %230, %231 : vector<8x1xf32>
    %233 = math.rsqrt %232 : vector<8x1xf32>
    %234 = vector.broadcast %233 : vector<8x1xf32> to vector<8x128xf32>
    %235 = arith.mulf %225, %234 : vector<8x128xf32>
    %236 = vector.broadcast %218 : vector<1x128xf32> to vector<8x128xf32>
    %237 = arith.mulf %235, %236 : vector<8x128xf32>
    %238 = vector.broadcast %219 : vector<1x128xf32> to vector<8x128xf32>
    %239 = arith.addf %237, %238 : vector<8x128xf32>
    %c0_95 = arith.constant 0 : index
    %c0_96 = arith.constant 0 : index
    %240 = vector.load %arg17[%c0_95, %c0_96] : memref<128x256xf32, #tpu.memory_space<vmem>>, vector<128x256xf32>
    %cst_97 = arith.constant dense<0.000000e+00> : vector<8x256xf32>
    %241 = tpu.matmul %239, %240, %cst_97 {dimension_numbers = #tpu.dot_dimension_numbers<[1], [0], [0], [1], [0, 0, 1, 1], [], []>} : vector<8x128xf32>, vector<128x256xf32>, vector<8x256xf32> -> vector<8x256xf32>
    %c0_98 = arith.constant 0 : index
    %c0_99 = arith.constant 0 : index
    %242 = vector.load %arg18[%c0_98, %c0_99] : memref<1x256xf32, #tpu.memory_space<vmem>>, vector<1x256xf32>
    %243 = vector.broadcast %242 : vector<1x256xf32> to vector<8x256xf32>
    %244 = arith.addf %241, %243 : vector<8x256xf32>
    %cst_100 = arith.constant 0.000000e+00 : f32
    %245 = vector.broadcast %cst_100 : f32 to vector<8x256xf32>
    %246 = arith.maximumf %244, %245 : vector<8x256xf32>
    %c0_101 = arith.constant 0 : index
    %c0_102 = arith.constant 0 : index
    %247 = vector.load %arg19[%c0_101, %c0_102] : memref<256x128xf32, #tpu.memory_space<vmem>>, vector<256x128xf32>
    %cst_103 = arith.constant dense<0.000000e+00> : vector<8x128xf32>
    %248 = tpu.matmul %246, %247, %cst_103 {dimension_numbers = #tpu.dot_dimension_numbers<[1], [0], [0], [1], [0, 0, 1, 1], [], []>} : vector<8x256xf32>, vector<256x128xf32>, vector<8x128xf32> -> vector<8x128xf32>
    %c0_104 = arith.constant 0 : index
    %c0_105 = arith.constant 0 : index
    %249 = vector.load %arg20[%c0_104, %c0_105] : memref<1x128xf32, #tpu.memory_space<vmem>>, vector<1x128xf32>
    %250 = vector.broadcast %249 : vector<1x128xf32> to vector<8x128xf32>
    %251 = arith.addf %248, %250 : vector<8x128xf32>
    %252 = arith.addf %239, %251 : vector<8x128xf32>
    %c0_106 = arith.constant 0 : index
    %c0_107 = arith.constant 0 : index
    %253 = vector.load %arg21[%c0_106, %c0_107] : memref<1x128xf32, #tpu.memory_space<vmem>>, vector<1x128xf32>
    %c0_108 = arith.constant 0 : index
    %c0_109 = arith.constant 0 : index
    %254 = vector.load %arg22[%c0_108, %c0_109] : memref<1x128xf32, #tpu.memory_space<vmem>>, vector<1x128xf32>
    %cst_110 = arith.constant dense<0.000000e+00> : vector<8xf32>
    %255 = vector.multi_reduction <add>, %252, %cst_110 [1] : vector<8x128xf32> to vector<8xf32>
    %256 = vector.shape_cast %255 : vector<8xf32> to vector<8x1xf32>
    %cst_111 = arith.constant 1.280000e+02 : f32
    %257 = vector.broadcast %cst_111 : f32 to vector<8x1xf32>
    %258 = arith.divf %256, %257 : vector<8x1xf32>
    %259 = vector.broadcast %258 : vector<8x1xf32> to vector<8x128xf32>
    %260 = arith.subf %252, %259 : vector<8x128xf32>
    %261 = arith.mulf %260, %260 : vector<8x128xf32>
    %cst_112 = arith.constant dense<0.000000e+00> : vector<8xf32>
    %262 = vector.multi_reduction <add>, %261, %cst_112 [1] : vector<8x128xf32> to vector<8xf32>
    %263 = vector.shape_cast %262 : vector<8xf32> to vector<8x1xf32>
    %cst_113 = arith.constant 1.280000e+02 : f32
    %264 = vector.broadcast %cst_113 : f32 to vector<8x1xf32>
    %265 = arith.divf %263, %264 : vector<8x1xf32>
    %cst_114 = arith.constant 9.99999974E-6 : f32
    %266 = vector.broadcast %cst_114 : f32 to vector<8x1xf32>
    %267 = arith.addf %265, %266 : vector<8x1xf32>
    %268 = math.rsqrt %267 : vector<8x1xf32>
    %269 = vector.broadcast %268 : vector<8x1xf32> to vector<8x128xf32>
    %270 = arith.mulf %260, %269 : vector<8x128xf32>
    %271 = vector.broadcast %253 : vector<1x128xf32> to vector<8x128xf32>
    %272 = arith.mulf %270, %271 : vector<8x128xf32>
    %273 = vector.broadcast %254 : vector<1x128xf32> to vector<8x128xf32>
    %274 = arith.addf %272, %273 : vector<8x128xf32>
    %c0_115 = arith.constant 0 : index
    %c0_116 = arith.constant 0 : index
    %c0_117 = arith.constant 0 : index
    %275 = vector.load %arg23[%c0_115, %c0_116, %c0_117] : memref<1x8x128xf32, #tpu.memory_space<vmem>>, vector<1x8x128xf32>
    %276 = vector.shape_cast %275 : vector<1x8x128xf32> to vector<8x128xf32>
    %277 = vector.shape_cast %274 : vector<8x128xf32> to vector<1x8x128xf32>
    tpu.vector_store %arg23[%c0_115, %c0_116, %c0_117], %277 {strides = array<i32>} : memref<1x8x128xf32, #tpu.memory_space<vmem>>, vector<1x8x128xf32>,
    return
  }
  func.func @transform_0(%arg0: i32) -> (i32, i32, i32) {
    %c0_i32 = arith.constant 0 : i32
    %c0_i32_0 = arith.constant 0 : i32
    %c0_i32_1 = arith.constant 0 : i32
    return %arg0, %c0_i32, %c0_i32_0 : i32, i32, i32
  }
  func.func @transform_1(%arg0: i32) -> (i32, i32, i32) {
    %c0_i32 = arith.constant 0 : i32
    %c0_i32_0 = arith.constant 0 : i32
    %c0_i32_1 = arith.constant 0 : i32
    return %arg0, %c0_i32, %c0_i32_0 : i32, i32, i32
  }
  func.func @transform_2(%arg0: i32) -> (i32, i32) {
    %c0_i32 = arith.constant 0 : i32
    %c0_i32_0 = arith.constant 0 : i32
    %c0_i32_1 = arith.constant 0 : i32
    return %c0_i32, %c0_i32_0 : i32, i32
  }
  func.func @transform_3(%arg0: i32) -> (i32, i32) {
    %c0_i32 = arith.constant 0 : i32
    %c0_i32_0 = arith.constant 0 : i32
    %c0_i32_1 = arith.constant 0 : i32
    return %c0_i32, %c0_i32_0 : i32, i32
  }
  func.func @transform_4(%arg0: i32) -> (i32, i32) {
    %c0_i32 = arith.constant 0 : i32
    %c0_i32_0 = arith.constant 0 : i32
    %c0_i32_1 = arith.constant 0 : i32
    return %c0_i32, %c0_i32_0 : i32, i32
  }
  func.func @transform_5(%arg0: i32) -> (i32, i32) {
    %c0_i32 = arith.constant 0 : i32
    %c0_i32_0 = arith.constant 0 : i32
    %c0_i32_1 = arith.constant 0 : i32
    return %c0_i32, %c0_i32_0 : i32, i32
  }
  func.func @transform_6(%arg0: i32) -> (i32, i32) {
    %c0_i32 = arith.constant 0 : i32
    %c0_i32_0 = arith.constant 0 : i32
    %c0_i32_1 = arith.constant 0 : i32
    return %c0_i32, %c0_i32_0 : i32, i32
  }
  func.func @transform_7(%arg0: i32) -> (i32, i32) {
    %c0_i32 = arith.constant 0 : i32
    %c0_i32_0 = arith.constant 0 : i32
    %c0_i32_1 = arith.constant 0 : i32
    return %c0_i32, %c0_i32_0 : i32, i32
  }
  func.func @transform_8(%arg0: i32) -> (i32, i32) {
    %c0_i32 = arith.constant 0 : i32
    %c0_i32_0 = arith.constant 0 : i32
    %c0_i32_1 = arith.constant 0 : i32
    return %c0_i32, %c0_i32_0 : i32, i32
  }
  func.func @transform_9(%arg0: i32) -> (i32, i32) {
    %c0_i32 = arith.constant 0 : i32
    %c0_i32_0 = arith.constant 0 : i32
    %c0_i32_1 = arith.constant 0 : i32
    return %c0_i32, %c0_i32_0 : i32, i32
  }
  func.func @transform_10(%arg0: i32) -> (i32, i32) {
    %c0_i32 = arith.constant 0 : i32
    %c0_i32_0 = arith.constant 0 : i32
    %c0_i32_1 = arith.constant 0 : i32
    return %c0_i32, %c0_i32_0 : i32, i32
  }
  func.func @transform_11(%arg0: i32) -> (i32, i32) {
    %c0_i32 = arith.constant 0 : i32
    %c0_i32_0 = arith.constant 0 : i32
    %c0_i32_1 = arith.constant 0 : i32
    return %c0_i32, %c0_i32_0 : i32, i32
  }
  func.func @transform_12(%arg0: i32) -> (i32, i32) {
    %c0_i32 = arith.constant 0 : i32
    %c0_i32_0 = arith.constant 0 : i32
    %c0_i32_1 = arith.constant 0 : i32
    return %c0_i32, %c0_i32_0 : i32, i32
  }
  func.func @transform_13(%arg0: i32) -> (i32, i32) {
    %c0_i32 = arith.constant 0 : i32
    %c0_i32_0 = arith.constant 0 : i32
    %c0_i32_1 = arith.constant 0 : i32
    return %c0_i32, %c0_i32_0 : i32, i32
  }
  func.func @transform_14(%arg0: i32) -> (i32, i32) {
    %c0_i32 = arith.constant 0 : i32
    %c0_i32_0 = arith.constant 0 : i32
    %c0_i32_1 = arith.constant 0 : i32
    return %c0_i32, %c0_i32_0 : i32, i32
  }
  func.func @transform_15(%arg0: i32) -> (i32, i32) {
    %c0_i32 = arith.constant 0 : i32
    %c0_i32_0 = arith.constant 0 : i32
    %c0_i32_1 = arith.constant 0 : i32
    return %c0_i32, %c0_i32_0 : i32, i32
  }
  func.func @transform_16(%arg0: i32) -> (i32, i32) {
    %c0_i32 = arith.constant 0 : i32
    %c0_i32_0 = arith.constant 0 : i32
    %c0_i32_1 = arith.constant 0 : i32
    return %c0_i32, %c0_i32_0 : i32, i32
  }
  func.func @transform_17(%arg0: i32) -> (i32, i32) {
    %c0_i32 = arith.constant 0 : i32
    %c0_i32_0 = arith.constant 0 : i32
    %c0_i32_1 = arith.constant 0 : i32
    return %c0_i32, %c0_i32_0 : i32, i32
  }
  func.func @transform_18(%arg0: i32) -> (i32, i32) {
    %c0_i32 = arith.constant 0 : i32
    %c0_i32_0 = arith.constant 0 : i32
    %c0_i32_1 = arith.constant 0 : i32
    return %c0_i32, %c0_i32_0 : i32, i32
  }
  func.func @transform_19(%arg0: i32) -> (i32, i32) {
    %c0_i32 = arith.constant 0 : i32
    %c0_i32_0 = arith.constant 0 : i32
    %c0_i32_1 = arith.constant 0 : i32
    return %c0_i32, %c0_i32_0 : i32, i32
  }
  func.func @transform_20(%arg0: i32) -> (i32, i32) {
    %c0_i32 = arith.constant 0 : i32
    %c0_i32_0 = arith.constant 0 : i32
    %c0_i32_1 = arith.constant 0 : i32
    return %c0_i32, %c0_i32_0 : i32, i32
  }
  func.func @transform_21(%arg0: i32) -> (i32, i32) {
    %c0_i32 = arith.constant 0 : i32
    %c0_i32_0 = arith.constant 0 : i32
    %c0_i32_1 = arith.constant 0 : i32
    return %c0_i32, %c0_i32_0 : i32, i32
  }
  func.func @transform_22(%arg0: i32) -> (i32, i32, i32) {
    %c0_i32 = arith.constant 0 : i32
    %c0_i32_0 = arith.constant 0 : i32
    %c0_i32_1 = arith.constant 0 : i32
    return %arg0, %c0_i32, %c0_i32_0 : i32, i32, i32
  }
}

module attributes {stable_mosaic.version = 11 : i64} {
  func.func @_decoder_layer_kernel(%arg0: i32, %arg1: memref<1x8x128xf32, #tpu.memory_space<vmem>>, %arg2: memref<1x8x128xf32, #tpu.memory_space<vmem>>, %arg3: memref<128x384xf32, #tpu.memory_space<vmem>>, %arg4: memref<1x384xf32, #tpu.memory_space<vmem>>, %arg5: memref<128x128xf32, #tpu.memory_space<vmem>>, %arg6: memref<1x128xf32, #tpu.memory_space<vmem>>, %arg7: memref<1x128xf32, #tpu.memory_space<vmem>>, %arg8: memref<1x128xf32, #tpu.memory_space<vmem>>, %arg9: memref<128x128xf32, #tpu.memory_space<vmem>>, %arg10: memref<1x128xf32, #tpu.memory_space<vmem>>, %arg11: memref<128x256xf32, #tpu.memory_space<vmem>>, %arg12: memref<1x256xf32, #tpu.memory_space<vmem>>, %arg13: memref<128x128xf32, #tpu.memory_space<vmem>>, %arg14: memref<1x128xf32, #tpu.memory_space<vmem>>, %arg15: memref<1x128xf32, #tpu.memory_space<vmem>>, %arg16: memref<1x128xf32, #tpu.memory_space<vmem>>, %arg17: memref<128x256xf32, #tpu.memory_space<vmem>>, %arg18: memref<1x256xf32, #tpu.memory_space<vmem>>, %arg19: memref<256x128xf32, #tpu.memory_space<vmem>>, %arg20: memref<1x128xf32, #tpu.memory_space<vmem>>, %arg21: memref<1x128xf32, #tpu.memory_space<vmem>>, %arg22: memref<1x128xf32, #tpu.memory_space<vmem>>, %arg23: memref<1x8x128xf32, #tpu.memory_space<vmem>>) attributes {dimension_semantics = [#tpu.dimension_semantics<parallel>], iteration_bounds = array<i64: 2>, scalar_prefetch = 0 : i64, scratch_operands = 0 : i64, tpu.core_type = #tpu.core_type<tc>, window_params = [{transform_indices = @transform_0, window_bounds = array<i64: 1, 8, 128>}, {transform_indices = @transform_1, window_bounds = array<i64: 1, 8, 128>}, {pipeline_mode = #tpu.pipeline_mode<synchronous>, transform_indices = @transform_2, window_bounds = array<i64: 128, 384>}, {pipeline_mode = #tpu.pipeline_mode<synchronous>, transform_indices = @transform_3, window_bounds = array<i64: 1, 384>}, {pipeline_mode = #tpu.pipeline_mode<synchronous>, transform_indices = @transform_4, window_bounds = array<i64: 128, 128>}, {pipeline_mode = #tpu.pipeline_mode<synchronous>, transform_indices = @transform_5, window_bounds = array<i64: 1, 128>}, {pipeline_mode = #tpu.pipeline_mode<synchronous>, transform_indices = @transform_6, window_bounds = array<i64: 1, 128>}, {pipeline_mode = #tpu.pipeline_mode<synchronous>, transform_indices = @transform_7, window_bounds = array<i64: 1, 128>}, {pipeline_mode = #tpu.pipeline_mode<synchronous>, transform_indices = @transform_8, window_bounds = array<i64: 128, 128>}, {pipeline_mode = #tpu.pipeline_mode<synchronous>, transform_indices = @transform_9, window_bounds = array<i64: 1, 128>}, {pipeline_mode = #tpu.pipeline_mode<synchronous>, transform_indices = @transform_10, window_bounds = array<i64: 128, 256>}, {pipeline_mode = #tpu.pipeline_mode<synchronous>, transform_indices = @transform_11, window_bounds = array<i64: 1, 256>}, {pipeline_mode = #tpu.pipeline_mode<synchronous>, transform_indices = @transform_12, window_bounds = array<i64: 128, 128>}, {pipeline_mode = #tpu.pipeline_mode<synchronous>, transform_indices = @transform_13, window_bounds = array<i64: 1, 128>}, {pipeline_mode = #tpu.pipeline_mode<synchronous>, transform_indices = @transform_14, window_bounds = array<i64: 1, 128>}, {pipeline_mode = #tpu.pipeline_mode<synchronous>, transform_indices = @transform_15, window_bounds = array<i64: 1, 128>}, {pipeline_mode = #tpu.pipeline_mode<synchronous>, transform_indices = @transform_16, window_bounds = array<i64: 128, 256>}, {pipeline_mode = #tpu.pipeline_mode<synchronous>, transform_indices = @transform_17, window_bounds = array<i64: 1, 256>}, {pipeline_mode = #tpu.pipeline_mode<synchronous>, transform_indices = @transform_18, window_bounds = array<i64: 256, 128>}, {pipeline_mode = #tpu.pipeline_mode<synchronous>, transform_indices = @transform_19, window_bounds = array<i64: 1, 128>}, {pipeline_mode = #tpu.pipeline_mode<synchronous>, transform_indices = @transform_20, window_bounds = array<i64: 1, 128>}, {pipeline_mode = #tpu.pipeline_mode<synchronous>, transform_indices = @transform_21, window_bounds = array<i64: 1, 128>}, {transform_indices = @transform_22, window_bounds = array<i64: 1, 8, 128>}]} {
    %c0 = arith.constant 0 : index
    %c0_0 = arith.constant 0 : index
    %c0_1 = arith.constant 0 : index
    %0 = vector.load %arg1[%c0, %c0_0, %c0_1] : memref<1x8x128xf32, #tpu.memory_space<vmem>>, vector<1x8x128xf32>
    %1 = vector.shape_cast %0 : vector<1x8x128xf32> to vector<8x128xf32>
    %c0_2 = arith.constant 0 : index
    %c0_3 = arith.constant 0 : index
    %c0_4 = arith.constant 0 : index
    %2 = vector.load %arg2[%c0_2, %c0_3, %c0_4] : memref<1x8x128xf32, #tpu.memory_space<vmem>>, vector<1x8x128xf32>
    %3 = vector.shape_cast %2 : vector<1x8x128xf32> to vector<8x128xf32>
    %c0_5 = arith.constant 0 : index
    %c0_6 = arith.constant 0 : index
    %4 = vector.load %arg3[%c0_5, %c0_6] : memref<128x384xf32, #tpu.memory_space<vmem>>, vector<128x384xf32>
    %cst = arith.constant dense<0.000000e+00> : vector<8x384xf32>
    %5 = tpu.matmul %1, %4, %cst {dimension_numbers = #tpu.dot_dimension_numbers<[1], [0], [0], [1], [0, 0, 1, 1], [], []>} : vector<8x128xf32>, vector<128x384xf32>, vector<8x384xf32> -> vector<8x384xf32>
    %c0_7 = arith.constant 0 : index
    %c0_8 = arith.constant 0 : index
    %6 = vector.load %arg4[%c0_7, %c0_8] : memref<1x384xf32, #tpu.memory_space<vmem>>, vector<1x384xf32>
    %7 = vector.broadcast %6 : vector<1x384xf32> to vector<8x384xf32>
    %8 = arith.addf %5, %7 : vector<8x384xf32>
    %9 = vector.extract_strided_slice %8 {offsets = [0, 0], sizes = [8, 128], strides = [1, 1]} : vector<8x384xf32> to vector<8x128xf32>
    %10 = vector.extract_strided_slice %8 {offsets = [0, 128], sizes = [8, 128], strides = [1, 1]} : vector<8x384xf32> to vector<8x128xf32>
    %11 = vector.extract_strided_slice %8 {offsets = [0, 256], sizes = [8, 128], strides = [1, 1]} : vector<8x384xf32> to vector<8x128xf32>
    %c0_9 = arith.constant 0 : index
    %c0_10 = arith.constant 0 : index
    %12 = vector.load %arg5[%c0_9, %c0_10] : memref<128x128xf32, #tpu.memory_space<vmem>>, vector<128x128xf32>
    %c0_11 = arith.constant 0 : index
    %c0_12 = arith.constant 0 : index
    %13 = vector.load %arg6[%c0_11, %c0_12] : memref<1x128xf32, #tpu.memory_space<vmem>>, vector<1x128xf32>
    %cst_13 = arith.constant 0.000000e+00 : f32
    %14 = vector.broadcast %cst_13 : f32 to vector<8x128xf32>
    %15 = vector.broadcast %13 : vector<1x128xf32> to vector<8x128xf32>
    %16 = arith.addf %14, %15 : vector<8x128xf32>
    %17 = vector.extract_strided_slice %9 {offsets = [0, 0], sizes = [8, 32], strides = [1, 1]} : vector<8x128xf32> to vector<8x32xf32>
    %18 = vector.extract_strided_slice %10 {offsets = [0, 0], sizes = [8, 32], strides = [1, 1]} : vector<8x128xf32> to vector<8x32xf32>
    %19 = vector.extract_strided_slice %11 {offsets = [0, 0], sizes = [8, 32], strides = [1, 1]} : vector<8x128xf32> to vector<8x32xf32>
    %cst_14 = arith.constant dense<0.000000e+00> : vector<8x8xf32>
    %20 = tpu.matmul %17, %18, %cst_14 {dimension_numbers = #tpu.dot_dimension_numbers<[1], [1], [0], [0], [0, 0, 1, 0], [], []>} : vector<8x32xf32>, vector<8x32xf32>, vector<8x8xf32> -> vector<8x8xf32>
    %cst_15 = arith.constant 0.176776692 : f32
    %21 = vector.broadcast %cst_15 : f32 to vector<8x8xf32>
    %22 = arith.mulf %20, %21 : vector<8x8xf32>
    %cst_16 = arith.constant dense<0xFF800000> : vector<8xf32>
    %23 = vector.multi_reduction <maximumf>, %22, %cst_16 [1] : vector<8x8xf32> to vector<8xf32>
    %24 = vector.shape_cast %23 : vector<8xf32> to vector<8x1xf32>
    %25 = vector.broadcast %24 : vector<8x1xf32> to vector<8x8xf32>
    %26 = arith.subf %22, %25 : vector<8x8xf32>
    %27 = math.exp %26 : vector<8x8xf32>
    %cst_17 = arith.constant dense<0.000000e+00> : vector<8xf32>
    %28 = vector.multi_reduction <add>, %27, %cst_17 [1] : vector<8x8xf32> to vector<8xf32>
    %29 = vector.shape_cast %28 : vector<8xf32> to vector<8x1xf32>
    %30 = tpu.reciprocal %29 {approx = true} : vector<8x1xf32> -> vector<8x1xf32>
    %31 = vector.broadcast %30 : vector<8x1xf32> to vector<8x8xf32>
    %32 = arith.mulf %27, %31 : vector<8x8xf32>
    %cst_18 = arith.constant dense<0.000000e+00> : vector<8x32xf32>
    %33 = tpu.matmul %32, %19, %cst_18 {dimension_numbers = #tpu.dot_dimension_numbers<[1], [0], [0], [1], [0, 0, 1, 1], [], []>} : vector<8x8xf32>, vector<8x32xf32>, vector<8x32xf32> -> vector<8x32xf32>
    %34 = vector.extract_strided_slice %12 {offsets = [0, 0], sizes = [32, 128], strides = [1, 1]} : vector<128x128xf32> to vector<32x128xf32>
    %cst_19 = arith.constant dense<0.000000e+00> : vector<8x128xf32>
    %35 = tpu.matmul %33, %34, %cst_19 {dimension_numbers = #tpu.dot_dimension_numbers<[1], [0], [0], [1], [0, 0, 1, 1], [], []>} : vector<8x32xf32>, vector<32x128xf32>, vector<8x128xf32> -> vector<8x128xf32>
    %36 = arith.addf %16, %35 : vector<8x128xf32>
    %37 = vector.extract_strided_slice %9 {offsets = [0, 32], sizes = [8, 32], strides = [1, 1]} : vector<8x128xf32> to vector<8x32xf32>
    %38 = vector.extract_strided_slice %10 {offsets = [0, 32], sizes = [8, 32], strides = [1, 1]} : vector<8x128xf32> to vector<8x32xf32>
    %39 = vector.extract_strided_slice %11 {offsets = [0, 32], sizes = [8, 32], strides = [1, 1]} : vector<8x128xf32> to vector<8x32xf32>
    %cst_20 = arith.constant dense<0.000000e+00> : vector<8x8xf32>
    %40 = tpu.matmul %37, %38, %cst_20 {dimension_numbers = #tpu.dot_dimension_numbers<[1], [1], [0], [0], [0, 0, 1, 0], [], []>} : vector<8x32xf32>, vector<8x32xf32>, vector<8x8xf32> -> vector<8x8xf32>
    %cst_21 = arith.constant 0.176776692 : f32
    %41 = vector.broadcast %cst_21 : f32 to vector<8x8xf32>
    %42 = arith.mulf %40, %41 : vector<8x8xf32>
    %cst_22 = arith.constant dense<0xFF800000> : vector<8xf32>
    %43 = vector.multi_reduction <maximumf>, %42, %cst_22 [1] : vector<8x8xf32> to vector<8xf32>
    %44 = vector.shape_cast %43 : vector<8xf32> to vector<8x1xf32>
    %45 = vector.broadcast %44 : vector<8x1xf32> to vector<8x8xf32>
    %46 = arith.subf %42, %45 : vector<8x8xf32>
    %47 = math.exp %46 : vector<8x8xf32>
    %cst_23 = arith.constant dense<0.000000e+00> : vector<8xf32>
    %48 = vector.multi_reduction <add>, %47, %cst_23 [1] : vector<8x8xf32> to vector<8xf32>
    %49 = vector.shape_cast %48 : vector<8xf32> to vector<8x1xf32>
    %50 = tpu.reciprocal %49 {approx = true} : vector<8x1xf32> -> vector<8x1xf32>
    %51 = vector.broadcast %50 : vector<8x1xf32> to vector<8x8xf32>
    %52 = arith.mulf %47, %51 : vector<8x8xf32>
    %cst_24 = arith.constant dense<0.000000e+00> : vector<8x32xf32>
    %53 = tpu.matmul %52, %39, %cst_24 {dimension_numbers = #tpu.dot_dimension_numbers<[1], [0], [0], [1], [0, 0, 1, 1], [], []>} : vector<8x8xf32>, vector<8x32xf32>, vector<8x32xf32> -> vector<8x32xf32>
    %54 = vector.extract_strided_slice %12 {offsets = [32, 0], sizes = [32, 128], strides = [1, 1]} : vector<128x128xf32> to vector<32x128xf32>
    %cst_25 = arith.constant dense<0.000000e+00> : vector<8x128xf32>
    %55 = tpu.matmul %53, %54, %cst_25 {dimension_numbers = #tpu.dot_dimension_numbers<[1], [0], [0], [1], [0, 0, 1, 1], [], []>} : vector<8x32xf32>, vector<32x128xf32>, vector<8x128xf32> -> vector<8x128xf32>
    %56 = arith.addf %36, %55 : vector<8x128xf32>
    %57 = vector.extract_strided_slice %9 {offsets = [0, 64], sizes = [8, 32], strides = [1, 1]} : vector<8x128xf32> to vector<8x32xf32>
    %58 = vector.extract_strided_slice %10 {offsets = [0, 64], sizes = [8, 32], strides = [1, 1]} : vector<8x128xf32> to vector<8x32xf32>
    %59 = vector.extract_strided_slice %11 {offsets = [0, 64], sizes = [8, 32], strides = [1, 1]} : vector<8x128xf32> to vector<8x32xf32>
    %cst_26 = arith.constant dense<0.000000e+00> : vector<8x8xf32>
    %60 = tpu.matmul %57, %58, %cst_26 {dimension_numbers = #tpu.dot_dimension_numbers<[1], [1], [0], [0], [0, 0, 1, 0], [], []>} : vector<8x32xf32>, vector<8x32xf32>, vector<8x8xf32> -> vector<8x8xf32>
    %cst_27 = arith.constant 0.176776692 : f32
    %61 = vector.broadcast %cst_27 : f32 to vector<8x8xf32>
    %62 = arith.mulf %60, %61 : vector<8x8xf32>
    %cst_28 = arith.constant dense<0xFF800000> : vector<8xf32>
    %63 = vector.multi_reduction <maximumf>, %62, %cst_28 [1] : vector<8x8xf32> to vector<8xf32>
    %64 = vector.shape_cast %63 : vector<8xf32> to vector<8x1xf32>
    %65 = vector.broadcast %64 : vector<8x1xf32> to vector<8x8xf32>
    %66 = arith.subf %62, %65 : vector<8x8xf32>
    %67 = math.exp %66 : vector<8x8xf32>
    %cst_29 = arith.constant dense<0.000000e+00> : vector<8xf32>
    %68 = vector.multi_reduction <add>, %67, %cst_29 [1] : vector<8x8xf32> to vector<8xf32>
    %69 = vector.shape_cast %68 : vector<8xf32> to vector<8x1xf32>
    %70 = tpu.reciprocal %69 {approx = true} : vector<8x1xf32> -> vector<8x1xf32>
    %71 = vector.broadcast %70 : vector<8x1xf32> to vector<8x8xf32>
    %72 = arith.mulf %67, %71 : vector<8x8xf32>
    %cst_30 = arith.constant dense<0.000000e+00> : vector<8x32xf32>
    %73 = tpu.matmul %72, %59, %cst_30 {dimension_numbers = #tpu.dot_dimension_numbers<[1], [0], [0], [1], [0, 0, 1, 1], [], []>} : vector<8x8xf32>, vector<8x32xf32>, vector<8x32xf32> -> vector<8x32xf32>
    %74 = vector.extract_strided_slice %12 {offsets = [64, 0], sizes = [32, 128], strides = [1, 1]} : vector<128x128xf32> to vector<32x128xf32>
    %cst_31 = arith.constant dense<0.000000e+00> : vector<8x128xf32>
    %75 = tpu.matmul %73, %74, %cst_31 {dimension_numbers = #tpu.dot_dimension_numbers<[1], [0], [0], [1], [0, 0, 1, 1], [], []>} : vector<8x32xf32>, vector<32x128xf32>, vector<8x128xf32> -> vector<8x128xf32>
    %76 = arith.addf %56, %75 : vector<8x128xf32>
    %77 = vector.extract_strided_slice %9 {offsets = [0, 96], sizes = [8, 32], strides = [1, 1]} : vector<8x128xf32> to vector<8x32xf32>
    %78 = vector.extract_strided_slice %10 {offsets = [0, 96], sizes = [8, 32], strides = [1, 1]} : vector<8x128xf32> to vector<8x32xf32>
    %79 = vector.extract_strided_slice %11 {offsets = [0, 96], sizes = [8, 32], strides = [1, 1]} : vector<8x128xf32> to vector<8x32xf32>
    %cst_32 = arith.constant dense<0.000000e+00> : vector<8x8xf32>
    %80 = tpu.matmul %77, %78, %cst_32 {dimension_numbers = #tpu.dot_dimension_numbers<[1], [1], [0], [0], [0, 0, 1, 0], [], []>} : vector<8x32xf32>, vector<8x32xf32>, vector<8x8xf32> -> vector<8x8xf32>
    %cst_33 = arith.constant 0.176776692 : f32
    %81 = vector.broadcast %cst_33 : f32 to vector<8x8xf32>
    %82 = arith.mulf %80, %81 : vector<8x8xf32>
    %cst_34 = arith.constant dense<0xFF800000> : vector<8xf32>
    %83 = vector.multi_reduction <maximumf>, %82, %cst_34 [1] : vector<8x8xf32> to vector<8xf32>
    %84 = vector.shape_cast %83 : vector<8xf32> to vector<8x1xf32>
    %85 = vector.broadcast %84 : vector<8x1xf32> to vector<8x8xf32>
    %86 = arith.subf %82, %85 : vector<8x8xf32>
    %87 = math.exp %86 : vector<8x8xf32>
    %cst_35 = arith.constant dense<0.000000e+00> : vector<8xf32>
    %88 = vector.multi_reduction <add>, %87, %cst_35 [1] : vector<8x8xf32> to vector<8xf32>
    %89 = vector.shape_cast %88 : vector<8xf32> to vector<8x1xf32>
    %90 = tpu.reciprocal %89 {approx = true} : vector<8x1xf32> -> vector<8x1xf32>
    %91 = vector.broadcast %90 : vector<8x1xf32> to vector<8x8xf32>
    %92 = arith.mulf %87, %91 : vector<8x8xf32>
    %cst_36 = arith.constant dense<0.000000e+00> : vector<8x32xf32>
    %93 = tpu.matmul %92, %79, %cst_36 {dimension_numbers = #tpu.dot_dimension_numbers<[1], [0], [0], [1], [0, 0, 1, 1], [], []>} : vector<8x8xf32>, vector<8x32xf32>, vector<8x32xf32> -> vector<8x32xf32>
    %94 = vector.extract_strided_slice %12 {offsets = [96, 0], sizes = [32, 128], strides = [1, 1]} : vector<128x128xf32> to vector<32x128xf32>
    %cst_37 = arith.constant dense<0.000000e+00> : vector<8x128xf32>
    %95 = tpu.matmul %93, %94, %cst_37 {dimension_numbers = #tpu.dot_dimension_numbers<[1], [0], [0], [1], [0, 0, 1, 1], [], []>} : vector<8x32xf32>, vector<32x128xf32>, vector<8x128xf32> -> vector<8x128xf32>
    %96 = arith.addf %76, %95 : vector<8x128xf32>
    %97 = arith.addf %1, %96 : vector<8x128xf32>
    %c0_38 = arith.constant 0 : index
    %c0_39 = arith.constant 0 : index
    %98 = vector.load %arg7[%c0_38, %c0_39] : memref<1x128xf32, #tpu.memory_space<vmem>>, vector<1x128xf32>
    %c0_40 = arith.constant 0 : index
    %c0_41 = arith.constant 0 : index
    %99 = vector.load %arg8[%c0_40, %c0_41] : memref<1x128xf32, #tpu.memory_space<vmem>>, vector<1x128xf32>
    %cst_42 = arith.constant dense<0.000000e+00> : vector<8xf32>
    %100 = vector.multi_reduction <add>, %97, %cst_42 [1] : vector<8x128xf32> to vector<8xf32>
    %101 = vector.shape_cast %100 : vector<8xf32> to vector<8x1xf32>
    %cst_43 = arith.constant 1.280000e+02 : f32
    %102 = vector.broadcast %cst_43 : f32 to vector<8x1xf32>
    %103 = arith.divf %101, %102 : vector<8x1xf32>
    %104 = vector.broadcast %103 : vector<8x1xf32> to vector<8x128xf32>
    %105 = arith.subf %97, %104 : vector<8x128xf32>
    %106 = arith.mulf %105, %105 : vector<8x128xf32>
    %cst_44 = arith.constant dense<0.000000e+00> : vector<8xf32>
    %107 = vector.multi_reduction <add>, %106, %cst_44 [1] : vector<8x128xf32> to vector<8xf32>
    %108 = vector.shape_cast %107 : vector<8xf32> to vector<8x1xf32>
    %cst_45 = arith.constant 1.280000e+02 : f32
    %109 = vector.broadcast %cst_45 : f32 to vector<8x1xf32>
    %110 = arith.divf %108, %109 : vector<8x1xf32>
    %cst_46 = arith.constant 9.99999974E-6 : f32
    %111 = vector.broadcast %cst_46 : f32 to vector<8x1xf32>
    %112 = arith.addf %110, %111 : vector<8x1xf32>
    %113 = math.rsqrt %112 : vector<8x1xf32>
    %114 = vector.broadcast %113 : vector<8x1xf32> to vector<8x128xf32>
    %115 = arith.mulf %105, %114 : vector<8x128xf32>
    %116 = vector.broadcast %98 : vector<1x128xf32> to vector<8x128xf32>
    %117 = arith.mulf %115, %116 : vector<8x128xf32>
    %118 = vector.broadcast %99 : vector<1x128xf32> to vector<8x128xf32>
    %119 = arith.addf %117, %118 : vector<8x128xf32>
    %c0_47 = arith.constant 0 : index
    %c0_48 = arith.constant 0 : index
    %120 = vector.load %arg9[%c0_47, %c0_48] : memref<128x128xf32, #tpu.memory_space<vmem>>, vector<128x128xf32>
    %cst_49 = arith.constant dense<0.000000e+00> : vector<8x128xf32>
    %121 = tpu.matmul %119, %120, %cst_49 {dimension_numbers = #tpu.dot_dimension_numbers<[1], [0], [0], [1], [0, 0, 1, 1], [], []>} : vector<8x128xf32>, vector<128x128xf32>, vector<8x128xf32> -> vector<8x128xf32>
    %c0_50 = arith.constant 0 : index
    %c0_51 = arith.constant 0 : index
    %122 = vector.load %arg10[%c0_50, %c0_51] : memref<1x128xf32, #tpu.memory_space<vmem>>, vector<1x128xf32>
    %123 = vector.broadcast %122 : vector<1x128xf32> to vector<8x128xf32>
    %124 = arith.addf %121, %123 : vector<8x128xf32>
    %c0_52 = arith.constant 0 : index
    %c0_53 = arith.constant 0 : index
    %125 = vector.load %arg11[%c0_52, %c0_53] : memref<128x256xf32, #tpu.memory_space<vmem>>, vector<128x256xf32>
    %cst_54 = arith.constant dense<0.000000e+00> : vector<8x256xf32>
    %126 = tpu.matmul %3, %125, %cst_54 {dimension_numbers = #tpu.dot_dimension_numbers<[1], [0], [0], [1], [0, 0, 1, 1], [], []>} : vector<8x128xf32>, vector<128x256xf32>, vector<8x256xf32> -> vector<8x256xf32>
    %c0_55 = arith.constant 0 : index
    %c0_56 = arith.constant 0 : index
    %127 = vector.load %arg12[%c0_55, %c0_56] : memref<1x256xf32, #tpu.memory_space<vmem>>, vector<1x256xf32>
    %128 = vector.broadcast %127 : vector<1x256xf32> to vector<8x256xf32>
    %129 = arith.addf %126, %128 : vector<8x256xf32>
    %130 = vector.extract_strided_slice %129 {offsets = [0, 0], sizes = [8, 128], strides = [1, 1]} : vector<8x256xf32> to vector<8x128xf32>
    %131 = vector.extract_strided_slice %129 {offsets = [0, 128], sizes = [8, 128], strides = [1, 1]} : vector<8x256xf32> to vector<8x128xf32>
    %c0_57 = arith.constant 0 : index
    %c0_58 = arith.constant 0 : index
    %132 = vector.load %arg13[%c0_57, %c0_58] : memref<128x128xf32, #tpu.memory_space<vmem>>, vector<128x128xf32>
    %c0_59 = arith.constant 0 : index
    %c0_60 = arith.constant 0 : index
    %133 = vector.load %arg14[%c0_59, %c0_60] : memref<1x128xf32, #tpu.memory_space<vmem>>, vector<1x128xf32>
    %cst_61 = arith.constant 0.000000e+00 : f32
    %134 = vector.broadcast %cst_61 : f32 to vector<8x128xf32>
    %135 = vector.broadcast %133 : vector<1x128xf32> to vector<8x128xf32>
    %136 = arith.addf %134, %135 : vector<8x128xf32>
    %137 = vector.extract_strided_slice %124 {offsets = [0, 0], sizes = [8, 32], strides = [1, 1]} : vector<8x128xf32> to vector<8x32xf32>
    %138 = vector.extract_strided_slice %130 {offsets = [0, 0], sizes = [8, 32], strides = [1, 1]} : vector<8x128xf32> to vector<8x32xf32>
    %139 = vector.extract_strided_slice %131 {offsets = [0, 0], sizes = [8, 32], strides = [1, 1]} : vector<8x128xf32> to vector<8x32xf32>
    %cst_62 = arith.constant dense<0.000000e+00> : vector<8x8xf32>
    %140 = tpu.matmul %137, %138, %cst_62 {dimension_numbers = #tpu.dot_dimension_numbers<[1], [1], [0], [0], [0, 0, 1, 0], [], []>} : vector<8x32xf32>, vector<8x32xf32>, vector<8x8xf32> -> vector<8x8xf32>
    %cst_63 = arith.constant 0.176776692 : f32
    %141 = vector.broadcast %cst_63 : f32 to vector<8x8xf32>
    %142 = arith.mulf %140, %141 : vector<8x8xf32>
    %cst_64 = arith.constant dense<0xFF800000> : vector<8xf32>
    %143 = vector.multi_reduction <maximumf>, %142, %cst_64 [1] : vector<8x8xf32> to vector<8xf32>
    %144 = vector.shape_cast %143 : vector<8xf32> to vector<8x1xf32>
    %145 = vector.broadcast %144 : vector<8x1xf32> to vector<8x8xf32>
    %146 = arith.subf %142, %145 : vector<8x8xf32>
    %147 = math.exp %146 : vector<8x8xf32>
    %cst_65 = arith.constant dense<0.000000e+00> : vector<8xf32>
    %148 = vector.multi_reduction <add>, %147, %cst_65 [1] : vector<8x8xf32> to vector<8xf32>
    %149 = vector.shape_cast %148 : vector<8xf32> to vector<8x1xf32>
    %150 = tpu.reciprocal %149 {approx = true} : vector<8x1xf32> -> vector<8x1xf32>
    %151 = vector.broadcast %150 : vector<8x1xf32> to vector<8x8xf32>
    %152 = arith.mulf %147, %151 : vector<8x8xf32>
    %cst_66 = arith.constant dense<0.000000e+00> : vector<8x32xf32>
    %153 = tpu.matmul %152, %139, %cst_66 {dimension_numbers = #tpu.dot_dimension_numbers<[1], [0], [0], [1], [0, 0, 1, 1], [], []>} : vector<8x8xf32>, vector<8x32xf32>, vector<8x32xf32> -> vector<8x32xf32>
    %154 = vector.extract_strided_slice %132 {offsets = [0, 0], sizes = [32, 128], strides = [1, 1]} : vector<128x128xf32> to vector<32x128xf32>
    %cst_67 = arith.constant dense<0.000000e+00> : vector<8x128xf32>
    %155 = tpu.matmul %153, %154, %cst_67 {dimension_numbers = #tpu.dot_dimension_numbers<[1], [0], [0], [1], [0, 0, 1, 1], [], []>} : vector<8x32xf32>, vector<32x128xf32>, vector<8x128xf32> -> vector<8x128xf32>
    %156 = arith.addf %136, %155 : vector<8x128xf32>
    %157 = vector.extract_strided_slice %124 {offsets = [0, 32], sizes = [8, 32], strides = [1, 1]} : vector<8x128xf32> to vector<8x32xf32>
    %158 = vector.extract_strided_slice %130 {offsets = [0, 32], sizes = [8, 32], strides = [1, 1]} : vector<8x128xf32> to vector<8x32xf32>
    %159 = vector.extract_strided_slice %131 {offsets = [0, 32], sizes = [8, 32], strides = [1, 1]} : vector<8x128xf32> to vector<8x32xf32>
    %cst_68 = arith.constant dense<0.000000e+00> : vector<8x8xf32>
    %160 = tpu.matmul %157, %158, %cst_68 {dimension_numbers = #tpu.dot_dimension_numbers<[1], [1], [0], [0], [0, 0, 1, 0], [], []>} : vector<8x32xf32>, vector<8x32xf32>, vector<8x8xf32> -> vector<8x8xf32>
    %cst_69 = arith.constant 0.176776692 : f32
    %161 = vector.broadcast %cst_69 : f32 to vector<8x8xf32>
    %162 = arith.mulf %160, %161 : vector<8x8xf32>
    %cst_70 = arith.constant dense<0xFF800000> : vector<8xf32>
    %163 = vector.multi_reduction <maximumf>, %162, %cst_70 [1] : vector<8x8xf32> to vector<8xf32>
    %164 = vector.shape_cast %163 : vector<8xf32> to vector<8x1xf32>
    %165 = vector.broadcast %164 : vector<8x1xf32> to vector<8x8xf32>
    %166 = arith.subf %162, %165 : vector<8x8xf32>
    %167 = math.exp %166 : vector<8x8xf32>
    %cst_71 = arith.constant dense<0.000000e+00> : vector<8xf32>
    %168 = vector.multi_reduction <add>, %167, %cst_71 [1] : vector<8x8xf32> to vector<8xf32>
    %169 = vector.shape_cast %168 : vector<8xf32> to vector<8x1xf32>
    %170 = tpu.reciprocal %169 {approx = true} : vector<8x1xf32> -> vector<8x1xf32>
    %171 = vector.broadcast %170 : vector<8x1xf32> to vector<8x8xf32>
    %172 = arith.mulf %167, %171 : vector<8x8xf32>
    %cst_72 = arith.constant dense<0.000000e+00> : vector<8x32xf32>
    %173 = tpu.matmul %172, %159, %cst_72 {dimension_numbers = #tpu.dot_dimension_numbers<[1], [0], [0], [1], [0, 0, 1, 1], [], []>} : vector<8x8xf32>, vector<8x32xf32>, vector<8x32xf32> -> vector<8x32xf32>
    %174 = vector.extract_strided_slice %132 {offsets = [32, 0], sizes = [32, 128], strides = [1, 1]} : vector<128x128xf32> to vector<32x128xf32>
    %cst_73 = arith.constant dense<0.000000e+00> : vector<8x128xf32>
    %175 = tpu.matmul %173, %174, %cst_73 {dimension_numbers = #tpu.dot_dimension_numbers<[1], [0], [0], [1], [0, 0, 1, 1], [], []>} : vector<8x32xf32>, vector<32x128xf32>, vector<8x128xf32> -> vector<8x128xf32>
    %176 = arith.addf %156, %175 : vector<8x128xf32>
    %177 = vector.extract_strided_slice %124 {offsets = [0, 64], sizes = [8, 32], strides = [1, 1]} : vector<8x128xf32> to vector<8x32xf32>
    %178 = vector.extract_strided_slice %130 {offsets = [0, 64], sizes = [8, 32], strides = [1, 1]} : vector<8x128xf32> to vector<8x32xf32>
    %179 = vector.extract_strided_slice %131 {offsets = [0, 64], sizes = [8, 32], strides = [1, 1]} : vector<8x128xf32> to vector<8x32xf32>
    %cst_74 = arith.constant dense<0.000000e+00> : vector<8x8xf32>
    %180 = tpu.matmul %177, %178, %cst_74 {dimension_numbers = #tpu.dot_dimension_numbers<[1], [1], [0], [0], [0, 0, 1, 0], [], []>} : vector<8x32xf32>, vector<8x32xf32>, vector<8x8xf32> -> vector<8x8xf32>
    %cst_75 = arith.constant 0.176776692 : f32
    %181 = vector.broadcast %cst_75 : f32 to vector<8x8xf32>
    %182 = arith.mulf %180, %181 : vector<8x8xf32>
    %cst_76 = arith.constant dense<0xFF800000> : vector<8xf32>
    %183 = vector.multi_reduction <maximumf>, %182, %cst_76 [1] : vector<8x8xf32> to vector<8xf32>
    %184 = vector.shape_cast %183 : vector<8xf32> to vector<8x1xf32>
    %185 = vector.broadcast %184 : vector<8x1xf32> to vector<8x8xf32>
    %186 = arith.subf %182, %185 : vector<8x8xf32>
    %187 = math.exp %186 : vector<8x8xf32>
    %cst_77 = arith.constant dense<0.000000e+00> : vector<8xf32>
    %188 = vector.multi_reduction <add>, %187, %cst_77 [1] : vector<8x8xf32> to vector<8xf32>
    %189 = vector.shape_cast %188 : vector<8xf32> to vector<8x1xf32>
    %190 = tpu.reciprocal %189 {approx = true} : vector<8x1xf32> -> vector<8x1xf32>
    %191 = vector.broadcast %190 : vector<8x1xf32> to vector<8x8xf32>
    %192 = arith.mulf %187, %191 : vector<8x8xf32>
    %cst_78 = arith.constant dense<0.000000e+00> : vector<8x32xf32>
    %193 = tpu.matmul %192, %179, %cst_78 {dimension_numbers = #tpu.dot_dimension_numbers<[1], [0], [0], [1], [0, 0, 1, 1], [], []>} : vector<8x8xf32>, vector<8x32xf32>, vector<8x32xf32> -> vector<8x32xf32>
    %194 = vector.extract_strided_slice %132 {offsets = [64, 0], sizes = [32, 128], strides = [1, 1]} : vector<128x128xf32> to vector<32x128xf32>
    %cst_79 = arith.constant dense<0.000000e+00> : vector<8x128xf32>
    %195 = tpu.matmul %193, %194, %cst_79 {dimension_numbers = #tpu.dot_dimension_numbers<[1], [0], [0], [1], [0, 0, 1, 1], [], []>} : vector<8x32xf32>, vector<32x128xf32>, vector<8x128xf32> -> vector<8x128xf32>
    %196 = arith.addf %176, %195 : vector<8x128xf32>
    %197 = vector.extract_strided_slice %124 {offsets = [0, 96], sizes = [8, 32], strides = [1, 1]} : vector<8x128xf32> to vector<8x32xf32>
    %198 = vector.extract_strided_slice %130 {offsets = [0, 96], sizes = [8, 32], strides = [1, 1]} : vector<8x128xf32> to vector<8x32xf32>
    %199 = vector.extract_strided_slice %131 {offsets = [0, 96], sizes = [8, 32], strides = [1, 1]} : vector<8x128xf32> to vector<8x32xf32>
    %cst_80 = arith.constant dense<0.000000e+00> : vector<8x8xf32>
    %200 = tpu.matmul %197, %198, %cst_80 {dimension_numbers = #tpu.dot_dimension_numbers<[1], [1], [0], [0], [0, 0, 1, 0], [], []>} : vector<8x32xf32>, vector<8x32xf32>, vector<8x8xf32> -> vector<8x8xf32>
    %cst_81 = arith.constant 0.176776692 : f32
    %201 = vector.broadcast %cst_81 : f32 to vector<8x8xf32>
    %202 = arith.mulf %200, %201 : vector<8x8xf32>
    %cst_82 = arith.constant dense<0xFF800000> : vector<8xf32>
    %203 = vector.multi_reduction <maximumf>, %202, %cst_82 [1] : vector<8x8xf32> to vector<8xf32>
    %204 = vector.shape_cast %203 : vector<8xf32> to vector<8x1xf32>
    %205 = vector.broadcast %204 : vector<8x1xf32> to vector<8x8xf32>
    %206 = arith.subf %202, %205 : vector<8x8xf32>
    %207 = math.exp %206 : vector<8x8xf32>
    %cst_83 = arith.constant dense<0.000000e+00> : vector<8xf32>
    %208 = vector.multi_reduction <add>, %207, %cst_83 [1] : vector<8x8xf32> to vector<8xf32>
    %209 = vector.shape_cast %208 : vector<8xf32> to vector<8x1xf32>
    %210 = tpu.reciprocal %209 {approx = true} : vector<8x1xf32> -> vector<8x1xf32>
    %211 = vector.broadcast %210 : vector<8x1xf32> to vector<8x8xf32>
    %212 = arith.mulf %207, %211 : vector<8x8xf32>
    %cst_84 = arith.constant dense<0.000000e+00> : vector<8x32xf32>
    %213 = tpu.matmul %212, %199, %cst_84 {dimension_numbers = #tpu.dot_dimension_numbers<[1], [0], [0], [1], [0, 0, 1, 1], [], []>} : vector<8x8xf32>, vector<8x32xf32>, vector<8x32xf32> -> vector<8x32xf32>
    %214 = vector.extract_strided_slice %132 {offsets = [96, 0], sizes = [32, 128], strides = [1, 1]} : vector<128x128xf32> to vector<32x128xf32>
    %cst_85 = arith.constant dense<0.000000e+00> : vector<8x128xf32>
    %215 = tpu.matmul %213, %214, %cst_85 {dimension_numbers = #tpu.dot_dimension_numbers<[1], [0], [0], [1], [0, 0, 1, 1], [], []>} : vector<8x32xf32>, vector<32x128xf32>, vector<8x128xf32> -> vector<8x128xf32>
    %216 = arith.addf %196, %215 : vector<8x128xf32>
    %217 = arith.addf %119, %216 : vector<8x128xf32>
    %c0_86 = arith.constant 0 : index
    %c0_87 = arith.constant 0 : index
    %218 = vector.load %arg15[%c0_86, %c0_87] : memref<1x128xf32, #tpu.memory_space<vmem>>, vector<1x128xf32>
    %c0_88 = arith.constant 0 : index
    %c0_89 = arith.constant 0 : index
    %219 = vector.load %arg16[%c0_88, %c0_89] : memref<1x128xf32, #tpu.memory_space<vmem>>, vector<1x128xf32>
    %cst_90 = arith.constant dense<0.000000e+00> : vector<8xf32>
    %220 = vector.multi_reduction <add>, %217, %cst_90 [1] : vector<8x128xf32> to vector<8xf32>
    %221 = vector.shape_cast %220 : vector<8xf32> to vector<8x1xf32>
    %cst_91 = arith.constant 1.280000e+02 : f32
    %222 = vector.broadcast %cst_91 : f32 to vector<8x1xf32>
    %223 = arith.divf %221, %222 : vector<8x1xf32>
    %224 = vector.broadcast %223 : vector<8x1xf32> to vector<8x128xf32>
    %225 = arith.subf %217, %224 : vector<8x128xf32>
    %226 = arith.mulf %225, %225 : vector<8x128xf32>
    %cst_92 = arith.constant dense<0.000000e+00> : vector<8xf32>
    %227 = vector.multi_reduction <add>, %226, %cst_92 [1] : vector<8x128xf32> to vector<8xf32>
    %228 = vector.shape_cast %227 : vector<8xf32> to vector<8x1xf32>
    %cst_93 = arith.constant 1.280000e+02 : f32
    %229 = vector.broadcast %cst_93 : f32 to vector<8x1xf32>
    %230 = arith.divf %228, %229 : vector<8x1xf32>
    %cst_94 = arith.constant 9.99999974E-6 : f32
    %231 = vector.broadcast %cst_94 : f32 to vector<8x1xf32>
    %232 = arith.addf %230, %231 : vector<8x1xf32>
    %233 = math.rsqrt %232 : vector<8x1xf32>
    %234 = vector.broadcast %233 : vector<8x1xf32> to vector<8x128xf32>
    %235 = arith.mulf %225, %234 : vector<8x128xf32>
    %236 = vector.broadcast %218 : vector<1x128xf32> to vector<8x128xf32>
    %237 = arith.mulf %235, %236 : vector<8x128xf32>
    %238 = vector.broadcast %219 : vector<1x128xf32> to vector<8x128xf32>
    %239 = arith.addf %237, %238 : vector<8x128xf32>
    %c0_95 = arith.constant 0 : index
    %c0_96 = arith.constant 0 : index
    %240 = vector.load %arg17[%c0_95, %c0_96] : memref<128x256xf32, #tpu.memory_space<vmem>>, vector<128x256xf32>
    %cst_97 = arith.constant dense<0.000000e+00> : vector<8x256xf32>
    %241 = tpu.matmul %239, %240, %cst_97 {dimension_numbers = #tpu.dot_dimension_numbers<[1], [0], [0], [1], [0, 0, 1, 1], [], []>} : vector<8x128xf32>, vector<128x256xf32>, vector<8x256xf32> -> vector<8x256xf32>
    %c0_98 = arith.constant 0 : index
    %c0_99 = arith.constant 0 : index
    %242 = vector.load %arg18[%c0_98, %c0_99] : memref<1x256xf32, #tpu.memory_space<vmem>>, vector<1x256xf32>
    %243 = vector.broadcast %242 : vector<1x256xf32> to vector<8x256xf32>
    %244 = arith.addf %241, %243 : vector<8x256xf32>
    %cst_100 = arith.constant 0.000000e+00 : f32
    %245 = vector.broadcast %cst_100 : f32 to vector<8x256xf32>
    %246 = arith.maximumf %244, %245 : vector<8x256xf32>
    %c0_101 = arith.constant 0 : index
    %c0_102 = arith.constant 0 : index
    %247 = vector.load %arg19[%c0_101, %c0_102] : memref<256x128xf32, #tpu.memory_space<vmem>>, vector<256x128xf32>
    %cst_103 = arith.constant dense<0.000000e+00> : vector<8x128xf32>
    %248 = tpu.matmul %246, %247, %cst_103 {dimension_numbers = #tpu.dot_dimension_numbers<[1], [0], [0], [1], [0, 0, 1, 1], [], []>} : vector<8x256xf32>, vector<256x128xf32>, vector<8x128xf32> -> vector<8x128xf32>
    %c0_104 = arith.constant 0 : index
    %c0_105 = arith.constant 0 : index
    %249 = vector.load %arg20[%c0_104, %c0_105] : memref<1x128xf32, #tpu.memory_space<vmem>>, vector<1x128xf32>
    %250 = vector.broadcast %249 : vector<1x128xf32> to vector<8x128xf32>
    %251 = arith.addf %248, %250 : vector<8x128xf32>
    %252 = arith.addf %239, %251 : vector<8x128xf32>
    %c0_106 = arith.constant 0 : index
    %c0_107 = arith.constant 0 : index
    %253 = vector.load %arg21[%c0_106, %c0_107] : memref<1x128xf32, #tpu.memory_space<vmem>>, vector<1x128xf32>
    %c0_108 = arith.constant 0 : index
    %c0_109 = arith.constant 0 : index
    %254 = vector.load %arg22[%c0_108, %c0_109] : memref<1x128xf32, #tpu.memory_space<vmem>>, vector<1x128xf32>
    %cst_110 = arith.constant dense<0.000000e+00> : vector<8xf32>
    %255 = vector.multi_reduction <add>, %252, %cst_110 [1] : vector<8x128xf32> to vector<8xf32>
    %256 = vector.shape_cast %255 : vector<8xf32> to vector<8x1xf32>
    %cst_111 = arith.constant 1.280000e+02 : f32
    %257 = vector.broadcast %cst_111 : f32 to vector<8x1xf32>
    %258 = arith.divf %256, %257 : vector<8x1xf32>
    %259 = vector.broadcast %258 : vector<8x1xf32> to vector<8x128xf32>
    %260 = arith.subf %252, %259 : vector<8x128xf32>
    %261 = arith.mulf %260, %260 : vector<8x128xf32>
    %cst_112 = arith.constant dense<0.000000e+00> : vector<8xf32>
    %262 = vector.multi_reduction <add>, %261, %cst_112 [1] : vector<8x128xf32> to vector<8xf32>
    %263 = vector.shape_cast %262 : vector<8xf32> to vector<8x1xf32>
    %cst_113 = arith.constant 1.280000e+02 : f32
    %264 = vector.broadcast %cst_113 : f32 to vector<8x1xf32>
    %265 = arith.divf %263, %264 : vector<8x1xf32>
    %cst_114 = arith.constant 9.99999974E-6 : f32
    %266 = vector.broadcast %cst_114 : f32 to vector<8x1xf32>
    %267 = arith.addf %265, %266 : vector<8x1xf32>
    %268 = math.rsqrt %267 : vector<8x1xf32>
    %269 = vector.broadcast %268 : vector<8x1xf32> to vector<8x128xf32>
    %270 = arith.mulf %260, %269 : vector<8x128xf32>
    %271 = vector.broadcast %253 : vector<1x128xf32> to vector<8x128xf32>
    %272 = arith.mulf %270, %271 : vector<8x128xf32>
    %273 = vector.broadcast %254 : vector<1x128xf32> to vector<8x128xf32>
    %274 = arith.addf %272, %273 : vector<8x128xf32>
    %c0_115 = arith.constant 0 : index
    %c0_116 = arith.constant 0 : index
    %c0_117 = arith.constant 0 : index
    %275 = vector.load %arg23[%c0_115, %c0_116, %c0_117] : memref<1x8x128xf32, #tpu.memory_space<vmem>>, vector<1x8x128xf32>
    %276 = vector.shape_cast %275 : vector<1x8x128xf32> to vector<8x128xf32>
    %277 = vector.shape_cast %274 : vector<8x128xf32> to vector<1x8x128xf32>
    tpu.vector_store %arg23[%c0_115, %c0_116, %c0_117], %277 {strides = array<i32>} : memref<1x8x128xf32, #tpu.memory_space<vmem>>, vector<1x8x128xf32>,
    return
  }
  func.func @transform_0(%arg0: i32) -> (i32, i32, i32) {
    %c0_i32 = arith.constant 0 : i32
    %c0_i32_0 = arith.constant 0 : i32
    %c0_i32_1 = arith.constant 0 : i32
    return %arg0, %c0_i32, %c0_i32_0 : i32, i32, i32
  }
  func.func @transform_1(%arg0: i32) -> (i32, i32, i32) {
    %c0_i32 = arith.constant 0 : i32
    %c0_i32_0 = arith.constant 0 : i32
    %c0_i32_1 = arith.constant 0 : i32
    return %arg0, %c0_i32, %c0_i32_0 : i32, i32, i32
  }
  func.func @transform_2(%arg0: i32) -> (i32, i32) {
    %c0_i32 = arith.constant 0 : i32
    %c0_i32_0 = arith.constant 0 : i32
    %c0_i32_1 = arith.constant 0 : i32
    return %c0_i32, %c0_i32_0 : i32, i32
  }
  func.func @transform_3(%arg0: i32) -> (i32, i32) {
    %c0_i32 = arith.constant 0 : i32
    %c0_i32_0 = arith.constant 0 : i32
    %c0_i32_1 = arith.constant 0 : i32
    return %c0_i32, %c0_i32_0 : i32, i32
  }
  func.func @transform_4(%arg0: i32) -> (i32, i32) {
    %c0_i32 = arith.constant 0 : i32
    %c0_i32_0 = arith.constant 0 : i32
    %c0_i32_1 = arith.constant 0 : i32
    return %c0_i32, %c0_i32_0 : i32, i32
  }
  func.func @transform_5(%arg0: i32) -> (i32, i32) {
    %c0_i32 = arith.constant 0 : i32
    %c0_i32_0 = arith.constant 0 : i32
    %c0_i32_1 = arith.constant 0 : i32
    return %c0_i32, %c0_i32_0 : i32, i32
  }
  func.func @transform_6(%arg0: i32) -> (i32, i32) {
    %c0_i32 = arith.constant 0 : i32
    %c0_i32_0 = arith.constant 0 : i32
    %c0_i32_1 = arith.constant 0 : i32
    return %c0_i32, %c0_i32_0 : i32, i32
  }
  func.func @transform_7(%arg0: i32) -> (i32, i32) {
    %c0_i32 = arith.constant 0 : i32
    %c0_i32_0 = arith.constant 0 : i32
    %c0_i32_1 = arith.constant 0 : i32
    return %c0_i32, %c0_i32_0 : i32, i32
  }
  func.func @transform_8(%arg0: i32) -> (i32, i32) {
    %c0_i32 = arith.constant 0 : i32
    %c0_i32_0 = arith.constant 0 : i32
    %c0_i32_1 = arith.constant 0 : i32
    return %c0_i32, %c0_i32_0 : i32, i32
  }
  func.func @transform_9(%arg0: i32) -> (i32, i32) {
    %c0_i32 = arith.constant 0 : i32
    %c0_i32_0 = arith.constant 0 : i32
    %c0_i32_1 = arith.constant 0 : i32
    return %c0_i32, %c0_i32_0 : i32, i32
  }
  func.func @transform_10(%arg0: i32) -> (i32, i32) {
    %c0_i32 = arith.constant 0 : i32
    %c0_i32_0 = arith.constant 0 : i32
    %c0_i32_1 = arith.constant 0 : i32
    return %c0_i32, %c0_i32_0 : i32, i32
  }
  func.func @transform_11(%arg0: i32) -> (i32, i32) {
    %c0_i32 = arith.constant 0 : i32
    %c0_i32_0 = arith.constant 0 : i32
    %c0_i32_1 = arith.constant 0 : i32
    return %c0_i32, %c0_i32_0 : i32, i32
  }
  func.func @transform_12(%arg0: i32) -> (i32, i32) {
    %c0_i32 = arith.constant 0 : i32
    %c0_i32_0 = arith.constant 0 : i32
    %c0_i32_1 = arith.constant 0 : i32
    return %c0_i32, %c0_i32_0 : i32, i32
  }
  func.func @transform_13(%arg0: i32) -> (i32, i32) {
    %c0_i32 = arith.constant 0 : i32
    %c0_i32_0 = arith.constant 0 : i32
    %c0_i32_1 = arith.constant 0 : i32
    return %c0_i32, %c0_i32_0 : i32, i32
  }
  func.func @transform_14(%arg0: i32) -> (i32, i32) {
    %c0_i32 = arith.constant 0 : i32
    %c0_i32_0 = arith.constant 0 : i32
    %c0_i32_1 = arith.constant 0 : i32
    return %c0_i32, %c0_i32_0 : i32, i32
  }
  func.func @transform_15(%arg0: i32) -> (i32, i32) {
    %c0_i32 = arith.constant 0 : i32
    %c0_i32_0 = arith.constant 0 : i32
    %c0_i32_1 = arith.constant 0 : i32
    return %c0_i32, %c0_i32_0 : i32, i32
  }
  func.func @transform_16(%arg0: i32) -> (i32, i32) {
    %c0_i32 = arith.constant 0 : i32
    %c0_i32_0 = arith.constant 0 : i32
    %c0_i32_1 = arith.constant 0 : i32
    return %c0_i32, %c0_i32_0 : i32, i32
  }
  func.func @transform_17(%arg0: i32) -> (i32, i32) {
    %c0_i32 = arith.constant 0 : i32
    %c0_i32_0 = arith.constant 0 : i32
    %c0_i32_1 = arith.constant 0 : i32
    return %c0_i32, %c0_i32_0 : i32, i32
  }
  func.func @transform_18(%arg0: i32) -> (i32, i32) {
    %c0_i32 = arith.constant 0 : i32
    %c0_i32_0 = arith.constant 0 : i32
    %c0_i32_1 = arith.constant 0 : i32
    return %c0_i32, %c0_i32_0 : i32, i32
  }
  func.func @transform_19(%arg0: i32) -> (i32, i32) {
    %c0_i32 = arith.constant 0 : i32
    %c0_i32_0 = arith.constant 0 : i32
    %c0_i32_1 = arith.constant 0 : i32
    return %c0_i32, %c0_i32_0 : i32, i32
  }
  func.func @transform_20(%arg0: i32) -> (i32, i32) {
    %c0_i32 = arith.constant 0 : i32
    %c0_i32_0 = arith.constant 0 : i32
    %c0_i32_1 = arith.constant 0 : i32
    return %c0_i32, %c0_i32_0 : i32, i32
  }
  func.func @transform_21(%arg0: i32) -> (i32, i32) {
    %c0_i32 = arith.constant 0 : i32
    %c0_i32_0 = arith.constant 0 : i32
    %c0_i32_1 = arith.constant 0 : i32
    return %c0_i32, %c0_i32_0 : i32, i32
  }
  func.func @transform_22(%arg0: i32) -> (i32, i32, i32) {
    %c0_i32 = arith.constant 0 : i32
    %c0_i32_0 = arith.constant 0 : i32
    %c0_i32_1 = arith.constant 0 : i32
    return %arg0, %c0_i32, %c0_i32_0 : i32, i32, i32
  }
}

module attributes {stable_mosaic.version = 11 : i64} {
  func.func @_head_kernel(%arg0: i32, %arg1: memref<2x256xf32, #tpu.memory_space<vmem>>, %arg2: memref<2x128xf32, #tpu.memory_space<vmem>>, %arg3: memref<256x10xf32, #tpu.memory_space<vmem>>, %arg4: memref<1x10xf32, #tpu.memory_space<vmem>>, %arg5: memref<10x1024xf32, #tpu.memory_space<vmem>>, %arg6: memref<128x1024xf32, #tpu.memory_space<vmem>>, %arg7: memref<1x1024xf32, #tpu.memory_space<vmem>>, %arg8: memref<1024x10xf32, #tpu.memory_space<vmem>>, %arg9: memref<1x10xf32, #tpu.memory_space<vmem>>, %arg10: memref<2x10xf32, #tpu.memory_space<vmem>>, %arg11: memref<2x10xf32, #tpu.memory_space<vmem>>) attributes {dimension_semantics = [#tpu.dimension_semantics<arbitrary>], iteration_bounds = array<i64: 1>, scalar_prefetch = 0 : i64, scratch_operands = 0 : i64, tpu.core_type = #tpu.core_type<tc>, window_params = [{pipeline_mode = #tpu.pipeline_mode<synchronous>, transform_indices = @transform_0, window_bounds = array<i64: 2, 256>}, {pipeline_mode = #tpu.pipeline_mode<synchronous>, transform_indices = @transform_1, window_bounds = array<i64: 2, 128>}, {pipeline_mode = #tpu.pipeline_mode<synchronous>, transform_indices = @transform_2, window_bounds = array<i64: 256, 10>}, {pipeline_mode = #tpu.pipeline_mode<synchronous>, transform_indices = @transform_3, window_bounds = array<i64: 1, 10>}, {pipeline_mode = #tpu.pipeline_mode<synchronous>, transform_indices = @transform_4, window_bounds = array<i64: 10, 1024>}, {pipeline_mode = #tpu.pipeline_mode<synchronous>, transform_indices = @transform_5, window_bounds = array<i64: 128, 1024>}, {pipeline_mode = #tpu.pipeline_mode<synchronous>, transform_indices = @transform_6, window_bounds = array<i64: 1, 1024>}, {pipeline_mode = #tpu.pipeline_mode<synchronous>, transform_indices = @transform_7, window_bounds = array<i64: 1024, 10>}, {pipeline_mode = #tpu.pipeline_mode<synchronous>, transform_indices = @transform_8, window_bounds = array<i64: 1, 10>}, {pipeline_mode = #tpu.pipeline_mode<synchronous>, transform_indices = @transform_9, window_bounds = array<i64: 2, 10>}, {pipeline_mode = #tpu.pipeline_mode<synchronous>, transform_indices = @transform_10, window_bounds = array<i64: 2, 10>}]} {
    %c0 = arith.constant 0 : index
    %c0_0 = arith.constant 0 : index
    %0 = vector.load %arg1[%c0, %c0_0] : memref<2x256xf32, #tpu.memory_space<vmem>>, vector<2x256xf32>
    %c0_1 = arith.constant 0 : index
    %c0_2 = arith.constant 0 : index
    %1 = vector.load %arg3[%c0_1, %c0_2] : memref<256x10xf32, #tpu.memory_space<vmem>>, vector<256x10xf32>
    %cst = arith.constant dense<0.000000e+00> : vector<2x10xf32>
    %2 = tpu.matmul %0, %1, %cst {dimension_numbers = #tpu.dot_dimension_numbers<[1], [0], [0], [1], [0, 0, 1, 1], [], []>} : vector<2x256xf32>, vector<256x10xf32>, vector<2x10xf32> -> vector<2x10xf32>
    %c0_3 = arith.constant 0 : index
    %c0_4 = arith.constant 0 : index
    %3 = vector.load %arg4[%c0_3, %c0_4] : memref<1x10xf32, #tpu.memory_space<vmem>>, vector<1x10xf32>
    %4 = vector.broadcast %3 : vector<1x10xf32> to vector<2x10xf32>
    %5 = arith.addf %2, %4 : vector<2x10xf32>
    %c0_5 = arith.constant 0 : index
    %c0_6 = arith.constant 0 : index
    %6 = vector.load %arg5[%c0_5, %c0_6] : memref<10x1024xf32, #tpu.memory_space<vmem>>, vector<10x1024xf32>
    %cst_7 = arith.constant dense<0.000000e+00> : vector<2x1024xf32>
    %7 = tpu.matmul %5, %6, %cst_7 {dimension_numbers = #tpu.dot_dimension_numbers<[1], [0], [0], [1], [0, 0, 1, 1], [], []>} : vector<2x10xf32>, vector<10x1024xf32>, vector<2x1024xf32> -> vector<2x1024xf32>
    %c0_8 = arith.constant 0 : index
    %c0_9 = arith.constant 0 : index
    %8 = vector.load %arg2[%c0_8, %c0_9] : memref<2x128xf32, #tpu.memory_space<vmem>>, vector<2x128xf32>
    %c0_10 = arith.constant 0 : index
    %c0_11 = arith.constant 0 : index
    %9 = vector.load %arg6[%c0_10, %c0_11] : memref<128x1024xf32, #tpu.memory_space<vmem>>, vector<128x1024xf32>
    %cst_12 = arith.constant dense<0.000000e+00> : vector<2x1024xf32>
    %10 = tpu.matmul %8, %9, %cst_12 {dimension_numbers = #tpu.dot_dimension_numbers<[1], [0], [0], [1], [0, 0, 1, 1], [], []>} : vector<2x128xf32>, vector<128x1024xf32>, vector<2x1024xf32> -> vector<2x1024xf32>
    %11 = arith.addf %7, %10 : vector<2x1024xf32>
    %c0_13 = arith.constant 0 : index
    %c0_14 = arith.constant 0 : index
    %12 = vector.load %arg7[%c0_13, %c0_14] : memref<1x1024xf32, #tpu.memory_space<vmem>>, vector<1x1024xf32>
    %13 = vector.broadcast %12 : vector<1x1024xf32> to vector<2x1024xf32>
    %14 = arith.addf %11, %13 : vector<2x1024xf32>
    %cst_15 = arith.constant 0.000000e+00 : f32
    %15 = vector.broadcast %cst_15 : f32 to vector<2x1024xf32>
    %16 = arith.maximumf %14, %15 : vector<2x1024xf32>
    %c0_16 = arith.constant 0 : index
    %c0_17 = arith.constant 0 : index
    %17 = vector.load %arg8[%c0_16, %c0_17] : memref<1024x10xf32, #tpu.memory_space<vmem>>, vector<1024x10xf32>
    %cst_18 = arith.constant dense<0.000000e+00> : vector<2x10xf32>
    %18 = tpu.matmul %16, %17, %cst_18 {dimension_numbers = #tpu.dot_dimension_numbers<[1], [0], [0], [1], [0, 0, 1, 1], [], []>} : vector<2x1024xf32>, vector<1024x10xf32>, vector<2x10xf32> -> vector<2x10xf32>
    %c0_19 = arith.constant 0 : index
    %c0_20 = arith.constant 0 : index
    %19 = vector.load %arg9[%c0_19, %c0_20] : memref<1x10xf32, #tpu.memory_space<vmem>>, vector<1x10xf32>
    %20 = vector.broadcast %19 : vector<1x10xf32> to vector<2x10xf32>
    %21 = arith.addf %18, %20 : vector<2x10xf32>
    %c0_21 = arith.constant 0 : index
    %c0_22 = arith.constant 0 : index
    %22 = vector.load %arg10[%c0_21, %c0_22] : memref<2x10xf32, #tpu.memory_space<vmem>>, vector<2x10xf32>
    tpu.vector_store %arg10[%c0_21, %c0_22], %21 {strides = array<i32>} : memref<2x10xf32, #tpu.memory_space<vmem>>, vector<2x10xf32>,
    %c0_23 = arith.constant 0 : index
    %c0_24 = arith.constant 0 : index
    %23 = vector.load %arg11[%c0_23, %c0_24] : memref<2x10xf32, #tpu.memory_space<vmem>>, vector<2x10xf32>
    tpu.vector_store %arg11[%c0_23, %c0_24], %5 {strides = array<i32>} : memref<2x10xf32, #tpu.memory_space<vmem>>, vector<2x10xf32>,
    return
  }
  func.func @transform_0(%arg0: i32) -> (i32, i32) {
    %c0_i32 = arith.constant 0 : i32
    %c0_i32_0 = arith.constant 0 : i32
    %c0_i32_1 = arith.constant 0 : i32
    return %c0_i32, %c0_i32_0 : i32, i32
  }
  func.func @transform_1(%arg0: i32) -> (i32, i32) {
    %c0_i32 = arith.constant 0 : i32
    %c0_i32_0 = arith.constant 0 : i32
    %c0_i32_1 = arith.constant 0 : i32
    return %c0_i32, %c0_i32_0 : i32, i32
  }
  func.func @transform_2(%arg0: i32) -> (i32, i32) {
    %c0_i32 = arith.constant 0 : i32
    %c0_i32_0 = arith.constant 0 : i32
    %c0_i32_1 = arith.constant 0 : i32
    return %c0_i32, %c0_i32_0 : i32, i32
  }
  func.func @transform_3(%arg0: i32) -> (i32, i32) {
    %c0_i32 = arith.constant 0 : i32
    %c0_i32_0 = arith.constant 0 : i32
    %c0_i32_1 = arith.constant 0 : i32
    return %c0_i32, %c0_i32_0 : i32, i32
  }
  func.func @transform_4(%arg0: i32) -> (i32, i32) {
    %c0_i32 = arith.constant 0 : i32
    %c0_i32_0 = arith.constant 0 : i32
    %c0_i32_1 = arith.constant 0 : i32
    return %c0_i32, %c0_i32_0 : i32, i32
  }
  func.func @transform_5(%arg0: i32) -> (i32, i32) {
    %c0_i32 = arith.constant 0 : i32
    %c0_i32_0 = arith.constant 0 : i32
    %c0_i32_1 = arith.constant 0 : i32
    return %c0_i32, %c0_i32_0 : i32, i32
  }
  func.func @transform_6(%arg0: i32) -> (i32, i32) {
    %c0_i32 = arith.constant 0 : i32
    %c0_i32_0 = arith.constant 0 : i32
    %c0_i32_1 = arith.constant 0 : i32
    return %c0_i32, %c0_i32_0 : i32, i32
  }
  func.func @transform_7(%arg0: i32) -> (i32, i32) {
    %c0_i32 = arith.constant 0 : i32
    %c0_i32_0 = arith.constant 0 : i32
    %c0_i32_1 = arith.constant 0 : i32
    return %c0_i32, %c0_i32_0 : i32, i32
  }
  func.func @transform_8(%arg0: i32) -> (i32, i32) {
    %c0_i32 = arith.constant 0 : i32
    %c0_i32_0 = arith.constant 0 : i32
    %c0_i32_1 = arith.constant 0 : i32
    return %c0_i32, %c0_i32_0 : i32, i32
  }
  func.func @transform_9(%arg0: i32) -> (i32, i32) {
    %c0_i32 = arith.constant 0 : i32
    %c0_i32_0 = arith.constant 0 : i32
    %c0_i32_1 = arith.constant 0 : i32
    return %c0_i32, %c0_i32_0 : i32, i32
  }
  func.func @transform_10(%arg0: i32) -> (i32, i32) {
    %c0_i32 = arith.constant 0 : i32
    %c0_i32_0 = arith.constant 0 : i32
    %c0_i32_1 = arith.constant 0 : i32
    return %c0_i32, %c0_i32_0 : i32, i32
  }
}

</mosaic_0001>

<bundles_post_ra>
// kernel: cnn_transformer_linear_forward.7
= control target key start
LH: loop header
LB: loop body
LE: loop exit
PB: predicated region body
PF: predicated region fallthrough
CT: control target
= control target key end

     0   :  { %s851_s12 = smov 0   ;;  %s1047_s0 = inlined_call_operand.vmem [shape: f32[2,256,27], index: 0, kind: input, shape index: {}]   ;;  %s1048_s1 = inlined_call_operand.vmem [shape: f32[27,8], index: 1, kind: input, shape index: {}]   ;;  %s1049_s2 = inlined_call_operand.vmem [shape: f32[1,8], index: 2, kind: input, shape index: {}]   ;;  %s1050_s3 = inlined_call_operand.vmem [shape: f32[2,64,8], index: 3, kind: output, shape index: {}]  }
   0x1 LB: > { %s660_s13 = sadd.s32 4294967295, %s828_s12   ;;  %p664_p0 = scmp.ge.s32.totalorder %s828_s12, 1  ;;  %s828_s12 = sphi %s851_s12, %s13_s12  }
   0x2   : > { %p137_p1 = scmp.lt.s32.totalorder %s828_s12, 3 }
   0x4   : > { %p138_p2 = pnand %p664_p0, %p137_p1 }
   0x5   : > { %v203_v0 = vld [vmem:[%s1048_s1] sm:$0xff] (!%p138_p2)  ;;  %v204_v1 = vld [vmem:[%s1048_s1 + $0x8] sm:$0xff] (!%p138_p2)  ;;  %v205_v2 = vld [vmem:[%s1048_s1 + $0x10] sm:$0xff] (!%p138_p2)  ;;  %vm311_vm0 = vcmask (!%p138_p2), 1042432   ;;  %p161_p3 = scmp.lt.s32.totalorder (!%p138_p2), %s660_s13, 1  ;;  %vm830_vm1 = vmmov (!%p138_p2), 1  }
   0x6   : > { %141 = sbr.rel (%p138_p2) target bundleno = 269 (0x10d), region = 32  ;;  %v799_v3 = vpack.c.bf16 (!%p138_p2), %v204_v1, %v203_v0  ;;  %v206_v4 = vld [vmem:[%s1048_s1 + $0x18] sm:$0x7] (!%p138_p2)  ;;  %vm871_vm2 = vmpackc.low (!%p138_p2), %vm311_vm0, %vm830_vm1  ;;  %vm214_vm3 = vcmask (!%p138_p2), 220160   ;;  %v958_v47 = vld [vmem:[%s1049_s2] ss:$0 sm:$0xff] (!%p138_p2) }
   0x7   : > { %v803_v5 = vpack.c.bf16 (!%p138_p2), %v206_v4, %v205_v2  ;;  %vm596_vm4 = vcmask (!%p138_p2), 64512  }
   0x8   : > { %800 = vmatprep.subr.bf16.mxu0 (!%p138_p2), %v799_v3  ;;  %809 = vmatprep.subr.bf16.mxu1 (!%p138_p2), %v799_v3 }
   0x9   : > { %802 = vmatpush3.bf16.msra.mxu0 (!%p138_p2), %v799_v3  ;;  %811 = vmatpush3.bf16.msra.mxu1 (!%p138_p2), %v799_v3 }
   0xa   : > { %805 = vmatprep.subr.msk.bf16.mxu0 (!%p138_p2), %vm871_vm2, %v803_v5  ;;  %810 = vmatprep.subr.msk.bf16.mxu1 (!%p138_p2), %vm871_vm2, %v803_v5 }
   0xd   : > { %s1054_s13 = smov (!%p161_p3, %s660_s13), 1  ;;  %808 = vmatpush3.bf16.msk.msra.mxu0 %vm871_vm2, %v803_v5  ;;  %812 = vmatpush3.bf16.msk.msra.mxu1 %vm871_vm2, %v803_v5 }
   0xe   : > { %s705_s22 = sshll.u32 %s1054_s13, 8  ;;  %s706_s28 = sshll.u32 %s1054_s13, 6 }
   0xf   : > { %s885_s25 = scalar_lea.vmem %s1047_s0, %s705_s22  ;;  %s1012_s4 = scalar_lea.vmem %s1050_s3, %s706_s28 }
  0x10   : > { %v171_v7 = vld [vmem:[%s885_s25] sm:$0xff]  ;;  %v172_v9 = vld [vmem:[%s885_s25 + $0x8] sm:$0xff]  ;;  %v173_v11 = vld [vmem:[%s885_s25 + $0x10] sm:$0xff] }
  0x11   : > { %v187_v8 = vld [vmem:[%s885_s25 + $0x80] sm:$0xff]  ;;  %751 = vmatprep.mubr.msk.f32.mxu0 %vm214_vm3, %v171_v7  ;;  %v188_v10 = vld [vmem:[%s885_s25 + $0x88] sm:$0xff]  ;;  %v189_v12 = vld [vmem:[%s885_s25 + $0x90] sm:$0xff] }
  0x12   : > { %775 = vmatprep.mubr.msk.f32.mxu1 %vm214_vm3, %v187_v8  ;;  %752 = vmatmul.mubr.msk.f32.vlgmr.msra.gmra.mrb[0].mxu0 %vm214_vm3, %v172_v9  ;;  %v174_v13 = vld [vmem:[%s885_s25 + $0x18] sm:$0xff]  ;;  %v175_v15 = vld [vmem:[%s885_s25 + $0x20] sm:$0xff]  ;;  %v176_v17 = vld [vmem:[%s885_s25 + $0x28] sm:$0xff] }
  0x13   : > { %776 = vmatmul.mubr.msk.f32.vlgmr.msra.gmra.mrb[0].mxu1 %vm214_vm3, %v188_v10  ;;  %754 = vmatprep.mubr.msk.f32.mxu0 %vm214_vm3, %v173_v11  ;;  %v190_v14 = vld [vmem:[%s885_s25 + $0x98] sm:$0xff]  ;;  %v191_v16 = vld [vmem:[%s885_s25 + $0xa0] sm:$0xff]  ;;  %v192_v18 = vld [vmem:[%s885_s25 + $0xa8] sm:$0xff] }
  0x14   : > { %778 = vmatprep.mubr.msk.f32.mxu1 %vm214_vm3, %v189_v12  ;;  %v177_v19 = vld [vmem:[%s885_s25 + $0x30] sm:$0xff]  ;;  %v178_v21 = vld [vmem:[%s885_s25 + $0x38] sm:$0xff]  ;;  %v179_v23 = vld [vmem:[%s885_s25 + $0x40] sm:$0xff] }
  0x15   : > { %v193_v20 = vld [vmem:[%s885_s25 + $0xb0] sm:$0xff]  ;;  %v194_v22 = vld [vmem:[%s885_s25 + $0xb8] sm:$0xff]  ;;  %v195_v24 = vld [vmem:[%s885_s25 + $0xc0] sm:$0xff] }
  0x16   : > { %755 = vmatmul.mubr.msk.f32.gmra.mrb[2].mxu0 %vm214_vm3, %v174_v13  ;;  %v180_v25 = vld [vmem:[%s885_s25 + $0x48] sm:$0xff]  ;;  %v181_v27 = vld [vmem:[%s885_s25 + $0x50] sm:$0xff]  ;;  %v182_v29 = vld [vmem:[%s885_s25 + $0x58] sm:$0xff] }
  0x17   : > { %779 = vmatmul.mubr.msk.f32.gmra.mrb[2].mxu1 %vm214_vm3, %v190_v14  ;;  %757 = vmatprep.mubr.msk.f32.mxu0 %vm214_vm3, %v175_v15  ;;  %v196_v26 = vld [vmem:[%s885_s25 + $0xc8] sm:$0xff]  ;;  %v197_v28 = vld [vmem:[%s885_s25 + $0xd0] sm:$0xff]  ;;  %v198_v30 = vld [vmem:[%s885_s25 + $0xd8] sm:$0xff] }
  0x18   : > { %781 = vmatprep.mubr.msk.f32.mxu1 %vm214_vm3, %v191_v16  ;;  %v183_v31 = vld [vmem:[%s885_s25 + $0x60] sm:$0xff]  ;;  %v184_v33 = vld [vmem:[%s885_s25 + $0x68] sm:$0xff]  ;;  %v185_v35 = vld [vmem:[%s885_s25 + $0x70] sm:$0xff] }
  0x19   : > { %v199_v32 = vld [vmem:[%s885_s25 + $0xe0] sm:$0xff]  ;;  %v200_v34 = vld [vmem:[%s885_s25 + $0xe8] sm:$0xff]  ;;  %v201_v36 = vld [vmem:[%s885_s25 + $0xf0] sm:$0xff] }
  0x1a   : > { %758 = vmatmul.mubr.msk.f32.gmra.mrb[4].mxu0 %vm214_vm3, %v176_v17  ;;  %v186_v37 = vld [vmem:[%s885_s25 + $0x78] sm:$0xff] }
  0x1b   : > { %782 = vmatmul.mubr.msk.f32.gmra.mrb[4].mxu1 %vm214_vm3, %v192_v18  ;;  %760 = vmatprep.mubr.msk.f32.mxu0 %vm214_vm3, %v177_v19  ;;  %v202_v38 = vld [vmem:[%s885_s25 + $0xf8] sm:$0xff] }
  0x1c   : > { %784 = vmatprep.mubr.msk.f32.mxu1 %vm214_vm3, %v193_v20 }
  0x1e   : > { %761 = vmatmul.mubr.msk.f32.gmra.mrb[6].mxu0 %vm214_vm3, %v178_v21 }
  0x1f   : > { %785 = vmatmul.mubr.msk.f32.gmra.mrb[6].mxu1 %vm214_vm3, %v194_v22  ;;  %763 = vmatprep.mubr.msk.f32.mxu0 %vm214_vm3, %v179_v23 }
  0x20   : > { %787 = vmatprep.mubr.msk.f32.mxu1 %vm214_vm3, %v195_v24 }
  0x22   : > { %764 = vmatmul.mubr.msk.f32.gmra.mrb[8].mxu0 %vm214_vm3, %v180_v25 }
  0x23   : > { %788 = vmatmul.mubr.msk.f32.gmra.mrb[8].mxu1 %vm214_vm3, %v196_v26  ;;  %766 = vmatprep.mubr.msk.f32.mxu0 %vm214_vm3, %v181_v27 }
  0x24   : > { %790 = vmatprep.mubr.msk.f32.mxu1 %vm214_vm3, %v197_v28 }
  0x26   : > { %767 = vmatmul.mubr.msk.f32.gmra.mrb[10].mxu0 %vm214_vm3, %v182_v29 }
  0x27   : > { %791 = vmatmul.mubr.msk.f32.gmra.mrb[10].mxu1 %vm214_vm3, %v198_v30  ;;  %769 = vmatprep.mubr.msk.f32.mxu0 %vm214_vm3, %v183_v31 }
  0x28   : > { %793 = vmatprep.mubr.msk.f32.mxu1 %vm214_vm3, %v199_v32 }
  0x2a   : > { %770 = vmatmul.mubr.msk.f32.gmra.mrb[12].mxu0 %vm214_vm3, %v184_v33 }
  0x2b   : > { %794 = vmatmul.mubr.msk.f32.gmra.mrb[12].mxu1 %vm214_vm3, %v200_v34  ;;  %772 = vmatprep.mubr.msk.f32.mxu0 %vm214_vm3, %v185_v35 }
  0x2c   : > { %796 = vmatprep.mubr.msk.f32.mxu1 %vm214_vm3, %v201_v36 }
  0x2e   : > { %773 = vmatmul.mubr.msk.f32.gmra.mrb[14].mxu0 %vm214_vm3, %v186_v37 }
  0x2f   : > { %797 = vmatmul.mubr.msk.f32.gmra.mrb[14].mxu1 %vm214_vm3, %v202_v38 }
  0xe5   : > { %v753_v39 = vpop.f32.mrb[0].mxu0 }
  0xe6   : > { %v777_v40 = vpop.f32.mrb[0].mxu1  ;;  %v381_v41 = vpop.f32.mrb[1].mxu0  ;;  %v387_v52 = vadd.f32 %v753_v39, %v958_v47 }
  0xe7   : > { %v461_v42 = vpop.f32.mrb[1].mxu1  ;;  %v467_v53 = vadd.f32 %v777_v40, %v958_v47  ;;  %v382_v54 = vadd.f32 %v958_v47, %v381_v41 }
  0xe8   : > { %v462_v55 = vadd.f32 %v958_v47, %v461_v42  ;;  %v541_v2 = vmax.f32 %v387_v52, 0.0 }
  0xe9   : > { %v756_v43 = vpop.f32.mrb[2].mxu0  ;;  %v557_v3 = vmax.f32 %v467_v53, 0.0  ;;  %v540_v6 = vmax.f32 %v382_v54, 0.0 }
  0xea   : > { %v780_v44 = vpop.f32.mrb[2].mxu1  ;;  %v391_v45 = vpop.f32.mrb[3].mxu0  ;;  %v965_v56 = vadd.f32 %v756_v43, %v958_v47  ;;  %v556_v7 = vmax.f32 %v462_v55, 0.0 }
  0xeb   : > { %v471_v46 = vpop.f32.mrb[3].mxu1  ;;  %v968_v57 = vadd.f32 %v780_v44, %v958_v47  ;;  %v971_v60 = vadd.f32 %v958_v47, %v391_v45 }
  0xec   : > { %v974_v61 = vadd.f32 %v958_v47, %v471_v46  ;;  %v543_v8 = vmax.f32 %v965_v56, 0.0 }
  0xed   : > { %v759_v48 = vpop.f32.mrb[4].mxu0  ;;  %v559_v9 = vmax.f32 %v968_v57, 0.0  ;;  %v542_v12 = vmax.f32 %v971_v60, 0.0 }
  0xee   : > { %v783_v49 = vpop.f32.mrb[4].mxu1  ;;  %v401_v50 = vpop.f32.mrb[5].mxu0  ;;  %v977_v0 = vadd.f32 %v759_v48, %v958_v47  ;;  %v558_v13 = vmax.f32 %v974_v61, 0.0 }
  0xef   : > { %v481_v51 = vpop.f32.mrb[5].mxu1  ;;  %v980_v1 = vadd.f32 %v783_v49, %v958_v47  ;;  %v983_v4 = vadd.f32 %v958_v47, %v401_v50 }
  0xf0   : > { %v986_v5 = vadd.f32 %v958_v47, %v481_v51  ;;  %v545_v18 = vmax.f32 %v977_v0, 0.0 }
  0xf1   : > { %v762_v58 = vpop.f32.mrb[6].mxu0  ;;  %v561_v19 = vmax.f32 %v980_v1, 0.0  ;;  %v544_v22 = vmax.f32 %v983_v4, 0.0 }
  0xf2   : > { %v786_v59 = vpop.f32.mrb[6].mxu1  ;;  %v411_v62 = vpop.f32.mrb[7].mxu0  ;;  %v560_v23 = vmax.f32 %v986_v5, 0.0  ;;  %v1002_v26 = vadd.f32 %v762_v58, %v958_v47 }
  0xf3   : > { %v491_v63 = vpop.f32.mrb[7].mxu1  ;;  %v1005_v27 = vadd.f32 %v786_v59, %v958_v47  ;;  %v412_v42 = vadd.f32 %v958_v47, %v411_v62 }
  0xf4   : > { %v492_v46 = vadd.f32 %v958_v47, %v491_v63  ;;  %v547_v63 = vmax.f32 %v1002_v26, 0.0 }
  0xf5   : > { %v765_v10 = vpop.f32.mrb[8].mxu0 }
  0xf6   : > { %v789_v11 = vpop.f32.mrb[8].mxu1  ;;  %v427_v14 = vadd.f32 %v765_v10, %v958_v47  ;;  %v421_v16 = vpop.f32.mrb[9].mxu0 }
  0xf7   : > { %v507_v15 = vadd.f32 %v789_v11, %v958_v47  ;;  %v501_v17 = vpop.f32.mrb[9].mxu1  ;;  %v422_v20 = vadd.f32 %v958_v47, %v421_v16 }
  0xf8   : > { %v502_v21 = vadd.f32 %v958_v47, %v501_v17  ;;  %v549_v24 = vmax.f32 %v427_v14, 0.0 }
  0xf9   : > { %v565_v25 = vmax.f32 %v507_v15, 0.0  ;;  %v548_v28 = vmax.f32 %v422_v20, 0.0  ;;  %v768_v30 = vpop.f32.mrb[10].mxu0 }
  0xfa   : > { %v564_v29 = vmax.f32 %v502_v21, 0.0  ;;  %v792_v31 = vpop.f32.mrb[10].mxu1  ;;  %v573_v32 = vmax.f32 %v541_v2, %v549_v24  ;;  %v437_v34 = vadd.f32 %v768_v30, %v958_v47  ;;  %v431_v36 = vpop.f32.mrb[11].mxu0  ;;  %v546_v21 = vmax.f32 %v412_v42, 0.0 }
  0xfb   : > { %v581_v33 = vmax.f32 %v557_v3, %v565_v25  ;;  %v517_v35 = vadd.f32 %v792_v31, %v958_v47  ;;  %v511_v37 = vpop.f32.mrb[11].mxu1  ;;  %v572_v38 = vmax.f32 %v540_v6, %v548_v28  ;;  %v432_v40 = vadd.f32 %v958_v47, %v431_v36 }
  0xfc   : > { %v580_v39 = vmax.f32 %v556_v7, %v564_v29  ;;  %v512_v41 = vadd.f32 %v958_v47, %v511_v37  ;;  %v551_v44 = vmax.f32 %v437_v34, 0.0  ;;  %v563_v3 = vmax.f32 %v1005_v27, 0.0 }
  0xfd   : > { %v589_v43 = vmax.f32 %v573_v32, %v581_v33  ;;  %v567_v45 = vmax.f32 %v517_v35, 0.0  ;;  %v550_v49 = vmax.f32 %v432_v40, 0.0  ;;  %v771_v51 = vpop.f32.mrb[12].mxu0  ;;  %v562_v25 = vmax.f32 %v492_v46, 0.0 }
  0xfe   : > { %v588_v48 = vmax.f32 %v572_v38, %v580_v39  ;;  %v566_v50 = vmax.f32 %v512_v41, 0.0  ;;  %v795_v52 = vpop.f32.mrb[12].mxu1  ;;  %v575_v53 = vmax.f32 %v543_v8, %v551_v44  ;;  %v447_v55 = vadd.f32 %v771_v51, %v958_v47  ;;  %v441_v57 = vpop.f32.mrb[13].mxu0 }
  0xff   : > { %598 = vst.msk [vmem:[%s1012_s4 + $0x8] sm:$0xff] %vm596_vm4, %v589_v43  ;;  %v583_v54 = vmax.f32 %v559_v9, %v567_v45  ;;  %v527_v56 = vadd.f32 %v795_v52, %v958_v47  ;;  %v521_v58 = vpop.f32.mrb[13].mxu1  ;;  %v574_v59 = vmax.f32 %v542_v12, %v550_v49  ;;  %v442_v61 = vadd.f32 %v958_v47, %v441_v57 }
 0x100   : > { %597 = vst.msk [vmem:[%s1012_s4] sm:$0xff] %vm596_vm4, %v588_v48  ;;  %v582_v60 = vmax.f32 %v558_v13, %v566_v50  ;;  %v522_v62 = vadd.f32 %v958_v47, %v521_v58  ;;  %v553_v1 = vmax.f32 %v447_v55, 0.0 }
 0x101   : > { %v591_v0 = vmax.f32 %v575_v53, %v583_v54  ;;  %v569_v2 = vmax.f32 %v527_v56, 0.0  ;;  %v552_v5 = vmax.f32 %v442_v61, 0.0  ;;  %v774_v7 = vpop.f32.mrb[14].mxu0 }
 0x102   : > { %v590_v4 = vmax.f32 %v574_v59, %v582_v60  ;;  %v568_v6 = vmax.f32 %v522_v62, 0.0  ;;  %v798_v8 = vpop.f32.mrb[14].mxu1  ;;  %v577_v9 = vmax.f32 %v545_v18, %v553_v1  ;;  %v457_v11 = vadd.f32 %v774_v7, %v958_v47  ;;  %v451_v13 = vpop.f32.mrb[15].mxu0 }
 0x103   : > { %600 = vst.msk [vmem:[%s1012_s4 + $0x18] sm:$0xff] %vm596_vm4, %v591_v0  ;;  %v585_v10 = vmax.f32 %v561_v19, %v569_v2  ;;  %v537_v12 = vadd.f32 %v798_v8, %v958_v47  ;;  %v531_v14 = vpop.f32.mrb[15].mxu1  ;;  %v576_v15 = vmax.f32 %v544_v22, %v552_v5  ;;  %v452_v17 = vadd.f32 %v958_v47, %v451_v13 }
 0x104   : > { %599 = vst.msk [vmem:[%s1012_s4 + $0x10] sm:$0xff] %vm596_vm4, %v590_v4  ;;  %v584_v16 = vmax.f32 %v560_v23, %v568_v6  ;;  %v532_v20 = vadd.f32 %v958_v47, %v531_v14  ;;  %v555_v19 = vmax.f32 %v457_v11, 0.0 }
 0x105   : > { %v593_v18 = vmax.f32 %v577_v9, %v585_v10  ;;  %v571_v24 = vmax.f32 %v537_v12, 0.0  ;;  %v554_v27 = vmax.f32 %v452_v17, 0.0 }
 0x106   : > { %v592_v26 = vmax.f32 %v576_v15, %v584_v16  ;;  %v570_v28 = vmax.f32 %v532_v20, 0.0  ;;  %v579_v29 = vmax.f32 %v547_v63, %v555_v19 }
 0x107   : > { %602 = vst.msk [vmem:[%s1012_s4 + $0x28] sm:$0xff] %vm596_vm4, %v593_v18  ;;  %v587_v30 = vmax.f32 %v563_v3, %v571_v24  ;;  %v578_v22 = vmax.f32 %v546_v21, %v554_v27 }
 0x108   : > { %601 = vst.msk [vmem:[%s1012_s4 + $0x20] sm:$0xff] %vm596_vm4, %v592_v26  ;;  %v586_v23 = vmax.f32 %v562_v25, %v570_v28 }
 0x109   : > { %v595_v31 = vmax.f32 %v579_v29, %v587_v30 }
 0x10a   : > { %v594_v47 = vmax.f32 %v578_v22, %v586_v23 }
 0x10b   : > { %604 = vst.msk [vmem:[%s1012_s4 + $0x38] sm:$0xff] %vm596_vm4, %v595_v31 }
 0x10c   : > { %603 = vst.msk [vmem:[%s1012_s4 + $0x30] sm:$0xff] %vm596_vm4, %v594_v47 }
 0x10d PF: > { %s13_s12 = sadd.s32 1, %s828_s12  }
 0x10e   : > { %p10_p4 = scmp.ge.s32.totalorder %s13_s12, 4  }
 0x110   :  { %12 = sbr.rel (!%p10_p4) target bundleno = 1 (0x1), region = 62 }

// kernel: cnn_transformer_linear_forward.8
= control target key start
LH: loop header
LB: loop body
LE: loop exit
PB: predicated region body
PF: predicated region fallthrough
CT: control target
= control target key end

     0   :  { %s528_s12 = smov 0   ;;  %s597_s0 = inlined_call_operand.vmem [shape: f32[2,64,72], index: 0, kind: input, shape index: {}]   ;;  %s598_s1 = inlined_call_operand.vmem [shape: f32[72,16], index: 1, kind: input, shape index: {}]   ;;  %s599_s2 = inlined_call_operand.vmem [shape: f32[1,16], index: 2, kind: input, shape index: {}]   ;;  %s600_s3 = inlined_call_operand.vmem [shape: f32[2,16,16], index: 3, kind: output, shape index: {}]  }
   0x1 LB: > { %s397_s13 = sadd.s32 4294967295, %s506_s12   ;;  %p401_p0 = scmp.ge.s32.totalorder %s506_s12, 1  ;;  %s506_s12 = sphi %s528_s12, %s13_s12  }
   0x2   : > { %p137_p1 = scmp.lt.s32.totalorder %s506_s12, 3 }
   0x4   : > { %p138_p2 = pnand %p401_p0, %p137_p1 }
   0x5   : > { %v179_v0 = vld [vmem:[%s598_s1] sm:$0xff] (!%p138_p2)  ;;  %v180_v1 = vld [vmem:[%s598_s1 + $0x8] sm:$0xff] (!%p138_p2)  ;;  %v181_v2 = vld [vmem:[%s598_s1 + $0x10] sm:$0xff] (!%p138_p2)  ;;  %p161_p3 = scmp.lt.s32.totalorder (!%p138_p2), %s397_s13, 1  ;;  %vm195_vm0 = vcmask (!%p138_p2), 588800   ;;  %vm339_vm1 = vcmask (!%p138_p2), 130048  }
   0x6   : > { %141 = sbr.rel (%p138_p2) target bundleno = 253 (0xfd), region = 32  ;;  %v466_v3 = vpack.c.bf16 (!%p138_p2), %v180_v1, %v179_v0  ;;  %v182_v4 = vld [vmem:[%s598_s1 + $0x18] sm:$0xff] (!%p138_p2)  ;;  %v183_v6 = vld [vmem:[%s598_s1 + $0x20] sm:$0xff] (!%p138_p2)  ;;  %v184_v7 = vld [vmem:[%s598_s1 + $0x28] sm:$0xff] (!%p138_p2) }
   0x7   : > { %v470_v5 = vpack.c.bf16 (!%p138_p2), %v182_v4, %v181_v2  ;;  %v474_v8 = vpack.c.bf16 (!%p138_p2), %v184_v7, %v183_v6  ;;  %v185_v9 = vld [vmem:[%s598_s1 + $0x30] sm:$0xff] (!%p138_p2)  ;;  %v186_v10 = vld [vmem:[%s598_s1 + $0x38] sm:$0xff] (!%p138_p2)  ;;  %v187_v14 = vld [vmem:[%s598_s1 + $0x40] sm:$0xff] (!%p138_p2) }
   0x8   : > { %467 = vmatprep.subr.bf16.mxu0 (!%p138_p2), %v466_v3  ;;  %482 = vmatprep.subr.bf16.mxu1 (!%p138_p2), %v466_v3  ;;  %v478_v13 = vpack.c.bf16 (!%p138_p2), %v186_v10, %v185_v9  ;;  %v406_v22 = vld [vmem:[%s599_s2] ss:$0 sm:$0xff] (!%p138_p2) }
   0x9   : > { %469 = vmatpush3.bf16.msra.mxu0 (!%p138_p2), %v466_v3  ;;  %487 = vmatpush3.bf16.msra.mxu1 (!%p138_p2), %v466_v3 }
   0xa   : > { %471 = vmatprep.subr.bf16.mxu0 (!%p138_p2), %v470_v5  ;;  %483 = vmatprep.subr.bf16.mxu1 (!%p138_p2), %v470_v5 }
   0xd   : > { %s602_s13 = smov (!%p161_p3, %s397_s13), 1  ;;  %473 = vmatpush3.bf16.msra.mxu0 %v470_v5  ;;  %488 = vmatpush3.bf16.msra.mxu1 %v470_v5 }
   0xe   : > { %s417_s26 = sshll.u32 %s602_s13, 6  ;;  %475 = vmatprep.subr.bf16.mxu0 %v474_v8  ;;  %484 = vmatprep.subr.bf16.mxu1 %v474_v8  ;;  %s418_s11 = sshll.u32 %s602_s13, 4 }
   0xf   : > { %s563_s4 = scalar_lea.vmem %s597_s0, %s417_s26  ;;  %s170_s16 = scalar_lea.vmem %s600_s3, %s418_s11 }
  0x10   : > { %v171_v11 = vld [vmem:[%s563_s4] sm:$0xff]  ;;  %v172_v15 = vld [vmem:[%s563_s4 + $0x8] sm:$0xff]  ;;  %v173_v17 = vld [vmem:[%s563_s4 + $0x10] sm:$0xff] }
  0x11   : > { %v175_v12 = vld [vmem:[%s563_s4 + $0x20] sm:$0xff]  ;;  %454 = vmatprep.mubr.msk.f32.mxu0 %vm195_vm0, %v171_v11  ;;  %477 = vmatpush3.bf16.msra.mxu0 %v474_v8  ;;  %v176_v16 = vld [vmem:[%s563_s4 + $0x28] sm:$0xff]  ;;  %v177_v18 = vld [vmem:[%s563_s4 + $0x30] sm:$0xff] }
  0x12   : > { %460 = vmatprep.mubr.msk.f32.mxu1 %vm195_vm0, %v175_v12  ;;  %489 = vmatpush3.bf16.msra.mxu1 %v474_v8  ;;  %v174_v19 = vld [vmem:[%s563_s4 + $0x18] sm:$0xff] }
  0x13   : > { %479 = vmatprep.subr.bf16.mxu0 %v478_v13  ;;  %485 = vmatprep.subr.bf16.mxu1 %v478_v13  ;;  %v178_v20 = vld [vmem:[%s563_s4 + $0x38] sm:$0xff] }
  0x15   : > { %481 = vmatpush3.bf16.msra.mxu0 %v478_v13 }
  0x16   : > { %490 = vmatpush3.bf16.msra.mxu1 %v478_v13  ;;  %452 = vmatprep.subr.mxu0 %v187_v14 }
  0x17   : > { %486 = vmatprep.subr.mxu1 %v187_v14 }
  0x19   : > { %453 = vmatpush3.msra.mxu0 %v187_v14 }
  0x1a   : > { %491 = vmatpush3.msra.mxu1 %v187_v14  ;;  %455 = vmatmul.mubr.msk.f32.vlgmr.msra.gmra.mrb[0].mxu0 %vm195_vm0, %v172_v15 }
  0x1b   : > { %461 = vmatmul.mubr.msk.f32.vlgmr.msra.gmra.mrb[0].mxu1 %vm195_vm0, %v176_v16  ;;  %457 = vmatprep.mubr.msk.f32.mxu0 %vm195_vm0, %v173_v17 }
  0x1c   : > { %463 = vmatprep.mubr.msk.f32.mxu1 %vm195_vm0, %v177_v18 }
  0x1e   : > { %458 = vmatmul.mubr.msk.f32.gmra.mrb[2].mxu0 %vm195_vm0, %v174_v19 }
  0x1f   : > { %464 = vmatmul.mubr.msk.f32.gmra.mrb[2].mxu1 %vm195_vm0, %v178_v20 }
  0xed   : > { %v456_v21 = vpop.f32.mrb[0].mxu0 }
  0xee   : > { %v462_v23 = vpop.f32.mrb[0].mxu1  ;;  %v286_v24 = vpop.f32.mrb[1].mxu0  ;;  %v292_v26 = vadd.f32 %v456_v21, %v406_v22 }
  0xef   : > { %v306_v25 = vpop.f32.mrb[1].mxu1  ;;  %v312_v27 = vadd.f32 %v462_v23, %v406_v22  ;;  %v287_v28 = vadd.f32 %v406_v22, %v286_v24 }
  0xf0   : > { %v307_v29 = vadd.f32 %v406_v22, %v306_v25  ;;  %v326_v38 = vmax.f32 %v292_v26, 0.0 }
  0xf1   : > { %v459_v30 = vpop.f32.mrb[2].mxu0  ;;  %v330_v39 = vmax.f32 %v312_v27, 0.0  ;;  %v325_v42 = vmax.f32 %v287_v28, 0.0 }
  0xf2   : > { %v465_v31 = vpop.f32.mrb[2].mxu1  ;;  %v302_v32 = vadd.f32 %v459_v30, %v406_v22  ;;  %v296_v34 = vpop.f32.mrb[3].mxu0  ;;  %v329_v43 = vmax.f32 %v307_v29, 0.0 }
  0xf3   : > { %v322_v33 = vadd.f32 %v465_v31, %v406_v22  ;;  %v316_v35 = vpop.f32.mrb[3].mxu1  ;;  %v297_v36 = vadd.f32 %v406_v22, %v296_v34 }
  0xf4   : > { %v317_v37 = vadd.f32 %v406_v22, %v316_v35  ;;  %v328_v40 = vmax.f32 %v302_v32, 0.0 }
  0xf5   : > { %v332_v41 = vmax.f32 %v322_v33, 0.0  ;;  %v327_v44 = vmax.f32 %v297_v36, 0.0 }
  0xf6   : > { %v331_v45 = vmax.f32 %v317_v37, 0.0  ;;  %v334_v46 = vmax.f32 %v326_v38, %v328_v40 }
  0xf7   : > { %v336_v47 = vmax.f32 %v330_v39, %v332_v41  ;;  %v333_v48 = vmax.f32 %v325_v42, %v327_v44 }
  0xf8   : > { %v335_v49 = vmax.f32 %v329_v43, %v331_v45 }
  0xf9   : > { %v338_v50 = vmax.f32 %v334_v46, %v336_v47 }
  0xfa   : > { %v337_v51 = vmax.f32 %v333_v48, %v335_v49 }
  0xfb   : > { %341 = vst.msk [vmem:[%s170_s16 + $0x8] sm:$0xff] %vm339_vm1, %v338_v50 }
  0xfc   : > { %340 = vst.msk [vmem:[%s170_s16] sm:$0xff] %vm339_vm1, %v337_v51 }
  0xfd PF: > { %s13_s12 = sadd.s32 1, %s506_s12  }
  0xfe   : > { %p10_p4 = scmp.ge.s32.totalorder %s13_s12, 4  }
 0x100   :  { %12 = sbr.rel (!%p10_p4) target bundleno = 1 (0x1), region = 62 }

// kernel: cnn_transformer_linear_forward.5
= control target key start
LH: loop header
LB: loop body
LE: loop exit
PB: predicated region body
PF: predicated region fallthrough
CT: control target
= control target key end

     0   :  { %s5171_s0 = inlined_call_operand.vmem [shape: f32[2,8,128], index: 0, kind: input, shape index: {}, may-alias: {0,1}]   ;;  %s5172_s1 = inlined_call_operand.vmem [shape: f32[2,8,128], index: 1, kind: input, shape index: {}, may-alias: {0,1}]   ;;  %s5173_s2 = inlined_call_operand.vmem [shape: f32[128,384], index: 2, kind: input, shape index: {}]   ;;  %s5174_s3 = inlined_call_operand.vmem [shape: f32[1,384], index: 3, kind: input, shape index: {}]   ;;  %s5175_s4 = inlined_call_operand.vmem [shape: f32[128,128], index: 4, kind: input, shape index: {}]   ;;  %s5176_s5 = inlined_call_operand.vmem [shape: f32[1,128], index: 5, kind: input, shape index: {}]   ;;  %s5177_s6 = inlined_call_operand.vmem [shape: f32[1,128], index: 6, kind: input, shape index: {}]   ;;  %s5178_s7 = inlined_call_operand.vmem [shape: f32[1,128], index: 7, kind: input, shape index: {}]   ;;  %s5179_s8 = inlined_call_operand.vmem [shape: f32[128,128], index: 8, kind: input, shape index: {}]   ;;  %s5180_s9 = inlined_call_operand.vmem [shape: f32[1,128], index: 9, kind: input, shape index: {}]   ;;  %s5181_s10 = inlined_call_operand.vmem [shape: f32[128,256], index: 10, kind: input, shape index: {}]   ;;  %s5182_s11 = inlined_call_operand.vmem [shape: f32[1,256], index: 11, kind: input, shape index: {}]   ;;  %s5183_s12 = inlined_call_operand.vmem [shape: f32[128,128], index: 12, kind: input, shape index: {}]   ;;  %s5184_s13 = inlined_call_operand.vmem [shape: f32[1,128], index: 13, kind: input, shape index: {}]   ;;  %s5185_s14 = inlined_call_operand.vmem [shape: f32[1,128], index: 14, kind: input, shape index: {}]   ;;  %s5186_s15 = inlined_call_operand.vmem [shape: f32[1,128], index: 15, kind: input, shape index: {}]   ;;  %s5187_s16 = inlined_call_operand.vmem [shape: f32[128,256], index: 16, kind: input, shape index: {}]   ;;  %s5188_s17 = inlined_call_operand.vmem [shape: f32[1,256], index: 17, kind: input, shape index: {}]   ;;  %s5189_s18 = inlined_call_operand.vmem [shape: f32[256,128], index: 18, kind: input, shape index: {}]   ;;  %s5190_s19 = inlined_call_operand.vmem [shape: f32[1,128], index: 19, kind: input, shape index: {}]   ;;  %s5191_s20 = inlined_call_operand.vmem [shape: f32[1,128], index: 20, kind: input, shape index: {}]   ;;  %s5192_s21 = inlined_call_operand.vmem [shape: f32[1,128], index: 21, kind: input, shape index: {}]   ;;  %s5193_s22 = inlined_call_operand.vmem [shape: f32[2,8,128], index: 22, kind: output, shape index: {}]  }
   0x1   :  { %5202 = sst [smem:[#allocation2_spill]] %s5171_s0 }
   0x2   :  { %5203 = sst [smem:[#allocation3_spill]] %s5172_s1 }
   0x3   :  { %5204 = sst [smem:[#allocation4_spill]] %s5173_s2 }
   0x4   :  { %5205 = sst [smem:[#allocation5_spill]] %s5174_s3  ;;  %s4287_s3 = smov 0  }
   0x5   :  { %5206 = sst [smem:[#allocation6_spill]] %s5175_s4 }
   0x6   :  { %5207 = sst [smem:[#allocation7_spill]] %s5176_s5 }
   0x7   :  { %5208 = sst [smem:[#allocation8_spill]] %s5177_s6 }
   0x8 LB: > { %s3451_s28 = sadd.s32 4294967295, %s4164_s3   ;;  %p3455_p0 = scmp.ge.s32.totalorder %s4164_s3, 1  ;;  %s4164_s3 = sphi %s4287_s3, %s32_s3  }
   0x9   : > { %p620_p1 = scmp.lt.s32.totalorder %s4164_s3, 3 }
   0xb   : > { %p621_p2 = pnand %p3455_p0, %p620_p1 }
   0xc   : > { %s5209_s4 = sld [smem:[#allocation4_spill]] (!%p621_p2)  ;;  %v4166_v7 = vmov (!%p621_p2), 0.0   ;;  %v4167_v8 = vmov (!%p621_p2), 0.0|0.0   ;;  %p4396_p3 = scmp.lt.s32.totalorder (!%p621_p2), %s3451_s28, 1  ;;  %vm4168_vm0 = vmmov (!%p621_p2), 0   ;;  %vm928_vm1 = vcmask (!%p621_p2), 261120  }
   0xd   : > { %624 = sbr.rel (%p621_p2) target bundleno = 6960 (0x1b30), region = 108  ;;  %827 = vmatprep.mubr.f32.mxu0 (!%p621_p2), %v4166_v7  ;;  %3914 = vmatprep.subr.bf16.mxu1 (!%p621_p2), %v4167_v8  ;;  %vm1006_vm2 = vcmask (!%p621_p2), 64512   ;;  %s5213_s1 = sld [smem:[#allocation6_spill]] (!%p621_p2) }
   0xe   : > { %3676 = vmatprep.mubr.msk.f32.mxu1 (!%p621_p2), %vm4168_vm0, %v4166_v7  ;;  %s5198_s25 = smov (!%p621_p2), 64   ;;  %s5214_s29 = sld [smem:[#allocation7_spill]] (!%p621_p2) }
   0xf   : > { %s5216_s24 = sld [smem:[#allocation8_spill]] (!%p621_p2)  ;;  %s5219_s27 = smov (!%p621_p2), 32  }
  0x12   : > { %v699_v0 = vld [vmem:[%s5209_s4 + $0x8] sm:$0xff] (!%p621_p2)  ;;  %v702_v1 = vld [vmem:[%s5209_s4 + $0x20] sm:$0xff] (!%p621_p2)  ;;  %v701_v4 = vld [vmem:[%s5209_s4 + $0x18] sm:$0xff] (!%p621_p2) }
  0x13   : > { %v698_v2 = vld [vmem:[%s5209_s4] sm:$0xff] (!%p621_p2)  ;;  %v3882_v3 = vpack.c.bf16 (!%p621_p2), %v702_v1, %v699_v0  ;;  %v705_v5 = vld [vmem:[%s5209_s4 + $0x38] sm:$0xff] (!%p621_p2)  ;;  %v708_v6 = vld [vmem:[%s5209_s4 + $0x50] sm:$0xff] (!%p621_p2) }
  0x14   : > { %v3884_v9 = vpack.c.bf16 %v701_v4, %v698_v2  ;;  %v3886_v10 = vpack.c.bf16 %v708_v6, %v705_v5  ;;  %v704_v11 = vld [vmem:[%s5209_s4 + $0x30] sm:$0xff]  ;;  %v707_v12 = vld [vmem:[%s5209_s4 + $0x48] sm:$0xff]  ;;  %v714_v14 = vld [vmem:[%s5209_s4 + $0x80] sm:$0xff]  ;;  %s5221_s28 = smov (!%p4396_p3, %s3451_s28), 1 }
  0x15   : > { %v711_v13 = vld [vmem:[%s5209_s4 + $0x68] sm:$0xff]  ;;  %3883 = vmatprep.subr.bf16.mxu0 %v3882_v3  ;;  %v3888_v15 = vpack.c.bf16 %v707_v12, %v704_v11  ;;  %v710_v17 = vld [vmem:[%s5209_s4 + $0x60] sm:$0xff]  ;;  %v713_v18 = vld [vmem:[%s5209_s4 + $0x78] sm:$0xff]  ;;  %s4436_s30 = sshll.u32 %s5221_s28, 3  ;;  %s5211_s28 = sld [smem:[#allocation2_spill]] }
  0x16   : > { %3885 = vmatpush1.bf16.msra.mxu0 %v3884_v9  ;;  %v3890_v16 = vpack.c.bf16 %v714_v14, %v711_v13  ;;  %v717_v19 = vld [vmem:[%s5209_s4 + $0x98] sm:$0xff]  ;;  %v720_v20 = vld [vmem:[%s5209_s4 + $0xb0] sm:$0xff]  ;;  %v3892_v21 = vpack.c.bf16 %v713_v18, %v710_v17  ;;  %v719_v24 = vld [vmem:[%s5209_s4 + $0xa8] sm:$0xff]  ;;  %v748_v13 = vlaneseq  ;;  %s695_s5 = scalar_lea.vmem %s5193_s22, %s4436_s30 }
  0x17   : > { %3887 = vmatprep.subr.bf16.mxu0 %v3886_v10  ;;  %v3894_v22 = vpack.c.bf16 %v720_v20, %v717_v19  ;;  %v716_v23 = vld [vmem:[%s5209_s4 + $0x90] sm:$0xff]  ;;  %v723_v25 = vld [vmem:[%s5209_s4 + $0xc8] sm:$0xff]  ;;  %v726_v26 = vld [vmem:[%s5209_s4 + $0xe0] sm:$0xff] }
  0x18   : > { %v700_v27 = vld [vmem:[%s5209_s4 + $0x10] sm:$0xff]  ;;  %v703_v28 = vld [vmem:[%s5209_s4 + $0x28] sm:$0xff]  ;;  %v706_v29 = vld [vmem:[%s5209_s4 + $0x40] sm:$0xff]  ;;  %v3896_v30 = vpack.c.bf16 %v719_v24, %v716_v23  ;;  %v3898_v33 = vpack.c.bf16 %v726_v26, %v723_v25  ;;  %v749_v14 = vshrl.u32 %v748_v13, 7 }
  0x19   : > { %v3915_v31 = vpack.c.bf16 %v703_v28, %v700_v27  ;;  %v709_v32 = vld [vmem:[%s5209_s4 + $0x58] sm:$0xff]  ;;  %v722_v34 = vld [vmem:[%s5209_s4 + $0xc0] sm:$0xff]  ;;  %v732_v37 = vld [vmem:[%s5209_s4 + $0x110] sm:$0xff] }
  0x1a   : > { %3889 = vmatpush1.bf16.msra.mxu0 %v3888_v15  ;;  %v725_v35 = vld [vmem:[%s5209_s4 + $0xd8] sm:$0xff]  ;;  %v3918_v38 = vpack.c.bf16 %v709_v32, %v706_v29  ;;  %v712_v39 = vld [vmem:[%s5209_s4 + $0x70] sm:$0xff]  ;;  %v715_v40 = vld [vmem:[%s5209_s4 + $0x88] sm:$0xff]  ;;  %v4476_v15 = vsub.s32 1, %v749_v14  ;;  %v4481_v17 = vsub.s32 0, %v749_v14  ;;  %v758_v24 = vsub.s32 2, %v749_v14 }
  0x1b   : > { %3891 = vmatprep.subr.bf16.mxu0 %v3890_v16  ;;  %v729_v36 = vld [vmem:[%s5209_s4 + $0xf8] sm:$0xff]  ;;  %3916 = vmatpush3.bf16.msra.mxu1 %v3915_v31  ;;  %v3900_v41 = vpack.c.bf16 %v725_v35, %v722_v34  ;;  %v728_v43 = vld [vmem:[%s5209_s4 + $0xf0] sm:$0xff]  ;;  %v731_v44 = vld [vmem:[%s5209_s4 + $0x108] sm:$0xff]  ;;  %v3921_v47 = vpack.c.bf16 %v715_v40, %v712_v39  ;;  %s687_s26 = scalar_lea.vmem %s5211_s28, %s4436_s30  ;;  %s5212_s28 = sld [smem:[#allocation5_spill]] }
  0x1c   : > { %3917 = vmatprep.subr.bf16.mxu1 %v4167_v8  ;;  %v3902_v42 = vpack.c.bf16 %v732_v37, %v729_v36  ;;  %v735_v45 = vld [vmem:[%s5209_s4 + $0x128] sm:$0xff]  ;;  %v738_v46 = vld [vmem:[%s5209_s4 + $0x140] sm:$0xff]  ;;  %v721_v49 = vld [vmem:[%s5209_s4 + $0xb8] sm:$0xff]  ;;  %v3904_v50 = vpack.c.bf16 %v731_v44, %v728_v43 }
  0x1d   : > { %v718_v48 = vld [vmem:[%s5209_s4 + $0xa0] sm:$0xff]  ;;  %v3906_v51 = vpack.c.bf16 %v738_v46, %v735_v45  ;;  %v737_v53 = vld [vmem:[%s5209_s4 + $0x138] sm:$0xff]  ;;  %v744_v55 = vld [vmem:[%s5209_s4 + $0x170] sm:$0xff] }
  0x1e   : > { %3893 = vmatpush1.bf16.msra.mxu0 %v3892_v21  ;;  %v734_v52 = vld [vmem:[%s5209_s4 + $0x120] sm:$0xff]  ;;  %v741_v54 = vld [vmem:[%s5209_s4 + $0x158] sm:$0xff]  ;;  %v3924_v56 = vpack.c.bf16 %v721_v49, %v718_v48  ;;  %v724_v57 = vld [vmem:[%s5209_s4 + $0xd0] sm:$0xff] }
  0x1f   : > { %3895 = vmatprep.subr.bf16.mxu0 %v3894_v22  ;;  %3919 = vmatpush3.bf16.msra.mxu1 %v3918_v38  ;;  %v727_v58 = vld [vmem:[%s5209_s4 + $0xe8] sm:$0xff]  ;;  %v3908_v59 = vpack.c.bf16 %v737_v53, %v734_v52  ;;  %v3910_v60 = vpack.c.bf16 %v744_v55, %v741_v54  ;;  %v740_v61 = vld [vmem:[%s5209_s4 + $0x150] sm:$0xff]  ;;  %v730_v0 = vld [vmem:[%s5209_s4 + $0x100] sm:$0xff] }
  0x20   : > { %3920 = vmatprep.subr.bf16.mxu1 %v4167_v8  ;;  %v743_v62 = vld [vmem:[%s5209_s4 + $0x168] sm:$0xff]  ;;  %v3927_v63 = vpack.c.bf16 %v727_v58, %v724_v57  ;;  %v733_v1 = vld [vmem:[%s5209_s4 + $0x118] sm:$0xff]  ;;  %v736_v4 = vld [vmem:[%s5209_s4 + $0x130] sm:$0xff] }
  0x21   : > { %v3912_v2 = vpack.c.bf16 %v743_v62, %v740_v61  ;;  %v3930_v3 = vpack.c.bf16 %v733_v1, %v730_v0  ;;  %v739_v5 = vld [vmem:[%s5209_s4 + $0x148] sm:$0xff]  ;;  %v4456_v6 = vld [vmem:[%s687_s26] sm:$0xff]  ;;  %v745_v11 = vld [vmem:[%s5209_s4 + $0x178] sm:$0xff]  ;;  %s5200_s26 = smov 96  }
  0x22   : > { %3897 = vmatpush1.bf16.msra.mxu0 %v3896_v30  ;;  %v3933_v9 = vpack.c.bf16 %v739_v5, %v736_v4  ;;  %v742_v10 = vld [vmem:[%s5209_s4 + $0x160] sm:$0xff]  ;;  %v905_v39 = vld [vmem:[%s5213_s1 + $0x8] sm:$0xff]  ;;  %v906_v40 = vld [vmem:[%s5213_s1 + $0x10] sm:$0xff] }
  0x23   : > { %3899 = vmatprep.subr.bf16.mxu0 %v3898_v33  ;;  %3922 = vmatpush3.bf16.msra.mxu1 %v3921_v47  ;;  %v3936_v12 = vpack.c.bf16 %v745_v11, %v742_v10  ;;  %v746_v16 = vld [vmem:[%s5212_s28] sm:$0x7]  ;;  %s5196_s28 = smov 32   ;;  %v909_v62 = vld [vmem:[%s5213_s1 + $0x28] sm:$0xff]  ;;  %v911_v1 = vld [vmem:[%s5213_s1 + $0x38] sm:$0xff] }
  0x24   : > { %3923 = vmatprep.subr.bf16.mxu1 %v4167_v8  ;;  %v755_v18 = vrot.slane %v746_v16, %v4476_v15  ;;  %v751_v20 = vrot.slane %v746_v16, %v4481_v17  ;;  %v759_v25 = vrot.slane %v746_v16, %v758_v24  ;;  %v904_v38 = vld [vmem:[%s5213_s1] sm:$0xff] }
  0x25   : > { %v908_v61 = vld [vmem:[%s5213_s1 + $0x20] sm:$0xff] }
  0x26   : > { %3901 = vmatpush1.bf16.msra.mxu0 %v3900_v41  ;;  %v3939_v41 = vpack.c.bf16 %v905_v39, %v904_v38  ;;  %v3945_v0 = vpack.c.bf16 %v909_v62, %v908_v61 }
  0x27   : > { %3903 = vmatprep.subr.bf16.mxu0 %v3902_v42  ;;  %3925 = vmatpush3.bf16.msra.mxu1 %v3924_v56  ;;  %v907_v42 = vld [vmem:[%s5213_s1 + $0x18] sm:$0xff] }
  0x28   : > { %3926 = vmatprep.subr.bf16.mxu1 %v4167_v8  ;;  %v3942_v43 = vpack.c.bf16 %v907_v42, %v906_v40 }
  0x2a   : > { %3905 = vmatpush1.bf16.msra.mxu0 %v3904_v50 }
  0x2b   : > { %3907 = vmatprep.subr.bf16.mxu0 %v3906_v51  ;;  %3928 = vmatpush3.bf16.msra.mxu1 %v3927_v63  ;;  %v910_v63 = vld [vmem:[%s5213_s1 + $0x30] sm:$0xff] }
  0x2c   : > { %3929 = vmatprep.subr.bf16.mxu1 %v4167_v8 }
  0x2e   : > { %3909 = vmatpush1.bf16.msra.mxu0 %v3908_v59 }
  0x2f   : > { %3911 = vmatprep.subr.bf16.mxu0 %v3910_v60  ;;  %3931 = vmatpush3.bf16.msra.mxu1 %v3930_v3 }
  0x30   : > { %3932 = vmatprep.subr.bf16.mxu1 %v4167_v8 }
  0x32   : > { %3913 = vmatpush1.bf16.msra.mxu0 %v3912_v2  ;;  %v3948_v2 = vpack.c.bf16 %v911_v1, %v910_v63 }
  0x33   : > { %3938 = vmatprep.subr.bf16.mxu0 %v4167_v8  ;;  %3934 = vmatpush3.bf16.msra.mxu1 %v3933_v9 }
  0x34   : > { %3935 = vmatprep.subr.bf16.mxu1 %v4167_v8 }
  0x35   : > { %828 = vmatmul.mubr.f32.vlgmr.msra.gmra.mrb[0].mxu0 %v4456_v6 }
  0x36   : > { %3697 = vmatprep.mubr.msk.f32.mxu0 %vm4168_vm0, %v4166_v7  ;;  %3940 = vmatpush3.bf16.msra.mxu0 %v3939_v41 }
  0x37   : > { %3937 = vmatpush3.bf16.msra.mxu1 %v3936_v12  ;;  %3941 = vmatprep.subr.bf16.mxu0 %v4167_v8 }
  0x38   : > { %3679 = vmatprep.subr.mxu1 %v4166_v7 }
  0x3a   : > { %3677 = vmatmul.mubr.f32.vlgmr.msra.gmra.mrb[0].mxu1 %v4456_v6  ;;  %3943 = vmatpush3.bf16.msra.mxu0 %v3942_v43 }
  0x3b   : > { %3681 = vmatprep.mubr.msk.f32.mxu1 %vm4168_vm0, %v4166_v7  ;;  %3944 = vmatprep.subr.bf16.mxu0 %v4167_v8 }
 0x108   : > { %v829_v19 = vpop.f32.mrb[0].mxu0 }
 0x109   : > { %v831_v21 = vpop.f32.mrb[1].mxu0  ;;  %v4491_v23 = vadd.f32 %v829_v19, %v751_v20 }
 0x10a   : > { %v4485_v22 = vadd.f32 %v831_v21, %v755_v18 }
 0x10c   : > { %1167 = vrot.lane.b32.xlu1 %v4485_v22, %s5200_s26  ;;  %3680 = vmatpush3.xpose.msk.msra.mxu1 %vm928_vm1, %v4485_v22 }
 0x10d   : > { %3684 = vmatprep.subr.mxu1 %v4166_v7  ;;  %v900_v26 = vpop.f32.mrb[0].mxu1 }
 0x10e   : > { %v4500_v27 = vadd.f32 %v900_v26, %v759_v25  ;;  %v3678_v28 = vpop.f32.mrb[1].mxu1 }
 0x10f   : > { %3682 = vmatmul.mubr.msk.f32.vlgmr.msra.gmra.mrb[2].mxu1 %vm928_vm1, %v4491_v23 }
 0x110   : > { %1165 = vrot.lane.b32.xlu1 %v4491_v23, %s5200_s26  ;;  %3686 = vmatprep.mubr.msk.f32.mxu1 %vm4168_vm0, %v4166_v7 }
 0x111   : > { %3685 = vmatpush3.msra.mxu1 %v4500_v27 }
 0x112   : > { %3700 = vmatprep.subr.mxu1 %v4166_v7 }
 0x17e   : > { %v1168_v46 = vpop.permute.xlu1 %1167 }
 0x182   : > { %v1166_v48 = vpop.permute.xlu1 %1165 }
 0x1e2   : > { %v1001_v29 = vpop.f32.mrb[2].mxu1 }
 0x1e3   : > { %v1005_v30 = vmul.f32 0.17677669, %v1001_v29  ;;  %v3683_v31 = vpop.f32.mrb[3].mxu1  ;;  %v912_v29 = vld [vmem:[%s5213_s1 + $0x40] sm:$0xff] }
 0x1e4   : > { %v914_v31 = vld [vmem:[%s5213_s1 + $0x50] sm:$0xff] }
 0x1e5   : > { %v1007_v32 = vsel %vm1006_vm2, %v1005_v30, -inf }
 0x1e6   : > { %1008 = vmax.xlane.f32.xlu0 %v1007_v32 }
 0x273   : > { %v1009_v33 = vpop.xlane.xlu0 %1008 }
 0x274   : > { %v1010_v34 = vsub.f32 %v1005_v30, %v1009_v33  ;;  %v913_v30 = vld [vmem:[%s5213_s1 + $0x48] sm:$0xff]  ;;  %v915_v33 = vld [vmem:[%s5213_s1 + $0x58] sm:$0xff] }
 0x275   : > { %v3951_v32 = vpack.c.bf16 %v913_v30, %v912_v29  ;;  %v2017_v29 = vld [vmem:[%s5181_s10 + $0x48] sm:$0xff]  ;;  %v2019_v30 = vld [vmem:[%s5181_s10 + $0x58] sm:$0xff] }
 0x276   : > { %v1011_v35 = vmul.f32 1.442695, %v1010_v34  ;;  %v3954_v34 = vpack.c.bf16 %v915_v33, %v914_v31  ;;  %v1918_v33 = vld [vmem:[%s5179_s8 + $0x18] sm:$0xff] }
 0x278   : > { %4120 = vpow2.f32 %v1011_v35 }
 0x282   : > { %v4121_v36 = vpop.eup %4120 }
 0x283   : > { %v1013_v37 = vsel %vm1006_vm2, %v4121_v36, 0.0 }
 0x284   : > { %1014 = vadd.xlane.f32.xlu0 %v1013_v37 }
 0x311   : > { %v1015_v44 = vpop.xlane.xlu0 %1014 }
 0x312   : > { %4122 = vrcp.f32 %v1015_v44 }
 0x31c   : > { %v4123_v45 = vpop.eup %4122 }
 0x31d   : > { %v1017_v47 = vmul.f32 %v4123_v45, %v4121_v36 }
 0x31f   : > { %3687 = vmatmul.mubr.msk.f32.vlgmr.msra.gmra.mrb[4].mxu1 %vm1006_vm2, %v1017_v47 }
 0x320   : > { %3701 = vmatpush3.xpose.msk.msra.mxu1 %vm928_vm1, %v1168_v46  ;;  %3702 = vmatprep.mubr.msk.f32.mxu1 %vm4168_vm0, %v4166_v7 }
 0x321   : > { %3705 = vmatprep.subr.mxu1 %v4166_v7 }
 0x323   : > { %3703 = vmatmul.mubr.msk.f32.vlgmr.msra.gmra.mrb[6].mxu1 %vm928_vm1, %v1166_v48 }
 0x324   : > { %3707 = vmatprep.mubr.msk.f32.mxu1 %vm4168_vm0, %v4166_v7 }
 0x3f2   : > { %v1087_v49 = vpop.f32.mrb[4].mxu1 }
 0x3f3   : > { %v3688_v50 = vpop.f32.mrb[5].mxu1  ;;  %3698 = vmatmul.mubr.msk.f32.vlgmr.msra.gmra.mrb[2].mxu0 %vm928_vm1, %v1087_v49 }
 0x3f4   : > { %3718 = vmatprep.mubr.msk.f32.mxu0 %vm4168_vm0, %v4166_v7  ;;  %3946 = vmatpush3.bf16.msra.mxu0 %v3945_v0 }
 0x3f5   : > { %3947 = vmatprep.subr.bf16.mxu0 %v4167_v8 }
 0x3f6   : > { %v1239_v51 = vpop.f32.mrb[6].mxu1 }
 0x3f7   : > { %v1243_v52 = vmul.f32 0.17677669, %v1239_v51  ;;  %v3704_v53 = vpop.f32.mrb[7].mxu1 }
 0x3f8   : > { %3949 = vmatpush3.bf16.msra.mxu0 %v3948_v2 }
 0x3f9   : > { %v1244_v54 = vsel %vm1006_vm2, %v1243_v52, -inf  ;;  %3950 = vmatprep.subr.bf16.mxu0 %v4167_v8 }
 0x3fa   : > { %1245 = vmax.xlane.f32.xlu0 %v1244_v54 }
 0x410   : > { %1256 = vrot.lane.b32.xlu0 %v4500_v27, %s5200_s26 }
 0x414   : > { %1408 = vrot.lane.b32.xlu0 %v4485_v22, %s5198_s25 }
 0x418   : > { %1406 = vrot.lane.b32.xlu0 %v4491_v23, %s5198_s25 }
 0x487   : > { %v1246_v55 = vpop.xlane.xlu0 %1245 }
 0x488   : > { %v1247_v56 = vsub.f32 %v1243_v52, %v1246_v55 }
 0x48a   : > { %v1248_v57 = vmul.f32 1.442695, %v1247_v56  ;;  %v916_v56 = vld [vmem:[%s5213_s1 + $0x60] sm:$0xff] }
 0x48b   : > { %v1257_v58 = vpop.permute.xlu0 %1256 }
 0x48c   : > { %4124 = vpow2.f32 %v1248_v57  ;;  %3706 = vmatpush3.msra.mxu1 %v1257_v58  ;;  %v918_v57 = vld [vmem:[%s5213_s1 + $0x70] sm:$0xff] }
 0x48d   : > { %3721 = vmatprep.subr.mxu1 %v4166_v7 }
 0x48f   : > { %v1409_v10 = vpop.permute.xlu0 %1408 }
 0x493   : > { %v1407_v12 = vpop.permute.xlu0 %1406 }
 0x496   : > { %v4125_v59 = vpop.eup %4124 }
 0x497   : > { %v1250_v60 = vsel %vm1006_vm2, %v4125_v59, 0.0 }
 0x498   : > { %1251 = vadd.xlane.f32.xlu1 %v1250_v60 }
 0x4a9   : > { %1496 = vrot.lane.b32.xlu1 %v4500_v27, %s5198_s25 }
 0x4ad   : > { %1648 = vrot.lane.b32.xlu1 %v4485_v22, %s5196_s28 }
 0x4c6   : > { %v1160_v3 = vpop.f32.mrb[2].mxu0 }
 0x4c7   : > { %v3699_v4 = vpop.f32.mrb[3].mxu0 }
 0x525   : > { %v1252_v5 = vpop.xlane.xlu1 %1251 }
 0x526   : > { %4126 = vrcp.f32 %v1252_v5 }
 0x529   : > { %v1497_v13 = vpop.permute.xlu1 %1496 }
 0x52d   : > { %v1649_v39 = vpop.permute.xlu1 %1648 }
 0x530   : > { %v4127_v9 = vpop.eup %4126 }
 0x531   : > { %v1254_v11 = vmul.f32 %v4127_v9, %v4125_v59  ;;  %v919_v59 = vld [vmem:[%s5213_s1 + $0x78] sm:$0xff] }
 0x532   : > { %v3960_v60 = vpack.c.bf16 %v919_v59, %v918_v57  ;;  %v2026_v57 = vld [vmem:[%s5181_s10 + $0x90] sm:$0xff]  ;;  %v2029_v59 = vld [vmem:[%s5181_s10 + $0xa8] sm:$0xff] }
 0x533   : > { %3708 = vmatmul.mubr.msk.f32.vlgmr.msra.gmra.mrb[8].mxu1 %vm1006_vm2, %v1254_v11 }
 0x534   : > { %3722 = vmatpush3.xpose.msk.msra.mxu1 %vm928_vm1, %v1409_v10  ;;  %3723 = vmatprep.mubr.msk.f32.mxu1 %vm4168_vm0, %v4166_v7 }
 0x535   : > { %3726 = vmatprep.subr.mxu1 %v4166_v7 }
 0x537   : > { %3724 = vmatmul.mubr.msk.f32.vlgmr.msra.gmra.mrb[10].mxu1 %vm928_vm1, %v1407_v12  ;;  %v2009_v12 = vld [vmem:[%s5181_s10 + $0x8] sm:$0xff] }
 0x538   : > { %3727 = vmatpush3.msra.mxu1 %v1497_v13  ;;  %3728 = vmatprep.mubr.msk.f32.mxu1 %vm4168_vm0, %v4166_v7  ;;  %v2011_v13 = vld [vmem:[%s5181_s10 + $0x18] sm:$0xff] }
 0x539   : > { %3742 = vmatprep.subr.mxu1 %v4166_v7 }
 0x606   : > { %v1328_v14 = vpop.f32.mrb[8].mxu1 }
 0x607   : > { %v3709_v16 = vpop.f32.mrb[9].mxu1  ;;  %3719 = vmatmul.mubr.msk.f32.vlgmr.msra.gmra.mrb[4].mxu0 %vm928_vm1, %v1328_v14  ;;  %v2008_v14 = vld [vmem:[%s5181_s10] sm:$0xff] }
 0x608   : > { %3739 = vmatprep.mubr.msk.f32.mxu0 %vm4168_vm0, %v4166_v7  ;;  %3952 = vmatpush3.bf16.msra.mxu0 %v3951_v32  ;;  %v3986_v16 = vpack.c.bf16 %v2011_v13, %v2009_v12  ;;  %v1917_v32 = vld [vmem:[%s5179_s8 + $0x10] sm:$0xff]  ;;  %v2032_v12 = vld [vmem:[%s5181_s10 + $0xc0] sm:$0xff] }
 0x609   : > { %3953 = vmatprep.subr.bf16.mxu0 %v4167_v8 }
 0x60a   : > { %v1480_v18 = vpop.f32.mrb[10].mxu1 }
 0x60b   : > { %v1484_v19 = vmul.f32 0.17677669, %v1480_v18  ;;  %v3725_v20 = vpop.f32.mrb[11].mxu1  ;;  %v2010_v18 = vld [vmem:[%s5181_s10 + $0x10] sm:$0xff] }
 0x60c   : > { %3955 = vmatpush3.bf16.msra.mxu0 %v3954_v34  ;;  %v3988_v20 = vpack.c.bf16 %v2010_v18, %v2008_v14  ;;  %v3994_v34 = vpack.c.bf16 %v2019_v30, %v2017_v29  ;;  %v2034_v14 = vld [vmem:[%s5181_s10 + $0xd0] sm:$0xff]  ;;  %v2039_v18 = vld [vmem:[%s5181_s10 + $0xf8] sm:$0xff] }
 0x60d   : > { %v1485_v21 = vsel %vm1006_vm2, %v1484_v19, -inf  ;;  %3956 = vmatprep.subr.bf16.mxu0 %v4167_v8  ;;  %v1930_v29 = vld [vmem:[%s5179_s8 + $0x78] sm:$0xff] }
 0x60e   : > { %1486 = vmax.xlane.f32.xlu0 %v1485_v21 }
 0x69b   : > { %v1487_v22 = vpop.xlane.xlu0 %1486 }
 0x69c   : > { %v1488_v24 = vsub.f32 %v1484_v19, %v1487_v22  ;;  %v2015_v19 = vld [vmem:[%s5181_s10 + $0x38] sm:$0xff]  ;;  %v1915_v22 = vld [vmem:[%s5179_s8] sm:$0xff] }
 0x69e   : > { %v1489_v25 = vmul.f32 1.442695, %v1488_v24  ;;  %v1916_v24 = vld [vmem:[%s5179_s8 + $0x8] sm:$0xff] }
 0x6a0   : > { %4128 = vpow2.f32 %v1489_v25  ;;  %v2012_v25 = vld [vmem:[%s5181_s10 + $0x20] sm:$0xff] }
 0x6aa   : > { %v4129_v26 = vpop.eup %4128 }
 0x6ab   : > { %v1491_v28 = vsel %vm1006_vm2, %v4129_v26, 0.0 }
 0x6ac   : > { %1492 = vadd.xlane.f32.xlu1 %v1491_v28  ;;  %v2014_v28 = vld [vmem:[%s5181_s10 + $0x30] sm:$0xff] }
 0x6ad   : > { %v3992_v31 = vpack.c.bf16 %v2014_v28, %v2012_v25  ;;  %v1929_v28 = vld [vmem:[%s5179_s8 + $0x70] sm:$0xff] }
 0x6ae   : > { %v3984_v30 = vpack.c.bf16 %v1930_v29, %v1929_v28  ;;  %v2130_v28 = vld [vmem:[%s5183_s12 + $0x38] sm:$0xff] }
 0x6bd   : > { %1646 = vrot.lane.b32.xlu1 %v4491_v23, %s5196_s28  ;;  %v3459_v23 = vld [vmem:[%s5214_s29] ss:$0 sm:$0xff]  ;;  %s5215_s29 = sld [smem:[#allocation3_spill]] }
 0x6be   : > { %v1164_v35 = vadd.f32 %v3459_v23, %v1160_v3  ;;  %v3966_v23 = vpack.c.bf16 %v1918_v33, %v1917_v32 }
 0x6c3   : > { %s691_s0 = scalar_lea.vmem %s5215_s29, %s4436_s30  ;;  %s5217_s29 = smov 96  }
 0x6da   : > { %v1401_v36 = vpop.f32.mrb[4].mxu0 }
 0x6db   : > { %v1405_v37 = vadd.f32 %v1401_v36, %v1164_v35  ;;  %v3720_v38 = vpop.f32.mrb[5].mxu0  ;;  %v2016_v35 = vld [vmem:[%s5181_s10 + $0x40] sm:$0xff]  ;;  %v2018_v36 = vld [vmem:[%s5181_s10 + $0x50] sm:$0xff] }
 0x6dc   : > { %v2023_v38 = vld [vmem:[%s5181_s10 + $0x78] sm:$0xff] }
 0x739   : > { %v1493_v40 = vpop.xlane.xlu1 %1492 }
 0x73a   : > { %4130 = vrcp.f32 %v1493_v40  ;;  %v1920_v40 = vld [vmem:[%s5179_s8 + $0x28] sm:$0xff] }
 0x73d   : > { %v1647_v43 = vpop.permute.xlu1 %1646 }
 0x744   : > { %v4131_v41 = vpop.eup %4130 }
 0x745   : > { %v1495_v42 = vmul.f32 %v4131_v41, %v4129_v26  ;;  %v3963_v26 = vpack.c.bf16 %v1916_v24, %v1915_v22  ;;  %v3996_v41 = vpack.c.bf16 %v2018_v36, %v2016_v35  ;;  %v2036_v22 = vld [vmem:[%s5181_s10 + $0xe0] sm:$0xff]  ;;  %v2038_v24 = vld [vmem:[%s5181_s10 + $0xf0] sm:$0xff] }
 0x746   : > { %v3476_v35 = vld [vmem:[%s5216_s24] ss:$0 sm:$0xff] }
 0x747   : > { %3729 = vmatmul.mubr.msk.f32.vlgmr.msra.gmra.mrb[12].mxu1 %vm1006_vm2, %v1495_v42 }
 0x748   : > { %3743 = vmatpush3.xpose.msk.msra.mxu1 %vm928_vm1, %v1649_v39  ;;  %3744 = vmatprep.mubr.msk.f32.mxu1 %vm4168_vm0, %v4166_v7  ;;  %v1919_v39 = vld [vmem:[%s5179_s8 + $0x20] sm:$0xff] }
 0x749   : > { %3747 = vmatprep.subr.mxu1 %v4166_v7 }
 0x74b   : > { %3745 = vmatmul.mubr.msk.f32.vlgmr.msra.gmra.mrb[14].mxu1 %vm928_vm1, %v1647_v43  ;;  %v3969_v43 = vpack.c.bf16 %v1920_v40, %v1919_v39  ;;  %v2040_v40 = vld [vmem:[%s5182_s11] sm:$0x3] }
 0x74c   : > { %3749 = vmatprep.mubr.msk.f32.mxu1 %vm4168_vm0, %v4166_v7 }
 0x81a   : > { %v1568_v44 = vpop.f32.mrb[12].mxu1 }
 0x81b   : > { %v3730_v45 = vpop.f32.mrb[13].mxu1  ;;  %3740 = vmatmul.mubr.msk.f32.vlgmr.msra.gmra.mrb[6].mxu0 %vm928_vm1, %v1568_v44  ;;  %v2020_v44 = vld [vmem:[%s5181_s10 + $0x60] sm:$0xff] }
 0x81c   : > { %3760 = vmatprep.mubr.msk.f32.mxu0 %vm4168_vm0, %v4166_v7  ;;  %v2022_v45 = vld [vmem:[%s5181_s10 + $0x70] sm:$0xff] }
 0x81e   : > { %v1720_v46 = vpop.f32.mrb[14].mxu1 }
 0x81f   : > { %v1724_v47 = vmul.f32 0.17677669, %v1720_v46  ;;  %v3746_v48 = vpop.f32.mrb[15].mxu1  ;;  %v4000_v46 = vpack.c.bf16 %v2022_v45, %v2020_v44  ;;  %v2049_v45 = vrot.slane %v2040_v40, %v4476_v15 }
 0x821   : > { %v1725_v49 = vsel %vm1006_vm2, %v1724_v47, -inf }
 0x822   : > { %1726 = vmax.xlane.f32.xlu0 %v1725_v49 }
 0x838   : > { %1736 = vrot.lane.b32.xlu0 %v4500_v27, %s5196_s28  ;;  %v917_v27 = vld [vmem:[%s5213_s1 + $0x68] sm:$0xff]  ;;  %s5218_s28 = smov 64  }
 0x839   : > { %v3957_v58 = vpack.c.bf16 %v917_v27, %v916_v56  ;;  %v2024_v56 = vld [vmem:[%s5181_s10 + $0x80] sm:$0xff] }
 0x83b   : > { %3958 = vmatpush3.bf16.msra.mxu0 %v3957_v58  ;;  %v4004_v58 = vpack.c.bf16 %v2026_v57, %v2024_v56 }
 0x83c   : > { %3959 = vmatprep.subr.bf16.mxu0 %v4167_v8 }
 0x83f   : > { %3961 = vmatpush3.bf16.msra.mxu0 %v3960_v60  ;;  %v2031_v60 = vld [vmem:[%s5181_s10 + $0xb8] sm:$0xff] }
 0x840   : > { %3987 = vmatprep.subr.bf16.mxu0 %v3986_v16  ;;  %v2037_v16 = vld [vmem:[%s5181_s10 + $0xe8] sm:$0xff] }
 0x8af   : > { %v1727_v50 = vpop.xlane.xlu0 %1726 }
 0x8b0   : > { %v1728_v51 = vsub.f32 %v1724_v47, %v1727_v50 }
 0x8b2   : > { %v1729_v52 = vmul.f32 1.442695, %v1728_v51  ;;  %v2025_v51 = vld [vmem:[%s5181_s10 + $0x88] sm:$0xff] }
 0x8b3   : > { %v1737_v53 = vpop.permute.xlu0 %1736 }
 0x8b4   : > { %4132 = vpow2.f32 %v1729_v52  ;;  %3748 = vmatpush3.msra.mxu1 %v1737_v53  ;;  %v2027_v52 = vld [vmem:[%s5181_s10 + $0x98] sm:$0xff] }
 0x8b5   : > { %3962 = vmatprep.subr.bf16.mxu1 %v4167_v8  ;;  %v4002_v53 = vpack.c.bf16 %v2027_v52, %v2025_v51 }
 0x8be   : > { %v4133_v54 = vpop.eup %4132 }
 0x8bf   : > { %v1731_v55 = vsel %vm1006_vm2, %v4133_v54, 0.0 }
 0x8c0   : > { %1732 = vadd.xlane.f32.xlu1 %v1731_v55  ;;  %v1922_v55 = vld [vmem:[%s5179_s8 + $0x38] sm:$0xff] }
 0x8ee   : > { %v1641_v61 = vpop.f32.mrb[6].mxu0 }
 0x8ef   : > { %v1645_v62 = vadd.f32 %v1641_v61, %v1405_v37  ;;  %v3741_v63 = vpop.f32.mrb[7].mxu0  ;;  %v2021_v37 = vld [vmem:[%s5181_s10 + $0x68] sm:$0xff]  ;;  %v4006_v61 = vpack.c.bf16 %v2031_v60, %v2029_v59  ;;  %v2123_v59 = vld [vmem:[%s5183_s12] sm:$0xff] }
 0x8f0   : > { %v3998_v42 = vpack.c.bf16 %v2023_v38, %v2021_v37  ;;  %v1924_v63 = vld [vmem:[%s5179_s8 + $0x48] sm:$0xff]  ;;  %v3477_v37 = vld [vmem:[%s5178_s7] ss:$0 sm:$0xff] }
 0x8f1   : > { %v2124_v60 = vld [vmem:[%s5183_s12 + $0x8] sm:$0xff] }
 0x94d   : > { %v1733_v0 = vpop.xlane.xlu1 %1732 }
 0x94e   : > { %4134 = vrcp.f32 %v1733_v0  ;;  %v2028_v0 = vld [vmem:[%s5181_s10 + $0xa0] sm:$0xff] }
 0x958   : > { %v4135_v1 = vpop.eup %4134 }
 0x959   : > { %v1735_v2 = vmul.f32 %v4135_v1, %v4133_v54  ;;  %v1921_v54 = vld [vmem:[%s5179_s8 + $0x30] sm:$0xff] }
 0x95a   : > { %v3972_v27 = vpack.c.bf16 %v1922_v55, %v1921_v54 }
 0x95b   : > { %3750 = vmatmul.mubr.msk.f32.vlgmr.msra.gmra.mrb[16].mxu1 %vm1006_vm2, %v1735_v2  ;;  %v2030_v2 = vld [vmem:[%s5181_s10 + $0xb0] sm:$0xff] }
 0x95c   : > { %3795 = vmatprep.mubr.msk.f32.mxu1 %vm4168_vm0, %v4166_v7  ;;  %3964 = vmatpush3.bf16.msra.mxu1 %v3963_v26  ;;  %v4016_v26 = vpack.c.bf16 %v2038_v24, %v2036_v22  ;;  %v2127_v22 = vld [vmem:[%s5183_s12 + $0x20] sm:$0xff]  ;;  %v2128_v24 = vld [vmem:[%s5183_s12 + $0x28] sm:$0xff] }
 0x95d   : > { %3965 = vmatprep.subr.bf16.mxu1 %v4167_v8 }
 0x960   : > { %3967 = vmatpush3.bf16.msra.mxu1 %v3966_v23 }
 0x961   : > { %3968 = vmatprep.subr.bf16.mxu1 %v4167_v8 }
 0x964   : > { %3970 = vmatpush3.bf16.msra.mxu1 %v3969_v43 }
 0x965   : > { %3971 = vmatprep.subr.bf16.mxu1 %v4167_v8 }
 0x968   : > { %3973 = vmatpush3.bf16.msra.mxu1 %v3972_v27 }
 0x969   : > { %3974 = vmatprep.subr.bf16.mxu1 %v4167_v8 }
 0xa2e   : > { %v1808_v3 = vpop.f32.mrb[16].mxu1 }
 0xa2f   : > { %v3751_v4 = vpop.f32.mrb[17].mxu1  ;;  %3761 = vmatmul.mubr.msk.f32.vlgmr.msra.gmra.mrb[8].mxu0 %vm928_vm1, %v1808_v3  ;;  %v2033_v3 = vld [vmem:[%s5181_s10 + $0xc8] sm:$0xff] }
 0xa30   : > { %2116 = vmatprep.mubr.f32.mxu0 %v4166_v7  ;;  %3989 = vmatpush1.bf16.msra.mxu0 %v3988_v20  ;;  %v2035_v4 = vld [vmem:[%s5181_s10 + $0xd8] sm:$0xff]  ;;  %v1928_v20 = vld [vmem:[%s5179_s8 + $0x68] sm:$0xff] }
 0xb02   : > { %v1881_v5 = vpop.f32.mrb[8].mxu0 }
 0xb03   : > { %v1885_v9 = vadd.f32 %v1881_v5, %v1645_v62  ;;  %v3762_v10 = vpop.f32.mrb[9].mxu0  ;;  %v1923_v62 = vld [vmem:[%s5179_s8 + $0x40] sm:$0xff]  ;;  %v4008_v5 = vpack.c.bf16 %v2030_v2, %v2028_v0 }
 0xb04   : > { %v3975_v1 = vpack.c.bf16 %v1924_v63, %v1923_v62  ;;  %v1925_v10 = vld [vmem:[%s5179_s8 + $0x50] sm:$0xff]  ;;  %v4019_v62 = vpack.c.bf16 %v2124_v60, %v2123_v59  ;;  %v2126_v63 = vld [vmem:[%s5183_s12 + $0x18] sm:$0xff] }
 0xb05   : > { %v1886_v11 = vadd.f32 %v1885_v9, %v4456_v6  ;;  %v2013_v6 = vld [vmem:[%s5181_s10 + $0x28] sm:$0xff]  ;;  %v4010_v9 = vpack.c.bf16 %v2035_v4, %v2033_v3 }
 0xb06   : > { %v3990_v21 = vpack.c.bf16 %v2015_v19, %v2013_v6  ;;  %3976 = vmatpush3.bf16.msra.mxu1 %v3975_v1  ;;  %v4012_v6 = vpack.c.bf16 %v2034_v14, %v2032_v12  ;;  %v1927_v19 = vld [vmem:[%s5179_s8 + $0x60] sm:$0xff] }
 0xb07   : > { %1889 = vadd.xlane.f32.xlu0 %v1886_v11  ;;  %3977 = vmatprep.subr.bf16.mxu1 %v4167_v8  ;;  %v3981_v25 = vpack.c.bf16 %v1928_v20, %v1927_v19 }
 0xb08   : > { %3991 = vmatprep.subr.bf16.mxu0 %v3990_v21  ;;  %v4014_v21 = vpack.c.bf16 %v2039_v18, %v2037_v16 }
 0xb09   : > { %3993 = vmatpush1.bf16.msra.mxu0 %v3992_v31  ;;  %v697_v31 = vld [vmem:[%s691_s0] sm:$0xff] }
 0xb0a   : > { %3995 = vmatprep.subr.bf16.mxu0 %v3994_v34 }
 0xb0d   : > { %3997 = vmatpush1.bf16.msra.mxu0 %v3996_v41  ;;  %v2045_v41 = vrot.slane %v2040_v40, %v4481_v17 }
 0xb0e   : > { %3999 = vmatprep.subr.bf16.mxu0 %v3998_v42 }
 0xb11   : > { %4001 = vmatpush1.bf16.msra.mxu0 %v4000_v46  ;;  %v3478_v46 = vld [vmem:[%s5180_s9] ss:$0 sm:$0xff] }
 0xb12   : > { %4003 = vmatprep.subr.bf16.mxu0 %v4002_v53 }
 0xb15   : > { %4005 = vmatpush1.bf16.msra.mxu0 %v4004_v58 }
 0xb16   : > { %4007 = vmatprep.subr.bf16.mxu0 %v4006_v61  ;;  %v2125_v61 = vld [vmem:[%s5183_s12 + $0x10] sm:$0xff] }
 0xb17   : > { %v4022_v0 = vpack.c.bf16 %v2126_v63, %v2125_v61 }
 0xb19   : > { %4009 = vmatpush1.bf16.msra.mxu0 %v4008_v5 }
 0xb1a   : > { %4011 = vmatprep.subr.bf16.mxu0 %v4010_v9 }
 0xb1d   : > { %4013 = vmatpush1.bf16.msra.mxu0 %v4012_v6 }
 0xb1e   : > { %4015 = vmatprep.subr.bf16.mxu0 %v4014_v21 }
 0xb21   : > { %4017 = vmatpush1.bf16.msra.mxu0 %v4016_v26  ;;  %v4025_v26 = vpack.c.bf16 %v2128_v24, %v2127_v22 }
 0xb22   : > { %4018 = vmatprep.subr.bf16.mxu0 %v4167_v8 }
 0xb24   : > { %2117 = vmatmul.mubr.f32.vlgmr.msra.gmra.mrb[10].mxu0 %v697_v31 }
 0xb25   : > { %3816 = vmatprep.mubr.msk.f32.mxu0 %vm4168_vm0, %v4166_v7  ;;  %4020 = vmatpush3.bf16.msra.mxu0 %v4019_v62 }
 0xb26   : > { %4021 = vmatprep.subr.bf16.mxu0 %v4167_v8 }
 0xb29   : > { %4023 = vmatpush3.bf16.msra.mxu0 %v4022_v0 }
 0xb2a   : > { %4024 = vmatprep.subr.bf16.mxu0 %v4167_v8 }
 0xb94   : > { %v1890_v47 = vpop.xlane.xlu0 %1889 }
 0xb95   : > { %v1892_v48 = vmul.f32 0.0078125, %v1890_v47 }
 0xb97   : > { %v4695_v49 = vsub.f32 %v1886_v11, %v1892_v48  ;;  %v1926_v11 = vld [vmem:[%s5179_s8 + $0x58] sm:$0xff] }
 0xb98   : > { %v3978_v13 = vpack.c.bf16 %v1926_v11, %v1925_v10 }
 0xb99   : > { %v1894_v50 = vmul.f32 %v4695_v49, %v4695_v49 }
 0xb9a   : > { %3979 = vmatpush3.bf16.msra.mxu1 %v3978_v13 }
 0xb9b   : > { %1895 = vadd.xlane.f32.xlu1 %v1894_v50  ;;  %3980 = vmatprep.subr.bf16.mxu1 %v4167_v8 }
 0xb9e   : > { %3982 = vmatpush3.bf16.msra.mxu1 %v3981_v25  ;;  %v2129_v25 = vld [vmem:[%s5183_s12 + $0x30] sm:$0xff] }
 0xb9f   : > { %3983 = vmatprep.subr.bf16.mxu1 %v4167_v8  ;;  %v4028_v29 = vpack.c.bf16 %v2130_v28, %v2129_v25 }
 0xba2   : > { %3985 = vmatpush3.bf16.msra.mxu1 %v3984_v30 }
 0xba3   : > { %3798 = vmatprep.subr.mxu1 %v4166_v7 }
 0xbf7   : > { %v2118_v42 = vpop.f32.mrb[10].mxu0 }
 0xbf8   : > { %v4805_v43 = vadd.f32 %v2118_v42, %v2045_v41  ;;  %v2120_v44 = vpop.f32.mrb[11].mxu0 }
 0xbf9   : > { %v4816_v50 = vadd.f32 %v2120_v44, %v2049_v45 }
 0xc28   : > { %v1896_v32 = vpop.xlane.xlu1 %1895 }
 0xc29   : > { %v1897_v33 = vmul.f32 0.0078125, %v1896_v32 }
 0xc2b   : > { %v1898_v34 = vadd.f32 1e-05, %v1897_v33 }
 0xc2d   : > { %4136 = vrsqrt.f32 %v1898_v34 }
 0xc37   : > { %v4137_v23 = vpop.eup %4136 }
 0xc38   : > { %v1900_v36 = vmul.f32 %v4137_v23, %v4695_v49 }
 0xc3a   : > { %v1907_v38 = vmul.f32 %v3476_v35, %v1900_v36 }
 0xc3c   : > { %v4796_v39 = vadd.f32 %v3477_v37, %v1907_v38 }
 0xc3e   : > { %3796 = vmatmul.mubr.f32.vlgmr.msra.gmra.mrb[18].mxu1 %v4796_v39 }
 0xc3f   : > { %3800 = vmatprep.mubr.msk.f32.mxu1 %vm4168_vm0, %v4166_v7  ;;  %3799 = vmatpush3.xpose.msk.msra.mxu1 %vm928_vm1, %v4805_v43 }
 0xc40   : > { %3803 = vmatprep.subr.mxu1 %v4166_v7 }
 0xd11   : > { %v2004_v47 = vpop.f32.mrb[18].mxu1 }
 0xd12   : > { %v4814_v48 = vadd.f32 %v3478_v46, %v2004_v47  ;;  %v3797_v49 = vpop.f32.mrb[19].mxu1 }
 0xd14   : > { %2382 = vrot.lane.b32.xlu0 %v4814_v48, %s5217_s29  ;;  %3801 = vmatmul.mubr.msk.f32.vlgmr.msra.gmra.mrb[20].mxu1 %vm928_vm1, %v4814_v48 }
 0xd15   : > { %3804 = vmatpush3.msra.mxu1 %v4816_v50  ;;  %3805 = vmatprep.mubr.msk.f32.mxu1 %vm4168_vm0, %v4166_v7 }
 0xd16   : > { %3819 = vmatprep.subr.mxu1 %v4166_v7 }
 0xd86   : > { %v2383_v5 = vpop.permute.xlu0 %2382 }
 0xde7   : > { %v2219_v51 = vpop.f32.mrb[20].mxu1 }
 0xde8   : > { %v2223_v52 = vmul.f32 0.17677669, %v2219_v51  ;;  %v3802_v53 = vpop.f32.mrb[21].mxu1 }
 0xde9   : > { %v2133_v53 = vld [vmem:[%s5183_s12 + $0x50] sm:$0xff] }
 0xdea   : > { %v2224_v54 = vsel %vm1006_vm2, %v2223_v52, -inf }
 0xdeb   : > { %2225 = vmax.xlane.f32.xlu1 %v2224_v54 }
 0xe78   : > { %v2226_v55 = vpop.xlane.xlu1 %2225 }
 0xe79   : > { %v2227_v56 = vsub.f32 %v2223_v52, %v2226_v55  ;;  %v2131_v52 = vld [vmem:[%s5183_s12 + $0x40] sm:$0xff]  ;;  %v2134_v55 = vld [vmem:[%s5183_s12 + $0x58] sm:$0xff] }
 0xe7b   : > { %v2228_v27 = vmul.f32 1.442695, %v2227_v56  ;;  %v4034_v56 = vpack.c.bf16 %v2134_v55, %v2133_v53 }
 0xe7d   : > { %4138 = vpow2.f32 %v2228_v27 }
 0xe87   : > { %v4139_v57 = vpop.eup %4138 }
 0xe88   : > { %v2230_v58 = vsel %vm1006_vm2, %v4139_v57, 0.0 }
 0xe89   : > { %2231 = vadd.xlane.f32.xlu1 %v2230_v58 }
 0xe9a   : > { %2384 = vrot.lane.b32.xlu1 %v4805_v43, %s5217_s29 }
 0xf16   : > { %v2232_v1 = vpop.xlane.xlu1 %2231 }
 0xf17   : > { %4140 = vrcp.f32 %v2232_v1 }
 0xf1a   : > { %v2385_v4 = vpop.permute.xlu1 %2384 }
 0xf21   : > { %v4141_v2 = vpop.eup %4140 }
 0xf22   : > { %v2234_v3 = vmul.f32 %v4141_v2, %v4139_v57 }
 0xf24   : > { %3806 = vmatmul.mubr.msk.f32.vlgmr.msra.gmra.mrb[22].mxu1 %vm1006_vm2, %v2234_v3 }
 0xf25   : > { %3820 = vmatpush3.xpose.msk.msra.mxu1 %vm928_vm1, %v2385_v4  ;;  %3821 = vmatprep.mubr.msk.f32.mxu1 %vm4168_vm0, %v4166_v7 }
 0xf26   : > { %3824 = vmatprep.subr.mxu1 %v4166_v7 }
 0xf28   : > { %3822 = vmatmul.mubr.msk.f32.vlgmr.msra.gmra.mrb[24].mxu1 %vm928_vm1, %v2383_v5 }
 0xf29   : > { %3826 = vmatprep.mubr.msk.f32.mxu1 %vm4168_vm0, %v4166_v7 }
 0xff7   : > { %v2304_v9 = vpop.f32.mrb[22].mxu1 }
 0xff8   : > { %v3807_v10 = vpop.f32.mrb[23].mxu1  ;;  %3817 = vmatmul.mubr.msk.f32.vlgmr.msra.gmra.mrb[12].mxu0 %vm928_vm1, %v2304_v9 }
 0xff9   : > { %3837 = vmatprep.mubr.msk.f32.mxu0 %vm4168_vm0, %v4166_v7  ;;  %4026 = vmatpush3.bf16.msra.mxu0 %v4025_v26 }
 0xffa   : > { %4027 = vmatprep.subr.bf16.mxu0 %v4167_v8 }
 0xffb   : > { %v2456_v11 = vpop.f32.mrb[24].mxu1 }
 0xffc   : > { %v2460_v12 = vmul.f32 0.17677669, %v2456_v11  ;;  %v3823_v13 = vpop.f32.mrb[25].mxu1 }
 0xffd   : > { %4029 = vmatpush3.bf16.msra.mxu0 %v4028_v29 }
 0xffe   : > { %v2461_v14 = vsel %vm1006_vm2, %v2460_v12, -inf  ;;  %4030 = vmatprep.subr.bf16.mxu0 %v4167_v8 }
 0xfff   : > { %2462 = vmax.xlane.f32.xlu1 %v2461_v14 }
0x1010   : > { %2473 = vrot.lane.b32.xlu1 %v4816_v50, %s5217_s29 }
0x1014   : > { %2623 = vrot.lane.b32.xlu1 %v4814_v48, %s5218_s28 }
0x108c   : > { %v2463_v16 = vpop.xlane.xlu1 %2462 }
0x108d   : > { %v2464_v18 = vsub.f32 %v2460_v12, %v2463_v16 }
0x108f   : > { %v2465_v6 = vmul.f32 1.442695, %v2464_v18  ;;  %v2135_v18 = vld [vmem:[%s5183_s12 + $0x60] sm:$0xff] }
0x1090   : > { %v2474_v19 = vpop.permute.xlu1 %2473 }
0x1091   : > { %4142 = vpow2.f32 %v2465_v6  ;;  %3825 = vmatpush3.msra.mxu1 %v2474_v19  ;;  %v2136_v6 = vld [vmem:[%s5183_s12 + $0x68] sm:$0xff] }
0x1092   : > { %3840 = vmatprep.subr.mxu1 %v4166_v7  ;;  %v4037_v19 = vpack.c.bf16 %v2136_v6, %v2135_v18  ;;  %v3157_v18 = vld [vmem:[%s5187_s16 + $0xd0] sm:$0xff]  ;;  %v3160_v6 = vld [vmem:[%s5187_s16 + $0xe8] sm:$0xff] }
0x1094   : > { %v2624_v35 = vpop.permute.xlu1 %2623 }
0x109b   : > { %v4143_v20 = vpop.eup %4142 }
0x109c   : > { %v2467_v21 = vsel %vm1006_vm2, %v4143_v20, 0.0 }
0x109d   : > { %2468 = vadd.xlane.f32.xlu0 %v2467_v21 }
0x10b3   : > { %2625 = vrot.lane.b32.xlu0 %v4805_v43, %s5218_s28 }
0x10cb   : > { %v2377_v30 = vpop.f32.mrb[12].mxu0 }
0x10cc   : > { %v3818_v31 = vpop.f32.mrb[13].mxu0 }
0x112a   : > { %v2469_v32 = vpop.xlane.xlu0 %2468 }
0x112b   : > { %4144 = vrcp.f32 %v2469_v32 }
0x112e   : > { %v2626_v23 = vpop.permute.xlu0 %2625 }
0x1135   : > { %v4145_v33 = vpop.eup %4144 }
0x1136   : > { %v2471_v34 = vmul.f32 %v4145_v33, %v4143_v20  ;;  %v2138_v20 = vld [vmem:[%s5183_s12 + $0x78] sm:$0xff] }
0x1138   : > { %3827 = vmatmul.mubr.msk.f32.vlgmr.msra.gmra.mrb[26].mxu1 %vm1006_vm2, %v2471_v34 }
0x1139   : > { %3841 = vmatpush3.xpose.msk.msra.mxu1 %vm928_vm1, %v2626_v23  ;;  %3842 = vmatprep.mubr.msk.f32.mxu1 %vm4168_vm0, %v4166_v7  ;;  %v3132_v23 = vld [vmem:[%s5187_s16 + $0x8] sm:$0xff] }
0x113a   : > { %3845 = vmatprep.subr.mxu1 %v4166_v7 }
0x113c   : > { %3843 = vmatmul.mubr.msk.f32.vlgmr.msra.gmra.mrb[28].mxu1 %vm928_vm1, %v2624_v35  ;;  %v3134_v35 = vld [vmem:[%s5187_s16 + $0x18] sm:$0xff] }
0x113d   : > { %3847 = vmatprep.mubr.msk.f32.mxu1 %vm4168_vm0, %v4166_v7 }
0x120b   : > { %v2545_v36 = vpop.f32.mrb[26].mxu1 }
0x120c   : > { %v3828_v37 = vpop.f32.mrb[27].mxu1  ;;  %3838 = vmatmul.mubr.msk.f32.vlgmr.msra.gmra.mrb[14].mxu0 %vm928_vm1, %v2545_v36  ;;  %v4042_v36 = vpack.c.bf16 %v3134_v35, %v3132_v23  ;;  %v3251_v23 = vld [vmem:[%s5189_s18 + $0x18] sm:$0xff]  ;;  %v3268_v35 = vld [vmem:[%s5189_s18 + $0xa0] sm:$0xff] }
0x120d   : > { %3858 = vmatprep.mubr.msk.f32.mxu0 %vm4168_vm0, %v4166_v7  ;;  %v3133_v37 = vld [vmem:[%s5187_s16 + $0x10] sm:$0xff] }
0x120f   : > { %v2697_v38 = vpop.f32.mrb[28].mxu1 }
0x1210   : > { %v2701_v40 = vmul.f32 0.17677669, %v2697_v38  ;;  %v3844_v41 = vpop.f32.mrb[29].mxu1  ;;  %v3138_v38 = vld [vmem:[%s5187_s16 + $0x38] sm:$0xff] }
0x1212   : > { %v2702_v42 = vsel %vm1006_vm2, %v2701_v40, -inf }
0x1213   : > { %2703 = vmax.xlane.f32.xlu1 %v2702_v42  ;;  %v3135_v42 = vld [vmem:[%s5187_s16 + $0x20] sm:$0xff] }
0x1224   : > { %2713 = vrot.lane.b32.xlu1 %v4816_v50, %s5218_s28 }
0x1228   : > { %2863 = vrot.lane.b32.xlu1 %v4814_v48, %s5219_s27  ;;  %v2132_v48 = vld [vmem:[%s5183_s12 + $0x48] sm:$0xff] }
0x1229   : > { %v4031_v54 = vpack.c.bf16 %v2132_v48, %v2131_v52  ;;  %v3141_v52 = vld [vmem:[%s5187_s16 + $0x50] sm:$0xff] }
0x122b   : > { %4032 = vmatpush3.bf16.msra.mxu0 %v4031_v54 }
0x122c   : > { %4033 = vmatprep.subr.bf16.mxu0 %v4167_v8 }
0x122f   : > { %4035 = vmatpush3.bf16.msra.mxu0 %v4034_v56 }
0x1230   : > { %4036 = vmatprep.subr.bf16.mxu0 %v4167_v8 }
0x12a0   : > { %v2704_v44 = vpop.xlane.xlu1 %2703 }
0x12a1   : > { %v2705_v45 = vsub.f32 %v2701_v40, %v2704_v44  ;;  %v3137_v44 = vld [vmem:[%s5187_s16 + $0x30] sm:$0xff] }
0x12a3   : > { %v2706_v46 = vmul.f32 1.442695, %v2705_v45  ;;  %v3140_v45 = vld [vmem:[%s5187_s16 + $0x48] sm:$0xff] }
0x12a4   : > { %v2714_v47 = vpop.permute.xlu1 %2713 }
0x12a5   : > { %4146 = vpow2.f32 %v2706_v46  ;;  %3846 = vmatpush3.msra.mxu1 %v2714_v47  ;;  %v3142_v46 = vld [vmem:[%s5187_s16 + $0x58] sm:$0xff]  ;;  %v4048_v47 = vpack.c.bf16 %v3137_v44, %v3135_v42 }
0x12a6   : > { %3861 = vmatprep.subr.mxu1 %v4166_v7 }
0x12a8   : > { %v2864_v0 = vpop.permute.xlu1 %2863 }
0x12af   : > { %v4147_v49 = vpop.eup %4146 }
0x12b0   : > { %v2708_v51 = vsel %vm1006_vm2, %v4147_v49, 0.0 }
0x12b1   : > { %2709 = vadd.xlane.f32.xlu0 %v2708_v51  ;;  %v3139_v51 = vld [vmem:[%s5187_s16 + $0x40] sm:$0xff] }
0x12b2   : > { %v4052_v48 = vpack.c.bf16 %v3141_v52, %v3139_v51 }
0x12c7   : > { %2865 = vrot.lane.b32.xlu0 %v4805_v43, %s5219_s27  ;;  %v3479_v43 = vld [vmem:[%s5184_s13] ss:$0 sm:$0xff] }
0x12c8   : > { %v2381_v27 = vadd.f32 %v3479_v43, %v2377_v30  ;;  %v3144_v43 = vld [vmem:[%s5187_s16 + $0x68] sm:$0xff] }
0x12df   : > { %v2618_v57 = vpop.f32.mrb[14].mxu0 }
0x12e0   : > { %v2622_v58 = vadd.f32 %v2618_v57, %v2381_v27  ;;  %v3839_v59 = vpop.f32.mrb[15].mxu0  ;;  %v3146_v27 = vld [vmem:[%s5187_s16 + $0x78] sm:$0xff] }
0x12e1   : > { %v4054_v57 = vpack.c.bf16 %v3146_v27, %v3144_v43  ;;  %v3145_v59 = vld [vmem:[%s5187_s16 + $0x70] sm:$0xff] }
0x133e   : > { %v2710_v60 = vpop.xlane.xlu0 %2709 }
0x133f   : > { %4148 = vrcp.f32 %v2710_v60 }
0x1342   : > { %v2866_v63 = vpop.permute.xlu0 %2865 }
0x1349   : > { %v4149_v61 = vpop.eup %4148 }
0x134a   : > { %v2712_v62 = vmul.f32 %v4149_v61, %v4147_v49  ;;  %v4050_v49 = vpack.c.bf16 %v3142_v46, %v3140_v45  ;;  %v3148_v61 = vld [vmem:[%s5187_s16 + $0x88] sm:$0xff]  ;;  %v3254_v45 = vld [vmem:[%s5189_s18 + $0x30] sm:$0xff]  ;;  %v3255_v46 = vld [vmem:[%s5189_s18 + $0x38] sm:$0xff] }
0x134b   : > { %v4088_v51 = vpack.c.bf16 %v3255_v46, %v3254_v45 }
0x134c   : > { %3848 = vmatmul.mubr.msk.f32.vlgmr.msra.gmra.mrb[30].mxu1 %vm1006_vm2, %v2712_v62  ;;  %v3150_v62 = vld [vmem:[%s5187_s16 + $0x98] sm:$0xff] }
0x134d   : > { %3862 = vmatpush3.xpose.msk.msra.mxu1 %vm928_vm1, %v2866_v63  ;;  %3863 = vmatprep.mubr.msk.f32.mxu1 %vm4168_vm0, %v4166_v7  ;;  %v4058_v63 = vpack.c.bf16 %v3150_v62, %v3148_v61 }
0x134e   : > { %3866 = vmatprep.subr.mxu1 %v4166_v7 }
0x1350   : > { %3864 = vmatmul.mubr.msk.f32.vlgmr.msra.gmra.mrb[32].mxu1 %vm928_vm1, %v2864_v0  ;;  %v3147_v0 = vld [vmem:[%s5187_s16 + $0x80] sm:$0xff] }
0x1351   : > { %3868 = vmatprep.mubr.msk.f32.mxu1 %vm4168_vm0, %v4166_v7 }
0x141f   : > { %v2785_v1 = vpop.f32.mrb[30].mxu1 }
0x1420   : > { %v3849_v2 = vpop.f32.mrb[31].mxu1  ;;  %3859 = vmatmul.mubr.msk.f32.vlgmr.msra.gmra.mrb[16].mxu0 %vm928_vm1, %v2785_v1  ;;  %v3149_v1 = vld [vmem:[%s5187_s16 + $0x90] sm:$0xff] }
0x1421   : > { %3879 = vmatprep.mubr.msk.f32.mxu0 %vm4168_vm0, %v4166_v7  ;;  %4038 = vmatpush3.bf16.msra.mxu0 %v4037_v19  ;;  %v3152_v2 = vld [vmem:[%s5187_s16 + $0xa8] sm:$0xff] }
0x1422   : > { %4039 = vmatprep.subr.bf16.mxu0 %v4167_v8 }
0x1423   : > { %v2937_v3 = vpop.f32.mrb[32].mxu1 }
0x1424   : > { %v2941_v4 = vmul.f32 0.17677669, %v2937_v3  ;;  %v3865_v5 = vpop.f32.mrb[33].mxu1  ;;  %v4060_v3 = vpack.c.bf16 %v3149_v1, %v3147_v0 }
0x1425   : > { %v3151_v5 = vld [vmem:[%s5187_s16 + $0xa0] sm:$0xff] }
0x1426   : > { %v2942_v9 = vsel %vm1006_vm2, %v2941_v4, -inf }
0x1427   : > { %2943 = vmax.xlane.f32.xlu1 %v2942_v9  ;;  %v3153_v9 = vld [vmem:[%s5187_s16 + $0xb0] sm:$0xff] }
0x1438   : > { %2953 = vrot.lane.b32.xlu1 %v4816_v50, %s5219_s27  ;;  %v2137_v50 = vld [vmem:[%s5183_s12 + $0x70] sm:$0xff] }
0x1439   : > { %v4040_v21 = vpack.c.bf16 %v2138_v20, %v2137_v50  ;;  %v3162_v50 = vld [vmem:[%s5187_s16 + $0xf8] sm:$0xff] }
0x143a   : > { %v4070_v20 = vpack.c.bf16 %v3162_v50, %v3160_v6  ;;  %v3263_v6 = vld [vmem:[%s5189_s18 + $0x78] sm:$0xff] }
0x143b   : > { %4041 = vmatpush3.bf16.msra.mxu0 %v4040_v21  ;;  %v3159_v21 = vld [vmem:[%s5187_s16 + $0xe0] sm:$0xff] }
0x14b4   : > { %v2944_v10 = vpop.xlane.xlu1 %2943 }
0x14b5   : > { %v2945_v11 = vsub.f32 %v2941_v4, %v2944_v10  ;;  %v3154_v4 = vld [vmem:[%s5187_s16 + $0xb8] sm:$0xff] }
0x14b6   : > { %v4062_v10 = vpack.c.bf16 %v3154_v4, %v3152_v2 }
0x14b7   : > { %v2946_v12 = vmul.f32 1.442695, %v2945_v11  ;;  %v3156_v11 = vld [vmem:[%s5187_s16 + $0xc8] sm:$0xff] }
0x14b8   : > { %v2954_v13 = vpop.permute.xlu1 %2953 }
0x14b9   : > { %4150 = vpow2.f32 %v2946_v12  ;;  %3867 = vmatpush3.msra.mxu1 %v2954_v13  ;;  %v3158_v12 = vld [vmem:[%s5187_s16 + $0xd8] sm:$0xff]  ;;  %v4064_v13 = vpack.c.bf16 %v3153_v9, %v3151_v5  ;;  %v3497_v5 = vld [vmem:[%s5186_s15] ss:$0 sm:$0xff] }
0x14ba   : > { %4043 = vmatprep.subr.bf16.mxu1 %v4042_v36 }
0x14c3   : > { %v4151_v14 = vpop.eup %4150 }
0x14c4   : > { %v2948_v16 = vsel %vm1006_vm2, %v4151_v14, 0.0 }
0x14c5   : > { %2949 = vadd.xlane.f32.xlu0 %v2948_v16  ;;  %v3155_v16 = vld [vmem:[%s5187_s16 + $0xc0] sm:$0xff] }
0x14c6   : > { %v4068_v19 = vpack.c.bf16 %v3157_v18, %v3155_v16  ;;  %v3262_v18 = vld [vmem:[%s5189_s18 + $0x70] sm:$0xff] }
0x14c7   : > { %v4104_v50 = vpack.c.bf16 %v3263_v6, %v3262_v18 }
0x14f3   : > { %v2858_v22 = vpop.f32.mrb[16].mxu0 }
0x14f4   : > { %v2862_v24 = vadd.f32 %v2858_v22, %v2622_v58  ;;  %v3860_v25 = vpop.f32.mrb[17].mxu0  ;;  %v3143_v58 = vld [vmem:[%s5187_s16 + $0x60] sm:$0xff]  ;;  %v3161_v22 = vld [vmem:[%s5187_s16 + $0xf0] sm:$0xff] }
0x14f5   : > { %v4056_v60 = vpack.c.bf16 %v3145_v59, %v3143_v58  ;;  %v3264_v25 = vld [vmem:[%s5189_s18 + $0x80] sm:$0xff]  ;;  %v3259_v58 = vld [vmem:[%s5189_s18 + $0x58] sm:$0xff] }
0x14f6   : > { %v3276_v59 = vld [vmem:[%s5189_s18 + $0xe0] sm:$0xff] }
0x1552   : > { %v2950_v26 = vpop.xlane.xlu0 %2949 }
0x1553   : > { %4152 = vrcp.f32 %v2950_v26  ;;  %v3265_v26 = vld [vmem:[%s5189_s18 + $0x88] sm:$0xff] }
0x155d   : > { %v4153_v28 = vpop.eup %4152 }
0x155e   : > { %v2952_v29 = vmul.f32 %v4153_v28, %v4151_v14  ;;  %v4066_v14 = vpack.c.bf16 %v3158_v12, %v3156_v11  ;;  %v3248_v28 = vld [vmem:[%s5189_s18] sm:$0xff]  ;;  %v3261_v12 = vld [vmem:[%s5189_s18 + $0x68] sm:$0xff] }
0x155f   : > { %v3260_v11 = vld [vmem:[%s5189_s18 + $0x60] sm:$0xff] }
0x1560   : > { %3869 = vmatmul.mubr.msk.f32.vlgmr.msra.gmra.mrb[34].mxu1 %vm1006_vm2, %v2952_v29  ;;  %v4074_v29 = vpack.c.bf16 %v3265_v26, %v3264_v25 }
0x1561   : > { %3239 = vmatprep.mubr.f32.mxu1 %v4166_v7  ;;  %v3131_v7 = vld [vmem:[%s5187_s16] sm:$0xff] }
0x1562   : > { %v4044_v40 = vpack.c.bf16 %v3133_v37, %v3131_v7  ;;  %4075 = vmatprep.subr.bf16.mxu0 %v4074_v29  ;;  %v3269_v7 = vld [vmem:[%s5189_s18 + $0xa8] sm:$0xff] }
0x1563   : > { %v4082_v37 = vpack.c.bf16 %v3269_v7, %v3268_v35 }
0x1564   : > { %4045 = vmatpush1.bf16.msra.mxu1 %v4044_v40  ;;  %v3270_v40 = vld [vmem:[%s5189_s18 + $0xb0] sm:$0xff] }
0x1633   : > { %v3025_v30 = vpop.f32.mrb[34].mxu1 }
0x1634   : > { %v3870_v31 = vpop.f32.mrb[35].mxu1  ;;  %3880 = vmatmul.mubr.msk.f32.vlgmr.msra.gmra.mrb[18].mxu0 %vm928_vm1, %v3025_v30  ;;  %v3249_v30 = vld [vmem:[%s5189_s18 + $0x8] sm:$0xff] }
0x1635   : > { %v3266_v31 = vld [vmem:[%s5189_s18 + $0x90] sm:$0xff] }
0x1707   : > { %v3098_v32 = vpop.f32.mrb[18].mxu0 }
0x1708   : > { %v3102_v33 = vadd.f32 %v3098_v32, %v2862_v24  ;;  %v3881_v34 = vpop.f32.mrb[19].mxu0  ;;  %v4072_v24 = vpack.c.bf16 %v3161_v22, %v3159_v21  ;;  %v3267_v32 = vld [vmem:[%s5189_s18 + $0x98] sm:$0xff] }
0x1709   : > { %v4078_v34 = vpack.c.bf16 %v3267_v32, %v3266_v31  ;;  %v3498_v31 = vld [vmem:[%s5190_s19] ss:$0 sm:$0xff] }
0x170a   : > { %v3103_v8 = vadd.f32 %v3102_v33, %v4796_v39  ;;  %v3136_v39 = vld [vmem:[%s5187_s16 + $0x28] sm:$0xff]  ;;  %v4076_v33 = vpack.c.bf16 %v3249_v30, %v3248_v28 }
0x170b   : > { %v4046_v41 = vpack.c.bf16 %v3138_v38, %v3136_v39  ;;  %v3252_v39 = vld [vmem:[%s5189_s18 + $0x20] sm:$0xff]  ;;  %v3253_v38 = vld [vmem:[%s5189_s18 + $0x28] sm:$0xff] }
0x170c   : > { %3106 = vadd.xlane.f32.xlu0 %v3103_v8  ;;  %4077 = vmatpush3.bf16.msra.mxu0 %v4076_v33  ;;  %v4084_v42 = vpack.c.bf16 %v3253_v38, %v3252_v39  ;;  %v3499_v38 = vld [vmem:[%s5191_s20] ss:$0 sm:$0xff] }
0x170d   : > { %4047 = vmatprep.subr.bf16.mxu1 %v4046_v41  ;;  %4079 = vmatprep.subr.bf16.mxu0 %v4078_v34  ;;  %v3271_v41 = vld [vmem:[%s5189_s18 + $0xb8] sm:$0xff] }
0x170e   : > { %4049 = vmatpush1.bf16.msra.mxu1 %v4048_v47  ;;  %v4086_v44 = vpack.c.bf16 %v3271_v41, %v3270_v40  ;;  %v3272_v47 = vld [vmem:[%s5189_s18 + $0xc0] sm:$0xff] }
0x170f   : > { %4051 = vmatprep.subr.bf16.mxu1 %v4050_v49  ;;  %v3273_v49 = vld [vmem:[%s5189_s18 + $0xc8] sm:$0xff]  ;;  %v3500_v41 = vld [vmem:[%s5192_s21] ss:$0 sm:$0xff] }
0x1710   : > { %v4090_v52 = vpack.c.bf16 %v3273_v49, %v3272_v47 }
0x1712   : > { %4053 = vmatpush1.bf16.msra.mxu1 %v4052_v48  ;;  %v3256_v48 = vld [vmem:[%s5189_s18 + $0x40] sm:$0xff] }
0x1713   : > { %4055 = vmatprep.subr.bf16.mxu1 %v4054_v57  ;;  %v3258_v57 = vld [vmem:[%s5189_s18 + $0x50] sm:$0xff] }
0x1714   : > { %v4096_v61 = vpack.c.bf16 %v3259_v58, %v3258_v57 }
0x1716   : > { %4057 = vmatpush1.bf16.msra.mxu1 %v4056_v60  ;;  %v3277_v60 = vld [vmem:[%s5189_s18 + $0xe8] sm:$0xff] }
0x1717   : > { %4059 = vmatprep.subr.bf16.mxu1 %v4058_v63  ;;  %v4098_v62 = vpack.c.bf16 %v3277_v60, %v3276_v59 }
0x171a   : > { %4061 = vmatpush1.bf16.msra.mxu1 %v4060_v3  ;;  %v3496_v3 = vld [vmem:[%s5185_s14] ss:$0 sm:$0xff] }
0x171b   : > { %4063 = vmatprep.subr.bf16.mxu1 %v4062_v10 }
0x171e   : > { %4065 = vmatpush1.bf16.msra.mxu1 %v4064_v13  ;;  %v4100_v13 = vpack.c.bf16 %v3261_v12, %v3260_v11 }
0x171f   : > { %4067 = vmatprep.subr.bf16.mxu1 %v4066_v14  ;;  %v3279_v14 = vld [vmem:[%s5189_s18 + $0xf8] sm:$0xff] }
0x1722   : > { %4069 = vmatpush1.bf16.msra.mxu1 %v4068_v19  ;;  %v3163_v19 = vld [vmem:[%s5188_s17] sm:$0x3] }
0x1723   : > { %4071 = vmatprep.subr.bf16.mxu1 %v4070_v20  ;;  %v3168_v20 = vrot.slane %v3163_v19, %v4481_v17  ;;  %v3172_v21 = vrot.slane %v3163_v19, %v4476_v15 }
0x1726   : > { %4073 = vmatpush1.bf16.msra.mxu1 %v4072_v24 }
0x1799   : > { %v3107_v53 = vpop.xlane.xlu0 %3106 }
0x179a   : > { %v3108_v54 = vmul.f32 0.0078125, %v3107_v53  ;;  %v3257_v53 = vld [vmem:[%s5189_s18 + $0x48] sm:$0xff] }
0x179b   : > { %v4092_v43 = vpack.c.bf16 %v3257_v53, %v3256_v48 }
0x179c   : > { %v4983_v55 = vsub.f32 %v3103_v8, %v3108_v54  ;;  %v3250_v8 = vld [vmem:[%s5189_s18 + $0x10] sm:$0xff] }
0x179d   : > { %v4080_v36 = vpack.c.bf16 %v3251_v23, %v3250_v8  ;;  %v3274_v54 = vld [vmem:[%s5189_s18 + $0xd0] sm:$0xff] }
0x179e   : > { %v3110_v56 = vmul.f32 %v4983_v55, %v4983_v55 }
0x179f   : > { %4081 = vmatpush3.bf16.msra.mxu0 %v4080_v36 }
0x17a0   : > { %3111 = vadd.xlane.f32.xlu0 %v3110_v56  ;;  %4083 = vmatprep.subr.bf16.mxu0 %v4082_v37  ;;  %v3275_v56 = vld [vmem:[%s5189_s18 + $0xd8] sm:$0xff] }
0x17a1   : > { %v4094_v27 = vpack.c.bf16 %v3275_v56, %v3274_v54 }
0x17a3   : > { %4085 = vmatpush3.bf16.msra.mxu0 %v4084_v42 }
0x17a4   : > { %4087 = vmatprep.subr.bf16.mxu0 %v4086_v44 }
0x17a7   : > { %4089 = vmatpush3.bf16.msra.mxu0 %v4088_v51 }
0x17a8   : > { %4091 = vmatprep.subr.bf16.mxu0 %v4090_v52 }
0x17ab   : > { %4093 = vmatpush3.bf16.msra.mxu0 %v4092_v43 }
0x17ac   : > { %4095 = vmatprep.subr.bf16.mxu0 %v4094_v27 }
0x17af   : > { %4097 = vmatpush3.bf16.msra.mxu0 %v4096_v61 }
0x17b0   : > { %4099 = vmatprep.subr.bf16.mxu0 %v4098_v62 }
0x17b3   : > { %4101 = vmatpush3.bf16.msra.mxu0 %v4100_v13 }
0x182d   : > { %v3112_v63 = vpop.xlane.xlu0 %3111 }
0x182e   : > { %v3113_v0 = vmul.f32 0.0078125, %v3112_v63 }
0x1830   : > { %v3114_v1 = vadd.f32 1e-05, %v3113_v0 }
0x1832   : > { %4154 = vrsqrt.f32 %v3114_v1 }
0x183c   : > { %v4155_v2 = vpop.eup %4154 }
0x183d   : > { %v3116_v4 = vmul.f32 %v4155_v2, %v4983_v55  ;;  %v3278_v55 = vld [vmem:[%s5189_s18 + $0xf0] sm:$0xff] }
0x183e   : > { %v4102_v16 = vpack.c.bf16 %v3279_v14, %v3278_v55 }
0x183f   : > { %v3123_v9 = vmul.f32 %v3496_v3, %v3116_v4 }
0x1840   : > { %4103 = vmatprep.subr.bf16.mxu0 %v4102_v16 }
0x1841   : > { %v3130_v10 = vadd.f32 %v3497_v5, %v3123_v9  ;;  %4105 = vmatpush3.bf16.msra.mxu0 %v4104_v50 }
0x1843   : > { %3240 = vmatmul.mubr.f32.vlgmr.msra.gmra.mrb[36].mxu1 %v3130_v10 }
0x1916   : > { %v3241_v22 = vpop.f32.mrb[36].mxu1 }
0x1917   : > { %v3242_v24 = vadd.f32 %v3241_v22, %v3168_v20  ;;  %v3243_v25 = vpop.f32.mrb[37].mxu1 }
0x1918   : > { %v3244_v26 = vadd.f32 %v3243_v25, %v3172_v21 }
0x1919   : > { %v3246_v29 = vmax.f32 %v3242_v24, 0.0 }
0x191a   : > { %v3247_v28 = vmax.f32 %v3244_v26, 0.0 }
0x191c   : > { %3351 = vmatprep.mubr.f32.mxu0 %v3247_v28 }
0x191d   : > { %3352 = vmatmul.mubr.f32.vlgmr.msra.gmra.mrb[20].mxu0 %v3246_v29 }
0x19f0   : > { %v3641_v30 = vpop.f32.mrb[20].mxu0 }
0x19f1   : > { %v3642_v32 = vpop.f32.mrb[21].mxu0 }
0x19f2   : > { %v3643_v33 = vadd.f32 %v3642_v32, %v3641_v30 }
0x19f4   : > { %v3354_v34 = vadd.f32 %v3643_v33, %v3498_v31 }
0x19f6   : > { %v3357_v8 = vadd.f32 %v3354_v34, %v3130_v10 }
0x19f8   : > { %3360 = vadd.xlane.f32.xlu0 %v3357_v8 }
0x1a85   : > { %v3361_v15 = vpop.xlane.xlu0 %3360 }
0x1a86   : > { %v3362_v17 = vmul.f32 0.0078125, %v3361_v15 }
0x1a88   : > { %v3363_v23 = vsub.f32 %v3357_v8, %v3362_v17 }
0x1a8a   : > { %v3364_v35 = vmul.f32 %v3363_v23, %v3363_v23 }
0x1a8c   : > { %3365 = vadd.xlane.f32.xlu0 %v3364_v35 }
0x1b19   : > { %v3366_v7 = vpop.xlane.xlu0 %3365 }
0x1b1a   : > { %v3367_v36 = vmul.f32 0.0078125, %v3366_v7 }
0x1b1c   : > { %v3368_v37 = vadd.f32 1e-05, %v3367_v36 }
0x1b1e   : > { %4156 = vrsqrt.f32 %v3368_v37 }
0x1b28   : > { %v4157_v39 = vpop.eup %4156 }
0x1b29   : > { %v3370_v40 = vmul.f32 %v4157_v39, %v3363_v23 }
0x1b2b   : > { %v3377_v42 = vmul.f32 %v3499_v38, %v3370_v40 }
0x1b2d   : > { %v3384_v44 = vadd.f32 %v3500_v41, %v3377_v42 }
0x1b2f   : > { %3385 = vst [vmem:[%s695_s5] sm:$0xff] %v3384_v44 }
0x1b30 PF: > { %s32_s3 = sadd.s32 1, %s4164_s3  }
0x1b31   : > { %p29_p4 = scmp.ge.s32.totalorder %s32_s3, 4  }
0x1b33   :  { %31 = sbr.rel (!%p29_p4) target bundleno = 8 (0x8), region = 141 }

// kernel: cnn_transformer_linear_forward.9
= control target key start
LH: loop header
LB: loop body
LE: loop exit
PB: predicated region body
PF: predicated region fallthrough
CT: control target
= control target key end

     0   :  { %16 = vsyncpa [#allocation3], 0  ;;  %v1965_v7 = vmov 0.0   ;;  %s3052_s0 = inlined_call_operand.vmem [shape: f32[2,256], index: 0, kind: input, shape index: {}]   ;;  %s3053_s1 = inlined_call_operand.vmem [shape: f32[2,128], index: 1, kind: input, shape index: {}]   ;;  %s3054_s2 = inlined_call_operand.vmem [shape: f32[256,10], index: 2, kind: input, shape index: {}]   ;;  %s3055_s3 = inlined_call_operand.vmem [shape: f32[1,10], index: 3, kind: input, shape index: {}]   ;;  %s3056_s4 = inlined_call_operand.vmem [shape: f32[10,1024], index: 4, kind: input, shape index: {}]   ;;  %s3057_s5 = inlined_call_operand.vmem [shape: f32[128,1024], index: 5, kind: input, shape index: {}]   ;;  %s3058_s6 = inlined_call_operand.vmem [shape: f32[1,1024], index: 6, kind: input, shape index: {}]   ;;  %s3059_s7 = inlined_call_operand.vmem [shape: f32[1024,10], index: 7, kind: input, shape index: {}]   ;;  %s3060_s8 = inlined_call_operand.vmem [shape: f32[1,10], index: 8, kind: input, shape index: {}]   ;;  %s3061_s9 = inlined_call_operand.hbm [shape: f32[2,10], index: 9, kind: output, shape index: {0}]   ;;  %s3062_s10 = inlined_call_operand.hbm [shape: f32[2,10], index: 10, kind: output, shape index: {1}]  }
   0x1   :  { %v53_v0 = vld [vmem:[%s3054_s2 + $0x80] sm:$0xff]  ;;  %v54_v1 = vld [vmem:[%s3054_s2 + $0x88] sm:$0xff]  ;;  %v55_v5 = vld [vmem:[%s3054_s2 + $0x90] sm:$0xff]  ;;  %366 = vmatprep.mubr.f32.mxu1 %v1965_v7 }
   0x2   :  { %v37_v2 = vld [vmem:[%s3054_s2] sm:$0xff]  ;;  %v1593_v3 = vpack.c.bf16 %v54_v1, %v53_v0  ;;  %v38_v4 = vld [vmem:[%s3054_s2 + $0x8] sm:$0xff]  ;;  %v56_v6 = vld [vmem:[%s3054_s2 + $0x98] sm:$0xff] }
   0x3   :  { %v1595_v8 = vpack.c.bf16 %v38_v4, %v37_v2  ;;  %v1597_v9 = vpack.c.bf16 %v56_v6, %v55_v5  ;;  %v39_v10 = vld [vmem:[%s3054_s2 + $0x10] sm:$0xff]  ;;  %v40_v11 = vld [vmem:[%s3054_s2 + $0x18] sm:$0xff]  ;;  %v57_v12 = vld [vmem:[%s3054_s2 + $0xa0] sm:$0xff] }
   0x4   :  { %1594 = vmatprep.subr.bf16.mxu0 %v1593_v3  ;;  %v58_v13 = vld [vmem:[%s3054_s2 + $0xa8] sm:$0xff]  ;;  %v1599_v14 = vpack.c.bf16 %v40_v11, %v39_v10  ;;  %v41_v16 = vld [vmem:[%s3054_s2 + $0x20] sm:$0xff]  ;;  %v59_v18 = vld [vmem:[%s3054_s2 + $0xb0] sm:$0xff] }
   0x5   :  { %1596 = vmatpush3.bf16.msra.mxu0 %v1595_v8  ;;  %v1601_v15 = vpack.c.bf16 %v58_v13, %v57_v12  ;;  %v42_v17 = vld [vmem:[%s3054_s2 + $0x28] sm:$0xff]  ;;  %v60_v19 = vld [vmem:[%s3054_s2 + $0xb8] sm:$0xff]  ;;  %v43_v22 = vld [vmem:[%s3054_s2 + $0x30] sm:$0xff] }
   0x6   :  { %1598 = vmatprep.subr.bf16.mxu0 %v1597_v9  ;;  %v1603_v20 = vpack.c.bf16 %v42_v17, %v41_v16  ;;  %v1605_v21 = vpack.c.bf16 %v60_v19, %v59_v18  ;;  %v44_v23 = vld [vmem:[%s3054_s2 + $0x38] sm:$0xff]  ;;  %v61_v24 = vld [vmem:[%s3054_s2 + $0xc0] sm:$0xff]  ;;  %v62_v25 = vld [vmem:[%s3054_s2 + $0xc8] sm:$0xff] }
   0x7   :  { %v2082_v26 = vld.sshfl [vmem:[%s3052_s0] sm:$0x33 pattern:$0x76325410]  ;;  %v46_v28 = vld [vmem:[%s3054_s2 + $0x48] sm:$0xff]  ;;  %v1607_v33 = vpack.c.bf16 %v44_v23, %v43_v22  ;;  %v1609_v38 = vpack.c.bf16 %v62_v25, %v61_v24  ;;  %v63_v44 = vld [vmem:[%s3054_s2 + $0xd0] sm:$0xff] }
   0x8   :  { %v45_v27 = vld [vmem:[%s3054_s2 + $0x40] sm:$0xff]  ;;  %v84_v29 = vcombine.high %v2082_v26, %v2082_v26  ;;  %v175_v30 = vld [vmem:[%s3057_s5 + $0x8] sm:$0xff]  ;;  %v64_v45 = vld [vmem:[%s3054_s2 + $0xd8] sm:$0xff] }
   0x9   :  { %1600 = vmatpush3.bf16.msra.mxu0 %v1599_v14  ;;  %v183_v31 = vld [vmem:[%s3057_s5 + $0x48] sm:$0xff]  ;;  %v174_v32 = vld [vmem:[%s3057_s5] sm:$0xff]  ;;  %v1611_v48 = vpack.c.bf16 %v46_v28, %v45_v27  ;;  %v47_v49 = vld [vmem:[%s3054_s2 + $0x50] sm:$0xff]  ;;  %v1613_v53 = vpack.c.bf16 %v64_v45, %v63_v44 }
   0xa   :  { %1602 = vmatprep.subr.bf16.mxu0 %v1601_v15  ;;  %v1625_v34 = vpack.c.bf16 %v183_v31, %v175_v30  ;;  %v182_v35 = vld [vmem:[%s3057_s5 + $0x40] sm:$0xff]  ;;  %v191_v36 = vld [vmem:[%s3057_s5 + $0x88] sm:$0xff]  ;;  %151 = vmatprep.mubr.f32.mxu0 %v84_v29  ;;  %v48_v54 = vld [vmem:[%s3054_s2 + $0x58] sm:$0xff] }
   0xb   :  { %v199_v37 = vld [vmem:[%s3057_s5 + $0xc8] sm:$0xff]  ;;  %v1627_v39 = vpack.c.bf16 %v182_v35, %v174_v32  ;;  %v190_v41 = vld [vmem:[%s3057_s5 + $0x80] sm:$0xff]  ;;  %v1615_v60 = vpack.c.bf16 %v48_v54, %v47_v49  ;;  %v67_v5 = vld [vmem:[%s3054_s2 + $0xf0] sm:$0xff] }
   0xc   :  { %v1629_v40 = vpack.c.bf16 %v199_v37, %v191_v36  ;;  %v198_v42 = vld [vmem:[%s3057_s5 + $0xc0] sm:$0xff]  ;;  %v207_v43 = vld [vmem:[%s3057_s5 + $0x108] sm:$0xff]  ;;  %1626 = vmatprep.subr.bf16.mxu1 %v1625_v34  ;;  %v68_v6 = vld [vmem:[%s3054_s2 + $0xf8] sm:$0xff] }
   0xd   :  { %1604 = vmatpush3.bf16.msra.mxu0 %v1603_v20  ;;  %v215_v46 = vld [vmem:[%s3057_s5 + $0x148] sm:$0xff]  ;;  %1628 = vmatpush1.bf16.msra.mxu1 %v1627_v39  ;;  %v1631_v47 = vpack.c.bf16 %v198_v42, %v190_v41  ;;  %v206_v51 = vld [vmem:[%s3057_s5 + $0x100] sm:$0xff]  ;;  %v51_v10 = vld [vmem:[%s3054_s2 + $0x70] sm:$0xff]  ;;  %v1621_v14 = vpack.c.bf16 %v68_v6, %v67_v5 }
   0xe   :  { %1606 = vmatprep.subr.bf16.mxu0 %v1605_v21  ;;  %1630 = vmatprep.subr.bf16.mxu1 %v1629_v40  ;;  %v1633_v50 = vpack.c.bf16 %v215_v46, %v207_v43  ;;  %v214_v52 = vld [vmem:[%s3057_s5 + $0x140] sm:$0xff]  ;;  %v223_v55 = vld [vmem:[%s3057_s5 + $0x188] sm:$0xff]  ;;  %v52_v15 = vld [vmem:[%s3054_s2 + $0x78] sm:$0xff] }
   0xf   :  { %v231_v56 = vld [vmem:[%s3057_s5 + $0x1c8] sm:$0xff]  ;;  %v65_v57 = vld [vmem:[%s3054_s2 + $0xe0] sm:$0xff]  ;;  %v1635_v59 = vpack.c.bf16 %v214_v52, %v206_v51  ;;  %v177_v18 = vld [vmem:[%s3057_s5 + $0x18] sm:$0xff]  ;;  %v1623_v21 = vpack.c.bf16 %v52_v15, %v51_v10 }
  0x10   :  { %v66_v58 = vld [vmem:[%s3054_s2 + $0xe8] sm:$0xff]  ;;  %v49_v61 = vld [vmem:[%s3054_s2 + $0x60] sm:$0xff]  ;;  %v1637_v62 = vpack.c.bf16 %v231_v56, %v223_v55  ;;  %v185_v19 = vld [vmem:[%s3057_s5 + $0x58] sm:$0xff] }
  0x11   :  { %1608 = vmatpush3.bf16.msra.mxu0 %v1607_v33  ;;  %1632 = vmatpush1.bf16.msra.mxu1 %v1631_v47  ;;  %v222_v63 = vld [vmem:[%s3057_s5 + $0x180] sm:$0xff]  ;;  %v1617_v1 = vpack.c.bf16 %v66_v58, %v65_v57  ;;  %v50_v2 = vld [vmem:[%s3054_s2 + $0x68] sm:$0xff]  ;;  %v176_v22 = vld [vmem:[%s3057_s5 + $0x10] sm:$0xff]  ;;  %v1657_v27 = vpack.c.bf16 %v185_v19, %v177_v18 }
  0x12   :  { %1610 = vmatprep.subr.bf16.mxu0 %v1609_v38  ;;  %1634 = vmatprep.subr.bf16.mxu1 %v1633_v50  ;;  %v230_v0 = vld [vmem:[%s3057_s5 + $0x1c0] sm:$0xff]  ;;  %v239_v3 = vld [vmem:[%s3057_s5 + $0x208] sm:$0xff]  ;;  %v1619_v9 = vpack.c.bf16 %v50_v2, %v49_v61  ;;  %v184_v28 = vld [vmem:[%s3057_s5 + $0x50] sm:$0xff] }
  0x13   :  { %v247_v4 = vld [vmem:[%s3057_s5 + $0x248] sm:$0xff]  ;;  %v1639_v8 = vpack.c.bf16 %v230_v0, %v222_v63  ;;  %v238_v12 = vld [vmem:[%s3057_s5 + $0x200] sm:$0xff]  ;;  %v193_v31 = vld [vmem:[%s3057_s5 + $0x98] sm:$0xff]  ;;  %v1659_v34 = vpack.c.bf16 %v184_v28, %v176_v22 }
  0x14   :  { %v1641_v11 = vpack.c.bf16 %v247_v4, %v239_v3  ;;  %v246_v13 = vld [vmem:[%s3057_s5 + $0x240] sm:$0xff]  ;;  %v255_v16 = vld [vmem:[%s3057_s5 + $0x288] sm:$0xff]  ;;  %v201_v32 = vld [vmem:[%s3057_s5 + $0xd8] sm:$0xff] }
  0x15   :  { %1612 = vmatpush3.bf16.msra.mxu0 %v1611_v48  ;;  %1636 = vmatpush1.bf16.msra.mxu1 %v1635_v59  ;;  %v263_v17 = vld [vmem:[%s3057_s5 + $0x2c8] sm:$0xff]  ;;  %v1643_v20 = vpack.c.bf16 %v246_v13, %v238_v12  ;;  %v254_v24 = vld [vmem:[%s3057_s5 + $0x280] sm:$0xff]  ;;  %v192_v35 = vld [vmem:[%s3057_s5 + $0x90] sm:$0xff]  ;;  %v1661_v39 = vpack.c.bf16 %v201_v32, %v193_v31 }
  0x16   :  { %1614 = vmatprep.subr.bf16.mxu0 %v1613_v53  ;;  %1638 = vmatprep.subr.bf16.mxu1 %v1637_v62  ;;  %v1645_v23 = vpack.c.bf16 %v263_v17, %v255_v16  ;;  %v262_v25 = vld [vmem:[%s3057_s5 + $0x2c0] sm:$0xff]  ;;  %v271_v29 = vld [vmem:[%s3057_s5 + $0x308] sm:$0xff]  ;;  %v200_v40 = vld [vmem:[%s3057_s5 + $0xd0] sm:$0xff] }
  0x17   :  { %v279_v30 = vld [vmem:[%s3057_s5 + $0x348] sm:$0xff]  ;;  %v1647_v33 = vpack.c.bf16 %v262_v25, %v254_v24  ;;  %v270_v37 = vld [vmem:[%s3057_s5 + $0x300] sm:$0xff]  ;;  %v209_v43 = vld [vmem:[%s3057_s5 + $0x118] sm:$0xff]  ;;  %v1663_v46 = vpack.c.bf16 %v200_v40, %v192_v35 }
  0x18   :  { %v1649_v36 = vpack.c.bf16 %v279_v30, %v271_v29  ;;  %v278_v38 = vld [vmem:[%s3057_s5 + $0x340] sm:$0xff]  ;;  %v287_v41 = vld [vmem:[%s3057_s5 + $0x388] sm:$0xff]  ;;  %v217_v44 = vld [vmem:[%s3057_s5 + $0x158] sm:$0xff] }
  0x19   :  { %1616 = vmatpush3.bf16.msra.mxu0 %v1615_v60  ;;  %1640 = vmatpush1.bf16.msra.mxu1 %v1639_v8  ;;  %v295_v42 = vld [vmem:[%s3057_s5 + $0x3c8] sm:$0xff]  ;;  %v1651_v45 = vpack.c.bf16 %v278_v38, %v270_v37  ;;  %v208_v47 = vld [vmem:[%s3057_s5 + $0x110] sm:$0xff]  ;;  %v286_v49 = vld [vmem:[%s3057_s5 + $0x380] sm:$0xff] }
  0x1a   :  { %1618 = vmatprep.subr.bf16.mxu0 %v1617_v1  ;;  %1642 = vmatprep.subr.bf16.mxu1 %v1641_v11  ;;  %v1653_v48 = vpack.c.bf16 %v295_v42, %v287_v41  ;;  %v294_v50 = vld [vmem:[%s3057_s5 + $0x3c0] sm:$0xff]  ;;  %v216_v51 = vld [vmem:[%s3057_s5 + $0x150] sm:$0xff]  ;;  %v179_v52 = vld [vmem:[%s3057_s5 + $0x28] sm:$0xff] }
  0x1b   :  { %v187_v53 = vld [vmem:[%s3057_s5 + $0x68] sm:$0xff]  ;;  %v225_v54 = vld [vmem:[%s3057_s5 + $0x198] sm:$0xff]  ;;  %v1655_v56 = vpack.c.bf16 %v294_v50, %v286_v49  ;;  %v1667_v57 = vpack.c.bf16 %v216_v51, %v208_v47  ;;  %v224_v58 = vld [vmem:[%s3057_s5 + $0x190] sm:$0xff] }
  0x1c   :  { %v233_v55 = vld [vmem:[%s3057_s5 + $0x1d8] sm:$0xff]  ;;  %v1689_v59 = vpack.c.bf16 %v187_v53, %v179_v52  ;;  %v178_v60 = vld [vmem:[%s3057_s5 + $0x20] sm:$0xff]  ;;  %v232_v63 = vld [vmem:[%s3057_s5 + $0x1d0] sm:$0xff] }
  0x1d   :  { %1620 = vmatpush3.bf16.msra.mxu0 %v1619_v9  ;;  %1644 = vmatpush1.bf16.msra.mxu1 %v1643_v20  ;;  %v186_v61 = vld [vmem:[%s3057_s5 + $0x60] sm:$0xff]  ;;  %v1669_v62 = vpack.c.bf16 %v233_v55, %v225_v54  ;;  %v195_v0 = vld [vmem:[%s3057_s5 + $0xa8] sm:$0xff]  ;;  %v241_v2 = vld [vmem:[%s3057_s5 + $0x218] sm:$0xff]  ;;  %v1671_v6 = vpack.c.bf16 %v232_v63, %v224_v58 }
  0x1e   :  { %1622 = vmatprep.subr.bf16.mxu0 %v1621_v14  ;;  %1646 = vmatprep.subr.bf16.mxu1 %v1645_v23  ;;  %v203_v1 = vld [vmem:[%s3057_s5 + $0xe8] sm:$0xff]  ;;  %v249_v3 = vld [vmem:[%s3057_s5 + $0x258] sm:$0xff]  ;;  %v2301_v4 = vld [vmem:[%s3053_s1] sm:$0x3]  ;;  %v1691_v5 = vpack.c.bf16 %v186_v61, %v178_v60 }
  0x1f   :  { %v240_v8 = vld [vmem:[%s3057_s5 + $0x210] sm:$0xff]  ;;  %v1693_v9 = vpack.c.bf16 %v203_v1, %v195_v0  ;;  %v194_v10 = vld [vmem:[%s3057_s5 + $0xa0] sm:$0xff]  ;;  %v1673_v12 = vpack.c.bf16 %v249_v3, %v241_v2  ;;  %v211_v14 = vld [vmem:[%s3057_s5 + $0x128] sm:$0xff] }
  0x20   :  { %v202_v11 = vld [vmem:[%s3057_s5 + $0xe0] sm:$0xff]  ;;  %v248_v13 = vld [vmem:[%s3057_s5 + $0x250] sm:$0xff]  ;;  %v219_v15 = vld [vmem:[%s3057_s5 + $0x168] sm:$0xff] }
  0x21   :  { %1624 = vmatpush3.bf16.msra.mxu0 %v1623_v21  ;;  %1648 = vmatpush1.bf16.msra.mxu1 %v1647_v33  ;;  %v257_v16 = vld [vmem:[%s3057_s5 + $0x298] sm:$0xff]  ;;  %v1695_v18 = vpack.c.bf16 %v202_v11, %v194_v10  ;;  %v256_v19 = vld [vmem:[%s3057_s5 + $0x290] sm:$0xff]  ;;  %v1675_v20 = vpack.c.bf16 %v248_v13, %v240_v8  ;;  %v1697_v21 = vpack.c.bf16 %v219_v15, %v211_v14  ;;  %v210_v22 = vld [vmem:[%s3057_s5 + $0x120] sm:$0xff] }
  0x22   :  { %1658 = vmatprep.subr.bf16.mxu0 %v1657_v27  ;;  %1650 = vmatprep.subr.bf16.mxu1 %v1649_v36  ;;  %v265_v17 = vld [vmem:[%s3057_s5 + $0x2d8] sm:$0xff]  ;;  %v218_v23 = vld [vmem:[%s3057_s5 + $0x160] sm:$0xff] }
  0x24   :  { %152 = vmatmul.mubr.f32.vlgmr.msra.gmra.mrb[0].mxu0 %v2082_v26  ;;  %v1665_v26 = vpack.c.bf16 %v217_v44, %v209_v43 }
  0x25   :  { %1660 = vmatpush1.bf16.msra.mxu0 %v1659_v34  ;;  %437 = vmatprep.mubr.f32.mxu0 %v1965_v7 }
  0x26   :  { %1662 = vmatprep.subr.bf16.mxu0 %v1661_v39  ;;  %1652 = vmatpush1.bf16.msra.mxu1 %v1651_v45 }
  0x27   :  { %1654 = vmatprep.subr.bf16.mxu1 %v1653_v48 }
  0x29   :  { %1664 = vmatpush1.bf16.msra.mxu0 %v1663_v46 }
  0x2a   :  { %1666 = vmatprep.subr.bf16.mxu0 %v1665_v26  ;;  %1656 = vmatpush1.bf16.msra.mxu1 %v1655_v56 }
  0x2b   :  { %1690 = vmatprep.subr.bf16.mxu1 %v1689_v59 }
  0x2d   :  { %1668 = vmatpush1.bf16.msra.mxu0 %v1667_v57  ;;  %367 = vmatmul.mubr.f32.vlgmr.msra.gmra.mrb[0].mxu1 %v2301_v4 }
  0x2e   :  { %1670 = vmatprep.subr.bf16.mxu0 %v1669_v62  ;;  %1692 = vmatpush1.bf16.msra.mxu1 %v1691_v5 }
  0x2f   :  { %508 = vmatprep.mubr.f32.mxu1 %v1965_v7  ;;  %1694 = vmatprep.subr.bf16.mxu1 %v1693_v9 }
  0x31   :  { %1672 = vmatpush1.bf16.msra.mxu0 %v1671_v6 }
  0x32   :  { %17 = vsyncpa [#allocation5], 0  ;;  %1674 = vmatprep.subr.bf16.mxu0 %v1673_v12  ;;  %v1677_v24 = vpack.c.bf16 %v265_v17, %v257_v16  ;;  %v264_v25 = vld [vmem:[%s3057_s5 + $0x2d0] sm:$0xff]  ;;  %v227_v27 = vld [vmem:[%s3057_s5 + $0x1a8] sm:$0xff]  ;;  %1696 = vmatpush1.bf16.msra.mxu1 %v1695_v18  ;;  %v1699_v31 = vpack.c.bf16 %v218_v23, %v210_v22  ;;  %vm590_vm0 = vcmask 1041408   ;;  %vm1966_vm1 = vmmov 1  }
  0x33   :  { %v235_v28 = vld [vmem:[%s3057_s5 + $0x1e8] sm:$0xff]  ;;  %v273_v29 = vld [vmem:[%s3057_s5 + $0x318] sm:$0xff]  ;;  %v1679_v32 = vpack.c.bf16 %v264_v25, %v256_v19  ;;  %1698 = vmatprep.subr.bf16.mxu1 %v1697_v21  ;;  %v272_v33 = vld [vmem:[%s3057_s5 + $0x310] sm:$0xff]  ;;  %vm586_vm3 = vcmask 80896   ;;  %vm1372_vm4 = vcmask 74752   ;;  %s1967_s12 = smov [#allocation4]  }
  0x34   :  { %v281_v30 = vld [vmem:[%s3057_s5 + $0x358] sm:$0xff]  ;;  %v1701_v34 = vpack.c.bf16 %v235_v28, %v227_v27  ;;  %v226_v35 = vld [vmem:[%s3057_s5 + $0x1a0] sm:$0xff]  ;;  %v280_v38 = vld [vmem:[%s3057_s5 + $0x350] sm:$0xff]  ;;  %s1391_s13 = sshll.u32 %s1967_s12, 4  ;;  %s1392_s13 = int_to_ptr.vmem [resolvable:$true] %s1391_s13 }
  0x35   :  { %1676 = vmatpush1.bf16.msra.mxu0 %v1675_v20  ;;  %v234_v36 = vld [vmem:[%s3057_s5 + $0x1e0] sm:$0xff]  ;;  %v1681_v37 = vpack.c.bf16 %v281_v30, %v273_v29  ;;  %v243_v39 = vld [vmem:[%s3057_s5 + $0x228] sm:$0xff]  ;;  %v289_v41 = vld [vmem:[%s3057_s5 + $0x398] sm:$0xff]  ;;  %v1683_v44 = vpack.c.bf16 %v280_v38, %v272_v33  ;;  %s1917_s14 = scalar_lea.vmem %s1392_s13, 32  ;;  %p1922_p1 = scmp.lt.s32.totalorder %s1392_s13, %s1392_s13 }
  0x36   :  { %1678 = vmatprep.subr.bf16.mxu0 %v1677_v24  ;;  %v251_v40 = vld [vmem:[%s3057_s5 + $0x268] sm:$0xff]  ;;  %v297_v42 = vld [vmem:[%s3057_s5 + $0x3d8] sm:$0xff]  ;;  %1700 = vmatpush1.bf16.msra.mxu1 %v1699_v31  ;;  %v1703_v43 = vpack.c.bf16 %v234_v36, %v226_v35  ;;  %v288_v45 = vld [vmem:[%s3057_s5 + $0x390] sm:$0xff]  ;;  %p1918_p0 = scmp.ne.s32.totalorder %s1392_s13, %s1917_s14  ;;  %p1923_p2 = scmp.lt.s32.totalorder %s1917_s14, %s1917_s14 }
  0x37   :  { %1702 = vmatprep.subr.bf16.mxu1 %v1701_v34  ;;  %v1705_v46 = vpack.c.bf16 %v251_v40, %v243_v39  ;;  %v242_v47 = vld [vmem:[%s3057_s5 + $0x220] sm:$0xff]  ;;  %v1685_v49 = vpack.c.bf16 %v297_v42, %v289_v41  ;;  %v296_v50 = vld [vmem:[%s3057_s5 + $0x3d0] sm:$0xff]  ;;  %v259_v26 = vld [vmem:[%s3057_s5 + $0x2a8] sm:$0xff] }
  0x38   :  { %v250_v48 = vld [vmem:[%s3057_s5 + $0x260] sm:$0xff]  ;;  %v267_v51 = vld [vmem:[%s3057_s5 + $0x2e8] sm:$0xff]  ;;  %v181_v52 = vld [vmem:[%s3057_s5 + $0x38] sm:$0xff]  ;;  %v1687_v55 = vpack.c.bf16 %v296_v50, %v288_v45  ;;  %p1924_p3 = por %p1923_p2, %p1922_p1 }
  0x39   :  { %1680 = vmatpush1.bf16.msra.mxu0 %v1679_v32  ;;  %v189_v53 = vld [vmem:[%s3057_s5 + $0x78] sm:$0xff]  ;;  %v1707_v54 = vpack.c.bf16 %v250_v48, %v242_v47  ;;  %v180_v56 = vld [vmem:[%s3057_s5 + $0x30] sm:$0xff]  ;;  %v1709_v57 = vpack.c.bf16 %v267_v51, %v259_v26  ;;  %v258_v58 = vld [vmem:[%s3057_s5 + $0x2a0] sm:$0xff] }
  0x3a   :  { %1682 = vmatprep.subr.bf16.mxu0 %v1681_v37  ;;  %1704 = vmatpush1.bf16.msra.mxu1 %v1703_v43  ;;  %v266_v59 = vld [vmem:[%s3057_s5 + $0x2e0] sm:$0xff]  ;;  %v1721_v60 = vpack.c.bf16 %v189_v53, %v181_v52  ;;  %v188_v61 = vld [vmem:[%s3057_s5 + $0x70] sm:$0xff]  ;;  %v275_v62 = vld [vmem:[%s3057_s5 + $0x328] sm:$0xff]  ;;  %p1925_p4 = pnand %p1924_p3, %p1918_p0 }
  0x3b   :  { %1706 = vmatprep.subr.bf16.mxu1 %v1705_v46  ;;  %v283_v63 = vld [vmem:[%s3057_s5 + $0x368] sm:$0xff]  ;;  %v197_v0 = vld [vmem:[%s3057_s5 + $0xb8] sm:$0xff]  ;;  %v1711_v2 = vpack.c.bf16 %v266_v59, %v258_v58  ;;  %v1723_v3 = vpack.c.bf16 %v188_v61, %v180_v56  ;;  %v196_v5 = vld [vmem:[%s3057_s5 + $0xb0] sm:$0xff] }
  0x3c   :  { %v205_v1 = vld [vmem:[%s3057_s5 + $0xf8] sm:$0xff]  ;;  %v1713_v6 = vpack.c.bf16 %v283_v63, %v275_v62  ;;  %v274_v8 = vld [vmem:[%s3057_s5 + $0x320] sm:$0xff]  ;;  %v204_v11 = vld [vmem:[%s3057_s5 + $0xf0] sm:$0xff] }
  0x3d   :  { %1684 = vmatpush1.bf16.msra.mxu0 %v1683_v44  ;;  %v282_v9 = vld [vmem:[%s3057_s5 + $0x360] sm:$0xff]  ;;  %v1725_v10 = vpack.c.bf16 %v205_v1, %v197_v0  ;;  %v291_v12 = vld [vmem:[%s3057_s5 + $0x3a8] sm:$0xff]  ;;  %v213_v14 = vld [vmem:[%s3057_s5 + $0x138] sm:$0xff]  ;;  %v1727_v17 = vpack.c.bf16 %v204_v11, %v196_v5 }
  0x3e   :  { %1686 = vmatprep.subr.bf16.mxu0 %v1685_v49  ;;  %1708 = vmatpush1.bf16.msra.mxu1 %v1707_v54  ;;  %v299_v13 = vld [vmem:[%s3057_s5 + $0x3e8] sm:$0xff]  ;;  %v221_v15 = vld [vmem:[%s3057_s5 + $0x178] sm:$0xff]  ;;  %v1715_v16 = vpack.c.bf16 %v282_v9, %v274_v8  ;;  %v290_v19 = vld [vmem:[%s3057_s5 + $0x3a0] sm:$0xff] }
  0x3f   :  { %1710 = vmatprep.subr.bf16.mxu1 %v1709_v57  ;;  %v1717_v18 = vpack.c.bf16 %v299_v13, %v291_v12  ;;  %v298_v20 = vld [vmem:[%s3057_s5 + $0x3e0] sm:$0xff]  ;;  %v1729_v21 = vpack.c.bf16 %v221_v15, %v213_v14  ;;  %v212_v22 = vld [vmem:[%s3057_s5 + $0x130] sm:$0xff]  ;;  %v229_v24 = vld [vmem:[%s3057_s5 + $0x1b8] sm:$0xff] }
  0x40   :  { %v220_v23 = vld [vmem:[%s3057_s5 + $0x170] sm:$0xff]  ;;  %v237_v25 = vld [vmem:[%s3057_s5 + $0x1f8] sm:$0xff]  ;;  %v1719_v27 = vpack.c.bf16 %v298_v20, %v290_v19  ;;  %v158_v33 = vld [vmem:[%s3056_s4 + $0x8] sm:$0xff] }
  0x41   :  { %1688 = vmatpush1.bf16.msra.mxu0 %v1687_v55  ;;  %v1731_v28 = vpack.c.bf16 %v220_v23, %v212_v22  ;;  %v1733_v29 = vpack.c.bf16 %v237_v25, %v229_v24  ;;  %v228_v30 = vld [vmem:[%s3057_s5 + $0x1b0] sm:$0xff]  ;;  %v166_v34 = vld [vmem:[%s3056_s4 + $0x48] sm:$0x3]  ;;  %v245_v35 = vld [vmem:[%s3057_s5 + $0x238] sm:$0xff] }
  0x42   :  { %1722 = vmatprep.subr.bf16.mxu0 %v1721_v60  ;;  %1712 = vmatpush1.bf16.msra.mxu1 %v1711_v2  ;;  %v236_v31 = vld [vmem:[%s3057_s5 + $0x1f0] sm:$0xff]  ;;  %v1753_v36 = vpack.c.bf16 %v166_v34, %v158_v33  ;;  %v253_v37 = vld [vmem:[%s3057_s5 + $0x278] sm:$0xff]  ;;  %v157_v38 = vld [vmem:[%s3056_s4] sm:$0xff] }
  0x43   :  { %1714 = vmatprep.subr.bf16.mxu1 %v1713_v6  ;;  %v1735_v32 = vpack.c.bf16 %v236_v31, %v228_v30  ;;  %vm2492_vm2 = vmpackc.low %vm590_vm0, %vm1966_vm1  ;;  %v1737_v40 = vpack.c.bf16 %v253_v37, %v245_v35  ;;  %v165_v41 = vld [vmem:[%s3056_s4 + $0x40] sm:$0x3]  ;;  %v244_v42 = vld [vmem:[%s3057_s5 + $0x230] sm:$0xff] }
  0x44   :  { %438 = vmatmul.mubr.f32.vlgmr.msra.gmra.mrb[2].mxu0 %v2301_v4  ;;  %v1756_v43 = vpack.c.bf16 %v165_v41, %v157_v38  ;;  %v252_v44 = vld [vmem:[%s3057_s5 + $0x270] sm:$0xff]  ;;  %v160_v46 = vld [vmem:[%s3056_s4 + $0x18] sm:$0xff]  ;;  %v1005_v2 = vld [vmem:[%s3059_s7 + $0x180] sm:$0xff] }
  0x45   :  { %1724 = vmatpush1.bf16.msra.mxu0 %v1723_v3  ;;  %579 = vmatprep.mubr.f32.mxu0 %v1965_v7  ;;  %v1739_v45 = vpack.c.bf16 %v252_v44, %v244_v42  ;;  %v168_v47 = vld [vmem:[%s3056_s4 + $0x58] sm:$0x3]  ;;  %v260_v51 = vld [vmem:[%s3057_s5 + $0x2b0] sm:$0xff]  ;;  %v1006_v3 = vld [vmem:[%s3059_s7 + $0x188] sm:$0xff] }
  0x46   :  { %1726 = vmatprep.subr.bf16.mxu0 %v1725_v10  ;;  %1716 = vmatpush1.bf16.msra.mxu1 %v1715_v16  ;;  %v261_v48 = vld [vmem:[%s3057_s5 + $0x2b8] sm:$0xff]  ;;  %v1759_v49 = vpack.c.bf16 %v168_v47, %v160_v46  ;;  %v268_v52 = vld [vmem:[%s3057_s5 + $0x2f0] sm:$0xff]  ;;  %v989_v5 = vld [vmem:[%s3059_s7 + $0x100] sm:$0xff]  ;;  %v1809_v6 = vpack.c.bf16 %v1006_v3, %v1005_v2 }
  0x47   :  { %1718 = vmatprep.subr.bf16.mxu1 %v1717_v18  ;;  %v269_v50 = vld [vmem:[%s3057_s5 + $0x2f8] sm:$0xff]  ;;  %v1743_v53 = vpack.c.bf16 %v268_v52, %v260_v51  ;;  %v276_v57 = vld [vmem:[%s3057_s5 + $0x330] sm:$0xff]  ;;  %v990_v8 = vld [vmem:[%s3059_s7 + $0x108] sm:$0xff] }
  0x48   :  { %v1741_v26 = vpack.c.bf16 %v269_v50, %v261_v48  ;;  %v277_v54 = vld [vmem:[%s3057_s5 + $0x338] sm:$0xff]  ;;  %v284_v58 = vld [vmem:[%s3057_s5 + $0x370] sm:$0xff]  ;;  %v1811_v9 = vpack.c.bf16 %v990_v8, %v989_v5  ;;  %v1009_v15 = vld [vmem:[%s3059_s7 + $0x1a0] sm:$0xff] }
  0x49   :  { %1728 = vmatpush1.bf16.msra.mxu0 %v1727_v17  ;;  %v285_v55 = vld [vmem:[%s3057_s5 + $0x378] sm:$0xff]  ;;  %v1747_v59 = vpack.c.bf16 %v284_v58, %v276_v57  ;;  %v292_v63 = vld [vmem:[%s3057_s5 + $0x3b0] sm:$0xff]  ;;  %v1010_v16 = vld [vmem:[%s3059_s7 + $0x1a8] sm:$0xff] }
  0x4a   :  { %1730 = vmatprep.subr.bf16.mxu0 %v1729_v21  ;;  %1720 = vmatpush1.bf16.msra.mxu1 %v1719_v27  ;;  %v1745_v56 = vpack.c.bf16 %v285_v55, %v277_v54  ;;  %v293_v60 = vld [vmem:[%s3057_s5 + $0x3b8] sm:$0xff]  ;;  %v300_v0 = vld [vmem:[%s3057_s5 + $0x3f0] sm:$0xff]  ;;  %v993_v17 = vld [vmem:[%s3059_s7 + $0x120] sm:$0xff]  ;;  %v1817_v18 = vpack.c.bf16 %v1010_v16, %v1009_v15 }
  0x4b   :  { %1755 = vmatprep.subr.msk.bf16.mxu1 %vm2492_vm2, %v1753_v36  ;;  %v301_v61 = vld [vmem:[%s3057_s5 + $0x3f8] sm:$0xff]  ;;  %v1751_v1 = vpack.c.bf16 %v300_v0, %v292_v63  ;;  %v991_v11 = vld [vmem:[%s3059_s7 + $0x110] sm:$0xff]  ;;  %v994_v19 = vld [vmem:[%s3059_s7 + $0x128] sm:$0xff] }
  0x4c   :  { %v1749_v62 = vpack.c.bf16 %v301_v61, %v293_v60  ;;  %v1008_v10 = vld [vmem:[%s3059_s7 + $0x198] sm:$0xff]  ;;  %v1819_v20 = vpack.c.bf16 %v994_v19, %v993_v17  ;;  %v1011_v21 = vld [vmem:[%s3059_s7 + $0x1b0] sm:$0xff]  ;;  %v997_v30 = vld [vmem:[%s3059_s7 + $0x140] sm:$0xff] }
  0x4d   :  { %1732 = vmatpush1.bf16.msra.mxu0 %v1731_v28  ;;  %509 = vmatmul.mubr.f32.vlgmr.msra.gmra.mrb[2].mxu1 %v2301_v4  ;;  %v992_v13 = vld [vmem:[%s3059_s7 + $0x118] sm:$0xff]  ;;  %v995_v23 = vld [vmem:[%s3059_s7 + $0x130] sm:$0xff]  ;;  %v1013_v28 = vld [vmem:[%s3059_s7 + $0x1c0] sm:$0xff] }
  0x4e   :  { %1734 = vmatprep.subr.bf16.mxu0 %v1733_v29  ;;  %679 = vmatprep.mubr.f32.mxu1 %v1965_v7  ;;  %v1815_v14 = vpack.c.bf16 %v992_v13, %v991_v11  ;;  %v1012_v22 = vld [vmem:[%s3059_s7 + $0x1b8] sm:$0xff]  ;;  %v1014_v29 = vld [vmem:[%s3059_s7 + $0x1c8] sm:$0xff]  ;;  %v159_v35 = vld [vmem:[%s3056_s4 + $0x10] sm:$0xff] }
  0x4f   :  { %1758 = vmatpush1.bf16.msk.msra.mxu1 %vm2492_vm2, %v1756_v43  ;;  %v1821_v24 = vpack.c.bf16 %v1012_v22, %v1011_v21  ;;  %v996_v25 = vld [vmem:[%s3059_s7 + $0x138] sm:$0xff]  ;;  %v1825_v31 = vpack.c.bf16 %v1014_v29, %v1013_v28  ;;  %v167_v36 = vld [vmem:[%s3056_s4 + $0x50] sm:$0x3]  ;;  %v1403_v37 = vld [vmem:[%s3055_s3] ss:$0 sm:$0xff] }
  0x50   :  { %1761 = vmatprep.subr.msk.bf16.mxu1 %vm2492_vm2, %v1759_v49  ;;  %v1823_v27 = vpack.c.bf16 %v996_v25, %v995_v23  ;;  %v170_v41 = vld [vmem:[%s3056_s4 + $0x68] sm:$0x3]  ;;  %v1762_v43 = vpack.c.bf16 %v167_v36, %v159_v35  ;;  %v161_v46 = vld [vmem:[%s3056_s4 + $0x20] sm:$0xff]  ;;  %v164_v48 = vld [vmem:[%s3056_s4 + $0x38] sm:$0xff] }
  0x51   :  { %1736 = vmatpush1.bf16.msra.mxu0 %v1735_v32  ;;  %v998_v32 = vld [vmem:[%s3059_s7 + $0x148] sm:$0xff]  ;;  %v169_v47 = vld [vmem:[%s3056_s4 + $0x60] sm:$0x3]  ;;  %v172_v49 = vld [vmem:[%s3056_s4 + $0x78] sm:$0x3] }
  0x52   :  { %1738 = vmatprep.subr.bf16.mxu0 %v1737_v40  ;;  %v1827_v33 = vpack.c.bf16 %v998_v32, %v997_v30  ;;  %v162_v40 = vld [vmem:[%s3056_s4 + $0x28] sm:$0xff]  ;;  %v1768_v50 = vpack.c.bf16 %v169_v47, %v161_v46  ;;  %v163_v51 = vld [vmem:[%s3056_s4 + $0x30] sm:$0xff]  ;;  %v957_v57 = vld [vmem:[%s3059_s7] sm:$0xff] }
  0x53   :  { %v171_v52 = vld [vmem:[%s3056_s4 + $0x70] sm:$0x3]  ;;  %v974_v54 = vld [vmem:[%s3059_s7 + $0x88] sm:$0xff]  ;;  %v976_v60 = vld [vmem:[%s3059_s7 + $0x98] sm:$0xff] }
  0x54   :  { %v1774_v55 = vpack.c.bf16 %v171_v52, %v163_v51  ;;  %v958_v58 = vld [vmem:[%s3059_s7 + $0x8] sm:$0xff]  ;;  %v959_v63 = vld [vmem:[%s3059_s7 + $0x10] sm:$0xff]  ;;  %v960_v0 = vld [vmem:[%s3059_s7 + $0x18] sm:$0xff] }
  0x55   :  { %1740 = vmatpush1.bf16.msra.mxu0 %v1739_v45  ;;  %v1765_v45 = vpack.c.bf16 %v170_v41, %v162_v40  ;;  %v1779_v61 = vpack.c.bf16 %v958_v58, %v957_v57  ;;  %v978_v39 = vld [vmem:[%s3059_s7 + $0xa8] sm:$0xff]  ;;  %v961_v3 = vld [vmem:[%s3059_s7 + $0x20] sm:$0xff]  ;;  %v980_v8 = vld [vmem:[%s3059_s7 + $0xb8] sm:$0xff] }
  0x56   :  { %1742 = vmatprep.subr.bf16.mxu0 %v1741_v26  ;;  %v1771_v26 = vpack.c.bf16 %v172_v49, %v164_v48  ;;  %v962_v5 = vld [vmem:[%s3059_s7 + $0x28] sm:$0xff]  ;;  %v964_v11 = vld [vmem:[%s3059_s7 + $0x38] sm:$0xff]  ;;  %v965_v16 = vld [vmem:[%s3059_s7 + $0x40] sm:$0xff] }
  0x57   :  { %v982_v13 = vld [vmem:[%s3059_s7 + $0xc8] sm:$0xff]  ;;  %v984_v19 = vld [vmem:[%s3059_s7 + $0xd8] sm:$0xff]  ;;  %v967_v22 = vld [vmem:[%s3059_s7 + $0x50] sm:$0xff] }
  0x58   :  { %v966_v17 = vld [vmem:[%s3059_s7 + $0x48] sm:$0xff]  ;;  %v968_v23 = vld [vmem:[%s3059_s7 + $0x58] sm:$0xff]  ;;  %v969_v29 = vld [vmem:[%s3059_s7 + $0x60] sm:$0xff] }
  0x59   :  { %1744 = vmatpush1.bf16.msra.mxu0 %v1743_v53  ;;  %v973_v53 = vld [vmem:[%s3059_s7 + $0x80] sm:$0xff]  ;;  %v986_v25 = vld [vmem:[%s3059_s7 + $0xe8] sm:$0xff]  ;;  %v1015_v32 = vld [vmem:[%s3059_s7 + $0x1d0] sm:$0xff] }
  0x5a   :  { %1746 = vmatprep.subr.bf16.mxu0 %v1745_v56  ;;  %v1777_v56 = vpack.c.bf16 %v974_v54, %v973_v53  ;;  %v970_v30 = vld [vmem:[%s3059_s7 + $0x68] sm:$0xff]  ;;  %v999_v35 = vld [vmem:[%s3059_s7 + $0x150] sm:$0xff]  ;;  %v1000_v36 = vld [vmem:[%s3059_s7 + $0x158] sm:$0xff] }
  0x5b   :  { %v988_v40 = vld [vmem:[%s3059_s7 + $0xf8] sm:$0xff]  ;;  %v1018_v46 = vld [vmem:[%s3059_s7 + $0x1e8] sm:$0xff]  ;;  %v1001_v48 = vld [vmem:[%s3059_s7 + $0x160] sm:$0xff] }
  0x5c   :  { %v1002_v49 = vld [vmem:[%s3059_s7 + $0x168] sm:$0xff]  ;;  %v1037_v51 = vld [vmem:[%s3059_s7 + $0x280] sm:$0xff]  ;;  %v1003_v58 = vld [vmem:[%s3059_s7 + $0x170] sm:$0xff] }
  0x5d   :  { %1748 = vmatpush1.bf16.msra.mxu0 %v1747_v59  ;;  %v975_v59 = vld [vmem:[%s3059_s7 + $0x90] sm:$0xff]  ;;  %v1038_v52 = vld [vmem:[%s3059_s7 + $0x288] sm:$0xff] }
  0x5e   :  { %1750 = vmatprep.subr.bf16.mxu0 %v1749_v62  ;;  %v1781_v62 = vpack.c.bf16 %v976_v60, %v975_v59  ;;  %v1841_v54 = vpack.c.bf16 %v1038_v52, %v1037_v51  ;;  %v1004_v59 = vld [vmem:[%s3059_s7 + $0x178] sm:$0xff]  ;;  %v1043_v51 = vld [vmem:[%s3059_s7 + $0x2b0] sm:$0xff] }
  0x5f   :  { %v1839_v60 = vpack.c.bf16 %v1004_v59, %v1003_v58  ;;  %v1044_v52 = vld [vmem:[%s3059_s7 + $0x2b8] sm:$0xff] }
  0x61   :  { %1752 = vmatpush1.bf16.msra.mxu0 %v1751_v1  ;;  %v977_v1 = vld [vmem:[%s3059_s7 + $0xa0] sm:$0xff] }
  0x62   :  { %1810 = vmatprep.subr.bf16.mxu0 %v1809_v6  ;;  %v1785_v2 = vpack.c.bf16 %v978_v39, %v977_v1  ;;  %v979_v6 = vld [vmem:[%s3059_s7 + $0xb0] sm:$0xff]  ;;  %v901_v39 = vlaneseq }
  0x64   :  { %580 = vmatmul.mubr.f32.vlgmr.msra.gmra.mrb[4].mxu0 %v2301_v4  ;;  %v1007_v4 = vld [vmem:[%s3059_s7 + $0x190] sm:$0xff] }
  0x65   :  { %1812 = vmatpush3.bf16.msra.mxu0 %v1811_v9  ;;  %v1813_v12 = vpack.c.bf16 %v1008_v10, %v1007_v4  ;;  %v1787_v9 = vpack.c.bf16 %v962_v5, %v961_v3  ;;  %v1789_v4 = vpack.c.bf16 %v980_v8, %v979_v6  ;;  %v963_v10 = vld [vmem:[%s3059_s7 + $0x30] sm:$0xff]  ;;  %v2819_v3 = vld [vmem:[%s3058_s6] sm:$0xff] }
  0x67   :  { %1814 = vmatprep.subr.bf16.mxu0 %v1813_v12  ;;  %v981_v12 = vld [vmem:[%s3059_s7 + $0xc0] sm:$0xff] }
  0x68   :  { %v1793_v15 = vpack.c.bf16 %v982_v13, %v981_v12  ;;  %v1021_v13 = vld [vmem:[%s3059_s7 + $0x200] sm:$0xff] }
  0x69   :  { %1816 = vmatpush3.bf16.msra.mxu0 %v1815_v14  ;;  %v1791_v14 = vpack.c.bf16 %v964_v11, %v963_v10 }
  0x6a   :  { %1818 = vmatprep.subr.bf16.mxu0 %v1817_v18  ;;  %v983_v18 = vld [vmem:[%s3059_s7 + $0xd0] sm:$0xff] }
  0x6b   :  { %v1797_v21 = vpack.c.bf16 %v984_v19, %v983_v18  ;;  %v1040_v18 = vld [vmem:[%s3059_s7 + $0x298] sm:$0xff] }
  0x6d   :  { %1820 = vmatpush3.bf16.msra.mxu0 %v1819_v20  ;;  %v1795_v20 = vpack.c.bf16 %v966_v17, %v965_v16  ;;  %v1039_v17 = vld [vmem:[%s3059_s7 + $0x290] sm:$0xff] }
  0x6e   :  { %1822 = vmatprep.subr.bf16.mxu0 %v1821_v24  ;;  %v985_v24 = vld [vmem:[%s3059_s7 + $0xe0] sm:$0xff] }
  0x6f   :  { %v1801_v28 = vpack.c.bf16 %v986_v25, %v985_v24 }
  0x71   :  { %1824 = vmatpush3.bf16.msra.mxu0 %v1823_v27  ;;  %v1799_v27 = vpack.c.bf16 %v968_v23, %v967_v22 }
  0x72   :  { %1826 = vmatprep.subr.bf16.mxu0 %v1825_v31  ;;  %v1803_v31 = vpack.c.bf16 %v970_v30, %v969_v29  ;;  %v1023_v29 = vld [vmem:[%s3059_s7 + $0x210] sm:$0xff]  ;;  %v1024_v30 = vld [vmem:[%s3059_s7 + $0x218] sm:$0xff] }
  0x75   :  { %1828 = vmatpush3.bf16.msra.mxu0 %v1827_v33  ;;  %v1016_v33 = vld [vmem:[%s3059_s7 + $0x1d8] sm:$0xff] }
  0xf7   :  { %v1450_v34 = vpop.f32.mrb[0].mxu0 }
  0xf8   :  { %v1451_v38 = vpop.f32.mrb[1].mxu0 }
  0xf9   :  { %v1452_v42 = vadd.f32 %v1451_v38, %v1450_v34  ;;  %v1829_v34 = vpack.c.bf16 %v1016_v33, %v1015_v32  ;;  %v987_v38 = vld [vmem:[%s3059_s7 + $0xf0] sm:$0xff]  ;;  %v1041_v33 = vld [vmem:[%s3059_s7 + $0x2a0] sm:$0xff] }
  0xfa   :  { %v1805_v41 = vpack.c.bf16 %v988_v40, %v987_v38 }
  0xfb   :  { %v154_v44 = vadd.f32 %v1452_v42, %v1403_v37  ;;  %v1831_v37 = vpack.c.bf16 %v1000_v36, %v999_v35  ;;  %1830 = vmatprep.subr.bf16.mxu0 %v1829_v34  ;;  %v971_v42 = vld [vmem:[%s3059_s7 + $0x70] sm:$0xff]  ;;  %v1042_v34 = vld [vmem:[%s3059_s7 + $0x2a8] sm:$0xff]  ;;  %v1053_v36 = vld [vmem:[%s3059_s7 + $0x300] sm:$0xff] }
  0xfd   :  { %1407 = vmatmul.mubr.msk.f32.vlgmr.msra.gmra.mrb[0].mxu1 %vm586_vm3, %v154_v44  ;;  %1374 = vst.msk [vmem:[#allocation4] sm:$0x3] %vm1372_vm4, %v154_v44  ;;  %1832 = vmatpush3.bf16.msra.mxu0 %v1831_v37  ;;  %v1054_v37 = vld [vmem:[%s3059_s7 + $0x308] sm:$0xff] }
  0xfe   :  { %1764 = vmatpush1.bf16.msk.msra.mxu1 %vm2492_vm2, %v1762_v43  ;;  %750 = vmatprep.mubr.f32.mxu1 %v1965_v7  ;;  %v972_v43 = vld [vmem:[%s3059_s7 + $0x78] sm:$0xff] }
  0xff   :  { %1767 = vmatprep.subr.msk.bf16.mxu1 %vm2492_vm2, %v1765_v45  ;;  %v1017_v45 = vld [vmem:[%s3059_s7 + $0x1e0] sm:$0xff] }
 0x100   :  { %v1833_v47 = vpack.c.bf16 %v1018_v46, %v1017_v45  ;;  %v1849_v46 = vpack.c.bf16 %v1042_v34, %v1041_v33  ;;  %v1049_v34 = vld [vmem:[%s3059_s7 + $0x2e0] sm:$0xff] }
 0x101   :  { %1410 = vmatmul.mubr.msk.f32.vlgmr.msra.gmra.mrb[4].mxu1 %vm586_vm3, %v154_v44 }
 0x102   :  { %1770 = vmatpush1.bf16.msk.msra.mxu1 %vm2492_vm2, %v1768_v50  ;;  %821 = vmatprep.mubr.f32.mxu1 %v1965_v7 }
 0x103   :  { %1773 = vmatprep.subr.msk.bf16.mxu1 %vm2492_vm2, %v1771_v26  ;;  %v1835_v26 = vpack.c.bf16 %v1002_v49, %v1001_v48  ;;  %1834 = vmatprep.subr.bf16.mxu0 %v1833_v47  ;;  %v1025_v47 = vld [vmem:[%s3059_s7 + $0x220] sm:$0xff]  ;;  %v1026_v48 = vld [vmem:[%s3059_s7 + $0x228] sm:$0xff] }
 0x105   :  { %1413 = vmatmul.mubr.msk.f32.vlgmr.msra.gmra.mrb[2].mxu1 %vm586_vm3, %v154_v44  ;;  %1836 = vmatpush3.bf16.msra.mxu0 %v1835_v26  ;;  %v1875_v26 = vpack.c.bf16 %v1054_v37, %v1053_v36  ;;  %v1061_v37 = vld [vmem:[%s3059_s7 + $0x340] sm:$0xff] }
 0x106   :  { %1776 = vmatpush1.bf16.msk.msra.mxu1 %vm2492_vm2, %v1774_v55  ;;  %892 = vmatprep.mubr.f32.mxu1 %v1965_v7  ;;  %v1783_v7 = vpack.c.bf16 %v960_v0, %v959_v63  ;;  %v1019_v55 = vld [vmem:[%s3059_s7 + $0x1f0] sm:$0xff] }
 0x107   :  { %1778 = vmatprep.subr.bf16.mxu1 %v1777_v56  ;;  %v1020_v56 = vld [vmem:[%s3059_s7 + $0x1f8] sm:$0xff] }
 0x108   :  { %v1837_v57 = vpack.c.bf16 %v1020_v56, %v1019_v55  ;;  %v1055_v55 = vld [vmem:[%s3059_s7 + $0x310] sm:$0xff]  ;;  %v1056_v56 = vld [vmem:[%s3059_s7 + $0x318] sm:$0xff] }
 0x109   :  { %1416 = vmatmul.mubr.msk.f32.vlgmr.msra.gmra.mrb[6].mxu1 %vm586_vm3, %v154_v44  ;;  %v1807_v44 = vpack.c.bf16 %v972_v43, %v971_v42  ;;  %v1071_v43 = vld [vmem:[%s3059_s7 + $0x390] sm:$0xff] }
 0x10a   :  { %1780 = vmatpush3.bf16.msra.mxu1 %v1779_v61  ;;  %1838 = vmatprep.subr.bf16.mxu0 %v1837_v57  ;;  %v1069_v61 = vld [vmem:[%s3059_s7 + $0x380] sm:$0xff] }
 0x10b   :  { %1782 = vmatprep.subr.bf16.mxu1 %v1781_v62  ;;  %1840 = vmatpush3.bf16.msra.mxu0 %v1839_v60  ;;  %v1070_v62 = vld [vmem:[%s3059_s7 + $0x388] sm:$0xff]  ;;  %v1851_v60 = vpack.c.bf16 %v1026_v48, %v1025_v47 }
 0x10c   :  { %v1873_v63 = vpack.c.bf16 %v1070_v62, %v1069_v61  ;;  %v1073_v61 = vld [vmem:[%s3059_s7 + $0x3a0] sm:$0xff]  ;;  %v1074_v62 = vld [vmem:[%s3059_s7 + $0x3a8] sm:$0xff] }
 0x10d   :  { %v1034_v47 = vld [vmem:[%s3059_s7 + $0x268] sm:$0xff] }
 0x10e   :  { %1784 = vmatpush3.bf16.msra.mxu1 %v1783_v7  ;;  %1874 = vmatprep.subr.bf16.mxu0 %v1873_v63  ;;  %v2813_v7 = vshrl.u32 %v901_v39, 7 }
 0x10f   :  { %1786 = vmatprep.subr.bf16.mxu1 %v1785_v2 }
 0x110   :  { %v903_v2 = vsub.s32 0, %v2813_v7  ;;  %v907_v5 = vsub.s32 1, %v2813_v7  ;;  %v915_v10 = vsub.s32 3, %v2813_v7  ;;  %v923_v16 = vsub.s32 5, %v2813_v7 }
 0x111   :  { %v931_v42 = vsub.s32 7, %v2813_v7 }
 0x112   :  { %1788 = vmatpush3.bf16.msra.mxu1 %v1787_v9  ;;  %v904_v6 = vrot.slane %v2819_v3, %v903_v2  ;;  %v908_v8 = vrot.slane %v2819_v3, %v907_v5  ;;  %v911_v9 = vsub.s32 2, %v2813_v7  ;;  %v916_v22 = vrot.slane %v2819_v3, %v915_v10  ;;  %v1027_v5 = vld [vmem:[%s3059_s7 + $0x230] sm:$0xff] }
 0x113   :  { %1790 = vmatprep.subr.bf16.mxu1 %v1789_v4  ;;  %v924_v32 = vrot.slane %v2819_v3, %v923_v16  ;;  %v932_v59 = vrot.slane %v2819_v3, %v931_v42  ;;  %v1853_v2 = vpack.c.bf16 %v1044_v52, %v1043_v51  ;;  %v1881_v10 = vpack.c.bf16 %v1074_v62, %v1073_v61  ;;  %v1079_v42 = vld [vmem:[%s3059_s7 + $0x3d0] sm:$0xff]  ;;  %v1064_v52 = vld [vmem:[%s3059_s7 + $0x358] sm:$0xff] }
 0x114   :  { %v912_v19 = vrot.slane %v2819_v3, %v911_v9  ;;  %v1879_v9 = vpack.c.bf16 %v1056_v56, %v1055_v55  ;;  %v1063_v51 = vld [vmem:[%s3059_s7 + $0x350] sm:$0xff]  ;;  %v1082_v55 = vld [vmem:[%s3059_s7 + $0x3e8] sm:$0xff]  ;;  %v927_v61 = vsub.s32 6, %v2813_v7 }
 0x116   :  { %1792 = vmatpush3.bf16.msra.mxu1 %v1791_v14  ;;  %v1022_v14 = vld [vmem:[%s3059_s7 + $0x208] sm:$0xff] }
 0x117   :  { %1794 = vmatprep.subr.bf16.mxu1 %v1793_v15  ;;  %v439_v50 = vpop.f32.mrb[2].mxu0  ;;  %v1843_v23 = vpack.c.bf16 %v1022_v14, %v1021_v13  ;;  %v1075_v14 = vld [vmem:[%s3059_s7 + $0x3b0] sm:$0xff] }
 0x118   :  { %v441_v53 = vpop.f32.mrb[3].mxu0 }
 0x11a   :  { %1796 = vmatpush3.bf16.msra.mxu1 %v1795_v20 }
 0x11b   :  { %1798 = vmatprep.subr.bf16.mxu1 %v1797_v21 }
 0x11e   :  { %1800 = vmatpush3.bf16.msra.mxu1 %v1799_v27 }
 0x11f   :  { %1802 = vmatprep.subr.bf16.mxu1 %v1801_v28  ;;  %v1845_v28 = vpack.c.bf16 %v1040_v18, %v1039_v17  ;;  %v1029_v17 = vld [vmem:[%s3059_s7 + $0x240] sm:$0xff]  ;;  %v1030_v18 = vld [vmem:[%s3059_s7 + $0x248] sm:$0xff] }
 0x122   :  { %1804 = vmatpush3.bf16.msra.mxu1 %v1803_v31 }
 0x123   :  { %1806 = vmatprep.subr.bf16.mxu1 %v1805_v41  ;;  %v1847_v41 = vpack.c.bf16 %v1024_v30, %v1023_v29  ;;  %v1078_v29 = vld [vmem:[%s3059_s7 + $0x3c8] sm:$0xff] }
 0x126   :  { %1808 = vmatpush3.bf16.msra.mxu1 %v1807_v44  ;;  %v1072_v44 = vld [vmem:[%s3059_s7 + $0x398] sm:$0xff] }
 0x127   :  { %1842 = vmatprep.subr.bf16.mxu1 %v1841_v54  ;;  %v1877_v54 = vpack.c.bf16 %v1072_v44, %v1071_v43  ;;  %v1080_v43 = vld [vmem:[%s3059_s7 + $0x3d8] sm:$0xff]  ;;  %v919_v44 = vsub.s32 4, %v2813_v7 }
 0x128   :  { %v1084_v7 = vld [vmem:[%s3059_s7 + $0x3f8] sm:$0xff] }
 0x129   :  { %v920_v56 = vrot.slane %v2819_v3, %v919_v44 }
 0x137   :  { %v2809_v0 = vpop.f32.mrb[4].mxu0 }
 0x138   :  { %v2811_v1 = vpop.f32.mrb[5].mxu0 }
 0x1d0   :  { %v681_v4 = vpop.f32.mrb[0].mxu1 }
 0x1d1   :  { %v941_v11 = vadd.f32 %v904_v6, %v681_v4  ;;  %v683_v12 = vpop.f32.mrb[1].mxu1  ;;  %v1028_v6 = vld [vmem:[%s3059_s7 + $0x238] sm:$0xff]  ;;  %v1046_v4 = vld [vmem:[%s3059_s7 + $0x2c8] sm:$0xff] }
 0x1d2   :  { %v942_v15 = vadd.f32 %v908_v8, %v683_v12  ;;  %v1855_v13 = vpack.c.bf16 %v1028_v6, %v1027_v5  ;;  %v1083_v6 = vld [vmem:[%s3059_s7 + $0x3f0] sm:$0xff] }
 0x1d3   :  { %v949_v24 = vmax.f32 %v941_v11, 0.0  ;;  %v1057_v11 = vld [vmem:[%s3059_s7 + $0x320] sm:$0xff] }
 0x1d4   :  { %v950_v20 = vmax.f32 %v942_v15, 0.0  ;;  %v752_v21 = vpop.f32.mrb[4].mxu1  ;;  %v1076_v15 = vld [vmem:[%s3059_s7 + $0x3b8] sm:$0xff] }
 0x1d5   :  { %v753_v25 = vadd.f32 %v752_v21, %v439_v50  ;;  %v754_v27 = vpop.f32.mrb[5].mxu1  ;;  %v1047_v21 = vld [vmem:[%s3059_s7 + $0x2d0] sm:$0xff] }
 0x1d6   :  { %v755_v31 = vadd.f32 %v754_v27, %v441_v53  ;;  %1156 = vmatprep.mubr.f32.mxu1 %v950_v20  ;;  %v1859_v27 = vpack.c.bf16 %v1030_v18, %v1029_v17 }
 0x1d7   :  { %v943_v35 = vadd.f32 %v912_v19, %v753_v25  ;;  %1157 = vmatmul.mubr.f32.vlgmr.msra.gmra.mrb[8].mxu1 %v949_v24  ;;  %v1059_v24 = vld [vmem:[%s3059_s7 + $0x330] sm:$0xff]  ;;  %v1060_v25 = vld [vmem:[%s3059_s7 + $0x338] sm:$0xff] }
 0x1d8   :  { %v944_v38 = vadd.f32 %v916_v22, %v755_v31  ;;  %1844 = vmatpush3.bf16.msra.mxu1 %v1843_v23  ;;  %v2860_v40 = vpop.f32.mrb[2].mxu1  ;;  %v1048_v22 = vld [vmem:[%s3059_s7 + $0x2d8] sm:$0xff]  ;;  %v1885_v23 = vpack.c.bf16 %v1076_v15, %v1075_v14  ;;  %v1031_v31 = vld [vmem:[%s3059_s7 + $0x250] sm:$0xff]  ;;  %v1887_v33 = vpack.c.bf16 %v1060_v25, %v1059_v24 }
 0x1d9   :  { %v825_v45 = vpop.f32.mrb[3].mxu1  ;;  %1846 = vmatprep.subr.bf16.mxu1 %v1845_v28  ;;  %v951_v53 = vmax.f32 %v943_v35, 0.0  ;;  %v1077_v28 = vld [vmem:[%s3059_s7 + $0x3c0] sm:$0xff]  ;;  %v1861_v30 = vpack.c.bf16 %v1048_v22, %v1047_v21  ;;  %v1050_v35 = vld [vmem:[%s3059_s7 + $0x2e8] sm:$0xff] }
 0x1da   :  { %v952_v49 = vmax.f32 %v944_v38, 0.0  ;;  %v946_v50 = vadd.f32 %v924_v32, %v825_v45  ;;  %v1032_v32 = vld [vmem:[%s3059_s7 + $0x258] sm:$0xff]  ;;  %v1889_v36 = vpack.c.bf16 %v1078_v29, %v1077_v28  ;;  %v1062_v38 = vld [vmem:[%s3059_s7 + $0x348] sm:$0xff]  ;;  %v1865_v45 = vpack.c.bf16 %v1050_v35, %v1049_v34 }
 0x1db   :  { %v1891_v48 = vpack.c.bf16 %v1062_v38, %v1061_v37 }
 0x1dc   :  { %v954_v57 = vmax.f32 %v946_v50, 0.0  ;;  %1848 = vmatpush3.bf16.msra.mxu1 %v1847_v41  ;;  %v894_v58 = vpop.f32.mrb[6].mxu1  ;;  %1226 = vmatprep.mubr.f32.mxu0 %v952_v49  ;;  %v1863_v41 = vpack.c.bf16 %v1032_v32, %v1031_v31  ;;  %v1051_v49 = vld [vmem:[%s3059_s7 + $0x2f0] sm:$0xff]  ;;  %v1052_v50 = vld [vmem:[%s3059_s7 + $0x2f8] sm:$0xff] }
 0x1dd   :  { %v2895_v63 = vadd.f32 %v894_v58, %v2809_v0  ;;  %v896_v39 = vpop.f32.mrb[7].mxu1  ;;  %1227 = vmatmul.mubr.f32.vlgmr.msra.gmra.mrb[6].mxu0 %v951_v53  ;;  %1850 = vmatprep.subr.bf16.mxu1 %v1849_v46  ;;  %v1045_v0 = vld [vmem:[%s3059_s7 + $0x2c0] sm:$0xff]  ;;  %v1035_v58 = vld [vmem:[%s3059_s7 + $0x270] sm:$0xff] }
 0x1de   :  { %v897_v8 = vadd.f32 %v896_v39, %v2811_v1  ;;  %1876 = vmatpush3.bf16.msra.mxu0 %v1875_v26  ;;  %1296 = vmatprep.mubr.f32.mxu1 %v954_v57  ;;  %v1058_v1 = vld [vmem:[%s3059_s7 + $0x328] sm:$0xff]  ;;  %v1857_v16 = vpack.c.bf16 %v1046_v4, %v1045_v0  ;;  %v1033_v46 = vld [vmem:[%s3059_s7 + $0x260] sm:$0xff]  ;;  %v1893_v26 = vpack.c.bf16 %v1080_v43, %v1079_v42 }
 0x1df   :  { %1878 = vmatprep.subr.bf16.mxu0 %v1877_v54  ;;  %v1883_v20 = vpack.c.bf16 %v1058_v1, %v1057_v11  ;;  %v1867_v53 = vpack.c.bf16 %v1034_v47, %v1033_v46  ;;  %v1081_v54 = vld [vmem:[%s3059_s7 + $0x3e0] sm:$0xff]  ;;  %v1869_v57 = vpack.c.bf16 %v1052_v50, %v1051_v49  ;;  %v928_v0 = vrot.slane %v2819_v3, %v927_v61  ;;  %v1068_v11 = vld [vmem:[%s3059_s7 + $0x378] sm:$0xff] }
 0x1e0   :  { %v948_v12 = vadd.f32 %v932_v59, %v897_v8  ;;  %1852 = vmatpush3.bf16.msra.mxu1 %v1851_v60  ;;  %v1036_v59 = vld [vmem:[%s3059_s7 + $0x278] sm:$0xff]  ;;  %v1895_v60 = vpack.c.bf16 %v1064_v52, %v1063_v51  ;;  %v1897_v62 = vpack.c.bf16 %v1082_v55, %v1081_v54  ;;  %v1065_v39 = vld [vmem:[%s3059_s7 + $0x360] sm:$0xff]  ;;  %v945_v8 = vadd.f32 %v920_v56, %v2860_v40 }
 0x1e1   :  { %1854 = vmatprep.subr.bf16.mxu1 %v1853_v2  ;;  %v1066_v2 = vld [vmem:[%s3059_s7 + $0x368] sm:$0xff]  ;;  %v1871_v5 = vpack.c.bf16 %v1036_v59, %v1035_v58  ;;  %v1901_v4 = vpack.c.bf16 %v1084_v7, %v1083_v6  ;;  %v947_v40 = vadd.f32 %v928_v0, %v2895_v63 }
 0x1e2   :  { %v956_v19 = vmax.f32 %v948_v12, 0.0  ;;  %1880 = vmatpush3.bf16.msra.mxu0 %v1879_v9  ;;  %v1899_v9 = vpack.c.bf16 %v1066_v2, %v1065_v39  ;;  %v953_v1 = vmax.f32 %v945_v8, 0.0 }
 0x1e3   :  { %1882 = vmatprep.subr.bf16.mxu0 %v1881_v10  ;;  %v1067_v10 = vld [vmem:[%s3059_s7 + $0x370] sm:$0xff]  ;;  %v955_v3 = vmax.f32 %v947_v40, 0.0 }
 0x1e4   :  { %1856 = vmatpush3.bf16.msra.mxu1 %v1855_v13  ;;  %1366 = vmatprep.mubr.f32.mxu0 %v956_v19  ;;  %v1903_v12 = vpack.c.bf16 %v1068_v11, %v1067_v10 }
 0x1e5   :  { %1858 = vmatprep.subr.bf16.mxu1 %v1857_v16 }
 0x1e6   :  { %1884 = vmatpush3.bf16.msra.mxu0 %v1883_v20 }
 0x1e7   :  { %1886 = vmatprep.subr.bf16.mxu0 %v1885_v23 }
 0x1e8   :  { %1860 = vmatpush3.bf16.msra.mxu1 %v1859_v27 }
 0x1e9   :  { %1862 = vmatprep.subr.bf16.mxu1 %v1861_v30 }
 0x1ea   :  { %1888 = vmatpush3.bf16.msra.mxu0 %v1887_v33 }
 0x1eb   :  { %1890 = vmatprep.subr.bf16.mxu0 %v1889_v36 }
 0x1ec   :  { %1864 = vmatpush3.bf16.msra.mxu1 %v1863_v41 }
 0x1ed   :  { %1866 = vmatprep.subr.bf16.mxu1 %v1865_v45 }
 0x1ee   :  { %1892 = vmatpush3.bf16.msra.mxu0 %v1891_v48 }
 0x1ef   :  { %1894 = vmatprep.subr.bf16.mxu0 %v1893_v26 }
 0x1f0   :  { %1868 = vmatpush3.bf16.msra.mxu1 %v1867_v53 }
 0x1f1   :  { %1870 = vmatprep.subr.bf16.mxu1 %v1869_v57 }
 0x1f2   :  { %1896 = vmatpush3.bf16.msra.mxu0 %v1895_v60 }
 0x1f3   :  { %1898 = vmatprep.subr.bf16.mxu0 %v1897_v62 }
 0x1f4   :  { %1872 = vmatpush3.bf16.msra.mxu1 %v1871_v5 }
 0x1f6   :  { %1900 = vmatpush3.bf16.msra.mxu0 %v1899_v9 }
 0x1f7   :  { %1297 = vmatmul.mubr.f32.vlgmr.msra.gmra.mrb[10].mxu1 %v953_v1  ;;  %1902 = vmatprep.subr.bf16.mxu0 %v1901_v4 }
 0x1fa   :  { %1904 = vmatpush3.bf16.msra.mxu0 %v1903_v12 }
 0x1fd   :  { %1367 = vmatmul.mubr.f32.vlgmr.msra.gmra.mrb[8].mxu0 %v955_v3 }
 0x1fe   :  { %1928 = shalt.err (!%p1925_p4)
}
 0x1ff   :  { %s1929_s16 = scalar_lea.hbm %s3062_s10, 32 }
 0x200   :  { %p1930_p5 = scmp.ne.s32.totalorder %s3062_s10, %s1929_s16  ;;  %p1933_p6 = scmp.lt.u32.totalorder %s1929_s16, %s3062_s10 }
 0x202   :  { %p1935_p7 = pnand %p1933_p6, %p1930_p5 }
 0x204   :  { %1938 = shalt.err (!%p1935_p7)
}
 0x205   :  { %1394 = dma.vmem_to_hbm [thread:$0]  %s1392_s13, 32, %s3062_s10, [#allocation5]   ;;  %v1417_v15 = vld [vmem:[%s3060_s8] ss:$0 sm:$0xff] }
 0x206   :  { %s1968_s2 = smov [#allocation2]  }
 0x207   :  { %s1381_s10 = sshll.u32 %s1968_s2, 4  ;;  %s1382_s10 = int_to_ptr.vmem [resolvable:$true] %s1381_s10 }
 0x208   :  { %s1939_s5 = scalar_lea.vmem %s1382_s10, 32  ;;  %p1944_p9 = scmp.lt.s32.totalorder %s1382_s10, %s1382_s10 }
 0x209   :  { %p1940_p8 = scmp.ne.s32.totalorder %s1382_s10, %s1939_s5  ;;  %p1945_p10 = scmp.lt.s32.totalorder %s1939_s5, %s1939_s5 }
 0x20b   :  { %p1946_p11 = por %p1945_p10, %p1944_p9 }
 0x20d   :  { %p1947_p12 = pnand %p1946_p11, %p1940_p8 }
 0x2aa   :  { %v1485_v63 = vpop.f32.mrb[8].mxu1 }
 0x2ab   :  { %v1486_v13 = vpop.f32.mrb[9].mxu1 }
 0x2ac   :  { %v1487_v14 = vadd.f32 %v1486_v13, %v1485_v63 }
 0x2ae   :  { %v1159_v18 = vadd.f32 %v1487_v14, %v1417_v15 }
 0x2b0   :  { %v1520_v16 = vpop.f32.mrb[6].mxu0 }
 0x2b1   :  { %v1521_v17 = vpop.f32.mrb[7].mxu0 }
 0x2b2   :  { %v1522_v19 = vadd.f32 %v1521_v17, %v1520_v16 }
 0x2b4   :  { %v1229_v20 = vadd.f32 %v1522_v19, %v1159_v18 }
 0x2ca   :  { %v1555_v21 = vpop.f32.mrb[10].mxu1 }
 0x2cb   :  { %v1556_v22 = vpop.f32.mrb[11].mxu1 }
 0x2cc   :  { %v1557_v23 = vadd.f32 %v1556_v22, %v1555_v21 }
 0x2ce   :  { %v1299_v24 = vadd.f32 %v1557_v23, %v1229_v20 }
 0x2d0   :  { %v1590_v25 = vpop.f32.mrb[8].mxu0 }
 0x2d1   :  { %v1591_v27 = vpop.f32.mrb[9].mxu0 }
 0x2d2   :  { %v1592_v28 = vadd.f32 %v1591_v27, %v1590_v25 }
 0x2d4   :  { %v1369_v29 = vadd.f32 %v1592_v28, %v1299_v24 }
 0x2d6   :  { %1373 = vst.msk [vmem:[#allocation2] sm:$0x3] %vm1372_vm4, %v1369_v29 }
 0x2d7   :  { %1950 = shalt.err (!%p1947_p12)
}
 0x2d8   :  { %s1951_s24 = scalar_lea.hbm %s3061_s9, 32 }
 0x2d9   :  { %p1952_p13 = scmp.ne.s32.totalorder %s3061_s9, %s1951_s24  ;;  %p1955_p0 = scmp.lt.u32.totalorder %s1951_s24, %s3061_s9 }
 0x2db   :  { %p1957_p1 = pnand %p1955_p0, %p1952_p13 }
 0x2dd   :  { %1960 = shalt.err (!%p1957_p1)
}
 0x2de   :  { %1384 = dma.vmem_to_hbm [thread:$0]  %s1382_s10, 32, %s3061_s9, [#allocation3]  }
 0x2df   :  { %1961 = dma.done.wait [#allocation3], 32  }
 0x2e0   :  { %1962 = vsyncadd [#allocation3], 4294967264 }
 0x2e1   :  { %1963 = dma.done.wait [#allocation5], 32  }
 0x2e2   :  { %1964 = vsyncadd [#allocation5], 4294967264 }
 0x2e3   :  { %1401 = vsyncpa [#allocation3], 1 }
 0x2e4   :  { %1402 = vsyncpa [#allocation5], 1 }

// kernel: cnn_transformer_linear_forward.6
= control target key start
LH: loop header
LB: loop body
LE: loop exit
PB: predicated region body
PF: predicated region fallthrough
CT: control target
= control target key end

     0   :  { %s5458_s0 = inlined_call_operand.vmem [shape: f32[2,8,128], index: 0, kind: input, shape index: {}]   ;;  %s5459_s1 = inlined_call_operand.vmem [shape: f32[2,8,128], index: 1, kind: input, shape index: {}]   ;;  %s5460_s2 = inlined_call_operand.vmem [shape: f32[128,384], index: 2, kind: input, shape index: {}]   ;;  %s5461_s3 = inlined_call_operand.vmem [shape: f32[1,384], index: 3, kind: input, shape index: {}]   ;;  %s5462_s4 = inlined_call_operand.vmem [shape: f32[128,128], index: 4, kind: input, shape index: {}]   ;;  %s5463_s5 = inlined_call_operand.vmem [shape: f32[1,128], index: 5, kind: input, shape index: {}]   ;;  %s5464_s6 = inlined_call_operand.vmem [shape: f32[1,128], index: 6, kind: input, shape index: {}]   ;;  %s5465_s7 = inlined_call_operand.vmem [shape: f32[1,128], index: 7, kind: input, shape index: {}]   ;;  %s5466_s8 = inlined_call_operand.vmem [shape: f32[128,128], index: 8, kind: input, shape index: {}]   ;;  %s5467_s9 = inlined_call_operand.vmem [shape: f32[1,128], index: 9, kind: input, shape index: {}]   ;;  %s5468_s10 = inlined_call_operand.vmem [shape: f32[128,256], index: 10, kind: input, shape index: {}]   ;;  %s5469_s11 = inlined_call_operand.vmem [shape: f32[1,256], index: 11, kind: input, shape index: {}]   ;;  %s5470_s12 = inlined_call_operand.vmem [shape: f32[128,128], index: 12, kind: input, shape index: {}]   ;;  %s5471_s13 = inlined_call_operand.vmem [shape: f32[1,128], index: 13, kind: input, shape index: {}]   ;;  %s5472_s14 = inlined_call_operand.vmem [shape: f32[1,128], index: 14, kind: input, shape index: {}]   ;;  %s5473_s15 = inlined_call_operand.vmem [shape: f32[1,128], index: 15, kind: input, shape index: {}]   ;;  %s5474_s16 = inlined_call_operand.vmem [shape: f32[128,256], index: 16, kind: input, shape index: {}]   ;;  %s5475_s17 = inlined_call_operand.vmem [shape: f32[1,256], index: 17, kind: input, shape index: {}]   ;;  %s5476_s18 = inlined_call_operand.vmem [shape: f32[256,128], index: 18, kind: input, shape index: {}]   ;;  %s5477_s19 = inlined_call_operand.hbm [shape: f32[1,128], index: 19, kind: input, shape index: {}]   ;;  %s5478_s20 = inlined_call_operand.hbm [shape: f32[1,128], index: 20, kind: input, shape index: {}]   ;;  %s5479_s21 = inlined_call_operand.hbm [shape: f32[1,128], index: 21, kind: input, shape index: {}]   ;;  %s5480_s22 = inlined_call_operand.vmem [shape: f32[2,8,128], index: 22, kind: output, shape index: {}]  }
   0x1   :  { %5488 = sst [smem:[#allocation10_spill]] %s5458_s0 }
   0x2   :  { %5489 = sst [smem:[#allocation11_spill]] %s5459_s1 }
   0x3   :  { %5490 = sst [smem:[#allocation12_spill]] %s5460_s2 }
   0x4   :  { %5491 = sst [smem:[#allocation13_spill]] %s5461_s3 }
   0x5   :  { %5492 = sst [smem:[#allocation14_spill]] %s5462_s4 }
   0x6   :  { %5493 = sst [smem:[#allocation15_spill]] %s5463_s5 }
   0x7   :  { %5494 = sst [smem:[#allocation16_spill]] %s5464_s6 }
   0x8   :  { %5495 = sst [smem:[#allocation17_spill]] %s5480_s22 }
   0x9   :  { %27 = vsyncpa [#allocation3], 0 }
   0xa   :  { %28 = vsyncpa [#allocation5], 0  ;;  %s4488_s3 = smov 0  }
   0xb LB: > { %5496 = sst [smem:[#allocation9_spill]] %s4362_s3  ;;  %s4494_s28 = sadd.s32 4294967295, %s4362_s3   ;;  %s4362_s3 = sphi %s4488_s3, %s34_s3  }
   0xc   : > { %p3522_p0 = scmp.ge.s32.totalorder %s4362_s3, 1  ;;  %p537_p1 = scmp.lt.s32.totalorder %s4362_s3, 3 }
   0xd   : > { %p5483_p2 = scmp.eq.s32.totalorder %s4494_s28, 0  ;;  %s4364_s30 = smov [#allocation4]  }
   0xe   : > { %p4499_p3 = pnand %p3522_p0, %p537_p1  ;;  %s612_s4 = sshll.u32 %s4364_s30, 4  ;;  %s613_s4 = int_to_ptr.vmem [resolvable:$true] %s612_s4 }
   0xf   : > { %s4365_s0 = smov [#allocation2]   ;;  %s4366_s1 = smov [#allocation6]  }
  0x10   : > { %s5497_s29 = scalar_select %p4499_p3, 1, 0 }
  0x11   : > { %p4193_p4 = pneg %p4499_p3  ;;  %s601_s23 = sshll.u32 %s4365_s0, 4  ;;  %s4511_s23 = int_to_ptr.vmem [resolvable:$true] %s601_s23 }
  0x12   : > { %s623_s5 = sshll.u32 %s4366_s1, 4  ;;  %s4264_s26 = scalar_lea.hbm %s5478_s20, 16  ;;  %s4513_s5 = int_to_ptr.vmem [resolvable:$true] %s623_s5 }
  0x13   : > { %p4507_p5 = pnand %p5483_p2, %p4193_p4  ;;  %p4265_p6 = scmp.ne.s32.totalorder %s5478_s20, %s4264_s26 }
  0x14   : > { %p4271_p10 = scmp.lt.u32.totalorder %s4264_s26, %s5478_s20 }
  0x15   : > { %p4523_p7 = pneg %p4507_p5 }
  0x17   : > { %p4267_p8 = pnand %p4523_p7, %p4265_p6 }
  0x19   : > { %p4268_p9 = pneg %p4267_p8 }
  0x1b   : > { %p4273_p11 = pnand %p4271_p10, %p4268_p9 }
  0x1d   : > { %4276 = shalt.err (!%p4273_p11)
}
  0x1e   : > { %s4277_s6 = scalar_lea.vmem %s613_s4, 16  ;;  %s4284_s25 = scalar_lea.vmem %s613_s4, 32 }
  0x1f   : > { %p4278_p12 = scmp.ne.s32.totalorder %s613_s4, %s4277_s6  ;;  %p4285_p1 = scmp.lt.s32.totalorder %s613_s4, %s613_s4 }
  0x20   : > { %p4286_p4 = scmp.lt.s32.totalorder %s4284_s25, %s4277_s6 }
  0x21   : > { %p4280_p13 = pnand %p4278_p12, %p4523_p7 }
  0x22   : > { %p4287_p2 = por %p4286_p4, %p4285_p1 }
  0x23   : > { %p4281_p0 = pneg %p4280_p13 }
  0x25   : > { %p4288_p3 = pnand %p4287_p2, %p4281_p0 }
  0x27   : > { %4291 = shalt.err (!%p4288_p3)
}
  0x28   : > { %4199 = dma.hbm_to_vmem [thread:$0]  (!%p4507_p5), %s5478_s20, 16, %s613_s4, [#allocation5]  }
  0x29   : > { %s4292_s1 = scalar_lea.hbm %s5477_s19, 16 }
  0x2a   : > { %p4293_p6 = scmp.ne.s32.totalorder %s5477_s19, %s4292_s1  ;;  %p4299_p2 = scmp.lt.u32.totalorder %s4292_s1, %s5477_s19 }
  0x2c   : > { %p4295_p8 = pnand %p4293_p6, %p4523_p7 }
  0x2e   : > { %p4296_p9 = pneg %p4295_p8 }
  0x30   : > { %p4301_p3 = pnand %p4299_p2, %p4296_p9 }
  0x32   : > { %4304 = shalt.err (!%p4301_p3)
}
  0x33   : > { %s4305_s4 = scalar_lea.vmem %s4511_s23, 16  ;;  %s4312_s22 = scalar_lea.vmem %s4511_s23, 32 }
  0x34   : > { %p4306_p10 = scmp.ne.s32.totalorder %s4511_s23, %s4305_s4  ;;  %p4313_p13 = scmp.lt.s32.totalorder %s4511_s23, %s4511_s23 }
  0x35   : > { %p4314_p0 = scmp.lt.s32.totalorder %s4312_s22, %s4305_s4 }
  0x36   : > { %p4308_p11 = pnand %p4306_p10, %p4523_p7 }
  0x37   : > { %p4315_p1 = por %p4314_p0, %p4313_p13 }
  0x38   : > { %p4309_p12 = pneg %p4308_p11 }
  0x3a   : > { %p4316_p4 = pnand %p4315_p1, %p4309_p12 }
  0x3c   : > { %4319 = shalt.err (!%p4316_p4)
}
  0x3d   : > { %4196 = dma.hbm_to_vmem [thread:$0]  (!%p4507_p5), %s5477_s19, 16, %s4511_s23, [#allocation3]  }
  0x3e   : > { %s4320_s0 = scalar_lea.hbm %s5479_s21, 16 }
  0x3f   : > { %p4321_p6 = scmp.ne.s32.totalorder %s5479_s21, %s4320_s0  ;;  %p4327_p2 = scmp.lt.u32.totalorder %s4320_s0, %s5479_s21 }
  0x41   : > { %p4323_p8 = pnand %p4321_p6, %p4523_p7 }
  0x43   : > { %p4324_p9 = pneg %p4323_p8 }
  0x45   : > { %p4329_p3 = pnand %p4327_p2, %p4324_p9 }
  0x47   : > { %4332 = shalt.err (!%p4329_p3)
}
  0x48   : > { %s4333_s23 = scalar_lea.vmem %s4513_s5, 16  ;;  %s4340_s22 = scalar_lea.vmem %s4513_s5, 32 }
  0x49   : > { %p4334_p10 = scmp.ne.s32.totalorder %s4513_s5, %s4333_s23  ;;  %p4341_p13 = scmp.lt.s32.totalorder %s4513_s5, %s4513_s5 }
  0x4a   : > { %p4342_p0 = scmp.lt.s32.totalorder %s4340_s22, %s4333_s23 }
  0x4b   : > { %p4336_p11 = pnand %p4334_p10, %p4523_p7 }
  0x4c   : > { %p4343_p1 = por %p4342_p0, %p4341_p13 }
  0x4d   : > { %p4337_p12 = pneg %p4336_p11 }
  0x4f   : > { %p4344_p4 = pnand %p4343_p1, %p4337_p12 }
  0x51   : > { %4347 = shalt.err (!%p4344_p4)
}
  0x52   : > { %4202 = dma.hbm_to_vmem [thread:$0]  (!%p4507_p5), %s5479_s21, 16, %s4513_s5, [#allocation5]  }
  0x53   : > { %p5500_p6 = scmp.ne.s32.totalorder %s5497_s29, 0 }
  0x54   : > { %p5501_p7 = scmp.eq.s32.totalorder (!%p5500_p6), %s4494_s28, 0 }
  0x55   : > { %650 = sbr.rel (%p5500_p6) target bundleno = 7044 (0x1b84), region = 108 }
  0x5c   : > { %4353 = dma.done.wait (%p5501_p7), [#allocation3], 16   ;;  %p5502_p8 = pmov %p5501_p7 }
  0x5d   : > { %p5503_p9 = pmov %p5501_p7 }
  0x5e   : > { %4355 = vsyncadd (%p5502_p8), [#allocation3], 4294967280 }
  0x5f   : > { %4357 = dma.done.wait (%p5503_p9), [#allocation5], 32   ;;  %p5504_p2 = pmov %p5501_p7 }
  0x60   : > { %v4367_v0 = vmov 0.0   ;;  %v4368_v1 = vmov 0.0|0.0   ;;  %s5505_s24 = sld [smem:[#allocation12_spill]]  ;;  %p722_p5 = scmp.lt.s32.totalorder %s4494_s28, 1  ;;  %vm4369_vm0 = vmmov 0   ;;  %vm966_vm1 = vcmask 261120  }
  0x61   : > { %4359 = vsyncadd (%p5504_p2), [#allocation5], 4294967264  ;;  %865 = vmatprep.mubr.f32.mxu0 %v4367_v0  ;;  %3989 = vmatprep.subr.bf16.mxu1 %v4368_v1  ;;  %s5507_s0 = sld [smem:[#allocation13_spill]]  ;;  %s4370_s1 = smov 96   ;;  %vm1044_vm2 = vcmask 64512  }
  0x62   : > { %s5516_s28 = smov (!%p722_p5, %s4494_s28), 1  ;;  %3751 = vmatprep.mubr.msk.f32.mxu1 %vm4369_vm0, %v4367_v0  ;;  %s5508_s25 = sld [smem:[#allocation14_spill]] }
  0x63   : > { %s4732_s29 = sshll.u32 %s5516_s28, 3  ;;  %s5506_s28 = sld [smem:[#allocation10_spill]] }
  0x64   : > { %s4371_s30 = smov 64   ;;  %s5486_s27 = smov 32  }
  0x65   : > { %s5509_s2 = sld [smem:[#allocation15_spill]]  ;;  %s5510_s22 = sld [smem:[#allocation11_spill]] }
  0x66   : > { %v737_v2 = vld [vmem:[%s5505_s24 + $0x8] sm:$0xff]  ;;  %v740_v3 = vld [vmem:[%s5505_s24 + $0x20] sm:$0xff]  ;;  %v739_v6 = vld [vmem:[%s5505_s24 + $0x18] sm:$0xff]  ;;  %s5511_s26 = sld [smem:[#allocation16_spill]]  ;;  %s5513_s5 = sld [smem:[#allocation17_spill]] }
  0x67   : > { %v736_v4 = vld [vmem:[%s5505_s24] sm:$0xff]  ;;  %v3957_v5 = vpack.c.bf16 %v740_v3, %v737_v2  ;;  %v743_v7 = vld [vmem:[%s5505_s24 + $0x38] sm:$0xff]  ;;  %v746_v8 = vld [vmem:[%s5505_s24 + $0x50] sm:$0xff] }
  0x68   : > { %v3959_v9 = vpack.c.bf16 %v739_v6, %v736_v4  ;;  %v3961_v10 = vpack.c.bf16 %v746_v8, %v743_v7  ;;  %v742_v11 = vld [vmem:[%s5505_s24 + $0x30] sm:$0xff]  ;;  %v745_v12 = vld [vmem:[%s5505_s24 + $0x48] sm:$0xff]  ;;  %v752_v14 = vld [vmem:[%s5505_s24 + $0x80] sm:$0xff] }
  0x69   : > { %v749_v13 = vld [vmem:[%s5505_s24 + $0x68] sm:$0xff]  ;;  %3958 = vmatprep.subr.bf16.mxu0 %v3957_v5  ;;  %v3963_v15 = vpack.c.bf16 %v745_v12, %v742_v11  ;;  %v748_v17 = vld [vmem:[%s5505_s24 + $0x60] sm:$0xff]  ;;  %v751_v18 = vld [vmem:[%s5505_s24 + $0x78] sm:$0xff]  ;;  %s725_s6 = scalar_lea.vmem %s5506_s28, %s4732_s29 }
  0x6a   : > { %3960 = vmatpush1.bf16.msra.mxu0 %v3959_v9  ;;  %v3965_v16 = vpack.c.bf16 %v752_v14, %v749_v13  ;;  %v755_v19 = vld [vmem:[%s5505_s24 + $0x98] sm:$0xff]  ;;  %v758_v20 = vld [vmem:[%s5505_s24 + $0xb0] sm:$0xff]  ;;  %v3967_v21 = vpack.c.bf16 %v751_v18, %v748_v17  ;;  %v757_v24 = vld [vmem:[%s5505_s24 + $0xa8] sm:$0xff]  ;;  %v786_v13 = vlaneseq }
  0x6b   : > { %3962 = vmatprep.subr.bf16.mxu0 %v3961_v10  ;;  %v3969_v22 = vpack.c.bf16 %v758_v20, %v755_v19  ;;  %v754_v23 = vld [vmem:[%s5505_s24 + $0x90] sm:$0xff]  ;;  %v761_v25 = vld [vmem:[%s5505_s24 + $0xc8] sm:$0xff]  ;;  %v764_v26 = vld [vmem:[%s5505_s24 + $0xe0] sm:$0xff]  ;;  %s729_s3 = scalar_lea.vmem %s5510_s22, %s4732_s29 }
  0x6c   : > { %v738_v27 = vld [vmem:[%s5505_s24 + $0x10] sm:$0xff]  ;;  %v741_v28 = vld [vmem:[%s5505_s24 + $0x28] sm:$0xff]  ;;  %v744_v29 = vld [vmem:[%s5505_s24 + $0x40] sm:$0xff]  ;;  %v3971_v30 = vpack.c.bf16 %v757_v24, %v754_v23  ;;  %v3973_v33 = vpack.c.bf16 %v764_v26, %v761_v25  ;;  %v787_v14 = vshrl.u32 %v786_v13, 7 }
  0x6d   : > { %v3990_v31 = vpack.c.bf16 %v741_v28, %v738_v27  ;;  %v747_v32 = vld [vmem:[%s5505_s24 + $0x58] sm:$0xff]  ;;  %v760_v34 = vld [vmem:[%s5505_s24 + $0xc0] sm:$0xff]  ;;  %v770_v37 = vld [vmem:[%s5505_s24 + $0x110] sm:$0xff] }
  0x6e   : > { %3964 = vmatpush1.bf16.msra.mxu0 %v3963_v15  ;;  %v763_v35 = vld [vmem:[%s5505_s24 + $0xd8] sm:$0xff]  ;;  %v3993_v38 = vpack.c.bf16 %v747_v32, %v744_v29  ;;  %v750_v39 = vld [vmem:[%s5505_s24 + $0x70] sm:$0xff]  ;;  %v753_v40 = vld [vmem:[%s5505_s24 + $0x88] sm:$0xff]  ;;  %v4772_v15 = vsub.s32 1, %v787_v14  ;;  %v4777_v17 = vsub.s32 0, %v787_v14  ;;  %v796_v24 = vsub.s32 2, %v787_v14 }
  0x6f   : > { %3966 = vmatprep.subr.bf16.mxu0 %v3965_v16  ;;  %v767_v36 = vld [vmem:[%s5505_s24 + $0xf8] sm:$0xff]  ;;  %3991 = vmatpush3.bf16.msra.mxu1 %v3990_v31  ;;  %v3975_v41 = vpack.c.bf16 %v763_v35, %v760_v34  ;;  %v766_v43 = vld [vmem:[%s5505_s24 + $0xf0] sm:$0xff]  ;;  %v769_v44 = vld [vmem:[%s5505_s24 + $0x108] sm:$0xff]  ;;  %v3996_v47 = vpack.c.bf16 %v753_v40, %v750_v39 }
  0x70   : > { %3992 = vmatprep.subr.bf16.mxu1 %v4368_v1  ;;  %v3977_v42 = vpack.c.bf16 %v770_v37, %v767_v36  ;;  %v773_v45 = vld [vmem:[%s5505_s24 + $0x128] sm:$0xff]  ;;  %v776_v46 = vld [vmem:[%s5505_s24 + $0x140] sm:$0xff]  ;;  %v759_v49 = vld [vmem:[%s5505_s24 + $0xb8] sm:$0xff]  ;;  %v3979_v50 = vpack.c.bf16 %v769_v44, %v766_v43 }
  0x71   : > { %v756_v48 = vld [vmem:[%s5505_s24 + $0xa0] sm:$0xff]  ;;  %v3981_v51 = vpack.c.bf16 %v776_v46, %v773_v45  ;;  %v775_v53 = vld [vmem:[%s5505_s24 + $0x138] sm:$0xff]  ;;  %v782_v55 = vld [vmem:[%s5505_s24 + $0x170] sm:$0xff] }
  0x72   : > { %3968 = vmatpush1.bf16.msra.mxu0 %v3967_v21  ;;  %v772_v52 = vld [vmem:[%s5505_s24 + $0x120] sm:$0xff]  ;;  %v779_v54 = vld [vmem:[%s5505_s24 + $0x158] sm:$0xff]  ;;  %v3999_v56 = vpack.c.bf16 %v759_v49, %v756_v48  ;;  %v762_v57 = vld [vmem:[%s5505_s24 + $0xd0] sm:$0xff] }
  0x73   : > { %3970 = vmatprep.subr.bf16.mxu0 %v3969_v22  ;;  %3994 = vmatpush3.bf16.msra.mxu1 %v3993_v38  ;;  %v765_v58 = vld [vmem:[%s5505_s24 + $0xe8] sm:$0xff]  ;;  %v3983_v59 = vpack.c.bf16 %v775_v53, %v772_v52  ;;  %v3985_v60 = vpack.c.bf16 %v782_v55, %v779_v54  ;;  %v778_v61 = vld [vmem:[%s5505_s24 + $0x150] sm:$0xff]  ;;  %v768_v2 = vld [vmem:[%s5505_s24 + $0x100] sm:$0xff] }
  0x74   : > { %3995 = vmatprep.subr.bf16.mxu1 %v4368_v1  ;;  %v781_v62 = vld [vmem:[%s5505_s24 + $0x168] sm:$0xff]  ;;  %v4002_v63 = vpack.c.bf16 %v765_v58, %v762_v57  ;;  %v771_v3 = vld [vmem:[%s5505_s24 + $0x118] sm:$0xff]  ;;  %v774_v6 = vld [vmem:[%s5505_s24 + $0x130] sm:$0xff] }
  0x75   : > { %v3987_v4 = vpack.c.bf16 %v781_v62, %v778_v61  ;;  %v4005_v5 = vpack.c.bf16 %v771_v3, %v768_v2  ;;  %v777_v7 = vld [vmem:[%s5505_s24 + $0x148] sm:$0xff]  ;;  %v4752_v8 = vld [vmem:[%s725_s6] sm:$0xff]  ;;  %v783_v11 = vld [vmem:[%s5505_s24 + $0x178] sm:$0xff] }
  0x76   : > { %3972 = vmatpush1.bf16.msra.mxu0 %v3971_v30  ;;  %v4008_v9 = vpack.c.bf16 %v777_v7, %v774_v6  ;;  %v780_v10 = vld [vmem:[%s5505_s24 + $0x160] sm:$0xff]  ;;  %v943_v39 = vld [vmem:[%s5508_s25 + $0x8] sm:$0xff]  ;;  %v944_v40 = vld [vmem:[%s5508_s25 + $0x10] sm:$0xff] }
  0x77   : > { %3974 = vmatprep.subr.bf16.mxu0 %v3973_v33  ;;  %3997 = vmatpush3.bf16.msra.mxu1 %v3996_v47  ;;  %v4011_v12 = vpack.c.bf16 %v783_v11, %v780_v10  ;;  %v784_v16 = vld [vmem:[%s5507_s0] sm:$0x7]  ;;  %v947_v62 = vld [vmem:[%s5508_s25 + $0x28] sm:$0xff]  ;;  %v949_v3 = vld [vmem:[%s5508_s25 + $0x38] sm:$0xff]  ;;  %s733_s0 = scalar_lea.vmem %s5513_s5, %s4732_s29 }
  0x78   : > { %3998 = vmatprep.subr.bf16.mxu1 %v4368_v1  ;;  %v793_v18 = vrot.slane %v784_v16, %v4772_v15  ;;  %v789_v20 = vrot.slane %v784_v16, %v4777_v17  ;;  %v797_v25 = vrot.slane %v784_v16, %v796_v24  ;;  %v942_v38 = vld [vmem:[%s5508_s25] sm:$0xff] }
  0x79   : > { %v946_v61 = vld [vmem:[%s5508_s25 + $0x20] sm:$0xff] }
  0x7a   : > { %3976 = vmatpush1.bf16.msra.mxu0 %v3975_v41  ;;  %v4014_v41 = vpack.c.bf16 %v943_v39, %v942_v38  ;;  %v4020_v2 = vpack.c.bf16 %v947_v62, %v946_v61 }
  0x7b   : > { %3978 = vmatprep.subr.bf16.mxu0 %v3977_v42  ;;  %4000 = vmatpush3.bf16.msra.mxu1 %v3999_v56  ;;  %v945_v42 = vld [vmem:[%s5508_s25 + $0x18] sm:$0xff] }
  0x7c   : > { %4001 = vmatprep.subr.bf16.mxu1 %v4368_v1  ;;  %v4017_v43 = vpack.c.bf16 %v945_v42, %v944_v40 }
  0x7e   : > { %3980 = vmatpush1.bf16.msra.mxu0 %v3979_v50 }
  0x7f   : > { %3982 = vmatprep.subr.bf16.mxu0 %v3981_v51  ;;  %4003 = vmatpush3.bf16.msra.mxu1 %v4002_v63  ;;  %v948_v63 = vld [vmem:[%s5508_s25 + $0x30] sm:$0xff] }
  0x80   : > { %4004 = vmatprep.subr.bf16.mxu1 %v4368_v1 }
  0x82   : > { %3984 = vmatpush1.bf16.msra.mxu0 %v3983_v59 }
  0x83   : > { %3986 = vmatprep.subr.bf16.mxu0 %v3985_v60  ;;  %4006 = vmatpush3.bf16.msra.mxu1 %v4005_v5 }
  0x84   : > { %4007 = vmatprep.subr.bf16.mxu1 %v4368_v1 }
  0x86   : > { %3988 = vmatpush1.bf16.msra.mxu0 %v3987_v4  ;;  %v4023_v4 = vpack.c.bf16 %v949_v3, %v948_v63 }
  0x87   : > { %4013 = vmatprep.subr.bf16.mxu0 %v4368_v1  ;;  %4009 = vmatpush3.bf16.msra.mxu1 %v4008_v9 }
  0x88   : > { %4010 = vmatprep.subr.bf16.mxu1 %v4368_v1 }
  0x89   : > { %866 = vmatmul.mubr.f32.vlgmr.msra.gmra.mrb[0].mxu0 %v4752_v8 }
  0x8a   : > { %3772 = vmatprep.mubr.msk.f32.mxu0 %vm4369_vm0, %v4367_v0  ;;  %4015 = vmatpush3.bf16.msra.mxu0 %v4014_v41 }
  0x8b   : > { %4012 = vmatpush3.bf16.msra.mxu1 %v4011_v12  ;;  %4016 = vmatprep.subr.bf16.mxu0 %v4368_v1 }
  0x8c   : > { %3754 = vmatprep.subr.mxu1 %v4367_v0 }
  0x8e   : > { %3752 = vmatmul.mubr.f32.vlgmr.msra.gmra.mrb[0].mxu1 %v4752_v8  ;;  %4018 = vmatpush3.bf16.msra.mxu0 %v4017_v43 }
  0x8f   : > { %3756 = vmatprep.mubr.msk.f32.mxu1 %vm4369_vm0, %v4367_v0  ;;  %4019 = vmatprep.subr.bf16.mxu0 %v4368_v1 }
 0x15c   : > { %v867_v19 = vpop.f32.mrb[0].mxu0 }
 0x15d   : > { %v869_v21 = vpop.f32.mrb[1].mxu0  ;;  %v4787_v23 = vadd.f32 %v867_v19, %v789_v20 }
 0x15e   : > { %v4781_v22 = vadd.f32 %v869_v21, %v793_v18 }
 0x160   : > { %1205 = vrot.lane.b32.xlu1 %v4781_v22, %s4370_s1  ;;  %3755 = vmatpush3.xpose.msk.msra.mxu1 %vm966_vm1, %v4781_v22 }
 0x161   : > { %3759 = vmatprep.subr.mxu1 %v4367_v0  ;;  %v938_v26 = vpop.f32.mrb[0].mxu1 }
 0x162   : > { %v4796_v27 = vadd.f32 %v938_v26, %v797_v25  ;;  %v3753_v28 = vpop.f32.mrb[1].mxu1 }
 0x163   : > { %3757 = vmatmul.mubr.msk.f32.vlgmr.msra.gmra.mrb[2].mxu1 %vm966_vm1, %v4787_v23 }
 0x164   : > { %1203 = vrot.lane.b32.xlu1 %v4787_v23, %s4370_s1  ;;  %3761 = vmatprep.mubr.msk.f32.mxu1 %vm4369_vm0, %v4367_v0 }
 0x165   : > { %3760 = vmatpush3.msra.mxu1 %v4796_v27 }
 0x166   : > { %3775 = vmatprep.subr.mxu1 %v4367_v0 }
 0x1d2   : > { %v1206_v46 = vpop.permute.xlu1 %1205 }
 0x1d6   : > { %v1204_v48 = vpop.permute.xlu1 %1203 }
 0x236   : > { %v1039_v29 = vpop.f32.mrb[2].mxu1 }
 0x237   : > { %v1043_v30 = vmul.f32 0.17677669, %v1039_v29  ;;  %v3758_v31 = vpop.f32.mrb[3].mxu1  ;;  %v950_v29 = vld [vmem:[%s5508_s25 + $0x40] sm:$0xff] }
 0x238   : > { %v952_v31 = vld [vmem:[%s5508_s25 + $0x50] sm:$0xff] }
 0x239   : > { %v1045_v32 = vsel %vm1044_vm2, %v1043_v30, -inf }
 0x23a   : > { %1046 = vmax.xlane.f32.xlu0 %v1045_v32 }
 0x2c7   : > { %v1047_v33 = vpop.xlane.xlu0 %1046 }
 0x2c8   : > { %v1048_v34 = vsub.f32 %v1043_v30, %v1047_v33  ;;  %v951_v30 = vld [vmem:[%s5508_s25 + $0x48] sm:$0xff]  ;;  %v953_v33 = vld [vmem:[%s5508_s25 + $0x58] sm:$0xff] }
 0x2c9   : > { %v4026_v32 = vpack.c.bf16 %v951_v30, %v950_v29  ;;  %v2055_v29 = vld [vmem:[%s5468_s10 + $0x48] sm:$0xff]  ;;  %v2057_v30 = vld [vmem:[%s5468_s10 + $0x58] sm:$0xff] }
 0x2ca   : > { %v1049_v35 = vmul.f32 1.442695, %v1048_v34  ;;  %v4029_v34 = vpack.c.bf16 %v953_v33, %v952_v31  ;;  %v1956_v33 = vld [vmem:[%s5466_s8 + $0x18] sm:$0xff] }
 0x2cc   : > { %4226 = vpow2.f32 %v1049_v35 }
 0x2d6   : > { %v4227_v36 = vpop.eup %4226 }
 0x2d7   : > { %v1051_v37 = vsel %vm1044_vm2, %v4227_v36, 0.0 }
 0x2d8   : > { %1052 = vadd.xlane.f32.xlu0 %v1051_v37 }
 0x365   : > { %v1053_v44 = vpop.xlane.xlu0 %1052 }
 0x366   : > { %4228 = vrcp.f32 %v1053_v44 }
 0x370   : > { %v4229_v45 = vpop.eup %4228 }
 0x371   : > { %v1055_v47 = vmul.f32 %v4229_v45, %v4227_v36 }
 0x373   : > { %3762 = vmatmul.mubr.msk.f32.vlgmr.msra.gmra.mrb[4].mxu1 %vm1044_vm2, %v1055_v47 }
 0x374   : > { %3776 = vmatpush3.xpose.msk.msra.mxu1 %vm966_vm1, %v1206_v46  ;;  %3777 = vmatprep.mubr.msk.f32.mxu1 %vm4369_vm0, %v4367_v0 }
 0x375   : > { %3780 = vmatprep.subr.mxu1 %v4367_v0 }
 0x377   : > { %3778 = vmatmul.mubr.msk.f32.vlgmr.msra.gmra.mrb[6].mxu1 %vm966_vm1, %v1204_v48 }
 0x378   : > { %3782 = vmatprep.mubr.msk.f32.mxu1 %vm4369_vm0, %v4367_v0 }
 0x446   : > { %v1125_v49 = vpop.f32.mrb[4].mxu1 }
 0x447   : > { %v3763_v50 = vpop.f32.mrb[5].mxu1  ;;  %3773 = vmatmul.mubr.msk.f32.vlgmr.msra.gmra.mrb[2].mxu0 %vm966_vm1, %v1125_v49 }
 0x448   : > { %3793 = vmatprep.mubr.msk.f32.mxu0 %vm4369_vm0, %v4367_v0  ;;  %4021 = vmatpush3.bf16.msra.mxu0 %v4020_v2 }
 0x449   : > { %4022 = vmatprep.subr.bf16.mxu0 %v4368_v1 }
 0x44a   : > { %v1277_v51 = vpop.f32.mrb[6].mxu1 }
 0x44b   : > { %v1281_v52 = vmul.f32 0.17677669, %v1277_v51  ;;  %v3779_v53 = vpop.f32.mrb[7].mxu1 }
 0x44c   : > { %4024 = vmatpush3.bf16.msra.mxu0 %v4023_v4 }
 0x44d   : > { %v1282_v54 = vsel %vm1044_vm2, %v1281_v52, -inf  ;;  %4025 = vmatprep.subr.bf16.mxu0 %v4368_v1 }
 0x44e   : > { %1283 = vmax.xlane.f32.xlu0 %v1282_v54 }
 0x464   : > { %1294 = vrot.lane.b32.xlu0 %v4796_v27, %s4370_s1 }
 0x468   : > { %1446 = vrot.lane.b32.xlu0 %v4781_v22, %s4371_s30 }
 0x46c   : > { %1444 = vrot.lane.b32.xlu0 %v4787_v23, %s4371_s30 }
 0x4db   : > { %v1284_v55 = vpop.xlane.xlu0 %1283 }
 0x4dc   : > { %v1285_v56 = vsub.f32 %v1281_v52, %v1284_v55 }
 0x4de   : > { %v1286_v57 = vmul.f32 1.442695, %v1285_v56  ;;  %v954_v56 = vld [vmem:[%s5508_s25 + $0x60] sm:$0xff] }
 0x4df   : > { %v1295_v58 = vpop.permute.xlu0 %1294 }
 0x4e0   : > { %4230 = vpow2.f32 %v1286_v57  ;;  %3781 = vmatpush3.msra.mxu1 %v1295_v58  ;;  %v956_v57 = vld [vmem:[%s5508_s25 + $0x70] sm:$0xff] }
 0x4e1   : > { %3796 = vmatprep.subr.mxu1 %v4367_v0 }
 0x4e3   : > { %v1447_v10 = vpop.permute.xlu0 %1446 }
 0x4e7   : > { %v1445_v12 = vpop.permute.xlu0 %1444 }
 0x4ea   : > { %v4231_v59 = vpop.eup %4230 }
 0x4eb   : > { %v1288_v60 = vsel %vm1044_vm2, %v4231_v59, 0.0 }
 0x4ec   : > { %1289 = vadd.xlane.f32.xlu1 %v1288_v60 }
 0x4fd   : > { %1534 = vrot.lane.b32.xlu1 %v4796_v27, %s4371_s30 }
 0x501   : > { %1686 = vrot.lane.b32.xlu1 %v4781_v22, %s5486_s27 }
 0x51a   : > { %v1198_v5 = vpop.f32.mrb[2].mxu0 }
 0x51b   : > { %v3774_v6 = vpop.f32.mrb[3].mxu0 }
 0x579   : > { %v1290_v7 = vpop.xlane.xlu1 %1289 }
 0x57a   : > { %4232 = vrcp.f32 %v1290_v7 }
 0x57d   : > { %v1535_v13 = vpop.permute.xlu1 %1534 }
 0x581   : > { %v1687_v39 = vpop.permute.xlu1 %1686 }
 0x584   : > { %v4233_v9 = vpop.eup %4232 }
 0x585   : > { %v1292_v11 = vmul.f32 %v4233_v9, %v4231_v59  ;;  %v957_v59 = vld [vmem:[%s5508_s25 + $0x78] sm:$0xff] }
 0x586   : > { %v4035_v60 = vpack.c.bf16 %v957_v59, %v956_v57  ;;  %v2064_v57 = vld [vmem:[%s5468_s10 + $0x90] sm:$0xff]  ;;  %v2067_v59 = vld [vmem:[%s5468_s10 + $0xa8] sm:$0xff] }
 0x587   : > { %3783 = vmatmul.mubr.msk.f32.vlgmr.msra.gmra.mrb[8].mxu1 %vm1044_vm2, %v1292_v11 }
 0x588   : > { %3797 = vmatpush3.xpose.msk.msra.mxu1 %vm966_vm1, %v1447_v10  ;;  %3798 = vmatprep.mubr.msk.f32.mxu1 %vm4369_vm0, %v4367_v0 }
 0x589   : > { %3801 = vmatprep.subr.mxu1 %v4367_v0 }
 0x58b   : > { %3799 = vmatmul.mubr.msk.f32.vlgmr.msra.gmra.mrb[10].mxu1 %vm966_vm1, %v1445_v12  ;;  %v2047_v12 = vld [vmem:[%s5468_s10 + $0x8] sm:$0xff] }
 0x58c   : > { %3802 = vmatpush3.msra.mxu1 %v1535_v13  ;;  %3803 = vmatprep.mubr.msk.f32.mxu1 %vm4369_vm0, %v4367_v0  ;;  %v2049_v13 = vld [vmem:[%s5468_s10 + $0x18] sm:$0xff] }
 0x58d   : > { %3817 = vmatprep.subr.mxu1 %v4367_v0 }
 0x65a   : > { %v1366_v14 = vpop.f32.mrb[8].mxu1 }
 0x65b   : > { %v3784_v16 = vpop.f32.mrb[9].mxu1  ;;  %3794 = vmatmul.mubr.msk.f32.vlgmr.msra.gmra.mrb[4].mxu0 %vm966_vm1, %v1366_v14  ;;  %v2046_v14 = vld [vmem:[%s5468_s10] sm:$0xff] }
 0x65c   : > { %3814 = vmatprep.mubr.msk.f32.mxu0 %vm4369_vm0, %v4367_v0  ;;  %4027 = vmatpush3.bf16.msra.mxu0 %v4026_v32  ;;  %v4061_v16 = vpack.c.bf16 %v2049_v13, %v2047_v12  ;;  %v1955_v32 = vld [vmem:[%s5466_s8 + $0x10] sm:$0xff]  ;;  %v2070_v12 = vld [vmem:[%s5468_s10 + $0xc0] sm:$0xff] }
 0x65d   : > { %4028 = vmatprep.subr.bf16.mxu0 %v4368_v1 }
 0x65e   : > { %v1518_v18 = vpop.f32.mrb[10].mxu1 }
 0x65f   : > { %v1522_v19 = vmul.f32 0.17677669, %v1518_v18  ;;  %v3800_v20 = vpop.f32.mrb[11].mxu1  ;;  %v2048_v18 = vld [vmem:[%s5468_s10 + $0x10] sm:$0xff] }
 0x660   : > { %4030 = vmatpush3.bf16.msra.mxu0 %v4029_v34  ;;  %v4063_v20 = vpack.c.bf16 %v2048_v18, %v2046_v14  ;;  %v4069_v34 = vpack.c.bf16 %v2057_v30, %v2055_v29  ;;  %v2072_v14 = vld [vmem:[%s5468_s10 + $0xd0] sm:$0xff]  ;;  %v2077_v18 = vld [vmem:[%s5468_s10 + $0xf8] sm:$0xff] }
 0x661   : > { %v1523_v21 = vsel %vm1044_vm2, %v1522_v19, -inf  ;;  %4031 = vmatprep.subr.bf16.mxu0 %v4368_v1  ;;  %v1968_v29 = vld [vmem:[%s5466_s8 + $0x78] sm:$0xff] }
 0x662   : > { %1524 = vmax.xlane.f32.xlu0 %v1523_v21 }
 0x6ef   : > { %v1525_v22 = vpop.xlane.xlu0 %1524 }
 0x6f0   : > { %v1526_v24 = vsub.f32 %v1522_v19, %v1525_v22  ;;  %v2053_v19 = vld [vmem:[%s5468_s10 + $0x38] sm:$0xff]  ;;  %v1953_v22 = vld [vmem:[%s5466_s8] sm:$0xff] }
 0x6f2   : > { %v1527_v25 = vmul.f32 1.442695, %v1526_v24  ;;  %v1954_v24 = vld [vmem:[%s5466_s8 + $0x8] sm:$0xff] }
 0x6f4   : > { %4234 = vpow2.f32 %v1527_v25  ;;  %v2050_v25 = vld [vmem:[%s5468_s10 + $0x20] sm:$0xff] }
 0x6fe   : > { %v4235_v26 = vpop.eup %4234 }
 0x6ff   : > { %v1529_v28 = vsel %vm1044_vm2, %v4235_v26, 0.0 }
 0x700   : > { %1530 = vadd.xlane.f32.xlu1 %v1529_v28  ;;  %v2052_v28 = vld [vmem:[%s5468_s10 + $0x30] sm:$0xff] }
 0x701   : > { %v4067_v31 = vpack.c.bf16 %v2052_v28, %v2050_v25  ;;  %v1967_v28 = vld [vmem:[%s5466_s8 + $0x70] sm:$0xff] }
 0x702   : > { %v4059_v30 = vpack.c.bf16 %v1968_v29, %v1967_v28  ;;  %v2168_v28 = vld [vmem:[%s5470_s12 + $0x38] sm:$0xff] }
 0x711   : > { %1684 = vrot.lane.b32.xlu1 %v4787_v23, %s5486_s27  ;;  %v3534_v23 = vld [vmem:[%s5509_s2] ss:$0 sm:$0xff] }
 0x712   : > { %v1202_v35 = vadd.f32 %v3534_v23, %v1198_v5  ;;  %v4041_v23 = vpack.c.bf16 %v1956_v33, %v1955_v32 }
 0x72e   : > { %v1439_v36 = vpop.f32.mrb[4].mxu0 }
 0x72f   : > { %v1443_v37 = vadd.f32 %v1439_v36, %v1202_v35  ;;  %v3795_v38 = vpop.f32.mrb[5].mxu0  ;;  %v2054_v35 = vld [vmem:[%s5468_s10 + $0x40] sm:$0xff]  ;;  %v2056_v36 = vld [vmem:[%s5468_s10 + $0x50] sm:$0xff] }
 0x730   : > { %v2061_v38 = vld [vmem:[%s5468_s10 + $0x78] sm:$0xff] }
 0x78d   : > { %v1531_v40 = vpop.xlane.xlu1 %1530 }
 0x78e   : > { %4236 = vrcp.f32 %v1531_v40  ;;  %v1958_v40 = vld [vmem:[%s5466_s8 + $0x28] sm:$0xff] }
 0x791   : > { %v1685_v43 = vpop.permute.xlu1 %1684 }
 0x798   : > { %v4237_v41 = vpop.eup %4236 }
 0x799   : > { %v1533_v42 = vmul.f32 %v4237_v41, %v4235_v26  ;;  %v4038_v26 = vpack.c.bf16 %v1954_v24, %v1953_v22  ;;  %v4071_v41 = vpack.c.bf16 %v2056_v36, %v2054_v35  ;;  %v2074_v22 = vld [vmem:[%s5468_s10 + $0xe0] sm:$0xff]  ;;  %v2076_v24 = vld [vmem:[%s5468_s10 + $0xf0] sm:$0xff] }
 0x79a   : > { %v3551_v35 = vld [vmem:[%s5511_s26] ss:$0 sm:$0xff]  ;;  %s5512_s26 = smov 32  }
 0x79b   : > { %3804 = vmatmul.mubr.msk.f32.vlgmr.msra.gmra.mrb[12].mxu1 %vm1044_vm2, %v1533_v42 }
 0x79c   : > { %3818 = vmatpush3.xpose.msk.msra.mxu1 %vm966_vm1, %v1687_v39  ;;  %3819 = vmatprep.mubr.msk.f32.mxu1 %vm4369_vm0, %v4367_v0  ;;  %v1957_v39 = vld [vmem:[%s5466_s8 + $0x20] sm:$0xff] }
 0x79d   : > { %3822 = vmatprep.subr.mxu1 %v4367_v0 }
 0x79f   : > { %3820 = vmatmul.mubr.msk.f32.vlgmr.msra.gmra.mrb[14].mxu1 %vm966_vm1, %v1685_v43  ;;  %v4044_v43 = vpack.c.bf16 %v1958_v40, %v1957_v39  ;;  %v2078_v40 = vld [vmem:[%s5469_s11] sm:$0x3] }
 0x7a0   : > { %3824 = vmatprep.mubr.msk.f32.mxu1 %vm4369_vm0, %v4367_v0 }
 0x86e   : > { %v1606_v44 = vpop.f32.mrb[12].mxu1 }
 0x86f   : > { %v3805_v45 = vpop.f32.mrb[13].mxu1  ;;  %3815 = vmatmul.mubr.msk.f32.vlgmr.msra.gmra.mrb[6].mxu0 %vm966_vm1, %v1606_v44  ;;  %v2058_v44 = vld [vmem:[%s5468_s10 + $0x60] sm:$0xff] }
 0x870   : > { %3835 = vmatprep.mubr.msk.f32.mxu0 %vm4369_vm0, %v4367_v0  ;;  %v2060_v45 = vld [vmem:[%s5468_s10 + $0x70] sm:$0xff] }
 0x872   : > { %v1758_v46 = vpop.f32.mrb[14].mxu1 }
 0x873   : > { %v1762_v47 = vmul.f32 0.17677669, %v1758_v46  ;;  %v3821_v48 = vpop.f32.mrb[15].mxu1  ;;  %v4075_v46 = vpack.c.bf16 %v2060_v45, %v2058_v44  ;;  %v2087_v45 = vrot.slane %v2078_v40, %v4772_v15 }
 0x875   : > { %v1763_v49 = vsel %vm1044_vm2, %v1762_v47, -inf }
 0x876   : > { %1764 = vmax.xlane.f32.xlu0 %v1763_v49 }
 0x88c   : > { %1774 = vrot.lane.b32.xlu0 %v4796_v27, %s5486_s27  ;;  %v955_v27 = vld [vmem:[%s5508_s25 + $0x68] sm:$0xff] }
 0x88d   : > { %v4032_v58 = vpack.c.bf16 %v955_v27, %v954_v56  ;;  %v2062_v56 = vld [vmem:[%s5468_s10 + $0x80] sm:$0xff] }
 0x88f   : > { %4033 = vmatpush3.bf16.msra.mxu0 %v4032_v58  ;;  %v4079_v58 = vpack.c.bf16 %v2064_v57, %v2062_v56 }
 0x890   : > { %4034 = vmatprep.subr.bf16.mxu0 %v4368_v1 }
 0x893   : > { %4036 = vmatpush3.bf16.msra.mxu0 %v4035_v60  ;;  %v2069_v60 = vld [vmem:[%s5468_s10 + $0xb8] sm:$0xff] }
 0x894   : > { %4062 = vmatprep.subr.bf16.mxu0 %v4061_v16  ;;  %v2075_v16 = vld [vmem:[%s5468_s10 + $0xe8] sm:$0xff] }
 0x903   : > { %v1765_v50 = vpop.xlane.xlu0 %1764 }
 0x904   : > { %v1766_v51 = vsub.f32 %v1762_v47, %v1765_v50 }
 0x906   : > { %v1767_v52 = vmul.f32 1.442695, %v1766_v51  ;;  %v2063_v51 = vld [vmem:[%s5468_s10 + $0x88] sm:$0xff] }
 0x907   : > { %v1775_v53 = vpop.permute.xlu0 %1774 }
 0x908   : > { %4238 = vpow2.f32 %v1767_v52  ;;  %3823 = vmatpush3.msra.mxu1 %v1775_v53  ;;  %v2065_v52 = vld [vmem:[%s5468_s10 + $0x98] sm:$0xff] }
 0x909   : > { %4037 = vmatprep.subr.bf16.mxu1 %v4368_v1  ;;  %v4077_v53 = vpack.c.bf16 %v2065_v52, %v2063_v51 }
 0x912   : > { %v4239_v54 = vpop.eup %4238 }
 0x913   : > { %v1769_v55 = vsel %vm1044_vm2, %v4239_v54, 0.0 }
 0x914   : > { %1770 = vadd.xlane.f32.xlu1 %v1769_v55  ;;  %v1960_v55 = vld [vmem:[%s5466_s8 + $0x38] sm:$0xff] }
 0x942   : > { %v1679_v61 = vpop.f32.mrb[6].mxu0 }
 0x943   : > { %v1683_v62 = vadd.f32 %v1679_v61, %v1443_v37  ;;  %v3816_v63 = vpop.f32.mrb[7].mxu0  ;;  %v2059_v37 = vld [vmem:[%s5468_s10 + $0x68] sm:$0xff]  ;;  %v4081_v61 = vpack.c.bf16 %v2069_v60, %v2067_v59  ;;  %v2161_v59 = vld [vmem:[%s5470_s12] sm:$0xff] }
 0x944   : > { %v4073_v42 = vpack.c.bf16 %v2061_v38, %v2059_v37  ;;  %v1962_v63 = vld [vmem:[%s5466_s8 + $0x48] sm:$0xff]  ;;  %v3552_v37 = vld [vmem:[%s5465_s7] ss:$0 sm:$0xff] }
 0x945   : > { %v2162_v60 = vld [vmem:[%s5470_s12 + $0x8] sm:$0xff] }
 0x9a1   : > { %v1771_v2 = vpop.xlane.xlu1 %1770 }
 0x9a2   : > { %4240 = vrcp.f32 %v1771_v2  ;;  %v2066_v2 = vld [vmem:[%s5468_s10 + $0xa0] sm:$0xff] }
 0x9ac   : > { %v4241_v3 = vpop.eup %4240 }
 0x9ad   : > { %v1773_v4 = vmul.f32 %v4241_v3, %v4239_v54  ;;  %v1959_v54 = vld [vmem:[%s5466_s8 + $0x30] sm:$0xff] }
 0x9ae   : > { %v4047_v27 = vpack.c.bf16 %v1960_v55, %v1959_v54 }
 0x9af   : > { %3825 = vmatmul.mubr.msk.f32.vlgmr.msra.gmra.mrb[16].mxu1 %vm1044_vm2, %v1773_v4  ;;  %v2068_v4 = vld [vmem:[%s5468_s10 + $0xb0] sm:$0xff] }
 0x9b0   : > { %3870 = vmatprep.mubr.msk.f32.mxu1 %vm4369_vm0, %v4367_v0  ;;  %4039 = vmatpush3.bf16.msra.mxu1 %v4038_v26  ;;  %v4091_v26 = vpack.c.bf16 %v2076_v24, %v2074_v22  ;;  %v2165_v22 = vld [vmem:[%s5470_s12 + $0x20] sm:$0xff]  ;;  %v2166_v24 = vld [vmem:[%s5470_s12 + $0x28] sm:$0xff] }
 0x9b1   : > { %4040 = vmatprep.subr.bf16.mxu1 %v4368_v1 }
 0x9b4   : > { %4042 = vmatpush3.bf16.msra.mxu1 %v4041_v23 }
 0x9b5   : > { %4043 = vmatprep.subr.bf16.mxu1 %v4368_v1 }
 0x9b8   : > { %4045 = vmatpush3.bf16.msra.mxu1 %v4044_v43 }
 0x9b9   : > { %4046 = vmatprep.subr.bf16.mxu1 %v4368_v1 }
 0x9bc   : > { %4048 = vmatpush3.bf16.msra.mxu1 %v4047_v27 }
 0x9bd   : > { %4049 = vmatprep.subr.bf16.mxu1 %v4368_v1 }
 0xa82   : > { %v1846_v5 = vpop.f32.mrb[16].mxu1 }
 0xa83   : > { %v3826_v6 = vpop.f32.mrb[17].mxu1  ;;  %3836 = vmatmul.mubr.msk.f32.vlgmr.msra.gmra.mrb[8].mxu0 %vm966_vm1, %v1846_v5  ;;  %v2071_v5 = vld [vmem:[%s5468_s10 + $0xc8] sm:$0xff] }
 0xa84   : > { %2154 = vmatprep.mubr.f32.mxu0 %v4367_v0  ;;  %4064 = vmatpush1.bf16.msra.mxu0 %v4063_v20  ;;  %v2073_v6 = vld [vmem:[%s5468_s10 + $0xd8] sm:$0xff]  ;;  %v1966_v20 = vld [vmem:[%s5466_s8 + $0x68] sm:$0xff] }
 0xb56   : > { %v1919_v7 = vpop.f32.mrb[8].mxu0 }
 0xb57   : > { %v1923_v9 = vadd.f32 %v1919_v7, %v1683_v62  ;;  %v3837_v10 = vpop.f32.mrb[9].mxu0  ;;  %v1961_v62 = vld [vmem:[%s5466_s8 + $0x40] sm:$0xff]  ;;  %v4083_v7 = vpack.c.bf16 %v2068_v4, %v2066_v2 }
 0xb58   : > { %v4050_v3 = vpack.c.bf16 %v1962_v63, %v1961_v62  ;;  %v1963_v10 = vld [vmem:[%s5466_s8 + $0x50] sm:$0xff]  ;;  %v4094_v62 = vpack.c.bf16 %v2162_v60, %v2161_v59  ;;  %v2164_v63 = vld [vmem:[%s5470_s12 + $0x18] sm:$0xff] }
 0xb59   : > { %v1924_v11 = vadd.f32 %v1923_v9, %v4752_v8  ;;  %v2051_v8 = vld [vmem:[%s5468_s10 + $0x28] sm:$0xff]  ;;  %v4085_v9 = vpack.c.bf16 %v2073_v6, %v2071_v5 }
 0xb5a   : > { %v4065_v21 = vpack.c.bf16 %v2053_v19, %v2051_v8  ;;  %4051 = vmatpush3.bf16.msra.mxu1 %v4050_v3  ;;  %v4087_v8 = vpack.c.bf16 %v2072_v14, %v2070_v12  ;;  %v1965_v19 = vld [vmem:[%s5466_s8 + $0x60] sm:$0xff] }
 0xb5b   : > { %1927 = vadd.xlane.f32.xlu0 %v1924_v11  ;;  %4052 = vmatprep.subr.bf16.mxu1 %v4368_v1  ;;  %v4056_v25 = vpack.c.bf16 %v1966_v20, %v1965_v19 }
 0xb5c   : > { %4066 = vmatprep.subr.bf16.mxu0 %v4065_v21  ;;  %v4089_v21 = vpack.c.bf16 %v2077_v18, %v2075_v16 }
 0xb5d   : > { %4068 = vmatpush1.bf16.msra.mxu0 %v4067_v31  ;;  %v735_v31 = vld [vmem:[%s729_s3] sm:$0xff] }
 0xb5e   : > { %4070 = vmatprep.subr.bf16.mxu0 %v4069_v34 }
 0xb61   : > { %4072 = vmatpush1.bf16.msra.mxu0 %v4071_v41  ;;  %v2083_v41 = vrot.slane %v2078_v40, %v4777_v17 }
 0xb62   : > { %4074 = vmatprep.subr.bf16.mxu0 %v4073_v42 }
 0xb65   : > { %4076 = vmatpush1.bf16.msra.mxu0 %v4075_v46  ;;  %v3553_v46 = vld [vmem:[%s5467_s9] ss:$0 sm:$0xff] }
 0xb66   : > { %4078 = vmatprep.subr.bf16.mxu0 %v4077_v53 }
 0xb69   : > { %4080 = vmatpush1.bf16.msra.mxu0 %v4079_v58 }
 0xb6a   : > { %4082 = vmatprep.subr.bf16.mxu0 %v4081_v61  ;;  %v2163_v61 = vld [vmem:[%s5470_s12 + $0x10] sm:$0xff] }
 0xb6b   : > { %v4097_v2 = vpack.c.bf16 %v2164_v63, %v2163_v61 }
 0xb6d   : > { %4084 = vmatpush1.bf16.msra.mxu0 %v4083_v7 }
 0xb6e   : > { %4086 = vmatprep.subr.bf16.mxu0 %v4085_v9 }
 0xb71   : > { %4088 = vmatpush1.bf16.msra.mxu0 %v4087_v8 }
 0xb72   : > { %4090 = vmatprep.subr.bf16.mxu0 %v4089_v21 }
 0xb75   : > { %4092 = vmatpush1.bf16.msra.mxu0 %v4091_v26  ;;  %v4100_v26 = vpack.c.bf16 %v2166_v24, %v2165_v22 }
 0xb76   : > { %4093 = vmatprep.subr.bf16.mxu0 %v4368_v1 }
 0xb78   : > { %2155 = vmatmul.mubr.f32.vlgmr.msra.gmra.mrb[10].mxu0 %v735_v31 }
 0xb79   : > { %3891 = vmatprep.mubr.msk.f32.mxu0 %vm4369_vm0, %v4367_v0  ;;  %4095 = vmatpush3.bf16.msra.mxu0 %v4094_v62 }
 0xb7a   : > { %4096 = vmatprep.subr.bf16.mxu0 %v4368_v1 }
 0xb7d   : > { %4098 = vmatpush3.bf16.msra.mxu0 %v4097_v2 }
 0xb7e   : > { %4099 = vmatprep.subr.bf16.mxu0 %v4368_v1 }
 0xbe8   : > { %v1928_v47 = vpop.xlane.xlu0 %1927 }
 0xbe9   : > { %v1930_v48 = vmul.f32 0.0078125, %v1928_v47 }
 0xbeb   : > { %v4991_v49 = vsub.f32 %v1924_v11, %v1930_v48  ;;  %v1964_v11 = vld [vmem:[%s5466_s8 + $0x58] sm:$0xff] }
 0xbec   : > { %v4053_v13 = vpack.c.bf16 %v1964_v11, %v1963_v10 }
 0xbed   : > { %v1932_v50 = vmul.f32 %v4991_v49, %v4991_v49 }
 0xbee   : > { %4054 = vmatpush3.bf16.msra.mxu1 %v4053_v13 }
 0xbef   : > { %1933 = vadd.xlane.f32.xlu1 %v1932_v50  ;;  %4055 = vmatprep.subr.bf16.mxu1 %v4368_v1 }
 0xbf2   : > { %4057 = vmatpush3.bf16.msra.mxu1 %v4056_v25  ;;  %v2167_v25 = vld [vmem:[%s5470_s12 + $0x30] sm:$0xff] }
 0xbf3   : > { %4058 = vmatprep.subr.bf16.mxu1 %v4368_v1  ;;  %v4103_v29 = vpack.c.bf16 %v2168_v28, %v2167_v25 }
 0xbf6   : > { %4060 = vmatpush3.bf16.msra.mxu1 %v4059_v30 }
 0xbf7   : > { %3873 = vmatprep.subr.mxu1 %v4367_v0 }
 0xc4b   : > { %v2156_v42 = vpop.f32.mrb[10].mxu0 }
 0xc4c   : > { %v5101_v43 = vadd.f32 %v2156_v42, %v2083_v41  ;;  %v2158_v44 = vpop.f32.mrb[11].mxu0 }
 0xc4d   : > { %v5112_v50 = vadd.f32 %v2158_v44, %v2087_v45 }
 0xc7c   : > { %v1934_v32 = vpop.xlane.xlu1 %1933 }
 0xc7d   : > { %v1935_v33 = vmul.f32 0.0078125, %v1934_v32 }
 0xc7f   : > { %v1936_v34 = vadd.f32 1e-05, %v1935_v33 }
 0xc81   : > { %4242 = vrsqrt.f32 %v1936_v34 }
 0xc8b   : > { %v4243_v23 = vpop.eup %4242 }
 0xc8c   : > { %v1938_v36 = vmul.f32 %v4243_v23, %v4991_v49 }
 0xc8e   : > { %v1945_v38 = vmul.f32 %v3551_v35, %v1938_v36 }
 0xc90   : > { %v5092_v39 = vadd.f32 %v3552_v37, %v1945_v38 }
 0xc92   : > { %3871 = vmatmul.mubr.f32.vlgmr.msra.gmra.mrb[18].mxu1 %v5092_v39 }
 0xc93   : > { %3875 = vmatprep.mubr.msk.f32.mxu1 %vm4369_vm0, %v4367_v0  ;;  %3874 = vmatpush3.xpose.msk.msra.mxu1 %vm966_vm1, %v5101_v43 }
 0xc94   : > { %3878 = vmatprep.subr.mxu1 %v4367_v0 }
 0xd65   : > { %v2042_v47 = vpop.f32.mrb[18].mxu1 }
 0xd66   : > { %v5110_v48 = vadd.f32 %v3553_v46, %v2042_v47  ;;  %v3872_v49 = vpop.f32.mrb[19].mxu1 }
 0xd68   : > { %2420 = vrot.lane.b32.xlu0 %v5110_v48, %s4370_s1  ;;  %3876 = vmatmul.mubr.msk.f32.vlgmr.msra.gmra.mrb[20].mxu1 %vm966_vm1, %v5110_v48 }
 0xd69   : > { %3879 = vmatpush3.msra.mxu1 %v5112_v50  ;;  %3880 = vmatprep.mubr.msk.f32.mxu1 %vm4369_vm0, %v4367_v0 }
 0xd6a   : > { %3894 = vmatprep.subr.mxu1 %v4367_v0 }
 0xdda   : > { %v2421_v7 = vpop.permute.xlu0 %2420 }
 0xe3b   : > { %v2257_v51 = vpop.f32.mrb[20].mxu1 }
 0xe3c   : > { %v2261_v52 = vmul.f32 0.17677669, %v2257_v51  ;;  %v3877_v53 = vpop.f32.mrb[21].mxu1 }
 0xe3d   : > { %v2171_v53 = vld [vmem:[%s5470_s12 + $0x50] sm:$0xff] }
 0xe3e   : > { %v2262_v54 = vsel %vm1044_vm2, %v2261_v52, -inf }
 0xe3f   : > { %2263 = vmax.xlane.f32.xlu1 %v2262_v54 }
 0xecc   : > { %v2264_v55 = vpop.xlane.xlu1 %2263 }
 0xecd   : > { %v2265_v56 = vsub.f32 %v2261_v52, %v2264_v55  ;;  %v2169_v52 = vld [vmem:[%s5470_s12 + $0x40] sm:$0xff]  ;;  %v2172_v55 = vld [vmem:[%s5470_s12 + $0x58] sm:$0xff] }
 0xecf   : > { %v2266_v27 = vmul.f32 1.442695, %v2265_v56  ;;  %v4109_v56 = vpack.c.bf16 %v2172_v55, %v2171_v53 }
 0xed1   : > { %4244 = vpow2.f32 %v2266_v27 }
 0xedb   : > { %v4245_v57 = vpop.eup %4244 }
 0xedc   : > { %v2268_v58 = vsel %vm1044_vm2, %v4245_v57, 0.0 }
 0xedd   : > { %2269 = vadd.xlane.f32.xlu1 %v2268_v58 }
 0xeee   : > { %2422 = vrot.lane.b32.xlu1 %v5101_v43, %s4370_s1 }
 0xf6a   : > { %v2270_v3 = vpop.xlane.xlu1 %2269 }
 0xf6b   : > { %4246 = vrcp.f32 %v2270_v3 }
 0xf6e   : > { %v2423_v6 = vpop.permute.xlu1 %2422 }
 0xf75   : > { %v4247_v4 = vpop.eup %4246 }
 0xf76   : > { %v2272_v5 = vmul.f32 %v4247_v4, %v4245_v57 }
 0xf78   : > { %3881 = vmatmul.mubr.msk.f32.vlgmr.msra.gmra.mrb[22].mxu1 %vm1044_vm2, %v2272_v5 }
 0xf79   : > { %3895 = vmatpush3.xpose.msk.msra.mxu1 %vm966_vm1, %v2423_v6  ;;  %3896 = vmatprep.mubr.msk.f32.mxu1 %vm4369_vm0, %v4367_v0 }
 0xf7a   : > { %3899 = vmatprep.subr.mxu1 %v4367_v0 }
 0xf7c   : > { %3897 = vmatmul.mubr.msk.f32.vlgmr.msra.gmra.mrb[24].mxu1 %vm966_vm1, %v2421_v7 }
 0xf7d   : > { %3901 = vmatprep.mubr.msk.f32.mxu1 %vm4369_vm0, %v4367_v0 }
0x104b   : > { %v2342_v9 = vpop.f32.mrb[22].mxu1 }
0x104c   : > { %v3882_v10 = vpop.f32.mrb[23].mxu1  ;;  %3892 = vmatmul.mubr.msk.f32.vlgmr.msra.gmra.mrb[12].mxu0 %vm966_vm1, %v2342_v9 }
0x104d   : > { %3912 = vmatprep.mubr.msk.f32.mxu0 %vm4369_vm0, %v4367_v0  ;;  %4101 = vmatpush3.bf16.msra.mxu0 %v4100_v26 }
0x104e   : > { %4102 = vmatprep.subr.bf16.mxu0 %v4368_v1 }
0x104f   : > { %v2494_v11 = vpop.f32.mrb[24].mxu1 }
0x1050   : > { %v2498_v12 = vmul.f32 0.17677669, %v2494_v11  ;;  %v3898_v13 = vpop.f32.mrb[25].mxu1 }
0x1051   : > { %4104 = vmatpush3.bf16.msra.mxu0 %v4103_v29 }
0x1052   : > { %v2499_v14 = vsel %vm1044_vm2, %v2498_v12, -inf  ;;  %4105 = vmatprep.subr.bf16.mxu0 %v4368_v1 }
0x1053   : > { %2500 = vmax.xlane.f32.xlu1 %v2499_v14 }
0x1064   : > { %2511 = vrot.lane.b32.xlu1 %v5112_v50, %s4370_s1 }
0x1068   : > { %2661 = vrot.lane.b32.xlu1 %v5110_v48, %s4371_s30 }
0x10e0   : > { %v2501_v16 = vpop.xlane.xlu1 %2500 }
0x10e1   : > { %v2502_v18 = vsub.f32 %v2498_v12, %v2501_v16 }
0x10e3   : > { %v2503_v8 = vmul.f32 1.442695, %v2502_v18  ;;  %v2173_v18 = vld [vmem:[%s5470_s12 + $0x60] sm:$0xff] }
0x10e4   : > { %v2512_v19 = vpop.permute.xlu1 %2511 }
0x10e5   : > { %4248 = vpow2.f32 %v2503_v8  ;;  %3900 = vmatpush3.msra.mxu1 %v2512_v19  ;;  %v2174_v8 = vld [vmem:[%s5470_s12 + $0x68] sm:$0xff] }
0x10e6   : > { %3915 = vmatprep.subr.mxu1 %v4367_v0  ;;  %v4112_v19 = vpack.c.bf16 %v2174_v8, %v2173_v18  ;;  %v3195_v18 = vld [vmem:[%s5474_s16 + $0xd0] sm:$0xff]  ;;  %v3198_v8 = vld [vmem:[%s5474_s16 + $0xe8] sm:$0xff] }
0x10e8   : > { %v2662_v35 = vpop.permute.xlu1 %2661 }
0x10ef   : > { %v4249_v20 = vpop.eup %4248 }
0x10f0   : > { %v2505_v21 = vsel %vm1044_vm2, %v4249_v20, 0.0 }
0x10f1   : > { %2506 = vadd.xlane.f32.xlu0 %v2505_v21 }
0x1107   : > { %2663 = vrot.lane.b32.xlu0 %v5101_v43, %s4371_s30 }
0x111f   : > { %v2415_v30 = vpop.f32.mrb[12].mxu0 }
0x1120   : > { %v3893_v31 = vpop.f32.mrb[13].mxu0 }
0x117e   : > { %v2507_v32 = vpop.xlane.xlu0 %2506 }
0x117f   : > { %4250 = vrcp.f32 %v2507_v32 }
0x1182   : > { %v2664_v23 = vpop.permute.xlu0 %2663 }
0x1189   : > { %v4251_v33 = vpop.eup %4250 }
0x118a   : > { %v2509_v34 = vmul.f32 %v4251_v33, %v4249_v20  ;;  %v2176_v20 = vld [vmem:[%s5470_s12 + $0x78] sm:$0xff] }
0x118c   : > { %3902 = vmatmul.mubr.msk.f32.vlgmr.msra.gmra.mrb[26].mxu1 %vm1044_vm2, %v2509_v34 }
0x118d   : > { %3916 = vmatpush3.xpose.msk.msra.mxu1 %vm966_vm1, %v2664_v23  ;;  %3917 = vmatprep.mubr.msk.f32.mxu1 %vm4369_vm0, %v4367_v0  ;;  %v3170_v23 = vld [vmem:[%s5474_s16 + $0x8] sm:$0xff] }
0x118e   : > { %3920 = vmatprep.subr.mxu1 %v4367_v0 }
0x1190   : > { %3918 = vmatmul.mubr.msk.f32.vlgmr.msra.gmra.mrb[28].mxu1 %vm966_vm1, %v2662_v35  ;;  %v3172_v35 = vld [vmem:[%s5474_s16 + $0x18] sm:$0xff] }
0x1191   : > { %3922 = vmatprep.mubr.msk.f32.mxu1 %vm4369_vm0, %v4367_v0 }
0x125f   : > { %v2583_v36 = vpop.f32.mrb[26].mxu1 }
0x1260   : > { %v3903_v37 = vpop.f32.mrb[27].mxu1  ;;  %3913 = vmatmul.mubr.msk.f32.vlgmr.msra.gmra.mrb[14].mxu0 %vm966_vm1, %v2583_v36  ;;  %v4117_v36 = vpack.c.bf16 %v3172_v35, %v3170_v23  ;;  %v3289_v23 = vld [vmem:[%s5476_s18 + $0x18] sm:$0xff]  ;;  %v3306_v35 = vld [vmem:[%s5476_s18 + $0xa0] sm:$0xff] }
0x1261   : > { %3933 = vmatprep.mubr.msk.f32.mxu0 %vm4369_vm0, %v4367_v0  ;;  %v3171_v37 = vld [vmem:[%s5474_s16 + $0x10] sm:$0xff] }
0x1263   : > { %v2735_v38 = vpop.f32.mrb[28].mxu1 }
0x1264   : > { %v2739_v40 = vmul.f32 0.17677669, %v2735_v38  ;;  %v3919_v41 = vpop.f32.mrb[29].mxu1  ;;  %v3176_v38 = vld [vmem:[%s5474_s16 + $0x38] sm:$0xff] }
0x1266   : > { %v2740_v42 = vsel %vm1044_vm2, %v2739_v40, -inf }
0x1267   : > { %2741 = vmax.xlane.f32.xlu1 %v2740_v42  ;;  %v3173_v42 = vld [vmem:[%s5474_s16 + $0x20] sm:$0xff] }
0x1278   : > { %2751 = vrot.lane.b32.xlu1 %v5112_v50, %s4371_s30 }
0x127c   : > { %2901 = vrot.lane.b32.xlu1 %v5110_v48, %s5512_s26  ;;  %v2170_v48 = vld [vmem:[%s5470_s12 + $0x48] sm:$0xff] }
0x127d   : > { %v4106_v54 = vpack.c.bf16 %v2170_v48, %v2169_v52  ;;  %v3179_v52 = vld [vmem:[%s5474_s16 + $0x50] sm:$0xff] }
0x127f   : > { %4107 = vmatpush3.bf16.msra.mxu0 %v4106_v54 }
0x1280   : > { %4108 = vmatprep.subr.bf16.mxu0 %v4368_v1 }
0x1283   : > { %4110 = vmatpush3.bf16.msra.mxu0 %v4109_v56 }
0x1284   : > { %4111 = vmatprep.subr.bf16.mxu0 %v4368_v1 }
0x12f4   : > { %v2742_v44 = vpop.xlane.xlu1 %2741 }
0x12f5   : > { %v2743_v45 = vsub.f32 %v2739_v40, %v2742_v44  ;;  %v3175_v44 = vld [vmem:[%s5474_s16 + $0x30] sm:$0xff] }
0x12f7   : > { %v2744_v46 = vmul.f32 1.442695, %v2743_v45  ;;  %v3178_v45 = vld [vmem:[%s5474_s16 + $0x48] sm:$0xff] }
0x12f8   : > { %v2752_v47 = vpop.permute.xlu1 %2751 }
0x12f9   : > { %4252 = vpow2.f32 %v2744_v46  ;;  %3921 = vmatpush3.msra.mxu1 %v2752_v47  ;;  %v3180_v46 = vld [vmem:[%s5474_s16 + $0x58] sm:$0xff]  ;;  %v4123_v47 = vpack.c.bf16 %v3175_v44, %v3173_v42 }
0x12fa   : > { %3936 = vmatprep.subr.mxu1 %v4367_v0 }
0x12fc   : > { %v2902_v2 = vpop.permute.xlu1 %2901 }
0x1303   : > { %v4253_v49 = vpop.eup %4252 }
0x1304   : > { %v2746_v51 = vsel %vm1044_vm2, %v4253_v49, 0.0 }
0x1305   : > { %2747 = vadd.xlane.f32.xlu0 %v2746_v51  ;;  %v3177_v51 = vld [vmem:[%s5474_s16 + $0x40] sm:$0xff] }
0x1306   : > { %v4127_v48 = vpack.c.bf16 %v3179_v52, %v3177_v51 }
0x131b   : > { %2903 = vrot.lane.b32.xlu0 %v5101_v43, %s5512_s26  ;;  %v3554_v43 = vld [vmem:[%s5471_s13] ss:$0 sm:$0xff] }
0x131c   : > { %v2419_v27 = vadd.f32 %v3554_v43, %v2415_v30  ;;  %v3182_v43 = vld [vmem:[%s5474_s16 + $0x68] sm:$0xff] }
0x1333   : > { %v2656_v57 = vpop.f32.mrb[14].mxu0 }
0x1334   : > { %v2660_v58 = vadd.f32 %v2656_v57, %v2419_v27  ;;  %v3914_v59 = vpop.f32.mrb[15].mxu0  ;;  %v3184_v27 = vld [vmem:[%s5474_s16 + $0x78] sm:$0xff] }
0x1335   : > { %v4129_v57 = vpack.c.bf16 %v3184_v27, %v3182_v43  ;;  %v3183_v59 = vld [vmem:[%s5474_s16 + $0x70] sm:$0xff] }
0x1392   : > { %v2748_v60 = vpop.xlane.xlu0 %2747 }
0x1393   : > { %4254 = vrcp.f32 %v2748_v60 }
0x1396   : > { %v2904_v63 = vpop.permute.xlu0 %2903 }
0x139d   : > { %v4255_v61 = vpop.eup %4254 }
0x139e   : > { %v2750_v62 = vmul.f32 %v4255_v61, %v4253_v49  ;;  %v4125_v49 = vpack.c.bf16 %v3180_v46, %v3178_v45  ;;  %v3186_v61 = vld [vmem:[%s5474_s16 + $0x88] sm:$0xff]  ;;  %v3292_v45 = vld [vmem:[%s5476_s18 + $0x30] sm:$0xff]  ;;  %v3293_v46 = vld [vmem:[%s5476_s18 + $0x38] sm:$0xff] }
0x139f   : > { %v4163_v51 = vpack.c.bf16 %v3293_v46, %v3292_v45 }
0x13a0   : > { %3923 = vmatmul.mubr.msk.f32.vlgmr.msra.gmra.mrb[30].mxu1 %vm1044_vm2, %v2750_v62  ;;  %v3188_v62 = vld [vmem:[%s5474_s16 + $0x98] sm:$0xff] }
0x13a1   : > { %3937 = vmatpush3.xpose.msk.msra.mxu1 %vm966_vm1, %v2904_v63  ;;  %3938 = vmatprep.mubr.msk.f32.mxu1 %vm4369_vm0, %v4367_v0  ;;  %v4133_v63 = vpack.c.bf16 %v3188_v62, %v3186_v61 }
0x13a2   : > { %3941 = vmatprep.subr.mxu1 %v4367_v0 }
0x13a4   : > { %3939 = vmatmul.mubr.msk.f32.vlgmr.msra.gmra.mrb[32].mxu1 %vm966_vm1, %v2902_v2  ;;  %v3185_v2 = vld [vmem:[%s5474_s16 + $0x80] sm:$0xff] }
0x13a5   : > { %3943 = vmatprep.mubr.msk.f32.mxu1 %vm4369_vm0, %v4367_v0 }
0x1473   : > { %v2823_v3 = vpop.f32.mrb[30].mxu1 }
0x1474   : > { %v3924_v4 = vpop.f32.mrb[31].mxu1  ;;  %3934 = vmatmul.mubr.msk.f32.vlgmr.msra.gmra.mrb[16].mxu0 %vm966_vm1, %v2823_v3  ;;  %v3187_v3 = vld [vmem:[%s5474_s16 + $0x90] sm:$0xff] }
0x1475   : > { %3954 = vmatprep.mubr.msk.f32.mxu0 %vm4369_vm0, %v4367_v0  ;;  %4113 = vmatpush3.bf16.msra.mxu0 %v4112_v19  ;;  %v3190_v4 = vld [vmem:[%s5474_s16 + $0xa8] sm:$0xff] }
0x1476   : > { %4114 = vmatprep.subr.bf16.mxu0 %v4368_v1 }
0x1477   : > { %v2975_v5 = vpop.f32.mrb[32].mxu1 }
0x1478   : > { %v2979_v6 = vmul.f32 0.17677669, %v2975_v5  ;;  %v3940_v7 = vpop.f32.mrb[33].mxu1  ;;  %v4135_v5 = vpack.c.bf16 %v3187_v3, %v3185_v2 }
0x1479   : > { %v3189_v7 = vld [vmem:[%s5474_s16 + $0xa0] sm:$0xff] }
0x147a   : > { %v2980_v9 = vsel %vm1044_vm2, %v2979_v6, -inf }
0x147b   : > { %2981 = vmax.xlane.f32.xlu1 %v2980_v9  ;;  %v3191_v9 = vld [vmem:[%s5474_s16 + $0xb0] sm:$0xff] }
0x148c   : > { %2991 = vrot.lane.b32.xlu1 %v5112_v50, %s5512_s26  ;;  %v2175_v50 = vld [vmem:[%s5470_s12 + $0x70] sm:$0xff] }
0x148d   : > { %v4115_v21 = vpack.c.bf16 %v2176_v20, %v2175_v50  ;;  %v3200_v50 = vld [vmem:[%s5474_s16 + $0xf8] sm:$0xff] }
0x148e   : > { %v4145_v20 = vpack.c.bf16 %v3200_v50, %v3198_v8  ;;  %v3301_v8 = vld [vmem:[%s5476_s18 + $0x78] sm:$0xff] }
0x148f   : > { %4116 = vmatpush3.bf16.msra.mxu0 %v4115_v21  ;;  %v3197_v21 = vld [vmem:[%s5474_s16 + $0xe0] sm:$0xff] }
0x1508   : > { %v2982_v10 = vpop.xlane.xlu1 %2981 }
0x1509   : > { %v2983_v11 = vsub.f32 %v2979_v6, %v2982_v10  ;;  %v3192_v6 = vld [vmem:[%s5474_s16 + $0xb8] sm:$0xff] }
0x150a   : > { %v4137_v10 = vpack.c.bf16 %v3192_v6, %v3190_v4 }
0x150b   : > { %v2984_v12 = vmul.f32 1.442695, %v2983_v11  ;;  %v3194_v11 = vld [vmem:[%s5474_s16 + $0xc8] sm:$0xff] }
0x150c   : > { %v2992_v13 = vpop.permute.xlu1 %2991 }
0x150d   : > { %4256 = vpow2.f32 %v2984_v12  ;;  %3942 = vmatpush3.msra.mxu1 %v2992_v13  ;;  %v3196_v12 = vld [vmem:[%s5474_s16 + $0xd8] sm:$0xff]  ;;  %v4139_v13 = vpack.c.bf16 %v3191_v9, %v3189_v7  ;;  %v3572_v7 = vld [vmem:[%s5473_s15] ss:$0 sm:$0xff] }
0x150e   : > { %4118 = vmatprep.subr.bf16.mxu1 %v4117_v36 }
0x1517   : > { %v4257_v14 = vpop.eup %4256 }
0x1518   : > { %v2986_v16 = vsel %vm1044_vm2, %v4257_v14, 0.0 }
0x1519   : > { %2987 = vadd.xlane.f32.xlu0 %v2986_v16  ;;  %v3193_v16 = vld [vmem:[%s5474_s16 + $0xc0] sm:$0xff] }
0x151a   : > { %v4143_v19 = vpack.c.bf16 %v3195_v18, %v3193_v16  ;;  %v3300_v18 = vld [vmem:[%s5476_s18 + $0x70] sm:$0xff] }
0x151b   : > { %v4179_v50 = vpack.c.bf16 %v3301_v8, %v3300_v18 }
0x1547   : > { %v2896_v22 = vpop.f32.mrb[16].mxu0 }
0x1548   : > { %v2900_v24 = vadd.f32 %v2896_v22, %v2660_v58  ;;  %v3935_v25 = vpop.f32.mrb[17].mxu0  ;;  %v3181_v58 = vld [vmem:[%s5474_s16 + $0x60] sm:$0xff]  ;;  %v3199_v22 = vld [vmem:[%s5474_s16 + $0xf0] sm:$0xff] }
0x1549   : > { %v4131_v60 = vpack.c.bf16 %v3183_v59, %v3181_v58  ;;  %v3302_v25 = vld [vmem:[%s5476_s18 + $0x80] sm:$0xff]  ;;  %v3297_v58 = vld [vmem:[%s5476_s18 + $0x58] sm:$0xff] }
0x154a   : > { %v3314_v59 = vld [vmem:[%s5476_s18 + $0xe0] sm:$0xff] }
0x15a6   : > { %v2988_v26 = vpop.xlane.xlu0 %2987 }
0x15a7   : > { %4258 = vrcp.f32 %v2988_v26  ;;  %v3303_v26 = vld [vmem:[%s5476_s18 + $0x88] sm:$0xff] }
0x15b1   : > { %v4259_v28 = vpop.eup %4258 }
0x15b2   : > { %v2990_v29 = vmul.f32 %v4259_v28, %v4257_v14  ;;  %v4141_v14 = vpack.c.bf16 %v3196_v12, %v3194_v11  ;;  %v3286_v28 = vld [vmem:[%s5476_s18] sm:$0xff]  ;;  %v3299_v12 = vld [vmem:[%s5476_s18 + $0x68] sm:$0xff] }
0x15b3   : > { %v3298_v11 = vld [vmem:[%s5476_s18 + $0x60] sm:$0xff] }
0x15b4   : > { %3944 = vmatmul.mubr.msk.f32.vlgmr.msra.gmra.mrb[34].mxu1 %vm1044_vm2, %v2990_v29  ;;  %v4149_v29 = vpack.c.bf16 %v3303_v26, %v3302_v25 }
0x15b5   : > { %3277 = vmatprep.mubr.f32.mxu1 %v4367_v0  ;;  %v3169_v0 = vld [vmem:[%s5474_s16] sm:$0xff] }
0x15b6   : > { %v4119_v40 = vpack.c.bf16 %v3171_v37, %v3169_v0  ;;  %4150 = vmatprep.subr.bf16.mxu0 %v4149_v29  ;;  %v3307_v0 = vld [vmem:[%s5476_s18 + $0xa8] sm:$0xff] }
0x15b7   : > { %v4157_v37 = vpack.c.bf16 %v3307_v0, %v3306_v35 }
0x15b8   : > { %4120 = vmatpush1.bf16.msra.mxu1 %v4119_v40  ;;  %v3308_v40 = vld [vmem:[%s5476_s18 + $0xb0] sm:$0xff] }
0x1687   : > { %v3063_v30 = vpop.f32.mrb[34].mxu1 }
0x1688   : > { %v3945_v31 = vpop.f32.mrb[35].mxu1  ;;  %3955 = vmatmul.mubr.msk.f32.vlgmr.msra.gmra.mrb[18].mxu0 %vm966_vm1, %v3063_v30  ;;  %v3287_v30 = vld [vmem:[%s5476_s18 + $0x8] sm:$0xff] }
0x1689   : > { %v3304_v31 = vld [vmem:[%s5476_s18 + $0x90] sm:$0xff] }
0x175b   : > { %v3136_v32 = vpop.f32.mrb[18].mxu0 }
0x175c   : > { %v3140_v33 = vadd.f32 %v3136_v32, %v2900_v24  ;;  %v3956_v34 = vpop.f32.mrb[19].mxu0  ;;  %v4147_v24 = vpack.c.bf16 %v3199_v22, %v3197_v21  ;;  %v3305_v32 = vld [vmem:[%s5476_s18 + $0x98] sm:$0xff] }
0x175d   : > { %v4153_v34 = vpack.c.bf16 %v3305_v32, %v3304_v31  ;;  %v3573_v31 = vld [vmem:[#allocation2] ss:$0 sm:$0xff] }
0x175e   : > { %v3141_v1 = vadd.f32 %v3140_v33, %v5092_v39  ;;  %v3174_v39 = vld [vmem:[%s5474_s16 + $0x28] sm:$0xff]  ;;  %v4151_v33 = vpack.c.bf16 %v3287_v30, %v3286_v28 }
0x175f   : > { %v4121_v41 = vpack.c.bf16 %v3176_v38, %v3174_v39  ;;  %v3290_v39 = vld [vmem:[%s5476_s18 + $0x20] sm:$0xff]  ;;  %v3291_v38 = vld [vmem:[%s5476_s18 + $0x28] sm:$0xff] }
0x1760   : > { %3144 = vadd.xlane.f32.xlu0 %v3141_v1  ;;  %4152 = vmatpush3.bf16.msra.mxu0 %v4151_v33  ;;  %v4159_v42 = vpack.c.bf16 %v3291_v38, %v3290_v39  ;;  %v3574_v38 = vld [vmem:[#allocation4] ss:$0 sm:$0xff] }
0x1761   : > { %4122 = vmatprep.subr.bf16.mxu1 %v4121_v41  ;;  %4154 = vmatprep.subr.bf16.mxu0 %v4153_v34  ;;  %v3309_v41 = vld [vmem:[%s5476_s18 + $0xb8] sm:$0xff] }
0x1762   : > { %4124 = vmatpush1.bf16.msra.mxu1 %v4123_v47  ;;  %v4161_v44 = vpack.c.bf16 %v3309_v41, %v3308_v40  ;;  %v3310_v47 = vld [vmem:[%s5476_s18 + $0xc0] sm:$0xff] }
0x1763   : > { %4126 = vmatprep.subr.bf16.mxu1 %v4125_v49  ;;  %v3311_v49 = vld [vmem:[%s5476_s18 + $0xc8] sm:$0xff]  ;;  %v3575_v41 = vld [vmem:[#allocation6] ss:$0 sm:$0xff] }
0x1764   : > { %v4165_v52 = vpack.c.bf16 %v3311_v49, %v3310_v47 }
0x1766   : > { %4128 = vmatpush1.bf16.msra.mxu1 %v4127_v48  ;;  %v3294_v48 = vld [vmem:[%s5476_s18 + $0x40] sm:$0xff] }
0x1767   : > { %4130 = vmatprep.subr.bf16.mxu1 %v4129_v57  ;;  %v3296_v57 = vld [vmem:[%s5476_s18 + $0x50] sm:$0xff] }
0x1768   : > { %v4171_v61 = vpack.c.bf16 %v3297_v58, %v3296_v57 }
0x176a   : > { %4132 = vmatpush1.bf16.msra.mxu1 %v4131_v60  ;;  %v3315_v60 = vld [vmem:[%s5476_s18 + $0xe8] sm:$0xff] }
0x176b   : > { %4134 = vmatprep.subr.bf16.mxu1 %v4133_v63  ;;  %v4173_v62 = vpack.c.bf16 %v3315_v60, %v3314_v59 }
0x176e   : > { %4136 = vmatpush1.bf16.msra.mxu1 %v4135_v5  ;;  %v3571_v5 = vld [vmem:[%s5472_s14] ss:$0 sm:$0xff] }
0x176f   : > { %4138 = vmatprep.subr.bf16.mxu1 %v4137_v10 }
0x1772   : > { %4140 = vmatpush1.bf16.msra.mxu1 %v4139_v13  ;;  %v4175_v13 = vpack.c.bf16 %v3299_v12, %v3298_v11 }
0x1773   : > { %4142 = vmatprep.subr.bf16.mxu1 %v4141_v14  ;;  %v3317_v14 = vld [vmem:[%s5476_s18 + $0xf8] sm:$0xff] }
0x1776   : > { %4144 = vmatpush1.bf16.msra.mxu1 %v4143_v19  ;;  %v3201_v19 = vld [vmem:[%s5475_s17] sm:$0x3] }
0x1777   : > { %4146 = vmatprep.subr.bf16.mxu1 %v4145_v20  ;;  %v3206_v20 = vrot.slane %v3201_v19, %v4777_v17  ;;  %v3210_v21 = vrot.slane %v3201_v19, %v4772_v15 }
0x177a   : > { %4148 = vmatpush1.bf16.msra.mxu1 %v4147_v24 }
0x17ed   : > { %v3145_v53 = vpop.xlane.xlu0 %3144 }
0x17ee   : > { %v3146_v54 = vmul.f32 0.0078125, %v3145_v53  ;;  %v3295_v53 = vld [vmem:[%s5476_s18 + $0x48] sm:$0xff] }
0x17ef   : > { %v4167_v43 = vpack.c.bf16 %v3295_v53, %v3294_v48 }
0x17f0   : > { %v5279_v55 = vsub.f32 %v3141_v1, %v3146_v54  ;;  %v3288_v1 = vld [vmem:[%s5476_s18 + $0x10] sm:$0xff] }
0x17f1   : > { %v4155_v36 = vpack.c.bf16 %v3289_v23, %v3288_v1  ;;  %v3312_v54 = vld [vmem:[%s5476_s18 + $0xd0] sm:$0xff] }
0x17f2   : > { %v3148_v56 = vmul.f32 %v5279_v55, %v5279_v55 }
0x17f3   : > { %4156 = vmatpush3.bf16.msra.mxu0 %v4155_v36 }
0x17f4   : > { %3149 = vadd.xlane.f32.xlu0 %v3148_v56  ;;  %4158 = vmatprep.subr.bf16.mxu0 %v4157_v37  ;;  %v3313_v56 = vld [vmem:[%s5476_s18 + $0xd8] sm:$0xff] }
0x17f5   : > { %v4169_v27 = vpack.c.bf16 %v3313_v56, %v3312_v54 }
0x17f7   : > { %4160 = vmatpush3.bf16.msra.mxu0 %v4159_v42 }
0x17f8   : > { %4162 = vmatprep.subr.bf16.mxu0 %v4161_v44 }
0x17fb   : > { %4164 = vmatpush3.bf16.msra.mxu0 %v4163_v51 }
0x17fc   : > { %4166 = vmatprep.subr.bf16.mxu0 %v4165_v52 }
0x17ff   : > { %4168 = vmatpush3.bf16.msra.mxu0 %v4167_v43 }
0x1800   : > { %4170 = vmatprep.subr.bf16.mxu0 %v4169_v27 }
0x1803   : > { %4172 = vmatpush3.bf16.msra.mxu0 %v4171_v61 }
0x1804   : > { %4174 = vmatprep.subr.bf16.mxu0 %v4173_v62 }
0x1807   : > { %4176 = vmatpush3.bf16.msra.mxu0 %v4175_v13 }
0x1881   : > { %v3150_v63 = vpop.xlane.xlu0 %3149 }
0x1882   : > { %v3151_v2 = vmul.f32 0.0078125, %v3150_v63 }
0x1884   : > { %v3152_v3 = vadd.f32 1e-05, %v3151_v2 }
0x1886   : > { %4260 = vrsqrt.f32 %v3152_v3 }
0x1890   : > { %v4261_v4 = vpop.eup %4260 }
0x1891   : > { %v3154_v6 = vmul.f32 %v4261_v4, %v5279_v55  ;;  %v3316_v55 = vld [vmem:[%s5476_s18 + $0xf0] sm:$0xff] }
0x1892   : > { %v4177_v16 = vpack.c.bf16 %v3317_v14, %v3316_v55 }
0x1893   : > { %v3161_v9 = vmul.f32 %v3571_v5, %v3154_v6 }
0x1894   : > { %4178 = vmatprep.subr.bf16.mxu0 %v4177_v16 }
0x1895   : > { %v3168_v10 = vadd.f32 %v3572_v7, %v3161_v9  ;;  %4180 = vmatpush3.bf16.msra.mxu0 %v4179_v50 }
0x1897   : > { %3278 = vmatmul.mubr.f32.vlgmr.msra.gmra.mrb[36].mxu1 %v3168_v10 }
0x196a   : > { %v3279_v22 = vpop.f32.mrb[36].mxu1 }
0x196b   : > { %v3280_v24 = vadd.f32 %v3279_v22, %v3206_v20  ;;  %v3281_v25 = vpop.f32.mrb[37].mxu1 }
0x196c   : > { %v3282_v26 = vadd.f32 %v3281_v25, %v3210_v21 }
0x196d   : > { %v3284_v29 = vmax.f32 %v3280_v24, 0.0 }
0x196e   : > { %v3285_v28 = vmax.f32 %v3282_v26, 0.0 }
0x1970   : > { %3389 = vmatprep.mubr.f32.mxu0 %v3285_v28 }
0x1971   : > { %3390 = vmatmul.mubr.f32.vlgmr.msra.gmra.mrb[20].mxu0 %v3284_v29 }
0x1a44   : > { %v3716_v30 = vpop.f32.mrb[20].mxu0 }
0x1a45   : > { %v3717_v32 = vpop.f32.mrb[21].mxu0 }
0x1a46   : > { %v3718_v33 = vadd.f32 %v3717_v32, %v3716_v30 }
0x1a48   : > { %v3392_v34 = vadd.f32 %v3718_v33, %v3573_v31 }
0x1a4a   : > { %v3395_v1 = vadd.f32 %v3392_v34, %v3168_v10 }
0x1a4c   : > { %3398 = vadd.xlane.f32.xlu0 %v3395_v1 }
0x1ad9   : > { %v3399_v23 = vpop.xlane.xlu0 %3398 }
0x1ada   : > { %v3400_v17 = vmul.f32 0.0078125, %v3399_v23 }
0x1adc   : > { %v3401_v35 = vsub.f32 %v3395_v1, %v3400_v17 }
0x1ade   : > { %v3402_v15 = vmul.f32 %v3401_v35, %v3401_v35 }
0x1ae0   : > { %3403 = vadd.xlane.f32.xlu0 %v3402_v15 }
0x1b6d   : > { %v3404_v0 = vpop.xlane.xlu0 %3403 }
0x1b6e   : > { %v3405_v36 = vmul.f32 0.0078125, %v3404_v0 }
0x1b70   : > { %v3406_v37 = vadd.f32 1e-05, %v3405_v36 }
0x1b72   : > { %4262 = vrsqrt.f32 %v3406_v37 }
0x1b7c   : > { %v4263_v39 = vpop.eup %4262 }
0x1b7d   : > { %v3408_v40 = vmul.f32 %v4263_v39, %v3401_v35 }
0x1b7f   : > { %v3415_v42 = vmul.f32 %v3574_v38, %v3408_v40 }
0x1b81   : > { %v3422_v44 = vadd.f32 %v3575_v41, %v3415_v42 }
0x1b83   : > { %3423 = vst [vmem:[%s733_s0] sm:$0xff] %v3422_v44 }
0x1b84 PF: > { %s5514_s30 = sld [smem:[#allocation9_spill]] }
0x1b8a   : > { %s34_s3 = sadd.s32 1, %s5514_s30  }
0x1b8b   : > { %p31_p3 = scmp.ge.s32.totalorder %s34_s3, 4  }
0x1b8d   :  { %33 = sbr.rel (!%p31_p3) target bundleno = 11 (0xb), region = 154 }
0x1b94   :  { %3443 = vsyncpa [#allocation3], 1 }
0x1b95   :  { %3445 = vsyncpa [#allocation3 + $0x1], 1 }
0x1b96   :  { %3446 = vsyncpa [#allocation5], 1 }

</bundles_post_ra>
